<compile_context>
chip_gen: v6e
topology: v6e:2x2x1
jax: 0.10.0
libtpu: 0.0.40
codegen_flags: <defaults>
</compile_context>

<pallas_src>
import jax
import jax.numpy as jnp
import numpy as np
from jax.experimental import pallas as pl
from jax.experimental.pallas import tpu as pltpu

EPS = 1e-5
_LANE = 128
_PAD_OFF = 8      # sublane-aligned column where the image starts inside the
                  # padded VMEM scratch; tap (ky, kx) reads column _PAD_OFF-1+kx


def _round_up(x, m):
    return (x + m - 1) // m * m


# ----------------------------------------------------------------------------
# Fused conv (+ optional input BN+ReLU) + BatchNorm batch-statistics kernel
# ----------------------------------------------------------------------------
def _make_conv_kernel(hs, ws, n_taps, in_affine):
    """Per-image kernel.

    n_taps == 9 : 3x3 / stride-1 / pad-1 conv; taps streamed from a zero-padded
                  VMEM scratch copy of the image (no HBM im2col).
    n_taps == 1 : plain GEMM (1x1 projection conv or pre-built im2col rows).
    in_affine   : apply relu(x * scale + shift) to the input image before the
                  matmuls (fuses the previous BN + ReLU into this conv).
    """
    taps = ([(ky, kx) for ky in range(3) for kx in range(3)]
            if n_taps == 9 else [(0, 0)])

    def kernel(*refs):
        if in_affine:
            x_ref, w_ref, sc_ref, sh_ref, y_ref, st_ref, *scratch = refs
        else:
            x_ref, w_ref, y_ref, st_ref, *scratch = refs

        a0 = x_ref[0].astype(jnp.float32)                  # (M_in, K)
        if in_affine:
            a0 = jnp.maximum(a0 * sc_ref[...] + sh_ref[...], 0.0)

        m_out, cp = y_ref.shape[-2], y_ref.shape[-1]

        if n_taps == 9:
            buf = scratch[0]                               # (hs+2, ws_pad, K) f32
            buf[...] = jnp.zeros_like(buf)
            buf[1:1 + hs, _PAD_OFF:_PAD_OFF + ws, :] = a0.reshape(hs, ws, -1)
            acc = jnp.zeros((m_out, cp), jnp.float32)
            for t, (ky, kx) in enumerate(taps):
                c0 = _PAD_OFF - 1 + kx
                a = buf[ky:ky + hs, c0:c0 + ws, :].reshape(m_out, -1)
                acc = acc + jnp.dot(a.astype(jnp.bfloat16), w_ref[t],
                                    preferred_element_type=jnp.float32)
        else:
            acc = jnp.dot(a0.astype(jnp.bfloat16), w_ref[0],
                          preferred_element_type=jnp.float32)

        y_ref[0] = acc.astype(y_ref.dtype)

        # Packed per-image BN partials from the f32 accumulator:
        #   sublane 0 = column sum, sublane 1 = column sum of squares.
        # (Finalized as E[x^2]-E[x]^2 in f32 in the glue; adequate here.)
        s = jnp.sum(acc, axis=0, keepdims=True)
        q = jnp.sum(acc * acc, axis=0, keepdims=True)
        st_ref[0] = jnp.concatenate([s, q], axis=0)

    return kernel


def _fused_conv_bn_stats(x3d, w, affine=None, spatial=None):
    """x3d: (N, M, K) bf16 per-image rows; w: (T, K, Cp) bf16, T in {1, 9}.

    Returns y: (N, M, Cp) bf16 (raw conv output, pre-BN) and per-image BN
    partial statistics: (N, 2, Cp) f32.
    """
    n, m, k = x3d.shape
    t, k2, cp = w.shape
    assert k == k2 and t in (1, 9)
    in_affine = affine is not None

    if t == 9:
        hs, ws = spatial
        assert m == hs * ws
        ws_pad = _round_up(ws + _PAD_OFF + 2, 8)
        scratch = [pltpu.VMEM((hs + 2, ws_pad, k), jnp.float32)]
    else:
        hs = ws = None
        scratch = []

    kernel = _make_conv_kernel(hs, ws, t, in_affine)

    img = pl.BlockSpec((1, m, k), lambda i: (i, 0, 0))
    wsp = pl.BlockSpec((t, k, cp), lambda i: (0, 0, 0))        # VMEM-resident
    par = pl.BlockSpec((1, k), lambda i: (0, 0))
    in_specs = [img, wsp] + ([par, par] if in_affine else [])
    args = (x3d, w) + (tuple(affine) if in_affine else ())

    return pl.pallas_call(
        kernel,
        out_shape=(jax.ShapeDtypeStruct((n, m, cp), jnp.bfloat16),
                   jax.ShapeDtypeStruct((n, 2, cp), jnp.float32)),
        grid=(n,),
        in_specs=in_specs,
        out_specs=(pl.BlockSpec((1, m, cp), lambda i: (i, 0, 0)),
                   pl.BlockSpec((1, 2, cp), lambda i: (i, 0, 0))),
        scratch_shapes=scratch,
        compiler_params=pltpu.CompilerParams(
            dimension_semantics=("parallel",),
            vmem_limit_bytes=32 * 1024 * 1024),
    )(*args)


# ----------------------------------------------------------------------------
# Final fused epilogue: relu(bn2(y2) + bn_sc(res))
# ----------------------------------------------------------------------------
def _bn_add_relu_kernel(y_ref, r_ref, s2_ref, t2_ref, ss_ref, ts_ref, o_ref):
    main = y_ref[0].astype(jnp.float32) * s2_ref[...] + t2_ref[...]
    res = r_ref[0].astype(jnp.float32) * ss_ref[...] + ts_ref[...]
    o_ref[0] = jnp.maximum(main + res, 0.0)


def _bn_add_relu(y2, res, s2, t2, ss, ts):
    n, hw, cp = y2.shape
    img = pl.BlockSpec((1, hw, cp), lambda i: (i, 0, 0))
    par = pl.BlockSpec((1, cp), lambda i: (0, 0))
    return pl.pallas_call(
        _bn_add_relu_kernel,
        out_shape=jax.ShapeDtypeStruct((n, hw, cp), jnp.float32),
        grid=(n,),
        in_specs=[img, img, par, par, par, par],
        out_specs=img,
        compiler_params=pltpu.CompilerParams(
            dimension_semantics=("parallel",)),
    )(y2, res, s2, t2, ss, ts)


# ----------------------------------------------------------------------------
# Plain-JAX glue: BN finalize, weight layout, im2col fallback (stride > 1)
# ----------------------------------------------------------------------------
def _finalize_bn(stats, count, gamma, beta, cp):
    total = jnp.sum(stats[:, 0, :], axis=0)
    total_sq = jnp.sum(stats[:, 1, :], axis=0)
    mean = total / count
    var = jnp.maximum(total_sq / count - mean * mean, 0.0)   # biased, PyTorch BN
    g = jnp.pad(gamma.astype(jnp.float32), (0, cp - gamma.shape[0]))
    b = jnp.pad(beta.astype(jnp.float32), (0, cp - beta.shape[0]))
    scale = g * jax.lax.rsqrt(var + EPS)
    shift = b - mean * scale
    return scale.reshape(1, cp), shift.reshape(1, cp)


def _prep_w3x3(w, cin_p, cout_p):
    co, ci, _, _ = w.shape
    w = jnp.pad(w, ((0, cout_p - co), (0, cin_p - ci), (0, 0), (0, 0)))
    return jnp.transpose(w, (2, 3, 1, 0)).reshape(9, cin_p, cout_p).astype(jnp.bfloat16)


def _im2col_3x3(x_nhwc, stride):
    n, h, w, c = x_nhwc.shape
    xp = jnp.pad(x_nhwc, ((0, 0), (1, 1), (1, 1), (0, 0)))
    ho = (h - 1) // stride + 1
    wo = (w - 1) // stride + 1
    cols = [xp[:, ky:ky + stride * (ho - 1) + 1:stride,
               kx:kx + stride * (wo - 1) + 1:stride, :]
            for ky in range(3) for kx in range(3)]
    return jnp.concatenate(cols, axis=-1).reshape(n, ho * wo, 9 * c), (ho, wo)


def init_basic_block_params(key, in_channels, channels):
    k1, k2, k3 = jax.random.split(key, 3)
    params = {
        "w1": 0.1 * jax.random.normal(k1, (channels, in_channels, 3, 3), jnp.float32),
        "g1": jnp.ones((channels,), jnp.float32),
        "b1": jnp.zeros((channels,), jnp.float32),
        "w2": 0.1 * jax.random.normal(k2, (channels, channels, 3, 3), jnp.float32),
        "g2": jnp.ones((channels,), jnp.float32),
        "b2": jnp.zeros((channels,), jnp.float32),
    }
    if in_channels != channels:   # projection shortcut (expansion == 1)
        params["wsc"] = 0.1 * jax.random.normal(
            k3, (channels, in_channels, 1, 1), jnp.float32)
        params["gsc"] = jnp.ones((channels,), jnp.float32)
        params["bsc"] = jnp.zeros((channels,), jnp.float32)
    return params


def basic_block_forward(x_nchw, params, stride=1):
    n, cin, h, w = x_nchw.shape
    cout = params["w1"].shape[0]
    cin_p = _round_up(cin, _LANE)
    cp = _round_up(cout, _LANE)

    x = jnp.transpose(x_nchw, (0, 2, 3, 1))                      # NHWC f32

    # ---- conv1 (3x3, stride, pad 1) + fused bn1 batch-stats ----------------
    if stride == 1:
        ho, wo = h, w
        x1 = jnp.pad(x, ((0, 0), (0, 0), (0, 0), (0, cin_p - cin)))
        x1 = x1.astype(jnp.bfloat16).reshape(n, h * w, cin_p)
        w1 = _prep_w3x3(params["w1"], cin_p, cp)
        y1, st1 = _fused_conv_bn_stats(x1, w1, spatial=(h, w))
    else:
        # TODO(synk): stream taps for strided convs too (polyphase input split)
        # instead of materializing im2col patches.
        p1, (ho, wo) = _im2col_3x3(x, stride)
        k9 = 9 * cin
        k9p = _round_up(k9, _LANE)
        p1 = jnp.pad(p1, ((0, 0), (0, 0), (0, k9p - k9))).astype(jnp.bfloat16)
        w1 = jnp.transpose(params["w1"], (2, 3, 1, 0)).reshape(k9, cout)
        w1 = jnp.pad(w1, ((0, k9p - k9), (0, cp - cout)))
        w1 = w1.reshape(1, k9p, cp).astype(jnp.bfloat16)
        y1, st1 = _fused_conv_bn_stats(p1, w1)
    hw = ho * wo
    sc1, sh1 = _finalize_bn(st1, n * hw, params["g1"], params["b1"], cp)

    # ---- conv2 (3x3, stride 1, pad 1); bn1 + relu fused into its A load ----
    w2 = _prep_w3x3(params["w2"], cp, cp)
    y2, st2 = _fused_conv_bn_stats(y1, w2, affine=(sc1, sh1), spatial=(ho, wo))
    sc2, sh2 = _finalize_bn(st2, n * hw, params["g2"], params["b2"], cp)

    # ---- shortcut: projection (1x1 conv + bn) or identity -------------------
    if "wsc" in params:
        xs = x[:, ::stride, ::stride, :]
        xs = jnp.pad(xs, ((0, 0), (0, 0), (0, 0), (0, cin_p - cin)))
        xs = xs.astype(jnp.bfloat16).reshape(n, hw, cin_p)
        wsc = jnp.pad(params["wsc"][:, :, 0, 0],
                      ((0, cp - cout), (0, cin_p - cin)))
        wsc = jnp.transpose(wsc).reshape(1, cin_p, cp).astype(jnp.bfloat16)
        res, sts = _fused_conv_bn_stats(xs, wsc)
        scs, shs = _finalize_bn(sts, n * hw, params["gsc"], params["bsc"], cp)
    else:
        if stride != 1:
            raise ValueError("identity shortcut requires stride == 1")
        assert cin == cout
        res = jnp.pad(x, ((0, 0), (0, 0), (0, 0), (0, cp - cin))).reshape(n, hw, cp)
        scs = jnp.ones((1, cp), jnp.float32)
        shs = jnp.zeros((1, cp), jnp.float32)

    # ---- fused relu(bn2(y2) + bn_sc(res)) -----------------------------------
    out = _bn_add_relu(y2, res, sc2, sh2, scs, shs)              # (n, hw, cp) f32
    out = out[:, :, :cout].reshape(n, ho, wo, cout)
    return jnp.transpose(out, (0, 3, 1, 2))                      # back to NCHW


# ----------------------------------------------------------------------------
# Pure-JAX reference (same semantics as the PyTorch module, training-mode BN)
# ----------------------------------------------------------------------------
def reference_forward(x, params, stride=1):
    dn = ("NCHW", "OIHW", "NCHW")

    def conv(x, w, s, pad):
        return jax.lax.conv_general_dilated(x, w, (s, s), pad,
                                            dimension_numbers=dn)

    def bn(y, g, b):
        m = jnp.mean(y, axis=(0, 2, 3), keepdims=True)
        v = jnp.mean((y - m) ** 2, axis=(0, 2, 3), keepdims=True)
        return ((y - m) / jnp.sqrt(v + EPS)) * g.reshape(1, -1, 1, 1) \
            + b.reshape(1, -1, 1, 1)

    out = conv(x, params["w1"], stride, [(1, 1), (1, 1)])
    out = jnp.maximum(bn(out, params["g1"], params["b1"]), 0.0)
    out = conv(out, params["w2"], 1, [(1, 1), (1, 1)])
    out = bn(out, params["g2"], params["b2"])
    if "wsc" in params:
        sc = conv(x, params["wsc"], stride, [(0, 0), (0, 0)])
        sc = bn(sc, params["gsc"], params["bsc"])
    else:
        sc = x[:, :, ::stride, ::stride]
    return jnp.maximum(out + sc, 0.0)


# ----------------------------------------------------------------------------
if __name__ == "__main__":
    key = jax.random.PRNGKey(0)
    kx, kp = jax.random.split(key)

    batch, in_channels, channels, spatial, stride = 2, 4, 8, 16, 1
    x = jax.random.normal(kx, (batch, in_channels, spatial, spatial), jnp.float32)
    params = init_basic_block_params(kp, in_channels, channels)

    fwd = jax.jit(basic_block_forward, static_argnames="stride")
    out = jax.block_until_ready(fwd(x, params, stride=stride))

    ref = jax.block_until_ready(reference_forward(x, params, stride=stride))
    # bf16 MXU inputs + bf16 intermediates (f32 accumulation) -> widened tol.
    np.testing.assert_allclose(np.asarray(out), np.asarray(ref),
                               atol=4e-2, rtol=4e-2)

    print("KERNEL_OK")
</pallas_src>

<mosaic_0001>
module attributes {stable_mosaic.version = 11 : i64} {
  func.func @kernel(%arg0: i32, %arg1: memref<1x256x128xbf16, #tpu.memory_space<vmem>>, %arg2: memref<9x128x128xbf16, #tpu.memory_space<vmem>>, %arg3: memref<1x256x128xbf16, #tpu.memory_space<vmem>>, %arg4: memref<1x2x128xf32, #tpu.memory_space<vmem>>, %arg5: memref<18x32x128xf32, #tpu.memory_space<vmem>>) attributes {dimension_semantics = [#tpu.dimension_semantics<parallel>], iteration_bounds = array<i64: 2>, scalar_prefetch = 0 : i64, scratch_operands = 1 : i64, tpu.core_type = #tpu.core_type<tc>, window_params = [{transform_indices = @transform_0, window_bounds = array<i64: 1, 256, 128>}, {pipeline_mode = #tpu.pipeline_mode<synchronous>, transform_indices = @transform_1, window_bounds = array<i64: 9, 128, 128>}, {transform_indices = @transform_2, window_bounds = array<i64: 1, 256, 128>}, {transform_indices = @transform_3, window_bounds = array<i64: 1, 2, 128>}]} {
    %c0 = arith.constant 0 : index
    %c0_0 = arith.constant 0 : index
    %c0_1 = arith.constant 0 : index
    %0 = vector.load %arg1[%c0, %c0_0, %c0_1] : memref<1x256x128xbf16, #tpu.memory_space<vmem>>, vector<1x256x128xbf16>
    %1 = vector.shape_cast %0 : vector<1x256x128xbf16> to vector<256x128xbf16>
    %2 = arith.extf %1 : vector<256x128xbf16> to vector<256x128xf32>
    %cst = arith.constant 0.000000e+00 : f32
    %3 = vector.broadcast %cst : f32 to vector<18x32x128xf32>
    %c0_2 = arith.constant 0 : index
    %c0_3 = arith.constant 0 : index
    %c0_4 = arith.constant 0 : index
    %4 = vector.load %arg5[%c0_2, %c0_3, %c0_4] : memref<18x32x128xf32, #tpu.memory_space<vmem>>, vector<18x32x128xf32>
    tpu.vector_store %arg5[%c0_2, %c0_3, %c0_4], %3 {strides = array<i32>} : memref<18x32x128xf32, #tpu.memory_space<vmem>>, vector<18x32x128xf32>,
    %5 = vector.shape_cast %2 : vector<256x128xf32> to vector<16x16x128xf32>
    %c1 = arith.constant 1 : index
    %c8 = arith.constant 8 : index
    %c0_5 = arith.constant 0 : index
    %6 = vector.load %arg5[%c1, %c8, %c0_5] : memref<18x32x128xf32, #tpu.memory_space<vmem>>, vector<16x16x128xf32>
    tpu.vector_store %arg5[%c1, %c8, %c0_5], %5 {strides = array<i32>} : memref<18x32x128xf32, #tpu.memory_space<vmem>>, vector<16x16x128xf32>,
    %cst_6 = arith.constant 0.000000e+00 : f32
    %7 = vector.broadcast %cst_6 : f32 to vector<256x128xf32>
    %c0_7 = arith.constant 0 : index
    %c7 = arith.constant 7 : index
    %c0_8 = arith.constant 0 : index
    %8 = vector.load %arg5[%c0_7, %c7, %c0_8] : memref<18x32x128xf32, #tpu.memory_space<vmem>>, vector<16x16x128xf32>
    %9 = vector.shape_cast %8 : vector<16x16x128xf32> to vector<256x128xf32>
    %10 = arith.truncf %9 : vector<256x128xf32> to vector<256x128xbf16>
    %c0_9 = arith.constant 0 : index
    %c0_10 = arith.constant 0 : index
    %c0_11 = arith.constant 0 : index
    %11 = vector.load %arg2[%c0_9, %c0_10, %c0_11] : memref<9x128x128xbf16, #tpu.memory_space<vmem>>, vector<1x128x128xbf16>
    %12 = vector.shape_cast %11 : vector<1x128x128xbf16> to vector<128x128xbf16>
    %cst_12 = arith.constant dense<0.000000e+00> : vector<256x128xf32>
    %13 = tpu.matmul %10, %12, %cst_12 {dimension_numbers = #tpu.dot_dimension_numbers<[1], [0], [0], [1], [0, 0, 1, 1], [], []>} : vector<256x128xbf16>, vector<128x128xbf16>, vector<256x128xf32> -> vector<256x128xf32>
    %14 = arith.addf %7, %13 : vector<256x128xf32>
    %c0_13 = arith.constant 0 : index
    %c8_14 = arith.constant 8 : index
    %c0_15 = arith.constant 0 : index
    %15 = vector.load %arg5[%c0_13, %c8_14, %c0_15] : memref<18x32x128xf32, #tpu.memory_space<vmem>>, vector<16x16x128xf32>
    %16 = vector.shape_cast %15 : vector<16x16x128xf32> to vector<256x128xf32>
    %17 = arith.truncf %16 : vector<256x128xf32> to vector<256x128xbf16>
    %c1_16 = arith.constant 1 : index
    %c0_17 = arith.constant 0 : index
    %c0_18 = arith.constant 0 : index
    %18 = vector.load %arg2[%c1_16, %c0_17, %c0_18] : memref<9x128x128xbf16, #tpu.memory_space<vmem>>, vector<1x128x128xbf16>
    %19 = vector.shape_cast %18 : vector<1x128x128xbf16> to vector<128x128xbf16>
    %cst_19 = arith.constant dense<0.000000e+00> : vector<256x128xf32>
    %20 = tpu.matmul %17, %19, %cst_19 {dimension_numbers = #tpu.dot_dimension_numbers<[1], [0], [0], [1], [0, 0, 1, 1], [], []>} : vector<256x128xbf16>, vector<128x128xbf16>, vector<256x128xf32> -> vector<256x128xf32>
    %21 = arith.addf %14, %20 : vector<256x128xf32>
    %c0_20 = arith.constant 0 : index
    %c9 = arith.constant 9 : index
    %c0_21 = arith.constant 0 : index
    %22 = vector.load %arg5[%c0_20, %c9, %c0_21] : memref<18x32x128xf32, #tpu.memory_space<vmem>>, vector<16x16x128xf32>
    %23 = vector.shape_cast %22 : vector<16x16x128xf32> to vector<256x128xf32>
    %24 = arith.truncf %23 : vector<256x128xf32> to vector<256x128xbf16>
    %c2 = arith.constant 2 : index
    %c0_22 = arith.constant 0 : index
    %c0_23 = arith.constant 0 : index
    %25 = vector.load %arg2[%c2, %c0_22, %c0_23] : memref<9x128x128xbf16, #tpu.memory_space<vmem>>, vector<1x128x128xbf16>
    %26 = vector.shape_cast %25 : vector<1x128x128xbf16> to vector<128x128xbf16>
    %cst_24 = arith.constant dense<0.000000e+00> : vector<256x128xf32>
    %27 = tpu.matmul %24, %26, %cst_24 {dimension_numbers = #tpu.dot_dimension_numbers<[1], [0], [0], [1], [0, 0, 1, 1], [], []>} : vector<256x128xbf16>, vector<128x128xbf16>, vector<256x128xf32> -> vector<256x128xf32>
    %28 = arith.addf %21, %27 : vector<256x128xf32>
    %c1_25 = arith.constant 1 : index
    %c7_26 = arith.constant 7 : index
    %c0_27 = arith.constant 0 : index
    %29 = vector.load %arg5[%c1_25, %c7_26, %c0_27] : memref<18x32x128xf32, #tpu.memory_space<vmem>>, vector<16x16x128xf32>
    %30 = vector.shape_cast %29 : vector<16x16x128xf32> to vector<256x128xf32>
    %31 = arith.truncf %30 : vector<256x128xf32> to vector<256x128xbf16>
    %c3 = arith.constant 3 : index
    %c0_28 = arith.constant 0 : index
    %c0_29 = arith.constant 0 : index
    %32 = vector.load %arg2[%c3, %c0_28, %c0_29] : memref<9x128x128xbf16, #tpu.memory_space<vmem>>, vector<1x128x128xbf16>
    %33 = vector.shape_cast %32 : vector<1x128x128xbf16> to vector<128x128xbf16>
    %cst_30 = arith.constant dense<0.000000e+00> : vector<256x128xf32>
    %34 = tpu.matmul %31, %33, %cst_30 {dimension_numbers = #tpu.dot_dimension_numbers<[1], [0], [0], [1], [0, 0, 1, 1], [], []>} : vector<256x128xbf16>, vector<128x128xbf16>, vector<256x128xf32> -> vector<256x128xf32>
    %35 = arith.addf %28, %34 : vector<256x128xf32>
    %c1_31 = arith.constant 1 : index
    %c8_32 = arith.constant 8 : index
    %c0_33 = arith.constant 0 : index
    %36 = vector.load %arg5[%c1_31, %c8_32, %c0_33] : memref<18x32x128xf32, #tpu.memory_space<vmem>>, vector<16x16x128xf32>
    %37 = vector.shape_cast %36 : vector<16x16x128xf32> to vector<256x128xf32>
    %38 = arith.truncf %37 : vector<256x128xf32> to vector<256x128xbf16>
    %c4 = arith.constant 4 : index
    %c0_34 = arith.constant 0 : index
    %c0_35 = arith.constant 0 : index
    %39 = vector.load %arg2[%c4, %c0_34, %c0_35] : memref<9x128x128xbf16, #tpu.memory_space<vmem>>, vector<1x128x128xbf16>
    %40 = vector.shape_cast %39 : vector<1x128x128xbf16> to vector<128x128xbf16>
    %cst_36 = arith.constant dense<0.000000e+00> : vector<256x128xf32>
    %41 = tpu.matmul %38, %40, %cst_36 {dimension_numbers = #tpu.dot_dimension_numbers<[1], [0], [0], [1], [0, 0, 1, 1], [], []>} : vector<256x128xbf16>, vector<128x128xbf16>, vector<256x128xf32> -> vector<256x128xf32>
    %42 = arith.addf %35, %41 : vector<256x128xf32>
    %c1_37 = arith.constant 1 : index
    %c9_38 = arith.constant 9 : index
    %c0_39 = arith.constant 0 : index
    %43 = vector.load %arg5[%c1_37, %c9_38, %c0_39] : memref<18x32x128xf32, #tpu.memory_space<vmem>>, vector<16x16x128xf32>
    %44 = vector.shape_cast %43 : vector<16x16x128xf32> to vector<256x128xf32>
    %45 = arith.truncf %44 : vector<256x128xf32> to vector<256x128xbf16>
    %c5 = arith.constant 5 : index
    %c0_40 = arith.constant 0 : index
    %c0_41 = arith.constant 0 : index
    %46 = vector.load %arg2[%c5, %c0_40, %c0_41] : memref<9x128x128xbf16, #tpu.memory_space<vmem>>, vector<1x128x128xbf16>
    %47 = vector.shape_cast %46 : vector<1x128x128xbf16> to vector<128x128xbf16>
    %cst_42 = arith.constant dense<0.000000e+00> : vector<256x128xf32>
    %48 = tpu.matmul %45, %47, %cst_42 {dimension_numbers = #tpu.dot_dimension_numbers<[1], [0], [0], [1], [0, 0, 1, 1], [], []>} : vector<256x128xbf16>, vector<128x128xbf16>, vector<256x128xf32> -> vector<256x128xf32>
    %49 = arith.addf %42, %48 : vector<256x128xf32>
    %c2_43 = arith.constant 2 : index
    %c7_44 = arith.constant 7 : index
    %c0_45 = arith.constant 0 : index
    %50 = vector.load %arg5[%c2_43, %c7_44, %c0_45] : memref<18x32x128xf32, #tpu.memory_space<vmem>>, vector<16x16x128xf32>
    %51 = vector.shape_cast %50 : vector<16x16x128xf32> to vector<256x128xf32>
    %52 = arith.truncf %51 : vector<256x128xf32> to vector<256x128xbf16>
    %c6 = arith.constant 6 : index
    %c0_46 = arith.constant 0 : index
    %c0_47 = arith.constant 0 : index
    %53 = vector.load %arg2[%c6, %c0_46, %c0_47] : memref<9x128x128xbf16, #tpu.memory_space<vmem>>, vector<1x128x128xbf16>
    %54 = vector.shape_cast %53 : vector<1x128x128xbf16> to vector<128x128xbf16>
    %cst_48 = arith.constant dense<0.000000e+00> : vector<256x128xf32>
    %55 = tpu.matmul %52, %54, %cst_48 {dimension_numbers = #tpu.dot_dimension_numbers<[1], [0], [0], [1], [0, 0, 1, 1], [], []>} : vector<256x128xbf16>, vector<128x128xbf16>, vector<256x128xf32> -> vector<256x128xf32>
    %56 = arith.addf %49, %55 : vector<256x128xf32>
    %c2_49 = arith.constant 2 : index
    %c8_50 = arith.constant 8 : index
    %c0_51 = arith.constant 0 : index
    %57 = vector.load %arg5[%c2_49, %c8_50, %c0_51] : memref<18x32x128xf32, #tpu.memory_space<vmem>>, vector<16x16x128xf32>
    %58 = vector.shape_cast %57 : vector<16x16x128xf32> to vector<256x128xf32>
    %59 = arith.truncf %58 : vector<256x128xf32> to vector<256x128xbf16>
    %c7_52 = arith.constant 7 : index
    %c0_53 = arith.constant 0 : index
    %c0_54 = arith.constant 0 : index
    %60 = vector.load %arg2[%c7_52, %c0_53, %c0_54] : memref<9x128x128xbf16, #tpu.memory_space<vmem>>, vector<1x128x128xbf16>
    %61 = vector.shape_cast %60 : vector<1x128x128xbf16> to vector<128x128xbf16>
    %cst_55 = arith.constant dense<0.000000e+00> : vector<256x128xf32>
    %62 = tpu.matmul %59, %61, %cst_55 {dimension_numbers = #tpu.dot_dimension_numbers<[1], [0], [0], [1], [0, 0, 1, 1], [], []>} : vector<256x128xbf16>, vector<128x128xbf16>, vector<256x128xf32> -> vector<256x128xf32>
    %63 = arith.addf %56, %62 : vector<256x128xf32>
    %c2_56 = arith.constant 2 : index
    %c9_57 = arith.constant 9 : index
    %c0_58 = arith.constant 0 : index
    %64 = vector.load %arg5[%c2_56, %c9_57, %c0_58] : memref<18x32x128xf32, #tpu.memory_space<vmem>>, vector<16x16x128xf32>
    %65 = vector.shape_cast %64 : vector<16x16x128xf32> to vector<256x128xf32>
    %66 = arith.truncf %65 : vector<256x128xf32> to vector<256x128xbf16>
    %c8_59 = arith.constant 8 : index
    %c0_60 = arith.constant 0 : index
    %c0_61 = arith.constant 0 : index
    %67 = vector.load %arg2[%c8_59, %c0_60, %c0_61] : memref<9x128x128xbf16, #tpu.memory_space<vmem>>, vector<1x128x128xbf16>
    %68 = vector.shape_cast %67 : vector<1x128x128xbf16> to vector<128x128xbf16>
    %cst_62 = arith.constant dense<0.000000e+00> : vector<256x128xf32>
    %69 = tpu.matmul %66, %68, %cst_62 {dimension_numbers = #tpu.dot_dimension_numbers<[1], [0], [0], [1], [0, 0, 1, 1], [], []>} : vector<256x128xbf16>, vector<128x128xbf16>, vector<256x128xf32> -> vector<256x128xf32>
    %70 = arith.addf %63, %69 : vector<256x128xf32>
    %71 = arith.truncf %70 : vector<256x128xf32> to vector<256x128xbf16>
    %c0_63 = arith.constant 0 : index
    %c0_64 = arith.constant 0 : index
    %c0_65 = arith.constant 0 : index
    %72 = vector.load %arg3[%c0_63, %c0_64, %c0_65] : memref<1x256x128xbf16, #tpu.memory_space<vmem>>, vector<1x256x128xbf16>
    %73 = vector.shape_cast %72 : vector<1x256x128xbf16> to vector<256x128xbf16>
    %74 = vector.shape_cast %71 : vector<256x128xbf16> to vector<1x256x128xbf16>
    tpu.vector_store %arg3[%c0_63, %c0_64, %c0_65], %74 {strides = array<i32>} : memref<1x256x128xbf16, #tpu.memory_space<vmem>>, vector<1x256x128xbf16>,
    %cst_66 = arith.constant dense<0.000000e+00> : vector<128xf32>
    %75 = vector.multi_reduction <add>, %70, %cst_66 [0] : vector<256x128xf32> to vector<128xf32>
    %76 = vector.shape_cast %75 : vector<128xf32> to vector<1x128xf32>
    %77 = arith.mulf %70, %70 : vector<256x128xf32>
    %cst_67 = arith.constant dense<0.000000e+00> : vector<128xf32>
    %78 = vector.multi_reduction <add>, %77, %cst_67 [0] : vector<256x128xf32> to vector<128xf32>
    %79 = vector.shape_cast %78 : vector<128xf32> to vector<1x128xf32>
    %80 = tpu.concatenate %76, %79 in 0 : vector<1x128xf32>, vector<1x128xf32> -> vector<2x128xf32>
    %c0_68 = arith.constant 0 : index
    %c0_69 = arith.constant 0 : index
    %c0_70 = arith.constant 0 : index
    %81 = vector.load %arg4[%c0_68, %c0_69, %c0_70] : memref<1x2x128xf32, #tpu.memory_space<vmem>>, vector<1x2x128xf32>
    %82 = vector.shape_cast %81 : vector<1x2x128xf32> to vector<2x128xf32>
    %83 = vector.shape_cast %80 : vector<2x128xf32> to vector<1x2x128xf32>
    tpu.vector_store %arg4[%c0_68, %c0_69, %c0_70], %83 {strides = array<i32>} : memref<1x2x128xf32, #tpu.memory_space<vmem>>, vector<1x2x128xf32>,
    return
  }
  func.func @transform_0(%arg0: i32) -> (i32, i32, i32) {
    %c0_i32 = arith.constant 0 : i32
    %c0_i32_0 = arith.constant 0 : i32
    %c0_i32_1 = arith.constant 0 : i32
    return %arg0, %c0_i32, %c0_i32_0 : i32, i32, i32
  }
  func.func @transform_1(%arg0: i32) -> (i32, i32, i32) {
    %c0_i32 = arith.constant 0 : i32
    %c0_i32_0 = arith.constant 0 : i32
    %c0_i32_1 = arith.constant 0 : i32
    %c0_i32_2 = arith.constant 0 : i32
    return %c0_i32, %c0_i32_0, %c0_i32_1 : i32, i32, i32
  }
  func.func @transform_2(%arg0: i32) -> (i32, i32, i32) {
    %c0_i32 = arith.constant 0 : i32
    %c0_i32_0 = arith.constant 0 : i32
    %c0_i32_1 = arith.constant 0 : i32
    return %arg0, %c0_i32, %c0_i32_0 : i32, i32, i32
  }
  func.func @transform_3(%arg0: i32) -> (i32, i32, i32) {
    %c0_i32 = arith.constant 0 : i32
    %c0_i32_0 = arith.constant 0 : i32
    %c0_i32_1 = arith.constant 0 : i32
    return %arg0, %c0_i32, %c0_i32_0 : i32, i32, i32
  }
}

module attributes {stable_mosaic.version = 11 : i64} {
  func.func @kernel(%arg0: i32, %arg1: memref<1x256x128xbf16, #tpu.memory_space<vmem>>, %arg2: memref<9x128x128xbf16, #tpu.memory_space<vmem>>, %arg3: memref<1x128xf32, #tpu.memory_space<vmem>>, %arg4: memref<1x128xf32, #tpu.memory_space<vmem>>, %arg5: memref<1x256x128xbf16, #tpu.memory_space<vmem>>, %arg6: memref<1x2x128xf32, #tpu.memory_space<vmem>>, %arg7: memref<18x32x128xf32, #tpu.memory_space<vmem>>) attributes {dimension_semantics = [#tpu.dimension_semantics<parallel>], iteration_bounds = array<i64: 2>, scalar_prefetch = 0 : i64, scratch_operands = 1 : i64, tpu.core_type = #tpu.core_type<tc>, window_params = [{transform_indices = @transform_0, window_bounds = array<i64: 1, 256, 128>}, {pipeline_mode = #tpu.pipeline_mode<synchronous>, transform_indices = @transform_1, window_bounds = array<i64: 9, 128, 128>}, {pipeline_mode = #tpu.pipeline_mode<synchronous>, transform_indices = @transform_2, window_bounds = array<i64: 1, 128>}, {pipeline_mode = #tpu.pipeline_mode<synchronous>, transform_indices = @transform_3, window_bounds = array<i64: 1, 128>}, {transform_indices = @transform_4, window_bounds = array<i64: 1, 256, 128>}, {transform_indices = @transform_5, window_bounds = array<i64: 1, 2, 128>}]} {
    %c0 = arith.constant 0 : index
    %c0_0 = arith.constant 0 : index
    %c0_1 = arith.constant 0 : index
    %0 = vector.load %arg1[%c0, %c0_0, %c0_1] : memref<1x256x128xbf16, #tpu.memory_space<vmem>>, vector<1x256x128xbf16>
    %1 = vector.shape_cast %0 : vector<1x256x128xbf16> to vector<256x128xbf16>
    %2 = arith.extf %1 : vector<256x128xbf16> to vector<256x128xf32>
    %c0_2 = arith.constant 0 : index
    %c0_3 = arith.constant 0 : index
    %3 = vector.load %arg3[%c0_2, %c0_3] : memref<1x128xf32, #tpu.memory_space<vmem>>, vector<1x128xf32>
    %4 = vector.broadcast %3 : vector<1x128xf32> to vector<256x128xf32>
    %5 = arith.mulf %2, %4 : vector<256x128xf32>
    %c0_4 = arith.constant 0 : index
    %c0_5 = arith.constant 0 : index
    %6 = vector.load %arg4[%c0_4, %c0_5] : memref<1x128xf32, #tpu.memory_space<vmem>>, vector<1x128xf32>
    %7 = vector.broadcast %6 : vector<1x128xf32> to vector<256x128xf32>
    %8 = arith.addf %5, %7 : vector<256x128xf32>
    %cst = arith.constant 0.000000e+00 : f32
    %9 = vector.broadcast %cst : f32 to vector<256x128xf32>
    %10 = arith.maximumf %8, %9 : vector<256x128xf32>
    %cst_6 = arith.constant 0.000000e+00 : f32
    %11 = vector.broadcast %cst_6 : f32 to vector<18x32x128xf32>
    %c0_7 = arith.constant 0 : index
    %c0_8 = arith.constant 0 : index
    %c0_9 = arith.constant 0 : index
    %12 = vector.load %arg7[%c0_7, %c0_8, %c0_9] : memref<18x32x128xf32, #tpu.memory_space<vmem>>, vector<18x32x128xf32>
    tpu.vector_store %arg7[%c0_7, %c0_8, %c0_9], %11 {strides = array<i32>} : memref<18x32x128xf32, #tpu.memory_space<vmem>>, vector<18x32x128xf32>,
    %13 = vector.shape_cast %10 : vector<256x128xf32> to vector<16x16x128xf32>
    %c1 = arith.constant 1 : index
    %c8 = arith.constant 8 : index
    %c0_10 = arith.constant 0 : index
    %14 = vector.load %arg7[%c1, %c8, %c0_10] : memref<18x32x128xf32, #tpu.memory_space<vmem>>, vector<16x16x128xf32>
    tpu.vector_store %arg7[%c1, %c8, %c0_10], %13 {strides = array<i32>} : memref<18x32x128xf32, #tpu.memory_space<vmem>>, vector<16x16x128xf32>,
    %cst_11 = arith.constant 0.000000e+00 : f32
    %15 = vector.broadcast %cst_11 : f32 to vector<256x128xf32>
    %c0_12 = arith.constant 0 : index
    %c7 = arith.constant 7 : index
    %c0_13 = arith.constant 0 : index
    %16 = vector.load %arg7[%c0_12, %c7, %c0_13] : memref<18x32x128xf32, #tpu.memory_space<vmem>>, vector<16x16x128xf32>
    %17 = vector.shape_cast %16 : vector<16x16x128xf32> to vector<256x128xf32>
    %18 = arith.truncf %17 : vector<256x128xf32> to vector<256x128xbf16>
    %c0_14 = arith.constant 0 : index
    %c0_15 = arith.constant 0 : index
    %c0_16 = arith.constant 0 : index
    %19 = vector.load %arg2[%c0_14, %c0_15, %c0_16] : memref<9x128x128xbf16, #tpu.memory_space<vmem>>, vector<1x128x128xbf16>
    %20 = vector.shape_cast %19 : vector<1x128x128xbf16> to vector<128x128xbf16>
    %cst_17 = arith.constant dense<0.000000e+00> : vector<256x128xf32>
    %21 = tpu.matmul %18, %20, %cst_17 {dimension_numbers = #tpu.dot_dimension_numbers<[1], [0], [0], [1], [0, 0, 1, 1], [], []>} : vector<256x128xbf16>, vector<128x128xbf16>, vector<256x128xf32> -> vector<256x128xf32>
    %22 = arith.addf %15, %21 : vector<256x128xf32>
    %c0_18 = arith.constant 0 : index
    %c8_19 = arith.constant 8 : index
    %c0_20 = arith.constant 0 : index
    %23 = vector.load %arg7[%c0_18, %c8_19, %c0_20] : memref<18x32x128xf32, #tpu.memory_space<vmem>>, vector<16x16x128xf32>
    %24 = vector.shape_cast %23 : vector<16x16x128xf32> to vector<256x128xf32>
    %25 = arith.truncf %24 : vector<256x128xf32> to vector<256x128xbf16>
    %c1_21 = arith.constant 1 : index
    %c0_22 = arith.constant 0 : index
    %c0_23 = arith.constant 0 : index
    %26 = vector.load %arg2[%c1_21, %c0_22, %c0_23] : memref<9x128x128xbf16, #tpu.memory_space<vmem>>, vector<1x128x128xbf16>
    %27 = vector.shape_cast %26 : vector<1x128x128xbf16> to vector<128x128xbf16>
    %cst_24 = arith.constant dense<0.000000e+00> : vector<256x128xf32>
    %28 = tpu.matmul %25, %27, %cst_24 {dimension_numbers = #tpu.dot_dimension_numbers<[1], [0], [0], [1], [0, 0, 1, 1], [], []>} : vector<256x128xbf16>, vector<128x128xbf16>, vector<256x128xf32> -> vector<256x128xf32>
    %29 = arith.addf %22, %28 : vector<256x128xf32>
    %c0_25 = arith.constant 0 : index
    %c9 = arith.constant 9 : index
    %c0_26 = arith.constant 0 : index
    %30 = vector.load %arg7[%c0_25, %c9, %c0_26] : memref<18x32x128xf32, #tpu.memory_space<vmem>>, vector<16x16x128xf32>
    %31 = vector.shape_cast %30 : vector<16x16x128xf32> to vector<256x128xf32>
    %32 = arith.truncf %31 : vector<256x128xf32> to vector<256x128xbf16>
    %c2 = arith.constant 2 : index
    %c0_27 = arith.constant 0 : index
    %c0_28 = arith.constant 0 : index
    %33 = vector.load %arg2[%c2, %c0_27, %c0_28] : memref<9x128x128xbf16, #tpu.memory_space<vmem>>, vector<1x128x128xbf16>
    %34 = vector.shape_cast %33 : vector<1x128x128xbf16> to vector<128x128xbf16>
    %cst_29 = arith.constant dense<0.000000e+00> : vector<256x128xf32>
    %35 = tpu.matmul %32, %34, %cst_29 {dimension_numbers = #tpu.dot_dimension_numbers<[1], [0], [0], [1], [0, 0, 1, 1], [], []>} : vector<256x128xbf16>, vector<128x128xbf16>, vector<256x128xf32> -> vector<256x128xf32>
    %36 = arith.addf %29, %35 : vector<256x128xf32>
    %c1_30 = arith.constant 1 : index
    %c7_31 = arith.constant 7 : index
    %c0_32 = arith.constant 0 : index
    %37 = vector.load %arg7[%c1_30, %c7_31, %c0_32] : memref<18x32x128xf32, #tpu.memory_space<vmem>>, vector<16x16x128xf32>
    %38 = vector.shape_cast %37 : vector<16x16x128xf32> to vector<256x128xf32>
    %39 = arith.truncf %38 : vector<256x128xf32> to vector<256x128xbf16>
    %c3 = arith.constant 3 : index
    %c0_33 = arith.constant 0 : index
    %c0_34 = arith.constant 0 : index
    %40 = vector.load %arg2[%c3, %c0_33, %c0_34] : memref<9x128x128xbf16, #tpu.memory_space<vmem>>, vector<1x128x128xbf16>
    %41 = vector.shape_cast %40 : vector<1x128x128xbf16> to vector<128x128xbf16>
    %cst_35 = arith.constant dense<0.000000e+00> : vector<256x128xf32>
    %42 = tpu.matmul %39, %41, %cst_35 {dimension_numbers = #tpu.dot_dimension_numbers<[1], [0], [0], [1], [0, 0, 1, 1], [], []>} : vector<256x128xbf16>, vector<128x128xbf16>, vector<256x128xf32> -> vector<256x128xf32>
    %43 = arith.addf %36, %42 : vector<256x128xf32>
    %c1_36 = arith.constant 1 : index
    %c8_37 = arith.constant 8 : index
    %c0_38 = arith.constant 0 : index
    %44 = vector.load %arg7[%c1_36, %c8_37, %c0_38] : memref<18x32x128xf32, #tpu.memory_space<vmem>>, vector<16x16x128xf32>
    %45 = vector.shape_cast %44 : vector<16x16x128xf32> to vector<256x128xf32>
    %46 = arith.truncf %45 : vector<256x128xf32> to vector<256x128xbf16>
    %c4 = arith.constant 4 : index
    %c0_39 = arith.constant 0 : index
    %c0_40 = arith.constant 0 : index
    %47 = vector.load %arg2[%c4, %c0_39, %c0_40] : memref<9x128x128xbf16, #tpu.memory_space<vmem>>, vector<1x128x128xbf16>
    %48 = vector.shape_cast %47 : vector<1x128x128xbf16> to vector<128x128xbf16>
    %cst_41 = arith.constant dense<0.000000e+00> : vector<256x128xf32>
    %49 = tpu.matmul %46, %48, %cst_41 {dimension_numbers = #tpu.dot_dimension_numbers<[1], [0], [0], [1], [0, 0, 1, 1], [], []>} : vector<256x128xbf16>, vector<128x128xbf16>, vector<256x128xf32> -> vector<256x128xf32>
    %50 = arith.addf %43, %49 : vector<256x128xf32>
    %c1_42 = arith.constant 1 : index
    %c9_43 = arith.constant 9 : index
    %c0_44 = arith.constant 0 : index
    %51 = vector.load %arg7[%c1_42, %c9_43, %c0_44] : memref<18x32x128xf32, #tpu.memory_space<vmem>>, vector<16x16x128xf32>
    %52 = vector.shape_cast %51 : vector<16x16x128xf32> to vector<256x128xf32>
    %53 = arith.truncf %52 : vector<256x128xf32> to vector<256x128xbf16>
    %c5 = arith.constant 5 : index
    %c0_45 = arith.constant 0 : index
    %c0_46 = arith.constant 0 : index
    %54 = vector.load %arg2[%c5, %c0_45, %c0_46] : memref<9x128x128xbf16, #tpu.memory_space<vmem>>, vector<1x128x128xbf16>
    %55 = vector.shape_cast %54 : vector<1x128x128xbf16> to vector<128x128xbf16>
    %cst_47 = arith.constant dense<0.000000e+00> : vector<256x128xf32>
    %56 = tpu.matmul %53, %55, %cst_47 {dimension_numbers = #tpu.dot_dimension_numbers<[1], [0], [0], [1], [0, 0, 1, 1], [], []>} : vector<256x128xbf16>, vector<128x128xbf16>, vector<256x128xf32> -> vector<256x128xf32>
    %57 = arith.addf %50, %56 : vector<256x128xf32>
    %c2_48 = arith.constant 2 : index
    %c7_49 = arith.constant 7 : index
    %c0_50 = arith.constant 0 : index
    %58 = vector.load %arg7[%c2_48, %c7_49, %c0_50] : memref<18x32x128xf32, #tpu.memory_space<vmem>>, vector<16x16x128xf32>
    %59 = vector.shape_cast %58 : vector<16x16x128xf32> to vector<256x128xf32>
    %60 = arith.truncf %59 : vector<256x128xf32> to vector<256x128xbf16>
    %c6 = arith.constant 6 : index
    %c0_51 = arith.constant 0 : index
    %c0_52 = arith.constant 0 : index
    %61 = vector.load %arg2[%c6, %c0_51, %c0_52] : memref<9x128x128xbf16, #tpu.memory_space<vmem>>, vector<1x128x128xbf16>
    %62 = vector.shape_cast %61 : vector<1x128x128xbf16> to vector<128x128xbf16>
    %cst_53 = arith.constant dense<0.000000e+00> : vector<256x128xf32>
    %63 = tpu.matmul %60, %62, %cst_53 {dimension_numbers = #tpu.dot_dimension_numbers<[1], [0], [0], [1], [0, 0, 1, 1], [], []>} : vector<256x128xbf16>, vector<128x128xbf16>, vector<256x128xf32> -> vector<256x128xf32>
    %64 = arith.addf %57, %63 : vector<256x128xf32>
    %c2_54 = arith.constant 2 : index
    %c8_55 = arith.constant 8 : index
    %c0_56 = arith.constant 0 : index
    %65 = vector.load %arg7[%c2_54, %c8_55, %c0_56] : memref<18x32x128xf32, #tpu.memory_space<vmem>>, vector<16x16x128xf32>
    %66 = vector.shape_cast %65 : vector<16x16x128xf32> to vector<256x128xf32>
    %67 = arith.truncf %66 : vector<256x128xf32> to vector<256x128xbf16>
    %c7_57 = arith.constant 7 : index
    %c0_58 = arith.constant 0 : index
    %c0_59 = arith.constant 0 : index
    %68 = vector.load %arg2[%c7_57, %c0_58, %c0_59] : memref<9x128x128xbf16, #tpu.memory_space<vmem>>, vector<1x128x128xbf16>
    %69 = vector.shape_cast %68 : vector<1x128x128xbf16> to vector<128x128xbf16>
    %cst_60 = arith.constant dense<0.000000e+00> : vector<256x128xf32>
    %70 = tpu.matmul %67, %69, %cst_60 {dimension_numbers = #tpu.dot_dimension_numbers<[1], [0], [0], [1], [0, 0, 1, 1], [], []>} : vector<256x128xbf16>, vector<128x128xbf16>, vector<256x128xf32> -> vector<256x128xf32>
    %71 = arith.addf %64, %70 : vector<256x128xf32>
    %c2_61 = arith.constant 2 : index
    %c9_62 = arith.constant 9 : index
    %c0_63 = arith.constant 0 : index
    %72 = vector.load %arg7[%c2_61, %c9_62, %c0_63] : memref<18x32x128xf32, #tpu.memory_space<vmem>>, vector<16x16x128xf32>
    %73 = vector.shape_cast %72 : vector<16x16x128xf32> to vector<256x128xf32>
    %74 = arith.truncf %73 : vector<256x128xf32> to vector<256x128xbf16>
    %c8_64 = arith.constant 8 : index
    %c0_65 = arith.constant 0 : index
    %c0_66 = arith.constant 0 : index
    %75 = vector.load %arg2[%c8_64, %c0_65, %c0_66] : memref<9x128x128xbf16, #tpu.memory_space<vmem>>, vector<1x128x128xbf16>
    %76 = vector.shape_cast %75 : vector<1x128x128xbf16> to vector<128x128xbf16>
    %cst_67 = arith.constant dense<0.000000e+00> : vector<256x128xf32>
    %77 = tpu.matmul %74, %76, %cst_67 {dimension_numbers = #tpu.dot_dimension_numbers<[1], [0], [0], [1], [0, 0, 1, 1], [], []>} : vector<256x128xbf16>, vector<128x128xbf16>, vector<256x128xf32> -> vector<256x128xf32>
    %78 = arith.addf %71, %77 : vector<256x128xf32>
    %79 = arith.truncf %78 : vector<256x128xf32> to vector<256x128xbf16>
    %c0_68 = arith.constant 0 : index
    %c0_69 = arith.constant 0 : index
    %c0_70 = arith.constant 0 : index
    %80 = vector.load %arg5[%c0_68, %c0_69, %c0_70] : memref<1x256x128xbf16, #tpu.memory_space<vmem>>, vector<1x256x128xbf16>
    %81 = vector.shape_cast %80 : vector<1x256x128xbf16> to vector<256x128xbf16>
    %82 = vector.shape_cast %79 : vector<256x128xbf16> to vector<1x256x128xbf16>
    tpu.vector_store %arg5[%c0_68, %c0_69, %c0_70], %82 {strides = array<i32>} : memref<1x256x128xbf16, #tpu.memory_space<vmem>>, vector<1x256x128xbf16>,
    %cst_71 = arith.constant dense<0.000000e+00> : vector<128xf32>
    %83 = vector.multi_reduction <add>, %78, %cst_71 [0] : vector<256x128xf32> to vector<128xf32>
    %84 = vector.shape_cast %83 : vector<128xf32> to vector<1x128xf32>
    %85 = arith.mulf %78, %78 : vector<256x128xf32>
    %cst_72 = arith.constant dense<0.000000e+00> : vector<128xf32>
    %86 = vector.multi_reduction <add>, %85, %cst_72 [0] : vector<256x128xf32> to vector<128xf32>
    %87 = vector.shape_cast %86 : vector<128xf32> to vector<1x128xf32>
    %88 = tpu.concatenate %84, %87 in 0 : vector<1x128xf32>, vector<1x128xf32> -> vector<2x128xf32>
    %c0_73 = arith.constant 0 : index
    %c0_74 = arith.constant 0 : index
    %c0_75 = arith.constant 0 : index
    %89 = vector.load %arg6[%c0_73, %c0_74, %c0_75] : memref<1x2x128xf32, #tpu.memory_space<vmem>>, vector<1x2x128xf32>
    %90 = vector.shape_cast %89 : vector<1x2x128xf32> to vector<2x128xf32>
    %91 = vector.shape_cast %88 : vector<2x128xf32> to vector<1x2x128xf32>
    tpu.vector_store %arg6[%c0_73, %c0_74, %c0_75], %91 {strides = array<i32>} : memref<1x2x128xf32, #tpu.memory_space<vmem>>, vector<1x2x128xf32>,
    return
  }
  func.func @transform_0(%arg0: i32) -> (i32, i32, i32) {
    %c0_i32 = arith.constant 0 : i32
    %c0_i32_0 = arith.constant 0 : i32
    %c0_i32_1 = arith.constant 0 : i32
    return %arg0, %c0_i32, %c0_i32_0 : i32, i32, i32
  }
  func.func @transform_1(%arg0: i32) -> (i32, i32, i32) {
    %c0_i32 = arith.constant 0 : i32
    %c0_i32_0 = arith.constant 0 : i32
    %c0_i32_1 = arith.constant 0 : i32
    %c0_i32_2 = arith.constant 0 : i32
    return %c0_i32, %c0_i32_0, %c0_i32_1 : i32, i32, i32
  }
  func.func @transform_2(%arg0: i32) -> (i32, i32) {
    %c0_i32 = arith.constant 0 : i32
    %c0_i32_0 = arith.constant 0 : i32
    %c0_i32_1 = arith.constant 0 : i32
    return %c0_i32, %c0_i32_0 : i32, i32
  }
  func.func @transform_3(%arg0: i32) -> (i32, i32) {
    %c0_i32 = arith.constant 0 : i32
    %c0_i32_0 = arith.constant 0 : i32
    %c0_i32_1 = arith.constant 0 : i32
    return %c0_i32, %c0_i32_0 : i32, i32
  }
  func.func @transform_4(%arg0: i32) -> (i32, i32, i32) {
    %c0_i32 = arith.constant 0 : i32
    %c0_i32_0 = arith.constant 0 : i32
    %c0_i32_1 = arith.constant 0 : i32
    return %arg0, %c0_i32, %c0_i32_0 : i32, i32, i32
  }
  func.func @transform_5(%arg0: i32) -> (i32, i32, i32) {
    %c0_i32 = arith.constant 0 : i32
    %c0_i32_0 = arith.constant 0 : i32
    %c0_i32_1 = arith.constant 0 : i32
    return %arg0, %c0_i32, %c0_i32_0 : i32, i32, i32
  }
}

module attributes {stable_mosaic.version = 11 : i64} {
  func.func @kernel(%arg0: i32, %arg1: memref<1x256x128xbf16, #tpu.memory_space<vmem>>, %arg2: memref<1x128x128xbf16, #tpu.memory_space<vmem>>, %arg3: memref<1x256x128xbf16, #tpu.memory_space<vmem>>, %arg4: memref<1x2x128xf32, #tpu.memory_space<vmem>>) attributes {dimension_semantics = [#tpu.dimension_semantics<parallel>], iteration_bounds = array<i64: 2>, scalar_prefetch = 0 : i64, scratch_operands = 0 : i64, tpu.core_type = #tpu.core_type<tc>, window_params = [{transform_indices = @transform_0, window_bounds = array<i64: 1, 256, 128>}, {pipeline_mode = #tpu.pipeline_mode<synchronous>, transform_indices = @transform_1, window_bounds = array<i64: 1, 128, 128>}, {transform_indices = @transform_2, window_bounds = array<i64: 1, 256, 128>}, {transform_indices = @transform_3, window_bounds = array<i64: 1, 2, 128>}]} {
    %c0 = arith.constant 0 : index
    %c0_0 = arith.constant 0 : index
    %c0_1 = arith.constant 0 : index
    %0 = vector.load %arg1[%c0, %c0_0, %c0_1] : memref<1x256x128xbf16, #tpu.memory_space<vmem>>, vector<1x256x128xbf16>
    %1 = vector.shape_cast %0 : vector<1x256x128xbf16> to vector<256x128xbf16>
    %2 = arith.extf %1 : vector<256x128xbf16> to vector<256x128xf32>
    %3 = arith.truncf %2 : vector<256x128xf32> to vector<256x128xbf16>
    %c0_2 = arith.constant 0 : index
    %c0_3 = arith.constant 0 : index
    %c0_4 = arith.constant 0 : index
    %4 = vector.load %arg2[%c0_2, %c0_3, %c0_4] : memref<1x128x128xbf16, #tpu.memory_space<vmem>>, vector<1x128x128xbf16>
    %5 = vector.shape_cast %4 : vector<1x128x128xbf16> to vector<128x128xbf16>
    %cst = arith.constant dense<0.000000e+00> : vector<256x128xf32>
    %6 = tpu.matmul %3, %5, %cst {dimension_numbers = #tpu.dot_dimension_numbers<[1], [0], [0], [1], [0, 0, 1, 1], [], []>} : vector<256x128xbf16>, vector<128x128xbf16>, vector<256x128xf32> -> vector<256x128xf32>
    %7 = arith.truncf %6 : vector<256x128xf32> to vector<256x128xbf16>
    %c0_5 = arith.constant 0 : index
    %c0_6 = arith.constant 0 : index
    %c0_7 = arith.constant 0 : index
    %8 = vector.load %arg3[%c0_5, %c0_6, %c0_7] : memref<1x256x128xbf16, #tpu.memory_space<vmem>>, vector<1x256x128xbf16>
    %9 = vector.shape_cast %8 : vector<1x256x128xbf16> to vector<256x128xbf16>
    %10 = vector.shape_cast %7 : vector<256x128xbf16> to vector<1x256x128xbf16>
    tpu.vector_store %arg3[%c0_5, %c0_6, %c0_7], %10 {strides = array<i32>} : memref<1x256x128xbf16, #tpu.memory_space<vmem>>, vector<1x256x128xbf16>,
    %cst_8 = arith.constant dense<0.000000e+00> : vector<128xf32>
    %11 = vector.multi_reduction <add>, %6, %cst_8 [0] : vector<256x128xf32> to vector<128xf32>
    %12 = vector.shape_cast %11 : vector<128xf32> to vector<1x128xf32>
    %13 = arith.mulf %6, %6 : vector<256x128xf32>
    %cst_9 = arith.constant dense<0.000000e+00> : vector<128xf32>
    %14 = vector.multi_reduction <add>, %13, %cst_9 [0] : vector<256x128xf32> to vector<128xf32>
    %15 = vector.shape_cast %14 : vector<128xf32> to vector<1x128xf32>
    %16 = tpu.concatenate %12, %15 in 0 : vector<1x128xf32>, vector<1x128xf32> -> vector<2x128xf32>
    %c0_10 = arith.constant 0 : index
    %c0_11 = arith.constant 0 : index
    %c0_12 = arith.constant 0 : index
    %17 = vector.load %arg4[%c0_10, %c0_11, %c0_12] : memref<1x2x128xf32, #tpu.memory_space<vmem>>, vector<1x2x128xf32>
    %18 = vector.shape_cast %17 : vector<1x2x128xf32> to vector<2x128xf32>
    %19 = vector.shape_cast %16 : vector<2x128xf32> to vector<1x2x128xf32>
    tpu.vector_store %arg4[%c0_10, %c0_11, %c0_12], %19 {strides = array<i32>} : memref<1x2x128xf32, #tpu.memory_space<vmem>>, vector<1x2x128xf32>,
    return
  }
  func.func @transform_0(%arg0: i32) -> (i32, i32, i32) {
    %c0_i32 = arith.constant 0 : i32
    %c0_i32_0 = arith.constant 0 : i32
    %c0_i32_1 = arith.constant 0 : i32
    return %arg0, %c0_i32, %c0_i32_0 : i32, i32, i32
  }
  func.func @transform_1(%arg0: i32) -> (i32, i32, i32) {
    %c0_i32 = arith.constant 0 : i32
    %c0_i32_0 = arith.constant 0 : i32
    %c0_i32_1 = arith.constant 0 : i32
    %c0_i32_2 = arith.constant 0 : i32
    return %c0_i32, %c0_i32_0, %c0_i32_1 : i32, i32, i32
  }
  func.func @transform_2(%arg0: i32) -> (i32, i32, i32) {
    %c0_i32 = arith.constant 0 : i32
    %c0_i32_0 = arith.constant 0 : i32
    %c0_i32_1 = arith.constant 0 : i32
    return %arg0, %c0_i32, %c0_i32_0 : i32, i32, i32
  }
  func.func @transform_3(%arg0: i32) -> (i32, i32, i32) {
    %c0_i32 = arith.constant 0 : i32
    %c0_i32_0 = arith.constant 0 : i32
    %c0_i32_1 = arith.constant 0 : i32
    return %arg0, %c0_i32, %c0_i32_0 : i32, i32, i32
  }
}

module attributes {stable_mosaic.version = 11 : i64} {
  func.func @_bn_add_relu_kernel(%arg0: i32, %arg1: memref<1x256x128xbf16, #tpu.memory_space<vmem>>, %arg2: memref<1x256x128xbf16, #tpu.memory_space<vmem>>, %arg3: memref<1x128xf32, #tpu.memory_space<vmem>>, %arg4: memref<1x128xf32, #tpu.memory_space<vmem>>, %arg5: memref<1x128xf32, #tpu.memory_space<vmem>>, %arg6: memref<1x128xf32, #tpu.memory_space<vmem>>, %arg7: memref<1x256x128xf32, #tpu.memory_space<vmem>>) attributes {dimension_semantics = [#tpu.dimension_semantics<parallel>], iteration_bounds = array<i64: 2>, scalar_prefetch = 0 : i64, scratch_operands = 0 : i64, tpu.core_type = #tpu.core_type<tc>, window_params = [{transform_indices = @transform_0, window_bounds = array<i64: 1, 256, 128>}, {transform_indices = @transform_1, window_bounds = array<i64: 1, 256, 128>}, {pipeline_mode = #tpu.pipeline_mode<synchronous>, transform_indices = @transform_2, window_bounds = array<i64: 1, 128>}, {pipeline_mode = #tpu.pipeline_mode<synchronous>, transform_indices = @transform_3, window_bounds = array<i64: 1, 128>}, {pipeline_mode = #tpu.pipeline_mode<synchronous>, transform_indices = @transform_4, window_bounds = array<i64: 1, 128>}, {pipeline_mode = #tpu.pipeline_mode<synchronous>, transform_indices = @transform_5, window_bounds = array<i64: 1, 128>}, {transform_indices = @transform_6, window_bounds = array<i64: 1, 256, 128>}]} {
    %c0 = arith.constant 0 : index
    %c0_0 = arith.constant 0 : index
    %c0_1 = arith.constant 0 : index
    %0 = vector.load %arg1[%c0, %c0_0, %c0_1] : memref<1x256x128xbf16, #tpu.memory_space<vmem>>, vector<1x256x128xbf16>
    %1 = vector.shape_cast %0 : vector<1x256x128xbf16> to vector<256x128xbf16>
    %2 = arith.extf %1 : vector<256x128xbf16> to vector<256x128xf32>
    %c0_2 = arith.constant 0 : index
    %c0_3 = arith.constant 0 : index
    %3 = vector.load %arg3[%c0_2, %c0_3] : memref<1x128xf32, #tpu.memory_space<vmem>>, vector<1x128xf32>
    %4 = vector.broadcast %3 : vector<1x128xf32> to vector<256x128xf32>
    %5 = arith.mulf %2, %4 : vector<256x128xf32>
    %c0_4 = arith.constant 0 : index
    %c0_5 = arith.constant 0 : index
    %6 = vector.load %arg4[%c0_4, %c0_5] : memref<1x128xf32, #tpu.memory_space<vmem>>, vector<1x128xf32>
    %7 = vector.broadcast %6 : vector<1x128xf32> to vector<256x128xf32>
    %8 = arith.addf %5, %7 : vector<256x128xf32>
    %c0_6 = arith.constant 0 : index
    %c0_7 = arith.constant 0 : index
    %c0_8 = arith.constant 0 : index
    %9 = vector.load %arg2[%c0_6, %c0_7, %c0_8] : memref<1x256x128xbf16, #tpu.memory_space<vmem>>, vector<1x256x128xbf16>
    %10 = vector.shape_cast %9 : vector<1x256x128xbf16> to vector<256x128xbf16>
    %11 = arith.extf %10 : vector<256x128xbf16> to vector<256x128xf32>
    %c0_9 = arith.constant 0 : index
    %c0_10 = arith.constant 0 : index
    %12 = vector.load %arg5[%c0_9, %c0_10] : memref<1x128xf32, #tpu.memory_space<vmem>>, vector<1x128xf32>
    %13 = vector.broadcast %12 : vector<1x128xf32> to vector<256x128xf32>
    %14 = arith.mulf %11, %13 : vector<256x128xf32>
    %c0_11 = arith.constant 0 : index
    %c0_12 = arith.constant 0 : index
    %15 = vector.load %arg6[%c0_11, %c0_12] : memref<1x128xf32, #tpu.memory_space<vmem>>, vector<1x128xf32>
    %16 = vector.broadcast %15 : vector<1x128xf32> to vector<256x128xf32>
    %17 = arith.addf %14, %16 : vector<256x128xf32>
    %18 = arith.addf %8, %17 : vector<256x128xf32>
    %cst = arith.constant 0.000000e+00 : f32
    %19 = vector.broadcast %cst : f32 to vector<256x128xf32>
    %20 = arith.maximumf %18, %19 : vector<256x128xf32>
    %c0_13 = arith.constant 0 : index
    %c0_14 = arith.constant 0 : index
    %c0_15 = arith.constant 0 : index
    %21 = vector.load %arg7[%c0_13, %c0_14, %c0_15] : memref<1x256x128xf32, #tpu.memory_space<vmem>>, vector<1x256x128xf32>
    %22 = vector.shape_cast %21 : vector<1x256x128xf32> to vector<256x128xf32>
    %23 = vector.shape_cast %20 : vector<256x128xf32> to vector<1x256x128xf32>
    tpu.vector_store %arg7[%c0_13, %c0_14, %c0_15], %23 {strides = array<i32>} : memref<1x256x128xf32, #tpu.memory_space<vmem>>, vector<1x256x128xf32>,
    return
  }
  func.func @transform_0(%arg0: i32) -> (i32, i32, i32) {
    %c0_i32 = arith.constant 0 : i32
    %c0_i32_0 = arith.constant 0 : i32
    %c0_i32_1 = arith.constant 0 : i32
    return %arg0, %c0_i32, %c0_i32_0 : i32, i32, i32
  }
  func.func @transform_1(%arg0: i32) -> (i32, i32, i32) {
    %c0_i32 = arith.constant 0 : i32
    %c0_i32_0 = arith.constant 0 : i32
    %c0_i32_1 = arith.constant 0 : i32
    return %arg0, %c0_i32, %c0_i32_0 : i32, i32, i32
  }
  func.func @transform_2(%arg0: i32) -> (i32, i32) {
    %c0_i32 = arith.constant 0 : i32
    %c0_i32_0 = arith.constant 0 : i32
    %c0_i32_1 = arith.constant 0 : i32
    return %c0_i32, %c0_i32_0 : i32, i32
  }
  func.func @transform_3(%arg0: i32) -> (i32, i32) {
    %c0_i32 = arith.constant 0 : i32
    %c0_i32_0 = arith.constant 0 : i32
    %c0_i32_1 = arith.constant 0 : i32
    return %c0_i32, %c0_i32_0 : i32, i32
  }
  func.func @transform_4(%arg0: i32) -> (i32, i32) {
    %c0_i32 = arith.constant 0 : i32
    %c0_i32_0 = arith.constant 0 : i32
    %c0_i32_1 = arith.constant 0 : i32
    return %c0_i32, %c0_i32_0 : i32, i32
  }
  func.func @transform_5(%arg0: i32) -> (i32, i32) {
    %c0_i32 = arith.constant 0 : i32
    %c0_i32_0 = arith.constant 0 : i32
    %c0_i32_1 = arith.constant 0 : i32
    return %c0_i32, %c0_i32_0 : i32, i32
  }
  func.func @transform_6(%arg0: i32) -> (i32, i32, i32) {
    %c0_i32 = arith.constant 0 : i32
    %c0_i32_0 = arith.constant 0 : i32
    %c0_i32_1 = arith.constant 0 : i32
    return %arg0, %c0_i32, %c0_i32_0 : i32, i32, i32
  }
}

</mosaic_0001>

<bundles_post_ra>
// kernel: basic_block_forward.6
= control target key start
LH: loop header
LB: loop body
LE: loop exit
PB: predicated region body
PF: predicated region fallthrough
CT: control target
= control target key end

     0   :  { %s1236_s12 = smov 0   ;;  %s1414_s0 = inlined_call_operand.vmem [shape: bf16[2,256,128], index: 0, kind: input, shape index: {}]   ;;  %s1415_s1 = inlined_call_operand.vmem [shape: bf16[1,128,128], index: 1, kind: input, shape index: {}]   ;;  %s1416_s2 = inlined_call_operand.vmem [shape: bf16[2,256,128], index: 2, kind: output, shape index: {0}]   ;;  %s1417_s3 = inlined_call_operand.vmem [shape: f32[2,2,128], index: 3, kind: output, shape index: {1}]  }
   0x1 LB: > { %s891_s13 = sadd.s32 4294967295, %s1214_s12   ;;  %p895_p0 = scmp.ge.s32.totalorder %s1214_s12, 1  ;;  %s1214_s12 = sphi %s1236_s12, %s14_s12  }
   0x2   : > { %p140_p1 = scmp.lt.s32.totalorder %s1214_s12, 3 }
   0x4   : > { %p141_p2 = pnand %p895_p0, %p140_p1 }
   0x5   : > { %p168_p3 = scmp.lt.s32.totalorder (!%p141_p2), %s891_s13, 1 }
   0x6   : > { %144 = sbr.rel (%p141_p2) target bundleno = 321 (0x141), region = 28 }
   0xb   : > { %v1184_v0 = vld [vmem:[%s1415_s1 + $0x38] sm:$0xff]   ;;  %v1185_v1 = vld [vmem:[%s1415_s1 + $0x30] sm:$0xff]   ;;  %s1419_s13 = smov (!%p168_p3, %s891_s13), 1  ;;  %v1186_v2 = vld [vmem:[%s1415_s1 + $0x28] sm:$0xff]   ;;  %vm802_vm0 = vcmask 1040384  }
   0xc   : > { %1112 = vmatprep.subr.bf16.mxu0 %v1184_v0  ;;  %1160 = vmatprep.subr.bf16.mxu1 %v1184_v0  ;;  %s959_s20 = sshll.u32 %s1419_s13, 7  ;;  %v1187_v3 = vld [vmem:[%s1415_s1 + $0x20] sm:$0xff]   ;;  %v1188_v5 = vld [vmem:[%s1415_s1 + $0x18] sm:$0xff]   ;;  %v1189_v6 = vld [vmem:[%s1415_s1 + $0x10] sm:$0xff]   ;;  %s900_s10 = sshll.u32 %s1419_s13, 1 }
   0xd   : > { %1113 = vmatpush3.bf16.msra.mxu0 %v1184_v0  ;;  %1168 = vmatpush3.bf16.msra.mxu1 %v1184_v0  ;;  %s1261_s23 = scalar_lea.vmem %s1414_s0, %s959_s20  ;;  %v1190_v8 = vld [vmem:[%s1415_s1 + $0x8] sm:$0xff]   ;;  %v1191_v9 = vld [vmem:[%s1415_s1] sm:$0xff]   ;;  %s1303_s9 = scalar_lea.vmem %s1416_s2, %s959_s20 }
   0xe   : > { %1114 = vmatprep.subr.bf16.mxu0 %v1185_v1  ;;  %1161 = vmatprep.subr.bf16.mxu1 %v1185_v1  ;;  %v1192_v4 = vld [vmem:[%s1261_s23] sm:$0xff]   ;;  %v1193_v10 = vld [vmem:[%s1261_s23 + $0x8] sm:$0xff]   ;;  %v1194_v12 = vld [vmem:[%s1261_s23 + $0x10] sm:$0xff]   ;;  %s181_s15 = scalar_lea.vmem %s1417_s3, %s900_s10 }
   0xf   : > { %1128 = vmatprep.mubr.bf16.mxu0 %v1192_v4  ;;  %v1200_v7 = vld [vmem:[%s1261_s23 + $0x40] sm:$0xff]   ;;  %v1201_v11 = vld [vmem:[%s1261_s23 + $0x48] sm:$0xff]   ;;  %v1202_v13 = vld [vmem:[%s1261_s23 + $0x50] sm:$0xff]  }
  0x10   : > { %1144 = vmatprep.mubr.bf16.mxu1 %v1200_v7  ;;  %v1195_v14 = vld [vmem:[%s1261_s23 + $0x18] sm:$0xff]   ;;  %v1196_v16 = vld [vmem:[%s1261_s23 + $0x20] sm:$0xff]   ;;  %v1197_v18 = vld [vmem:[%s1261_s23 + $0x28] sm:$0xff]  }
  0x11   : > { %1115 = vmatpush3.bf16.msra.mxu0 %v1185_v1  ;;  %1169 = vmatpush3.bf16.msra.mxu1 %v1185_v1  ;;  %v1203_v15 = vld [vmem:[%s1261_s23 + $0x58] sm:$0xff]   ;;  %v1204_v17 = vld [vmem:[%s1261_s23 + $0x60] sm:$0xff]   ;;  %v1205_v19 = vld [vmem:[%s1261_s23 + $0x68] sm:$0xff]  }
  0x12   : > { %1116 = vmatprep.subr.bf16.mxu0 %v1186_v2  ;;  %1162 = vmatprep.subr.bf16.mxu1 %v1186_v2  ;;  %v1198_v20 = vld [vmem:[%s1261_s23 + $0x30] sm:$0xff]   ;;  %v1199_v22 = vld [vmem:[%s1261_s23 + $0x38] sm:$0xff]  }
  0x13   : > { %v1206_v21 = vld [vmem:[%s1261_s23 + $0x70] sm:$0xff]   ;;  %v1207_v23 = vld [vmem:[%s1261_s23 + $0x78] sm:$0xff]  }
  0x15   : > { %1117 = vmatpush3.bf16.msra.mxu0 %v1186_v2  ;;  %1170 = vmatpush3.bf16.msra.mxu1 %v1186_v2 }
  0x16   : > { %1118 = vmatprep.subr.bf16.mxu0 %v1187_v3  ;;  %1163 = vmatprep.subr.bf16.mxu1 %v1187_v3 }
  0x19   : > { %1119 = vmatpush3.bf16.msra.mxu0 %v1187_v3  ;;  %1171 = vmatpush3.bf16.msra.mxu1 %v1187_v3 }
  0x1a   : > { %1120 = vmatprep.subr.bf16.mxu0 %v1188_v5  ;;  %1164 = vmatprep.subr.bf16.mxu1 %v1188_v5 }
  0x1d   : > { %1121 = vmatpush3.bf16.msra.mxu0 %v1188_v5  ;;  %1172 = vmatpush3.bf16.msra.mxu1 %v1188_v5 }
  0x1e   : > { %1122 = vmatprep.subr.bf16.mxu0 %v1189_v6  ;;  %1165 = vmatprep.subr.bf16.mxu1 %v1189_v6 }
  0x21   : > { %1123 = vmatpush3.bf16.msra.mxu0 %v1189_v6  ;;  %1173 = vmatpush3.bf16.msra.mxu1 %v1189_v6 }
  0x22   : > { %1124 = vmatprep.subr.bf16.mxu0 %v1190_v8  ;;  %1166 = vmatprep.subr.bf16.mxu1 %v1190_v8 }
  0x25   : > { %1125 = vmatpush3.bf16.msra.mxu0 %v1190_v8  ;;  %1174 = vmatpush3.bf16.msra.mxu1 %v1190_v8 }
  0x26   : > { %1126 = vmatprep.subr.bf16.mxu0 %v1191_v9  ;;  %1167 = vmatprep.subr.bf16.mxu1 %v1191_v9 }
  0x29   : > { %1127 = vmatpush3.bf16.msra.mxu0 %v1191_v9  ;;  %1175 = vmatpush3.bf16.msra.mxu1 %v1191_v9 }
  0x2c   : > { %1129 = vmatmul.mubr.bf16.vlgmr.msra.gmra.mxu0 %v1193_v10  ;;  %1145 = vmatmul.mubr.bf16.vlgmr.msra.gmra.mxu1 %v1201_v11 }
  0x2d   : > { %1132 = vmatprep.mubr.bf16.mxu0 %v1194_v12  ;;  %1148 = vmatprep.mubr.bf16.mxu1 %v1202_v13 }
  0x34   : > { %1133 = vmatmul.mubr.bf16.gmra.mxu0 %v1195_v14  ;;  %1149 = vmatmul.mubr.bf16.gmra.mxu1 %v1203_v15 }
  0x35   : > { %1136 = vmatprep.mubr.bf16.mxu0 %v1196_v16  ;;  %1152 = vmatprep.mubr.bf16.mxu1 %v1204_v17 }
  0x3c   : > { %1137 = vmatmul.mubr.bf16.gmra.mxu0 %v1197_v18  ;;  %1153 = vmatmul.mubr.bf16.gmra.mxu1 %v1205_v19 }
  0x3d   : > { %1140 = vmatprep.mubr.bf16.mxu0 %v1198_v20  ;;  %1156 = vmatprep.mubr.bf16.mxu1 %v1206_v21 }
  0x44   : > { %1141 = vmatmul.mubr.bf16.gmra.mxu0 %v1199_v22  ;;  %1157 = vmatmul.mubr.bf16.gmra.mxu1 %v1207_v23 }
  0xec   : > { %v1130_v24 = vpop.f32.mrf.mxu0  ;;  %v1294_v25 = vpop.f32.mrf.mxu1 }
  0xed   : > { %v735_v41 = vmul.f32 %v1130_v24, %v1130_v24 }
  0xee   : > { %v409_v26 = vpop.f32.mrf.mxu0  ;;  %v1296_v27 = vpop.f32.mrf.mxu1 }
  0xef   : > { %v733_v32 = vmul.f32 %v409_v26, %v409_v26 }
  0xf0   : > { %v1131_v28 = vpop.f32.mrf.mxu0  ;;  %v1305_v29 = vpop.f32.mrf.mxu1 }
  0xf1   : > { %v1001_v30 = vpack.c.bf16 %v1131_v28, %v1130_v24  ;;  %v1041_v31 = vpack.c.bf16 %v1305_v29, %v1294_v25  ;;  %v736_v46 = vmul.f32 %v1131_v28, %v1131_v28 }
  0xf2   : > { %v412_v33 = vpop.f32.mrf.mxu0  ;;  %v1309_v34 = vpop.f32.mrf.mxu1 }
  0xf3   : > { %1073 = vst [vmem:[%s1303_s9 + $0x8] sm:$0xff] %v1001_v30   ;;  %v996_v35 = vpack.c.bf16 %v412_v33, %v409_v26  ;;  %v696_v36 = vadd.f32 %v412_v33, %v409_v26  ;;  %v734_v37 = vmul.f32 %v412_v33, %v412_v33  ;;  %1081 = vst [vmem:[%s1303_s9 + $0x48] sm:$0xff] %v1041_v31  }
  0xf4   : > { %v1036_v38 = vpack.c.bf16 %v1309_v34, %v1296_v27  ;;  %v1134_v39 = vpop.f32.mrf.mxu0  ;;  %v1315_v40 = vpop.f32.mrf.mxu1 }
  0xf5   : > { %997 = vst [vmem:[%s1303_s9] sm:$0xff] %v996_v35   ;;  %v697_v42 = vadd.f32 %v1130_v24, %v696_v36  ;;  %v765_v43 = vadd.f32 %v734_v37, %v733_v32  ;;  %v739_v1 = vmul.f32 %v1134_v39, %v1134_v39 }
  0xf6   : > { %1080 = vst [vmem:[%s1303_s9 + $0x40] sm:$0xff] %v1036_v38   ;;  %v425_v44 = vpop.f32.mrf.mxu0  ;;  %v1319_v45 = vpop.f32.mrf.mxu1 }
  0xf7   : > { %v766_v47 = vadd.f32 %v765_v43, %v735_v41  ;;  %v698_v48 = vadd.f32 %v1131_v28, %v697_v42  ;;  %v737_v52 = vmul.f32 %v425_v44, %v425_v44 }
  0xf8   : > { %v1135_v49 = vpop.f32.mrf.mxu0  ;;  %v1321_v50 = vpop.f32.mrf.mxu1 }
  0xf9   : > { %v699_v51 = vadd.f32 %v698_v48, %v425_v44  ;;  %v767_v53 = vadd.f32 %v766_v47, %v736_v46  ;;  %v1011_v54 = vpack.c.bf16 %v1135_v49, %v1134_v39  ;;  %v1051_v56 = vpack.c.bf16 %v1321_v50, %v1315_v40 }
  0xfa   : > { %v428_v55 = vpop.f32.mrf.mxu0  ;;  %v1325_v57 = vpop.f32.mrf.mxu1  ;;  %v740_v6 = vmul.f32 %v1135_v49, %v1135_v49 }
  0xfb   : > { %v768_v58 = vadd.f32 %v767_v53, %v737_v52  ;;  %1075 = vst [vmem:[%s1303_s9 + $0x18] sm:$0xff] %v1011_v54   ;;  %v1006_v59 = vpack.c.bf16 %v428_v55, %v425_v44  ;;  %v700_v60 = vadd.f32 %v699_v51, %v428_v55  ;;  %v738_v61 = vmul.f32 %v428_v55, %v428_v55 }
  0xfc   : > { %v1138_v62 = vpop.f32.mrf.mxu0  ;;  %1083 = vst [vmem:[%s1303_s9 + $0x58] sm:$0xff] %v1051_v56   ;;  %v1046_v63 = vpack.c.bf16 %v1325_v57, %v1319_v45  ;;  %v1331_v0 = vpop.f32.mrf.mxu1 }
  0xfd   : > { %1074 = vst [vmem:[%s1303_s9 + $0x10] sm:$0xff] %v1006_v59   ;;  %v701_v2 = vadd.f32 %v1134_v39, %v700_v60  ;;  %v769_v3 = vadd.f32 %v768_v58, %v738_v61  ;;  %v743_v26 = vmul.f32 %v1138_v62, %v1138_v62  ;;  %v749_v61 = vmul.f32 %v1296_v27, %v1296_v27 }
  0xfe   : > { %v441_v4 = vpop.f32.mrf.mxu0  ;;  %1082 = vst [vmem:[%s1303_s9 + $0x50] sm:$0xff] %v1046_v63   ;;  %v1335_v5 = vpop.f32.mrf.mxu1 }
  0xff   : > { %v770_v7 = vadd.f32 %v769_v3, %v739_v1  ;;  %v702_v8 = vadd.f32 %v1135_v49, %v701_v2  ;;  %v741_v12 = vmul.f32 %v441_v4, %v441_v4  ;;  %v750_v2 = vmul.f32 %v1309_v34, %v1309_v34 }
 0x100   : > { %v1139_v9 = vpop.f32.mrf.mxu0  ;;  %v1337_v10 = vpop.f32.mrf.mxu1 }
 0x101   : > { %v703_v11 = vadd.f32 %v702_v8, %v441_v4  ;;  %v771_v13 = vadd.f32 %v770_v7, %v740_v6  ;;  %v1021_v14 = vpack.c.bf16 %v1139_v9, %v1138_v62  ;;  %v1061_v16 = vpack.c.bf16 %v1337_v10, %v1331_v0 }
 0x102   : > { %v444_v15 = vpop.f32.mrf.mxu0  ;;  %v1341_v17 = vpop.f32.mrf.mxu1  ;;  %v744_v33 = vmul.f32 %v1139_v9, %v1139_v9  ;;  %v752_v8 = vmul.f32 %v1305_v29, %v1305_v29 }
 0x103   : > { %v772_v18 = vadd.f32 %v771_v13, %v741_v12  ;;  %1077 = vst [vmem:[%s1303_s9 + $0x28] sm:$0xff] %v1021_v14   ;;  %v1016_v19 = vpack.c.bf16 %v444_v15, %v441_v4  ;;  %v704_v20 = vadd.f32 %v703_v11, %v444_v15  ;;  %v742_v21 = vmul.f32 %v444_v15, %v444_v15 }
 0x104   : > { %v1142_v22 = vpop.f32.mrf.mxu0  ;;  %1085 = vst [vmem:[%s1303_s9 + $0x68] sm:$0xff] %v1061_v16   ;;  %v1056_v23 = vpack.c.bf16 %v1341_v17, %v1335_v5  ;;  %v1347_v24 = vpop.f32.mrf.mxu1  ;;  %v751_v4 = vmul.f32 %v1294_v25, %v1294_v25  ;;  %v753_v12 = vmul.f32 %v1319_v45, %v1319_v45  ;;  %v754_v15 = vmul.f32 %v1325_v57, %v1325_v57 }
 0x105   : > { %1076 = vst [vmem:[%s1303_s9 + $0x20] sm:$0xff] %v1016_v19   ;;  %v705_v28 = vadd.f32 %v1138_v62, %v704_v20  ;;  %v773_v30 = vadd.f32 %v772_v18, %v742_v21  ;;  %v747_v54 = vmul.f32 %v1142_v22, %v1142_v22  ;;  %v757_v21 = vmul.f32 %v1335_v5, %v1335_v5 }
 0x106   : > { %v457_v31 = vpop.f32.mrf.mxu0  ;;  %1084 = vst [vmem:[%s1303_s9 + $0x60] sm:$0xff] %v1056_v23   ;;  %v1351_v32 = vpop.f32.mrf.mxu1 }
 0x107   : > { %v774_v35 = vadd.f32 %v773_v30, %v743_v26  ;;  %v706_v36 = vadd.f32 %v1139_v9, %v705_v28  ;;  %v745_v41 = vmul.f32 %v457_v31, %v457_v31  ;;  %v758_v26 = vmul.f32 %v1341_v17, %v1341_v17 }
 0x108   : > { %v1143_v37 = vpop.f32.mrf.mxu0  ;;  %v1353_v38 = vpop.f32.mrf.mxu1 }
 0x109   : > { %v707_v39 = vadd.f32 %v706_v36, %v457_v31  ;;  %v775_v42 = vadd.f32 %v774_v35, %v744_v33  ;;  %v1031_v43 = vpack.c.bf16 %v1143_v37, %v1142_v22  ;;  %v1071_v46 = vpack.c.bf16 %v1353_v38, %v1347_v24 }
 0x10a   : > { %v460_v44 = vpop.f32.mrf.mxu0  ;;  %v524_v47 = vpop.f32.mrf.mxu1  ;;  %v748_v58 = vmul.f32 %v1143_v37, %v1143_v37  ;;  %v761_v35 = vmul.f32 %v1351_v32, %v1351_v32 }
 0x10b   : > { %v776_v48 = vadd.f32 %v775_v42, %v745_v41  ;;  %1079 = vst [vmem:[%s1303_s9 + $0x38] sm:$0xff] %v1031_v43   ;;  %v1026_v49 = vpack.c.bf16 %v460_v44, %v457_v31  ;;  %v708_v51 = vadd.f32 %v707_v39, %v460_v44  ;;  %v746_v52 = vmul.f32 %v460_v44, %v460_v44 }
 0x10c   : > { %1087 = vst [vmem:[%s1303_s9 + $0x78] sm:$0xff] %v1071_v46   ;;  %v1066_v53 = vpack.c.bf16 %v524_v47, %v1351_v32  ;;  %v762_v39 = vmul.f32 %v524_v47, %v524_v47  ;;  %v763_v41 = vmul.f32 %v1347_v24, %v1347_v24  ;;  %v764_v43 = vmul.f32 %v1353_v38, %v1353_v38 }
 0x10d   : > { %1078 = vst [vmem:[%s1303_s9 + $0x30] sm:$0xff] %v1026_v49   ;;  %v709_v55 = vadd.f32 %v1142_v22, %v708_v51  ;;  %v777_v56 = vadd.f32 %v776_v48, %v746_v52 }
 0x10e   : > { %1086 = vst [vmem:[%s1303_s9 + $0x70] sm:$0xff] %v1066_v53  }
 0x10f   : > { %v710_v59 = vadd.f32 %v1143_v37, %v709_v55  ;;  %v778_v60 = vadd.f32 %v777_v56, %v747_v54 }
 0x111   : > { %v779_v62 = vadd.f32 %v778_v60, %v748_v58  ;;  %v711_v63 = vadd.f32 %v710_v59, %v1296_v27 }
 0x113   : > { %v712_v1 = vadd.f32 %v711_v63, %v1309_v34  ;;  %v780_v3 = vadd.f32 %v779_v62, %v749_v61 }
 0x115   : > { %v713_v6 = vadd.f32 %v1294_v25, %v712_v1  ;;  %v781_v7 = vadd.f32 %v780_v3, %v750_v2  ;;  %v755_v25 = vmul.f32 %v1315_v40, %v1315_v40 }
 0x117   : > { %v782_v9 = vadd.f32 %v781_v7, %v751_v4  ;;  %v714_v11 = vadd.f32 %v1305_v29, %v713_v6  ;;  %v756_v29 = vmul.f32 %v1321_v50, %v1321_v50 }
 0x119   : > { %v715_v27 = vadd.f32 %v714_v11, %v1319_v45  ;;  %v783_v13 = vadd.f32 %v782_v9, %v752_v8 }
 0x11b   : > { %v784_v34 = vadd.f32 %v783_v13, %v753_v12  ;;  %v716_v14 = vadd.f32 %v715_v27, %v1325_v57 }
 0x11d   : > { %v717_v16 = vadd.f32 %v1315_v40, %v716_v14  ;;  %v785_v18 = vadd.f32 %v784_v34, %v754_v15  ;;  %v759_v40 = vmul.f32 %v1331_v0, %v1331_v0 }
 0x11f   : > { %v786_v19 = vadd.f32 %v785_v18, %v755_v25  ;;  %v718_v20 = vadd.f32 %v1321_v50, %v717_v16  ;;  %v760_v50 = vmul.f32 %v1337_v10, %v1337_v10 }
 0x121   : > { %v719_v45 = vadd.f32 %v718_v20, %v1335_v5  ;;  %v787_v22 = vadd.f32 %v786_v19, %v756_v29 }
 0x123   : > { %v788_v23 = vadd.f32 %v787_v22, %v757_v21  ;;  %v720_v57 = vadd.f32 %v719_v45, %v1341_v17 }
 0x125   : > { %v721_v28 = vadd.f32 %v1331_v0, %v720_v57  ;;  %v789_v30 = vadd.f32 %v788_v23, %v758_v26 }
 0x127   : > { %v790_v31 = vadd.f32 %v789_v30, %v759_v40  ;;  %v722_v33 = vadd.f32 %v1337_v10, %v721_v28 }
 0x129   : > { %v723_v5 = vadd.f32 %v722_v33, %v1351_v32  ;;  %v791_v36 = vadd.f32 %v790_v31, %v760_v50 }
 0x12b   : > { %v792_v37 = vadd.f32 %v791_v36, %v761_v35  ;;  %v724_v17 = vadd.f32 %v723_v5, %v524_v47 }
 0x12d   : > { %v725_v0 = vadd.f32 %v1347_v24, %v724_v17  ;;  %v793_v42 = vadd.f32 %v792_v37, %v762_v39 }
 0x12f   : > { %v726_v10 = vadd.f32 %v1353_v38, %v725_v0  ;;  %v794_v44 = vadd.f32 %v793_v42, %v763_v41 }
 0x131   : > { %v727_v46 = vrot.slane %v726_v10, 4  ;;  %v795_v48 = vadd.f32 %v794_v44, %v764_v43 }
 0x133   : > { %v728_v32 = vadd.f32 %v727_v46, %v726_v10  ;;  %v796_v49 = vrot.slane %v795_v48, 4 }
 0x135   : > { %v729_v51 = vrot.slane %v728_v32, 2  ;;  %v797_v52 = vadd.f32 %v796_v49, %v795_v48 }
 0x137   : > { %v730_v47 = vadd.f32 %v729_v51, %v728_v32  ;;  %v798_v53 = vrot.slane %v797_v52, 2 }
 0x139   : > { %v731_v54 = vrot.slane %v730_v47, 1  ;;  %v799_v55 = vadd.f32 %v798_v53, %v797_v52 }
 0x13b   : > { %v800_v56 = vrot.slane %v799_v55, 1  ;;  %v732_v24 = vadd.f32 %v731_v54, %v730_v47 }
 0x13d   : > { %v801_v38 = vadd.f32 %v800_v56, %v799_v55 }
 0x13f   : > { %v803_v58 = vsel %vm802_vm0, %v732_v24, %v801_v38 }
 0x140   : > { %804 = vst [vmem:[%s181_s15] sm:$0x3] %v803_v58 }
 0x141 PF: > { %s14_s12 = sadd.s32 1, %s1214_s12  }
 0x142   : > { %p11_p4 = scmp.ge.s32.totalorder %s14_s12, 4  }
 0x144   :  { %13 = sbr.rel (!%p11_p4) target bundleno = 1 (0x1), region = 70 }

// kernel: basic_block_forward.7
= control target key start
LH: loop header
LB: loop body
LE: loop exit
PB: predicated region body
PF: predicated region fallthrough
CT: control target
= control target key end

     0   :  { %s948_s21 = smov 0   ;;  %s1190_s0 = inlined_call_operand.vmem [shape: bf16[2,256,128], index: 0, kind: input, shape index: {}]   ;;  %s1191_s1 = inlined_call_operand.vmem [shape: bf16[2,256,128], index: 1, kind: input, shape index: {}]   ;;  %s1192_s2 = inlined_call_operand.vmem [shape: f32[1,128], index: 2, kind: input, shape index: {}]   ;;  %s1193_s3 = inlined_call_operand.vmem [shape: f32[1,128], index: 3, kind: input, shape index: {}]   ;;  %s1194_s4 = inlined_call_operand.vmem [shape: f32[1,128], index: 4, kind: input, shape index: {}]   ;;  %s1195_s5 = inlined_call_operand.vmem [shape: f32[1,128], index: 5, kind: input, shape index: {}]   ;;  %s1196_s6 = inlined_call_operand.vmem [shape: f32[2,256,128], index: 6, kind: output, shape index: {}]  }
   0x1 LB: > { %s719_s22 = sadd.s32 4294967295, %s911_s21   ;;  %p723_p0 = scmp.ge.s32.totalorder %s911_s21, 1  ;;  %s911_s21 = sphi %s948_s21, %s16_s21  }
   0x2   : > { %p222_p1 = scmp.lt.s32.totalorder %s911_s21, 3 }
   0x4   : > { %p223_p2 = pnand %p723_p0, %p222_p1 }
   0x5   : > { %p257_p3 = scmp.lt.s32.totalorder (!%p223_p2), %s719_s22, 1 }
   0x6   : > { %226 = sbr.rel (%p223_p2) target bundleno = 86 (0x56), region = 44 }
   0xb   : > { %s1198_s22 = smov (!%p257_p3, %s719_s22), 1  ;;  %v972_v0 = vld [vmem:[%s1192_s2] ss:$0 sm:$0xff] }
   0xc   : > { %s736_s23 = sshll.u32 %s1198_s22, 7  ;;  %v977_v1 = vld [vmem:[%s1194_s4] ss:$0 sm:$0xff]  ;;  %s738_s14 = sshll.u32 %s1198_s22, 8 }
   0xd   : > { %s962_s26 = scalar_lea.vmem %s1190_s0, %s736_s23  ;;  %s967_s29 = scalar_lea.vmem %s1191_s1, %s736_s23  ;;  %v986_v10 = vld [vmem:[%s1193_s3] ss:$0 sm:$0xff] }
   0xe   : > { %v740_v2 = vld [vmem:[%s962_s26] sm:$0xff]   ;;  %v867_v4 = vld [vmem:[%s962_s26 + $0x8] sm:$0xff]   ;;  %v868_v24 = vld [vmem:[%s962_s26 + $0x10] sm:$0xff]   ;;  %s1015_s17 = scalar_lea.vmem %s1196_s6, %s738_s14 }
   0xf   : > { %v804_v3 = vld [vmem:[%s967_s29] sm:$0xff]   ;;  %v741_v5 = vunpack.c.l.bf16 %v740_v2  ;;  %v742_v7 = vunpack.c.h.bf16 %v740_v2  ;;  %v882_v9 = vld [vmem:[%s967_s29 + $0x8] sm:$0xff]   ;;  %v745_v12 = vunpack.c.l.bf16 %v867_v4  ;;  %v746_v14 = vunpack.c.h.bf16 %v867_v4  ;;  %v883_v25 = vld [vmem:[%s967_s29 + $0x10] sm:$0xff]  }
  0x10   : > { %v805_v6 = vunpack.c.l.bf16 %v804_v3  ;;  %v806_v8 = vunpack.c.h.bf16 %v804_v3  ;;  %v991_v11 = vld [vmem:[%s1195_s5] ss:$0 sm:$0xff]  ;;  %v809_v13 = vunpack.c.l.bf16 %v882_v9  ;;  %v810_v15 = vunpack.c.h.bf16 %v882_v9  ;;  %v869_v42 = vld [vmem:[%s962_s26 + $0x18] sm:$0xff]  }
  0x11   : > { %v343_v16 = vmul.f32 %v741_v5, %v972_v0  ;;  %v344_v18 = vmul.f32 %v742_v7, %v972_v0  ;;  %v345_v20 = vmul.f32 %v745_v12, %v972_v0  ;;  %v346_v22 = vmul.f32 %v746_v14, %v972_v0  ;;  %v884_v43 = vld [vmem:[%s967_s29 + $0x18] sm:$0xff]   ;;  %v870_v52 = vld [vmem:[%s962_s26 + $0x20] sm:$0xff]   ;;  %v871_v14 = vld [vmem:[%s962_s26 + $0x28] sm:$0xff]  }
  0x12   : > { %v485_v17 = vmul.f32 %v805_v6, %v977_v1  ;;  %v486_v19 = vmul.f32 %v806_v8, %v977_v1  ;;  %v487_v21 = vmul.f32 %v809_v13, %v977_v1  ;;  %v488_v23 = vmul.f32 %v810_v15, %v977_v1  ;;  %v885_v57 = vld [vmem:[%s967_s29 + $0x20] sm:$0xff]   ;;  %v886_v15 = vld [vmem:[%s967_s29 + $0x28] sm:$0xff]  }
  0x13   : > { %v382_v26 = vadd.f32 %v986_v10, %v343_v16  ;;  %v383_v28 = vadd.f32 %v986_v10, %v344_v18  ;;  %v384_v30 = vadd.f32 %v986_v10, %v345_v20  ;;  %v385_v32 = vadd.f32 %v986_v10, %v346_v22 }
  0x14   : > { %v524_v27 = vadd.f32 %v991_v11, %v485_v17  ;;  %v525_v29 = vadd.f32 %v991_v11, %v486_v19  ;;  %v526_v31 = vadd.f32 %v991_v11, %v487_v21  ;;  %v527_v33 = vadd.f32 %v991_v11, %v488_v23 }
  0x15   : > { %v749_v36 = vunpack.c.l.bf16 %v868_v24  ;;  %v813_v37 = vunpack.c.l.bf16 %v883_v25  ;;  %v750_v40 = vunpack.c.h.bf16 %v868_v24  ;;  %v814_v41 = vunpack.c.h.bf16 %v883_v25 }
  0x16   : > { %v556_v34 = vadd.f32 %v524_v27, %v382_v26  ;;  %v557_v35 = vadd.f32 %v525_v29, %v383_v28  ;;  %v558_v38 = vadd.f32 %v526_v31, %v384_v30  ;;  %v559_v39 = vadd.f32 %v527_v33, %v385_v32  ;;  %v872_v32 = vld [vmem:[%s962_s26 + $0x30] sm:$0xff]  }
  0x17   : > { %v347_v46 = vmul.f32 %v749_v36, %v972_v0  ;;  %v489_v47 = vmul.f32 %v813_v37, %v977_v1  ;;  %v348_v50 = vmul.f32 %v750_v40, %v972_v0  ;;  %v490_v51 = vmul.f32 %v814_v41, %v977_v1  ;;  %v887_v37 = vld [vmem:[%s967_s29 + $0x30] sm:$0xff]  }
  0x18   : > { %v588_v44 = vmax.f32 %v556_v34, 0.0  ;;  %v589_v45 = vmax.f32 %v557_v35, 0.0  ;;  %v590_v48 = vmax.f32 %v558_v38, 0.0  ;;  %v591_v49 = vmax.f32 %v559_v39, 0.0 }
  0x19   : > { %v386_v53 = vadd.f32 %v986_v10, %v347_v46  ;;  %v528_v54 = vadd.f32 %v991_v11, %v489_v47  ;;  %v753_v55 = vunpack.c.l.bf16 %v869_v42  ;;  %v817_v56 = vunpack.c.l.bf16 %v884_v43  ;;  %v873_v46 = vld [vmem:[%s962_s26 + $0x38] sm:$0xff]  }
  0x1a   : > { %620 = vst [vmem:[%s1015_s17] sm:$0xff] %v588_v44  ;;  %621 = vst [vmem:[%s1015_s17 + $0x8] sm:$0xff] %v589_v45  ;;  %v387_v58 = vadd.f32 %v986_v10, %v348_v50  ;;  %v529_v59 = vadd.f32 %v991_v11, %v490_v51  ;;  %v754_v60 = vunpack.c.h.bf16 %v869_v42  ;;  %v818_v61 = vunpack.c.h.bf16 %v884_v43 }
  0x1b   : > { %622 = vst [vmem:[%s1015_s17 + $0x10] sm:$0xff] %v590_v48  ;;  %623 = vst [vmem:[%s1015_s17 + $0x18] sm:$0xff] %v591_v49  ;;  %v560_v62 = vadd.f32 %v528_v54, %v386_v53  ;;  %v349_v63 = vmul.f32 %v753_v55, %v972_v0  ;;  %v491_v2 = vmul.f32 %v817_v56, %v977_v1  ;;  %v757_v3 = vunpack.c.l.bf16 %v870_v52  ;;  %v888_v55 = vld [vmem:[%s967_s29 + $0x38] sm:$0xff]  }
  0x1c   : > { %v561_v4 = vadd.f32 %v529_v59, %v387_v58  ;;  %v350_v5 = vmul.f32 %v754_v60, %v972_v0  ;;  %v492_v6 = vmul.f32 %v818_v61, %v977_v1  ;;  %v821_v7 = vunpack.c.l.bf16 %v885_v57 }
  0x1d   : > { %v592_v8 = vmax.f32 %v560_v62, 0.0  ;;  %v388_v9 = vadd.f32 %v986_v10, %v349_v63  ;;  %v530_v12 = vadd.f32 %v991_v11, %v491_v2  ;;  %v351_v13 = vmul.f32 %v757_v3, %v972_v0 }
  0x1e   : > { %v593_v16 = vmax.f32 %v561_v4, 0.0  ;;  %v389_v17 = vadd.f32 %v986_v10, %v350_v5  ;;  %v531_v18 = vadd.f32 %v991_v11, %v492_v6  ;;  %v493_v19 = vmul.f32 %v821_v7, %v977_v1  ;;  %v874_v6 = vld [vmem:[%s962_s26 + $0x40] sm:$0xff]  }
  0x1f   : > { %624 = vst [vmem:[%s1015_s17 + $0x20] sm:$0xff] %v592_v8  ;;  %v562_v20 = vadd.f32 %v530_v12, %v388_v9  ;;  %v390_v21 = vadd.f32 %v986_v10, %v351_v13  ;;  %v758_v22 = vunpack.c.h.bf16 %v870_v52  ;;  %v822_v23 = vunpack.c.h.bf16 %v885_v57  ;;  %v889_v13 = vld [vmem:[%s967_s29 + $0x40] sm:$0xff]  }
  0x20   : > { %625 = vst [vmem:[%s1015_s17 + $0x28] sm:$0xff] %v593_v16  ;;  %v563_v24 = vadd.f32 %v531_v18, %v389_v17  ;;  %v532_v25 = vadd.f32 %v991_v11, %v493_v19  ;;  %v761_v26 = vunpack.c.l.bf16 %v871_v14  ;;  %v825_v27 = vunpack.c.l.bf16 %v886_v15 }
  0x21   : > { %v594_v28 = vmax.f32 %v562_v20, 0.0  ;;  %v352_v29 = vmul.f32 %v758_v22, %v972_v0  ;;  %v494_v30 = vmul.f32 %v822_v23, %v977_v1  ;;  %v762_v31 = vunpack.c.h.bf16 %v871_v14 }
  0x22   : > { %v595_v33 = vmax.f32 %v563_v24, 0.0  ;;  %v564_v34 = vadd.f32 %v532_v25, %v390_v21  ;;  %v353_v35 = vmul.f32 %v761_v26, %v972_v0  ;;  %v495_v36 = vmul.f32 %v825_v27, %v977_v1  ;;  %v875_v26 = vld [vmem:[%s962_s26 + $0x48] sm:$0xff]  }
  0x23   : > { %626 = vst [vmem:[%s1015_s17 + $0x30] sm:$0xff] %v594_v28  ;;  %v391_v38 = vadd.f32 %v986_v10, %v352_v29  ;;  %v533_v39 = vadd.f32 %v991_v11, %v494_v30  ;;  %v354_v40 = vmul.f32 %v762_v31, %v972_v0  ;;  %v826_v41 = vunpack.c.h.bf16 %v886_v15  ;;  %v890_v27 = vld [vmem:[%s967_s29 + $0x48] sm:$0xff]  }
  0x24   : > { %627 = vst [vmem:[%s1015_s17 + $0x38] sm:$0xff] %v595_v33  ;;  %v596_v42 = vmax.f32 %v564_v34, 0.0  ;;  %v392_v43 = vadd.f32 %v986_v10, %v353_v35  ;;  %v534_v44 = vadd.f32 %v991_v11, %v495_v36  ;;  %v765_v45 = vunpack.c.l.bf16 %v872_v32 }
  0x25   : > { %v565_v47 = vadd.f32 %v533_v39, %v391_v38  ;;  %v393_v48 = vadd.f32 %v986_v10, %v354_v40  ;;  %v496_v49 = vmul.f32 %v826_v41, %v977_v1  ;;  %v829_v50 = vunpack.c.l.bf16 %v887_v37  ;;  %v876_v40 = vld [vmem:[%s962_s26 + $0x50] sm:$0xff]  }
  0x26   : > { %628 = vst [vmem:[%s1015_s17 + $0x40] sm:$0xff] %v596_v42  ;;  %v566_v51 = vadd.f32 %v534_v44, %v392_v43  ;;  %v355_v52 = vmul.f32 %v765_v45, %v972_v0  ;;  %v766_v53 = vunpack.c.h.bf16 %v872_v32  ;;  %v830_v54 = vunpack.c.h.bf16 %v887_v37  ;;  %v891_v45 = vld [vmem:[%s967_s29 + $0x50] sm:$0xff]  }
  0x27   : > { %v597_v56 = vmax.f32 %v565_v47, 0.0  ;;  %v535_v57 = vadd.f32 %v991_v11, %v496_v49  ;;  %v497_v58 = vmul.f32 %v829_v50, %v977_v1  ;;  %v769_v59 = vunpack.c.l.bf16 %v873_v46 }
  0x28   : > { %v598_v60 = vmax.f32 %v566_v51, 0.0  ;;  %v394_v61 = vadd.f32 %v986_v10, %v355_v52  ;;  %v356_v62 = vmul.f32 %v766_v53, %v972_v0  ;;  %v498_v63 = vmul.f32 %v830_v54, %v977_v1 }
  0x29   : > { %629 = vst [vmem:[%s1015_s17 + $0x48] sm:$0xff] %v597_v56  ;;  %v567_v2 = vadd.f32 %v535_v57, %v393_v48  ;;  %v536_v3 = vadd.f32 %v991_v11, %v497_v58  ;;  %v357_v4 = vmul.f32 %v769_v59, %v972_v0  ;;  %v833_v5 = vunpack.c.l.bf16 %v888_v55 }
  0x2a   : > { %630 = vst [vmem:[%s1015_s17 + $0x50] sm:$0xff] %v598_v60  ;;  %v395_v7 = vadd.f32 %v986_v10, %v356_v62  ;;  %v537_v8 = vadd.f32 %v991_v11, %v498_v63  ;;  %v770_v9 = vunpack.c.h.bf16 %v873_v46  ;;  %v834_v12 = vunpack.c.h.bf16 %v888_v55  ;;  %v877_v62 = vld [vmem:[%s962_s26 + $0x58] sm:$0xff]  }
  0x2b   : > { %v599_v14 = vmax.f32 %v567_v2, 0.0  ;;  %v568_v15 = vadd.f32 %v536_v3, %v394_v61  ;;  %v396_v16 = vadd.f32 %v986_v10, %v357_v4  ;;  %v499_v17 = vmul.f32 %v833_v5, %v977_v1  ;;  %v892_v5 = vld [vmem:[%s967_s29 + $0x58] sm:$0xff]  }
  0x2c   : > { %v569_v18 = vadd.f32 %v537_v8, %v395_v7  ;;  %v358_v19 = vmul.f32 %v770_v9, %v972_v0  ;;  %v500_v20 = vmul.f32 %v834_v12, %v977_v1  ;;  %v773_v21 = vunpack.c.l.bf16 %v874_v6 }
  0x2d   : > { %631 = vst [vmem:[%s1015_s17 + $0x58] sm:$0xff] %v599_v14  ;;  %v600_v22 = vmax.f32 %v568_v15, 0.0  ;;  %v538_v23 = vadd.f32 %v991_v11, %v499_v17  ;;  %v837_v24 = vunpack.c.l.bf16 %v889_v13  ;;  %v774_v25 = vunpack.c.h.bf16 %v874_v6 }
  0x2e   : > { %v601_v28 = vmax.f32 %v569_v18, 0.0  ;;  %v397_v29 = vadd.f32 %v986_v10, %v358_v19  ;;  %v539_v30 = vadd.f32 %v991_v11, %v500_v20  ;;  %v359_v31 = vmul.f32 %v773_v21, %v972_v0  ;;  %v878_v20 = vld [vmem:[%s962_s26 + $0x60] sm:$0xff]  }
  0x2f   : > { %632 = vst [vmem:[%s1015_s17 + $0x60] sm:$0xff] %v600_v22  ;;  %v570_v32 = vadd.f32 %v538_v23, %v396_v16  ;;  %v501_v33 = vmul.f32 %v837_v24, %v977_v1  ;;  %v360_v34 = vmul.f32 %v774_v25, %v972_v0  ;;  %v838_v35 = vunpack.c.h.bf16 %v889_v13  ;;  %v893_v25 = vld [vmem:[%s967_s29 + $0x60] sm:$0xff]  }
  0x30   : > { %633 = vst [vmem:[%s1015_s17 + $0x68] sm:$0xff] %v601_v28  ;;  %v571_v36 = vadd.f32 %v539_v30, %v397_v29  ;;  %v398_v37 = vadd.f32 %v986_v10, %v359_v31  ;;  %v777_v38 = vunpack.c.l.bf16 %v875_v26  ;;  %v841_v39 = vunpack.c.l.bf16 %v890_v27 }
  0x31   : > { %v602_v41 = vmax.f32 %v570_v32, 0.0  ;;  %v540_v42 = vadd.f32 %v991_v11, %v501_v33  ;;  %v399_v43 = vadd.f32 %v986_v10, %v360_v34  ;;  %v502_v44 = vmul.f32 %v838_v35, %v977_v1  ;;  %v879_v34 = vld [vmem:[%s962_s26 + $0x68] sm:$0xff]  }
  0x32   : > { %v603_v46 = vmax.f32 %v571_v36, 0.0  ;;  %v361_v47 = vmul.f32 %v777_v38, %v972_v0  ;;  %v503_v48 = vmul.f32 %v841_v39, %v977_v1  ;;  %v778_v49 = vunpack.c.h.bf16 %v875_v26 }
  0x33   : > { %634 = vst [vmem:[%s1015_s17 + $0x70] sm:$0xff] %v602_v41  ;;  %v572_v50 = vadd.f32 %v540_v42, %v398_v37  ;;  %v541_v51 = vadd.f32 %v991_v11, %v502_v44  ;;  %v842_v52 = vunpack.c.h.bf16 %v890_v27  ;;  %v781_v53 = vunpack.c.l.bf16 %v876_v40 }
  0x34   : > { %635 = vst [vmem:[%s1015_s17 + $0x78] sm:$0xff] %v603_v46  ;;  %v400_v54 = vadd.f32 %v986_v10, %v361_v47  ;;  %v542_v55 = vadd.f32 %v991_v11, %v503_v48  ;;  %v362_v56 = vmul.f32 %v778_v49, %v972_v0  ;;  %v845_v57 = vunpack.c.l.bf16 %v891_v45 }
  0x35   : > { %v604_v58 = vmax.f32 %v572_v50, 0.0  ;;  %v573_v59 = vadd.f32 %v541_v51, %v399_v43  ;;  %v504_v60 = vmul.f32 %v842_v52, %v977_v1  ;;  %v363_v61 = vmul.f32 %v781_v53, %v972_v0  ;;  %v894_v43 = vld [vmem:[%s967_s29 + $0x68] sm:$0xff]  }
  0x36   : > { %v574_v63 = vadd.f32 %v542_v55, %v400_v54  ;;  %v401_v2 = vadd.f32 %v986_v10, %v362_v56  ;;  %v505_v3 = vmul.f32 %v845_v57, %v977_v1  ;;  %v782_v4 = vunpack.c.h.bf16 %v876_v40  ;;  %v880_v56 = vld [vmem:[%s962_s26 + $0x70] sm:$0xff]  }
  0x37   : > { %636 = vst [vmem:[%s1015_s17 + $0x80] sm:$0xff] %v604_v58  ;;  %v605_v6 = vmax.f32 %v573_v59, 0.0  ;;  %v543_v7 = vadd.f32 %v991_v11, %v504_v60  ;;  %v402_v8 = vadd.f32 %v986_v10, %v363_v61  ;;  %v846_v9 = vunpack.c.h.bf16 %v891_v45  ;;  %v895_v57 = vld [vmem:[%s967_s29 + $0x70] sm:$0xff]  }
  0x38   : > { %v606_v12 = vmax.f32 %v574_v63, 0.0  ;;  %v544_v13 = vadd.f32 %v991_v11, %v505_v3  ;;  %v364_v14 = vmul.f32 %v782_v4, %v972_v0  ;;  %v785_v15 = vunpack.c.l.bf16 %v877_v62 }
  0x39   : > { %637 = vst [vmem:[%s1015_s17 + $0x88] sm:$0xff] %v605_v6  ;;  %v575_v16 = vadd.f32 %v543_v7, %v401_v2  ;;  %v506_v17 = vmul.f32 %v846_v9, %v977_v1  ;;  %v849_v18 = vunpack.c.l.bf16 %v892_v5  ;;  %v786_v19 = vunpack.c.h.bf16 %v877_v62 }
  0x3a   : > { %638 = vst [vmem:[%s1015_s17 + $0x90] sm:$0xff] %v606_v12  ;;  %v576_v21 = vadd.f32 %v544_v13, %v402_v8  ;;  %v403_v22 = vadd.f32 %v986_v10, %v364_v14  ;;  %v365_v23 = vmul.f32 %v785_v15, %v972_v0  ;;  %v850_v24 = vunpack.c.h.bf16 %v892_v5  ;;  %v881_v14 = vld [vmem:[%s962_s26 + $0x78] sm:$0xff]  }
  0x3b   : > { %v607_v26 = vmax.f32 %v575_v16, 0.0  ;;  %v545_v27 = vadd.f32 %v991_v11, %v506_v17  ;;  %v507_v28 = vmul.f32 %v849_v18, %v977_v1  ;;  %v366_v29 = vmul.f32 %v786_v19, %v972_v0  ;;  %v896_v15 = vld [vmem:[%s967_s29 + $0x78] sm:$0xff]  }
  0x3c   : > { %v608_v30 = vmax.f32 %v576_v21, 0.0  ;;  %v404_v31 = vadd.f32 %v986_v10, %v365_v23  ;;  %v508_v32 = vmul.f32 %v850_v24, %v977_v1  ;;  %v789_v33 = vunpack.c.l.bf16 %v878_v20 }
  0x3d   : > { %639 = vst [vmem:[%s1015_s17 + $0x98] sm:$0xff] %v607_v26  ;;  %v577_v35 = vadd.f32 %v545_v27, %v403_v22  ;;  %v546_v36 = vadd.f32 %v991_v11, %v507_v28  ;;  %v405_v37 = vadd.f32 %v986_v10, %v366_v29  ;;  %v853_v38 = vunpack.c.l.bf16 %v893_v25 }
  0x3e   : > { %640 = vst [vmem:[%s1015_s17 + $0xa0] sm:$0xff] %v608_v30  ;;  %v547_v39 = vadd.f32 %v991_v11, %v508_v32  ;;  %v367_v40 = vmul.f32 %v789_v33, %v972_v0  ;;  %v790_v41 = vunpack.c.h.bf16 %v878_v20  ;;  %v854_v42 = vunpack.c.h.bf16 %v893_v25 }
  0x3f   : > { %v609_v44 = vmax.f32 %v577_v35, 0.0  ;;  %v578_v45 = vadd.f32 %v546_v36, %v404_v31  ;;  %v509_v46 = vmul.f32 %v853_v38, %v977_v1  ;;  %v793_v47 = vunpack.c.l.bf16 %v879_v34 }
  0x40   : > { %v579_v48 = vadd.f32 %v547_v39, %v405_v37  ;;  %v406_v49 = vadd.f32 %v986_v10, %v367_v40  ;;  %v368_v50 = vmul.f32 %v790_v41, %v972_v0  ;;  %v510_v51 = vmul.f32 %v854_v42, %v977_v1 }
  0x41   : > { %641 = vst [vmem:[%s1015_s17 + $0xa8] sm:$0xff] %v609_v44  ;;  %v610_v52 = vmax.f32 %v578_v45, 0.0  ;;  %v548_v53 = vadd.f32 %v991_v11, %v509_v46  ;;  %v369_v54 = vmul.f32 %v793_v47, %v972_v0  ;;  %v857_v55 = vunpack.c.l.bf16 %v894_v43 }
  0x42   : > { %v611_v58 = vmax.f32 %v579_v48, 0.0  ;;  %v407_v59 = vadd.f32 %v986_v10, %v368_v50  ;;  %v549_v60 = vadd.f32 %v991_v11, %v510_v51  ;;  %v794_v61 = vunpack.c.h.bf16 %v879_v34 }
  0x43   : > { %642 = vst [vmem:[%s1015_s17 + $0xb0] sm:$0xff] %v610_v52  ;;  %v580_v62 = vadd.f32 %v548_v53, %v406_v49  ;;  %v408_v63 = vadd.f32 %v986_v10, %v369_v54  ;;  %v511_v2 = vmul.f32 %v857_v55, %v977_v1  ;;  %v858_v3 = vunpack.c.h.bf16 %v894_v43 }
  0x44   : > { %643 = vst [vmem:[%s1015_s17 + $0xb8] sm:$0xff] %v611_v58  ;;  %v581_v4 = vadd.f32 %v549_v60, %v407_v59  ;;  %v370_v5 = vmul.f32 %v794_v61, %v972_v0  ;;  %v797_v6 = vunpack.c.l.bf16 %v880_v56  ;;  %v861_v7 = vunpack.c.l.bf16 %v895_v57 }
  0x45   : > { %v612_v8 = vmax.f32 %v580_v62, 0.0  ;;  %v550_v9 = vadd.f32 %v991_v11, %v511_v2  ;;  %v512_v12 = vmul.f32 %v858_v3, %v977_v1  ;;  %v798_v13 = vunpack.c.h.bf16 %v880_v56 }
  0x46   : > { %v613_v16 = vmax.f32 %v581_v4, 0.0  ;;  %v409_v17 = vadd.f32 %v986_v10, %v370_v5  ;;  %v371_v18 = vmul.f32 %v797_v6, %v972_v0  ;;  %v513_v19 = vmul.f32 %v861_v7, %v977_v1 }
  0x47   : > { %644 = vst [vmem:[%s1015_s17 + $0xc0] sm:$0xff] %v612_v8  ;;  %v582_v20 = vadd.f32 %v550_v9, %v408_v63  ;;  %v551_v21 = vadd.f32 %v991_v11, %v512_v12  ;;  %v372_v22 = vmul.f32 %v798_v13, %v972_v0  ;;  %v862_v23 = vunpack.c.h.bf16 %v895_v57 }
  0x48   : > { %645 = vst [vmem:[%s1015_s17 + $0xc8] sm:$0xff] %v613_v16  ;;  %v410_v24 = vadd.f32 %v986_v10, %v371_v18  ;;  %v552_v25 = vadd.f32 %v991_v11, %v513_v19  ;;  %v801_v26 = vunpack.c.l.bf16 %v881_v14  ;;  %v865_v27 = vunpack.c.l.bf16 %v896_v15 }
  0x49   : > { %v614_v28 = vmax.f32 %v582_v20, 0.0  ;;  %v583_v29 = vadd.f32 %v551_v21, %v409_v17  ;;  %v411_v30 = vadd.f32 %v986_v10, %v372_v22  ;;  %v514_v31 = vmul.f32 %v862_v23, %v977_v1 }
  0x4a   : > { %v584_v32 = vadd.f32 %v552_v25, %v410_v24  ;;  %v373_v33 = vmul.f32 %v801_v26, %v972_v0  ;;  %v515_v34 = vmul.f32 %v865_v27, %v977_v1  ;;  %v802_v35 = vunpack.c.h.bf16 %v881_v14 }
  0x4b   : > { %646 = vst [vmem:[%s1015_s17 + $0xd0] sm:$0xff] %v614_v28  ;;  %v615_v36 = vmax.f32 %v583_v29, 0.0  ;;  %v553_v37 = vadd.f32 %v991_v11, %v514_v31  ;;  %v866_v38 = vunpack.c.h.bf16 %v896_v15 }
  0x4c   : > { %v616_v39 = vmax.f32 %v584_v32, 0.0  ;;  %v412_v40 = vadd.f32 %v986_v10, %v373_v33  ;;  %v554_v41 = vadd.f32 %v991_v11, %v515_v34  ;;  %v374_v42 = vmul.f32 %v802_v35, %v972_v0 }
  0x4d   : > { %647 = vst [vmem:[%s1015_s17 + $0xd8] sm:$0xff] %v615_v36  ;;  %v585_v43 = vadd.f32 %v553_v37, %v411_v30  ;;  %v516_v44 = vmul.f32 %v866_v38, %v977_v1 }
  0x4e   : > { %648 = vst [vmem:[%s1015_s17 + $0xe0] sm:$0xff] %v616_v39  ;;  %v586_v45 = vadd.f32 %v554_v41, %v412_v40  ;;  %v413_v46 = vadd.f32 %v986_v10, %v374_v42 }
  0x4f   : > { %v617_v47 = vmax.f32 %v585_v43, 0.0  ;;  %v555_v48 = vadd.f32 %v991_v11, %v516_v44 }
  0x50   : > { %v618_v49 = vmax.f32 %v586_v45, 0.0 }
  0x51   : > { %649 = vst [vmem:[%s1015_s17 + $0xe8] sm:$0xff] %v617_v47  ;;  %v587_v50 = vadd.f32 %v555_v48, %v413_v46 }
  0x52   : > { %650 = vst [vmem:[%s1015_s17 + $0xf0] sm:$0xff] %v618_v49 }
  0x53   : > { %v619_v51 = vmax.f32 %v587_v50, 0.0 }
  0x55   : > { %651 = vst [vmem:[%s1015_s17 + $0xf8] sm:$0xff] %v619_v51 }
  0x56 PF: > { %s16_s21 = sadd.s32 1, %s911_s21  }
  0x57   : > { %p13_p4 = scmp.ge.s32.totalorder %s16_s21, 4  }
  0x59   :  { %15 = sbr.rel (!%p13_p4) target bundleno = 1 (0x1), region = 77 }

// kernel: basic_block_forward.4
= control target key start
LH: loop header
LB: loop body
LE: loop exit
PB: predicated region body
PF: predicated region fallthrough
CT: control target
= control target key end

     0   :  { %s4642_s12 = smov 0   ;;  %s5598_s0 = inlined_call_operand.vmem [shape: bf16[2,256,128], index: 0, kind: input, shape index: {}]   ;;  %s5599_s1 = inlined_call_operand.vmem [shape: bf16[9,128,128], index: 1, kind: input, shape index: {}]   ;;  %s5600_s2 = inlined_call_operand.vmem [shape: bf16[2,256,128], index: 2, kind: output, shape index: {0}]   ;;  %s5601_s3 = inlined_call_operand.vmem [shape: f32[2,2,128], index: 3, kind: output, shape index: {1}]  }
   0x1 LB: > { %s3397_s13 = sadd.s32 4294967295, %s4618_s12   ;;  %p3401_p0 = scmp.ge.s32.totalorder %s4618_s12, 1  ;;  %s4618_s12 = sphi %s4642_s12, %s14_s12  }
   0x2   : > { %p140_p1 = scmp.lt.s32.totalorder %s4618_s12, 3 }
   0x4   : > { %p141_p2 = pnand %p3401_p0, %p140_p1 }
   0x6   : > { %144 = sbr.rel (%p141_p2) target bundleno = 550 (0x226), region = 28 }
   0xb   : > { %v4522_v0 = vld [vmem:[%s5599_s1 + $0x78] sm:$0xff]   ;;  %v4523_v1 = vld [vmem:[%s5599_s1 + $0x70] sm:$0xff]   ;;  %v4620_v2 = vmov 0.0   ;;  %p168_p3 = scmp.lt.s32.totalorder %s3397_s13, 1  ;;  %v4524_v3 = vld [vmem:[%s5599_s1 + $0x68] sm:$0xff]   ;;  %v4621_v4 = vmov 0.0|0.0  }
   0xc   : > { %248 = vst [vmem:[#allocation2 + $0x8] sm:$0xff] %v4620_v2  ;;  %249 = vst [vmem:[#allocation2 + $0x10] sm:$0xff] %v4620_v2  ;;  %4065 = vmatprep.subr.bf16.mxu0 %v4522_v0  ;;  %4497 = vmatprep.subr.bf16.mxu1 %v4522_v0  ;;  %v4525_v5 = vld [vmem:[%s5599_s1 + $0x60] sm:$0xff]   ;;  %v4526_v16 = vld [vmem:[%s5599_s1 + $0x58] sm:$0xff]   ;;  %vm3308_vm0 = vcmask 1040384  }
   0xd   : > { %247 = vst [vmem:[#allocation2] sm:$0xff] %v4620_v2  ;;  %250 = vst [vmem:[#allocation2 + $0x18] sm:$0xff] %v4620_v2  ;;  %4066 = vmatpush3.bf16.msra.mxu0 %v4522_v0  ;;  %4505 = vmatpush3.bf16.msra.mxu1 %v4522_v0  ;;  %s5661_s13 = smov (!%p168_p3, %s3397_s13), 1  ;;  %v4527_v24 = vld [vmem:[%s5599_s1 + $0x50] sm:$0xff]   ;;  %v4528_v30 = vld [vmem:[%s5599_s1 + $0x48] sm:$0xff]  }
   0xe   : > { %251 = vst [vmem:[#allocation2 + $0x20] sm:$0xff] %v4620_v2  ;;  %254 = vst [vmem:[#allocation2 + $0x38] sm:$0xff] %v4620_v2  ;;  %4067 = vmatprep.subr.bf16.mxu0 %v4523_v1  ;;  %4498 = vmatprep.subr.bf16.mxu1 %v4523_v1  ;;  %s3641_s20 = sshll.u32 %s5661_s13, 7  ;;  %v4529_v43 = vld [vmem:[%s5599_s1 + $0x40] sm:$0xff]   ;;  %v4533_v44 = vld [vmem:[%s5599_s1 + $0x38] sm:$0xff]  }
   0xf   : > { %255 = vst [vmem:[#allocation2 + $0x40] sm:$0xff] %v4620_v2  ;;  %258 = vst [vmem:[#allocation2 + $0x58] sm:$0xff] %v4620_v2  ;;  %4081 = vmatprep.mubr.bf16.mxu0 %v4621_v4  ;;  %s4671_s23 = scalar_lea.vmem %s5598_s0, %s3641_s20  ;;  %v4534_v46 = vld [vmem:[%s5599_s1 + $0xb8] sm:$0xff]   ;;  %v4535_v58 = vld [vmem:[%s5599_s1 + $0x30] sm:$0xff]   ;;  %s5509_s24 = scalar_lea.vmem %s5600_s2, %s3641_s20 }
  0x10   : > { %259 = vst [vmem:[#allocation2 + $0x60] sm:$0xff] %v4620_v2  ;;  %262 = vst [vmem:[#allocation2 + $0x78] sm:$0xff] %v4620_v2  ;;  %v3825_v6 = vld [vmem:[%s4671_s23 + $0x38] sm:$0xff]   ;;  %v3676_v8 = vld [vmem:[%s4671_s23] sm:$0xff]   ;;  %s3406_s20 = sshll.u32 %s5661_s13, 1 }
  0x11   : > { %263 = vst [vmem:[#allocation2 + $0x80] sm:$0xff] %v4620_v2  ;;  %266 = vst [vmem:[#allocation2 + $0x98] sm:$0xff] %v4620_v2  ;;  %4068 = vmatpush3.bf16.msra.mxu0 %v4523_v1  ;;  %4506 = vmatpush3.bf16.msra.mxu1 %v4523_v1  ;;  %v4530_v7 = vld [vmem:[%s4671_s23 + $0x38] sm:$0xff]  ;;  %v3705_v9 = vunpack.c.l.bf16 %v3825_v6  ;;  %v3706_v10 = vunpack.c.h.bf16 %v3825_v6  ;;  %v3677_v11 = vunpack.c.l.bf16 %v3676_v8  ;;  %v3678_v12 = vunpack.c.h.bf16 %v3676_v8  ;;  %v3826_v13 = vld [vmem:[%s4671_s23 + $0x40] sm:$0xff]   ;;  %s181_s27 = scalar_lea.vmem %s5601_s3, %s3406_s20 }
  0x12   : > { %267 = vst [vmem:[#allocation2 + $0xa0] sm:$0xff] %v4620_v2  ;;  %270 = vst [vmem:[#allocation2 + $0xb8] sm:$0xff] %v4620_v2  ;;  %4069 = vmatprep.subr.bf16.mxu0 %v4524_v3  ;;  %4499 = vmatprep.subr.bf16.mxu1 %v4524_v3  ;;  %v3709_v14 = vunpack.c.l.bf16 %v3826_v13  ;;  %v3710_v15 = vunpack.c.h.bf16 %v3826_v13  ;;  %v3819_v17 = vld [vmem:[%s4671_s23 + $0x8] sm:$0xff]   ;;  %v3820_v23 = vld [vmem:[%s4671_s23 + $0x10] sm:$0xff]  }
  0x13   : > { %271 = vst [vmem:[#allocation2 + $0xc0] sm:$0xff] %v4620_v2  ;;  %274 = vst [vmem:[#allocation2 + $0xd8] sm:$0xff] %v4620_v2  ;;  %4097 = vmatprep.mubr.bf16.mxu1 %v4530_v7  ;;  %v3827_v18 = vld [vmem:[%s4671_s23 + $0x48] sm:$0xff]   ;;  %v3681_v19 = vunpack.c.l.bf16 %v3819_v17  ;;  %v3682_v20 = vunpack.c.h.bf16 %v3819_v17  ;;  %v3685_v25 = vunpack.c.l.bf16 %v3820_v23  ;;  %v3686_v26 = vunpack.c.h.bf16 %v3820_v23  ;;  %v3828_v27 = vld [vmem:[%s4671_s23 + $0x50] sm:$0xff]  }
  0x14   : > { %275 = vst [vmem:[#allocation2 + $0xe0] sm:$0xff] %v4620_v2  ;;  %278 = vst [vmem:[#allocation2 + $0xf8] sm:$0xff] %v4620_v2  ;;  %v3713_v21 = vunpack.c.l.bf16 %v3827_v18  ;;  %v3714_v22 = vunpack.c.h.bf16 %v3827_v18  ;;  %v3717_v28 = vunpack.c.l.bf16 %v3828_v27  ;;  %v3718_v29 = vunpack.c.h.bf16 %v3828_v27  ;;  %v3821_v31 = vld [vmem:[%s4671_s23 + $0x18] sm:$0xff]   ;;  %v3822_v37 = vld [vmem:[%s4671_s23 + $0x20] sm:$0xff]  }
  0x15   : > { %279 = vst [vmem:[#allocation2 + $0x100] sm:$0xff] %v4620_v2  ;;  %282 = vst [vmem:[#allocation2 + $0x118] sm:$0xff] %v4620_v2  ;;  %4070 = vmatpush3.bf16.msra.mxu0 %v4524_v3  ;;  %4507 = vmatpush3.bf16.msra.mxu1 %v4524_v3  ;;  %v3689_v32 = vunpack.c.l.bf16 %v3821_v31  ;;  %v3690_v33 = vunpack.c.h.bf16 %v3821_v31  ;;  %v3829_v34 = vld [vmem:[%s4671_s23 + $0x58] sm:$0xff]   ;;  %v3830_v38 = vld [vmem:[%s4671_s23 + $0x60] sm:$0xff]   ;;  %v3693_v39 = vunpack.c.l.bf16 %v3822_v37  ;;  %v3694_v40 = vunpack.c.h.bf16 %v3822_v37 }
  0x16   : > { %283 = vst [vmem:[#allocation2 + $0x120] sm:$0xff] %v4620_v2  ;;  %286 = vst [vmem:[#allocation2 + $0x138] sm:$0xff] %v4620_v2  ;;  %4071 = vmatprep.subr.bf16.mxu0 %v4525_v5  ;;  %4500 = vmatprep.subr.bf16.mxu1 %v4525_v5  ;;  %v3721_v35 = vunpack.c.l.bf16 %v3829_v34  ;;  %v3722_v36 = vunpack.c.h.bf16 %v3829_v34  ;;  %v3725_v41 = vunpack.c.l.bf16 %v3830_v38  ;;  %v3726_v42 = vunpack.c.h.bf16 %v3830_v38  ;;  %v3823_v45 = vld [vmem:[%s4671_s23 + $0x28] sm:$0xff]   ;;  %v3824_v50 = vld [vmem:[%s4671_s23 + $0x30] sm:$0xff]  }
  0x17   : > { %287 = vst [vmem:[#allocation2 + $0x140] sm:$0xff] %v4620_v2  ;;  %290 = vst [vmem:[#allocation2 + $0x158] sm:$0xff] %v4620_v2  ;;  %v3697_v47 = vunpack.c.l.bf16 %v3823_v45  ;;  %v3698_v48 = vunpack.c.h.bf16 %v3823_v45  ;;  %v3831_v49 = vld [vmem:[%s4671_s23 + $0x68] sm:$0xff]   ;;  %v4710_v51 = vld [vmem:[%s4671_s23] sm:$0xff]  ;;  %v3701_v55 = vunpack.c.l.bf16 %v3824_v50  ;;  %v3702_v56 = vunpack.c.h.bf16 %v3824_v50 }
  0x18   : > { %291 = vst [vmem:[#allocation2 + $0x160] sm:$0xff] %v4620_v2  ;;  %294 = vst [vmem:[#allocation2 + $0x178] sm:$0xff] %v4620_v2  ;;  %v4713_v52 = vld [vmem:[%s4671_s23 + $0x40] sm:$0xff]  ;;  %v3729_v53 = vunpack.c.l.bf16 %v3831_v49  ;;  %v3730_v54 = vunpack.c.h.bf16 %v3831_v49  ;;  %v3832_v57 = vld [vmem:[%s4671_s23 + $0x70] sm:$0xff]  }
  0x19   : > { %295 = vst [vmem:[#allocation2 + $0x180] sm:$0xff] %v4620_v2  ;;  %298 = vst [vmem:[#allocation2 + $0x198] sm:$0xff] %v4620_v2  ;;  %4072 = vmatpush3.bf16.msra.mxu0 %v4525_v5  ;;  %4508 = vmatpush3.bf16.msra.mxu1 %v4525_v5  ;;  %v3733_v59 = vunpack.c.l.bf16 %v3832_v57  ;;  %v3734_v60 = vunpack.c.h.bf16 %v3832_v57  ;;  %v4536_v61 = vld [vmem:[%s5599_s1 + $0xb0] sm:$0xff]   ;;  %v4723_v62 = vld [vmem:[%s4671_s23 + $0x8] sm:$0xff] }
  0x1a   : > { %299 = vst [vmem:[#allocation2 + $0x1a0] sm:$0xff] %v4620_v2  ;;  %302 = vst [vmem:[#allocation2 + $0x1b8] sm:$0xff] %v4620_v2  ;;  %4073 = vmatprep.subr.bf16.mxu0 %v4526_v16  ;;  %4501 = vmatprep.subr.bf16.mxu1 %v4526_v16  ;;  %v4726_v63 = vld [vmem:[%s4671_s23 + $0x48] sm:$0xff]  ;;  %v4742_v3 = vld [vmem:[%s4671_s23 + $0x50] sm:$0xff] }
  0x1b   : > { %303 = vst [vmem:[#allocation2 + $0x1c0] sm:$0xff] %v4620_v2  ;;  %306 = vst [vmem:[#allocation2 + $0x1d8] sm:$0xff] %v4620_v2  ;;  %v4541_v0 = vld [vmem:[%s5599_s1 + $0x28] sm:$0xff]   ;;  %v4543_v4 = vld [vmem:[%s5599_s1 + $0x20] sm:$0xff]  }
  0x1c   : > { %307 = vst [vmem:[#allocation2 + $0x1e0] sm:$0xff] %v4620_v2  ;;  %310 = vst [vmem:[#allocation2 + $0x1f8] sm:$0xff] %v4620_v2  ;;  %v4542_v1 = vld [vmem:[%s5599_s1 + $0xa8] sm:$0xff]   ;;  %v4544_v5 = vld [vmem:[%s5599_s1 + $0xa0] sm:$0xff]  }
  0x1d   : > { %311 = vst [vmem:[#allocation2 + $0x200] sm:$0xff] %v4620_v2  ;;  %314 = vst [vmem:[#allocation2 + $0x218] sm:$0xff] %v4620_v2  ;;  %4074 = vmatpush3.bf16.msra.mxu0 %v4526_v16  ;;  %4509 = vmatpush3.bf16.msra.mxu1 %v4526_v16  ;;  %v4751_v6 = vld [vmem:[%s4671_s23 + $0x18] sm:$0xff]  ;;  %v4552_v13 = vld [vmem:[%s5599_s1 + $0x90] sm:$0xff]  }
  0x1e   : > { %315 = vst [vmem:[#allocation2 + $0x220] sm:$0xff] %v4620_v2  ;;  %316 = vst [vmem:[#allocation2 + $0x228] sm:$0xff] %v4620_v2  ;;  %4075 = vmatprep.subr.bf16.mxu0 %v4527_v24  ;;  %4502 = vmatprep.subr.bf16.mxu1 %v4527_v24  ;;  %v4754_v7 = vld [vmem:[%s4671_s23 + $0x58] sm:$0xff]  ;;  %v4557_v16 = vld [vmem:[%s5599_s1 + $0x8] sm:$0xff]  }
  0x1f   : > { %317 = vst [vmem:[#allocation2 + $0x230] sm:$0xff] %v4620_v2  ;;  %318 = vst [vmem:[#allocation2 + $0x238] sm:$0xff] %v4620_v2  ;;  %v4739_v2 = vld [vmem:[%s4671_s23 + $0x10] sm:$0xff]  ;;  %v4549_v8 = vld [vmem:[%s5599_s1 + $0x18] sm:$0xff]  }
  0x20   : > { %334 = vst [vmem:[#allocation2 + $0x108] sm:$0xff] %v3705_v9  ;;  %335 = vst [vmem:[#allocation2 + $0x110] sm:$0xff] %v3706_v10  ;;  %v4550_v9 = vld [vmem:[%s5599_s1 + $0x98] sm:$0xff]   ;;  %v4767_v10 = vld [vmem:[%s4671_s23 + $0x20] sm:$0xff] }
  0x21   : > { %320 = vst [vmem:[#allocation2 + $0x28] sm:$0xff] %v3677_v11  ;;  %321 = vst [vmem:[#allocation2 + $0x30] sm:$0xff] %v3678_v12  ;;  %4076 = vmatpush3.bf16.msra.mxu0 %v4527_v24  ;;  %4510 = vmatpush3.bf16.msra.mxu1 %v4527_v24  ;;  %v4770_v11 = vld [vmem:[%s4671_s23 + $0x60] sm:$0xff]  ;;  %v4551_v12 = vld [vmem:[%s5599_s1 + $0x10] sm:$0xff]  }
  0x22   : > { %336 = vst [vmem:[#allocation2 + $0x128] sm:$0xff] %v3709_v14  ;;  %337 = vst [vmem:[#allocation2 + $0x130] sm:$0xff] %v3710_v15  ;;  %4077 = vmatprep.subr.bf16.mxu0 %v4528_v30  ;;  %4503 = vmatprep.subr.bf16.mxu1 %v4528_v30  ;;  %v4779_v14 = vld [vmem:[%s4671_s23 + $0x28] sm:$0xff]  ;;  %v4795_v18 = vld [vmem:[%s4671_s23 + $0x30] sm:$0xff] }
  0x23   : > { %322 = vst [vmem:[#allocation2 + $0x48] sm:$0xff] %v3681_v19  ;;  %323 = vst [vmem:[#allocation2 + $0x50] sm:$0xff] %v3682_v20  ;;  %v4782_v15 = vld [vmem:[%s4671_s23 + $0x68] sm:$0xff]  ;;  %v4798_v19 = vld [vmem:[%s4671_s23 + $0x70] sm:$0xff] }
  0x24   : > { %338 = vst [vmem:[#allocation2 + $0x148] sm:$0xff] %v3713_v21  ;;  %339 = vst [vmem:[#allocation2 + $0x150] sm:$0xff] %v3714_v22  ;;  %v4558_v17 = vld [vmem:[%s5599_s1 + $0x88] sm:$0xff]   ;;  %v900_v23 = vld [vmem:[#allocation2 + $0x11] sm:$0xff] }
  0x25   : > { %324 = vst [vmem:[#allocation2 + $0x68] sm:$0xff] %v3685_v25  ;;  %325 = vst [vmem:[#allocation2 + $0x70] sm:$0xff] %v3686_v26  ;;  %4078 = vmatpush3.bf16.msra.mxu0 %v4528_v30  ;;  %4511 = vmatpush3.bf16.msra.mxu1 %v4528_v30  ;;  %v352_v20 = vld [vmem:[#allocation2 + $0x7] sm:$0xff]  ;;  %v353_v21 = vld [vmem:[#allocation2 + $0xf] sm:$0xff] }
  0x26   : > { %340 = vst [vmem:[#allocation2 + $0x168] sm:$0xff] %v3717_v28  ;;  %341 = vst [vmem:[#allocation2 + $0x170] sm:$0xff] %v3718_v29  ;;  %4079 = vmatprep.subr.bf16.mxu0 %v4529_v43  ;;  %4504 = vmatprep.subr.bf16.mxu1 %v4529_v43  ;;  %v899_v22 = vld [vmem:[#allocation2 + $0x9] sm:$0xff]  ;;  %v4559_v24 = vld [vmem:[%s5599_s1] sm:$0xff]   ;;  %v384_v26 = vpack.c.bf16 %v353_v21, %v352_v20 }
  0x27   : > { %326 = vst [vmem:[#allocation2 + $0x88] sm:$0xff] %v3689_v32  ;;  %327 = vst [vmem:[#allocation2 + $0x90] sm:$0xff] %v3690_v33  ;;  %v4560_v25 = vld [vmem:[%s5599_s1 + $0x80] sm:$0xff]   ;;  %v931_v27 = vpack.c.bf16 %v900_v23, %v899_v22  ;;  %v4561_v32 = vld [vmem:[%s5599_s1 + $0xf8] sm:$0xff]  }
  0x28   : > { %342 = vst [vmem:[#allocation2 + $0x188] sm:$0xff] %v3721_v35  ;;  %343 = vst [vmem:[#allocation2 + $0x190] sm:$0xff] %v3722_v36  ;;  %v354_v28 = vld [vmem:[#allocation2 + $0x27] sm:$0xff]  ;;  %v355_v29 = vld [vmem:[#allocation2 + $0x2f] sm:$0xff] }
  0x29   : > { %328 = vst [vmem:[#allocation2 + $0xa8] sm:$0xff] %v3693_v39  ;;  %329 = vst [vmem:[#allocation2 + $0xb0] sm:$0xff] %v3694_v40  ;;  %4080 = vmatpush3.bf16.msra.mxu0 %v4529_v43  ;;  %4512 = vmatpush3.bf16.msra.mxu1 %v4529_v43  ;;  %v901_v30 = vld [vmem:[#allocation2 + $0x29] sm:$0xff]  ;;  %v902_v31 = vld [vmem:[#allocation2 + $0x31] sm:$0xff]  ;;  %v4814_v38 = vpack.c.bf16 %v355_v29, %v354_v28 }
  0x2a   : > { %344 = vst [vmem:[#allocation2 + $0x1a8] sm:$0xff] %v3725_v41  ;;  %345 = vst [vmem:[#allocation2 + $0x1b0] sm:$0xff] %v3726_v42  ;;  %4113 = vmatprep.subr.bf16.mxu1 %v4533_v44  ;;  %4161 = vmatprep.subr.bf16.mxu0 %v4534_v46  ;;  %v4562_v33 = vld [vmem:[%s5599_s1 + $0x138] sm:$0xff]   ;;  %v356_v34 = vld [vmem:[#allocation2 + $0x47] sm:$0xff]  ;;  %v4816_v39 = vpack.c.bf16 %v902_v31, %v901_v30 }
  0x2b   : > { %330 = vst [vmem:[#allocation2 + $0xc8] sm:$0xff] %v3697_v47  ;;  %331 = vst [vmem:[#allocation2 + $0xd0] sm:$0xff] %v3698_v48  ;;  %v357_v35 = vld [vmem:[#allocation2 + $0x4f] sm:$0xff]  ;;  %v368_v30 = vld [vmem:[#allocation2 + $0x107] sm:$0xff] }
  0x2c   : > { %346 = vst [vmem:[#allocation2 + $0x1c8] sm:$0xff] %v3729_v53  ;;  %347 = vst [vmem:[#allocation2 + $0x1d0] sm:$0xff] %v3730_v54  ;;  %4082 = vmatmul.mubr.bf16.vlgmr.msra.gmra.mxu0 %v4710_v51  ;;  %4098 = vmatmul.mubr.bf16.vlgmr.msra.gmra.mxu1 %v4713_v52  ;;  %v903_v36 = vld [vmem:[#allocation2 + $0x49] sm:$0xff]  ;;  %v904_v37 = vld [vmem:[#allocation2 + $0x51] sm:$0xff]  ;;  %v4818_v40 = vpack.c.bf16 %v357_v35, %v356_v34 }
  0x2d   : > { %332 = vst [vmem:[#allocation2 + $0xe8] sm:$0xff] %v3701_v55  ;;  %333 = vst [vmem:[#allocation2 + $0xf0] sm:$0xff] %v3702_v56  ;;  %4114 = vmatpush3.bf16.msra.mxu1 %v4533_v44  ;;  %4162 = vmatpush3.bf16.msra.mxu0 %v4534_v46  ;;  %v4820_v41 = vpack.c.bf16 %v904_v37, %v903_v36  ;;  %v4563_v42 = vld [vmem:[%s5599_s1 + $0xf0] sm:$0xff]   ;;  %v358_v43 = vld [vmem:[#allocation2 + $0x67] sm:$0xff] }
  0x2e   : > { %348 = vst [vmem:[#allocation2 + $0x1e8] sm:$0xff] %v3733_v59  ;;  %349 = vst [vmem:[#allocation2 + $0x1f0] sm:$0xff] %v3734_v60  ;;  %4115 = vmatprep.subr.bf16.mxu1 %v4535_v58  ;;  %4163 = vmatprep.subr.bf16.mxu0 %v4536_v61  ;;  %v359_v44 = vld [vmem:[#allocation2 + $0x6f] sm:$0xff]  ;;  %v360_v48 = vld [vmem:[#allocation2 + $0x87] sm:$0xff] }
  0x2f   : > { %4085 = vmatprep.mubr.bf16.mxu0 %v4723_v62  ;;  %4101 = vmatprep.mubr.bf16.mxu1 %v4726_v63  ;;  %v4564_v45 = vld [vmem:[%s5599_s1 + $0x130] sm:$0xff]   ;;  %v4565_v54 = vld [vmem:[%s5599_s1 + $0xe8] sm:$0xff]   ;;  %v4838_v56 = vpack.c.bf16 %v359_v44, %v358_v43  ;;  %v4567_v60 = vld [vmem:[%s5599_s1 + $0xe0] sm:$0xff]  }
  0x30   : > { %v905_v46 = vld [vmem:[#allocation2 + $0x69] sm:$0xff]  ;;  %v906_v47 = vld [vmem:[#allocation2 + $0x71] sm:$0xff] }
  0x31   : > { %4116 = vmatpush3.bf16.msra.mxu1 %v4535_v58  ;;  %4164 = vmatpush3.bf16.msra.mxu0 %v4536_v61  ;;  %v361_v49 = vld [vmem:[#allocation2 + $0x8f] sm:$0xff]  ;;  %v4840_v57 = vpack.c.bf16 %v906_v47, %v905_v46  ;;  %v362_v61 = vld [vmem:[#allocation2 + $0xa7] sm:$0xff]  ;;  %v3833_v36 = vld [vmem:[%s4671_s23 + $0x78] sm:$0xff]  }
  0x32   : > { %4117 = vmatprep.subr.bf16.mxu1 %v4541_v0  ;;  %4165 = vmatprep.subr.bf16.mxu0 %v4542_v1  ;;  %v907_v50 = vld [vmem:[#allocation2 + $0x89] sm:$0xff]  ;;  %v908_v53 = vld [vmem:[#allocation2 + $0x91] sm:$0xff]  ;;  %v4842_v58 = vpack.c.bf16 %v361_v49, %v360_v48  ;;  %v3737_v43 = vunpack.c.l.bf16 %v3833_v36  ;;  %v3738_v44 = vunpack.c.h.bf16 %v3833_v36  ;;  %v4575_v47 = vld [vmem:[%s5599_s1 + $0xc0] sm:$0xff]  }
  0x33   : > { %v4566_v55 = vld [vmem:[%s5599_s1 + $0x128] sm:$0xff]   ;;  %v4844_v59 = vpack.c.bf16 %v908_v53, %v907_v50  ;;  %v4572_v29 = vld [vmem:[%s5599_s1 + $0x110] sm:$0xff]  }
  0x34   : > { %4086 = vmatmul.mubr.bf16.gmra.mxu0 %v4739_v2  ;;  %4102 = vmatmul.mubr.bf16.gmra.mxu1 %v4742_v3  ;;  %v914_v28 = vld [vmem:[#allocation2 + $0xf1] sm:$0xff]  ;;  %v4573_v34 = vld [vmem:[%s5599_s1 + $0xc8] sm:$0xff]   ;;  %350 = vst [vmem:[#allocation2 + $0x208] sm:$0xff] %v3737_v43  ;;  %351 = vst [vmem:[#allocation2 + $0x210] sm:$0xff] %v3738_v44 }
  0x35   : > { %4118 = vmatpush3.bf16.msra.mxu1 %v4541_v0  ;;  %4166 = vmatpush3.bf16.msra.mxu0 %v4542_v1  ;;  %v363_v0 = vld [vmem:[#allocation2 + $0xaf] sm:$0xff]  ;;  %v370_v48 = vld [vmem:[#allocation2 + $0x127] sm:$0xff] }
  0x36   : > { %4119 = vmatprep.subr.bf16.mxu1 %v4543_v4  ;;  %4167 = vmatprep.subr.bf16.mxu0 %v4544_v5  ;;  %v909_v1 = vld [vmem:[#allocation2 + $0xa9] sm:$0xff]  ;;  %v4862_v20 = vpack.c.bf16 %v363_v0, %v362_v61  ;;  %v918_v53 = vld [vmem:[#allocation2 + $0x131] sm:$0xff] }
  0x37   : > { %4089 = vmatprep.mubr.bf16.mxu0 %v4751_v6  ;;  %4105 = vmatprep.mubr.bf16.mxu1 %v4754_v7  ;;  %v369_v31 = vld [vmem:[#allocation2 + $0x10f] sm:$0xff]  ;;  %v380_v43 = vld [vmem:[#allocation2 + $0x1c7] sm:$0xff] }
  0x38   : > { %v4574_v35 = vld [vmem:[%s5599_s1 + $0x108] sm:$0xff]   ;;  %v920_v0 = vld [vmem:[#allocation2 + $0x151] sm:$0xff] }
  0x39   : > { %4120 = vmatpush3.bf16.msra.mxu1 %v4543_v4  ;;  %4168 = vmatpush3.bf16.msra.mxu0 %v4544_v5  ;;  %v910_v4 = vld [vmem:[#allocation2 + $0xb1] sm:$0xff]  ;;  %v4568_v5 = vld [vmem:[%s5599_s1 + $0x120] sm:$0xff]   ;;  %v917_v50 = vld [vmem:[#allocation2 + $0x129] sm:$0xff] }
  0x3a   : > { %4121 = vmatprep.subr.bf16.mxu1 %v4549_v8  ;;  %4169 = vmatprep.subr.bf16.mxu0 %v4550_v9  ;;  %v4864_v21 = vpack.c.bf16 %v910_v4, %v909_v1  ;;  %v371_v49 = vld [vmem:[#allocation2 + $0x12f] sm:$0xff]  ;;  %v4577_v1 = vld [vmem:[%s5599_s1 + $0x178] sm:$0xff]  }
  0x3b   : > { %v919_v61 = vld [vmem:[#allocation2 + $0x149] sm:$0xff]  ;;  %v4578_v4 = vld [vmem:[%s5599_s1 + $0x1b8] sm:$0xff]  }
  0x3c   : > { %4090 = vmatmul.mubr.bf16.gmra.mxu0 %v4767_v10  ;;  %4106 = vmatmul.mubr.bf16.gmra.mxu1 %v4770_v11  ;;  %v926_v36 = vld [vmem:[#allocation2 + $0x1b1] sm:$0xff] }
  0x3d   : > { %4122 = vmatpush3.bf16.msra.mxu1 %v4549_v8  ;;  %4170 = vmatpush3.bf16.msra.mxu0 %v4550_v9  ;;  %v364_v8 = vld [vmem:[#allocation2 + $0xc7] sm:$0xff]  ;;  %v365_v9 = vld [vmem:[#allocation2 + $0xcf] sm:$0xff] }
  0x3e   : > { %4123 = vmatprep.subr.bf16.mxu1 %v4551_v12  ;;  %4171 = vmatprep.subr.bf16.mxu0 %v4552_v13  ;;  %v4866_v22 = vpack.c.bf16 %v365_v9, %v364_v8  ;;  %v4913_v8 = vpack.c.bf16 %v918_v53, %v917_v50  ;;  %v381_v44 = vld [vmem:[#allocation2 + $0x1cf] sm:$0xff] }
  0x3f   : > { %4093 = vmatprep.mubr.bf16.mxu0 %v4779_v14  ;;  %4109 = vmatprep.mubr.bf16.mxu1 %v4782_v15  ;;  %v4939_v53 = vpack.c.bf16 %v381_v44, %v380_v43 }
  0x41   : > { %4124 = vmatpush3.bf16.msra.mxu1 %v4551_v12  ;;  %4172 = vmatpush3.bf16.msra.mxu0 %v4552_v13  ;;  %v911_v12 = vld [vmem:[#allocation2 + $0xc9] sm:$0xff]  ;;  %v912_v13 = vld [vmem:[#allocation2 + $0xd1] sm:$0xff] }
  0x42   : > { %4125 = vmatprep.subr.bf16.mxu1 %v4557_v16  ;;  %4173 = vmatprep.subr.bf16.mxu0 %v4558_v17  ;;  %v4868_v23 = vpack.c.bf16 %v912_v13, %v911_v12  ;;  %v4917_v12 = vpack.c.bf16 %v920_v0, %v919_v61  ;;  %v374_v13 = vld [vmem:[#allocation2 + $0x167] sm:$0xff]  ;;  %v930_v0 = vld [vmem:[#allocation2 + $0x1f1] sm:$0xff] }
  0x43   : > { %v929_v61 = vld [vmem:[#allocation2 + $0x1e9] sm:$0xff] }
  0x44   : > { %4094 = vmatmul.mubr.bf16.gmra.mxu0 %v4795_v18  ;;  %4110 = vmatmul.mubr.bf16.gmra.mxu1 %v4798_v19 }
  0x45   : > { %4126 = vmatpush3.bf16.msra.mxu1 %v4557_v16  ;;  %4174 = vmatpush3.bf16.msra.mxu0 %v4558_v17  ;;  %v4569_v16 = vld [vmem:[%s5599_s1 + $0xd8] sm:$0xff]  }
  0x46   : > { %4127 = vmatprep.subr.bf16.mxu1 %v4559_v24  ;;  %4175 = vmatprep.subr.bf16.mxu0 %v4560_v25  ;;  %v4570_v17 = vld [vmem:[%s5599_s1 + $0x118] sm:$0xff]  }
  0x47   : > { %4129 = vmatprep.mubr.bf16.mxu1 %v384_v26  ;;  %4177 = vmatprep.mubr.bf16.mxu0 %v931_v27  ;;  %v367_v26 = vld [vmem:[#allocation2 + $0xef] sm:$0xff] }
  0x48   : > { %v913_v27 = vld [vmem:[#allocation2 + $0xe9] sm:$0xff] }
  0x49   : > { %4128 = vmatpush3.bf16.msra.mxu1 %v4559_v24  ;;  %4176 = vmatpush3.bf16.msra.mxu0 %v4560_v25  ;;  %v4571_v24 = vld [vmem:[%s5599_s1 + $0xd0] sm:$0xff]   ;;  %v366_v25 = vld [vmem:[#allocation2 + $0xe7] sm:$0xff] }
  0x4a   : > { %4209 = vmatprep.subr.bf16.mxu1 %v4561_v32  ;;  %4257 = vmatprep.subr.bf16.mxu0 %v4562_v33  ;;  %v4887_v37 = vpack.c.bf16 %v367_v26, %v366_v25  ;;  %v376_v25 = vld [vmem:[#allocation2 + $0x187] sm:$0xff]  ;;  %v377_v26 = vld [vmem:[#allocation2 + $0x18f] sm:$0xff] }
  0x4c   : > { %4130 = vmatmul.mubr.bf16.vlgmr.msra.gmra.mxu1 %v4814_v38  ;;  %4178 = vmatmul.mubr.bf16.vlgmr.msra.gmra.mxu0 %v4816_v39 }
  0x4d   : > { %4210 = vmatpush3.bf16.msra.mxu1 %v4561_v32  ;;  %4258 = vmatpush3.bf16.msra.mxu0 %v4562_v33  ;;  %v915_v32 = vld [vmem:[#allocation2 + $0x109] sm:$0xff]  ;;  %v916_v33 = vld [vmem:[#allocation2 + $0x111] sm:$0xff] }
  0x4e   : > { %4133 = vmatprep.mubr.bf16.mxu1 %v4818_v40  ;;  %4181 = vmatprep.mubr.bf16.mxu0 %v4820_v41  ;;  %v4893_v46 = vpack.c.bf16 %v916_v33, %v915_v32  ;;  %v378_v33 = vld [vmem:[#allocation2 + $0x1a7] sm:$0xff] }
  0x4f   : > { %4211 = vmatprep.subr.bf16.mxu1 %v4563_v42  ;;  %4259 = vmatprep.subr.bf16.mxu0 %v4564_v45 }
  0x51   : > { %4212 = vmatpush3.bf16.msra.mxu1 %v4563_v42  ;;  %4260 = vmatpush3.bf16.msra.mxu0 %v4564_v45  ;;  %v4889_v42 = vpack.c.bf16 %v914_v28, %v913_v27  ;;  %v4891_v45 = vpack.c.bf16 %v369_v31, %v368_v30  ;;  %v923_v27 = vld [vmem:[#allocation2 + $0x189] sm:$0xff]  ;;  %v924_v28 = vld [vmem:[#allocation2 + $0x191] sm:$0xff]  ;;  %v4927_v31 = vpack.c.bf16 %v377_v26, %v376_v25 }
  0x52   : > { %4213 = vmatprep.subr.bf16.mxu1 %v4565_v54  ;;  %4261 = vmatprep.subr.bf16.mxu0 %v4566_v55  ;;  %v4929_v32 = vpack.c.bf16 %v924_v28, %v923_v27  ;;  %v4589_v25 = vld [vmem:[%s5599_s1 + $0x148] sm:$0xff]   ;;  %v4610_v27 = vld [vmem:[%s4671_s23 + $0x38] sm:$0xff] }
  0x53   : > { %v4590_v26 = vld [vmem:[%s5599_s1 + $0x188] sm:$0xff]   ;;  %v4594_v28 = vld [vmem:[%s5599_s1 + $0x1f8] sm:$0xff]  }
  0x54   : > { %4134 = vmatmul.mubr.bf16.gmra.mxu1 %v4838_v56  ;;  %4182 = vmatmul.mubr.bf16.gmra.mxu0 %v4840_v57 }
  0x55   : > { %4137 = vmatprep.mubr.bf16.mxu1 %v4842_v58  ;;  %4185 = vmatprep.mubr.bf16.mxu0 %v4844_v59 }
  0x56   : > { %4214 = vmatpush3.bf16.msra.mxu1 %v4565_v54  ;;  %4262 = vmatpush3.bf16.msra.mxu0 %v4566_v55  ;;  %v4576_v54 = vld [vmem:[%s5599_s1 + $0x100] sm:$0xff]  }
  0x57   : > { %4215 = vmatprep.subr.bf16.mxu1 %v4567_v60  ;;  %4263 = vmatprep.subr.bf16.mxu0 %v4568_v5  ;;  %v372_v55 = vld [vmem:[#allocation2 + $0x147] sm:$0xff] }
  0x5a   : > { %4216 = vmatpush3.bf16.msra.mxu1 %v4567_v60  ;;  %4264 = vmatpush3.bf16.msra.mxu0 %v4568_v5  ;;  %v373_v60 = vld [vmem:[#allocation2 + $0x14f] sm:$0xff]  ;;  %v4911_v5 = vpack.c.bf16 %v371_v49, %v370_v48 }
  0x5b   : > { %4217 = vmatprep.subr.bf16.mxu1 %v4569_v16  ;;  %4265 = vmatprep.subr.bf16.mxu0 %v4570_v17  ;;  %v4915_v9 = vpack.c.bf16 %v373_v60, %v372_v55  ;;  %v928_v48 = vld [vmem:[#allocation2 + $0x1d1] sm:$0xff]  ;;  %v382_v55 = vld [vmem:[#allocation2 + $0x1e7] sm:$0xff] }
  0x5c   : > { %4138 = vmatmul.mubr.bf16.gmra.mxu1 %v4862_v20  ;;  %4186 = vmatmul.mubr.bf16.gmra.mxu0 %v4864_v21  ;;  %v383_v60 = vld [vmem:[#allocation2 + $0x1ef] sm:$0xff] }
  0x5d   : > { %4141 = vmatprep.mubr.bf16.mxu1 %v4866_v22  ;;  %4189 = vmatprep.mubr.bf16.mxu0 %v4868_v23 }
  0x5e   : > { %4218 = vmatpush3.bf16.msra.mxu1 %v4569_v16  ;;  %4266 = vmatpush3.bf16.msra.mxu0 %v4570_v17  ;;  %v375_v16 = vld [vmem:[#allocation2 + $0x16f] sm:$0xff] }
  0x5f   : > { %4219 = vmatprep.subr.bf16.mxu1 %v4571_v24  ;;  %4267 = vmatprep.subr.bf16.mxu0 %v4572_v29  ;;  %v921_v17 = vld [vmem:[#allocation2 + $0x169] sm:$0xff] }
  0x62   : > { %4220 = vmatpush3.bf16.msra.mxu1 %v4571_v24  ;;  %4268 = vmatpush3.bf16.msra.mxu0 %v4572_v29  ;;  %v922_v24 = vld [vmem:[#allocation2 + $0x171] sm:$0xff]  ;;  %v4923_v29 = vpack.c.bf16 %v375_v16, %v374_v13  ;;  %v4947_v13 = vpack.c.bf16 %v383_v60, %v382_v55  ;;  %v4949_v16 = vpack.c.bf16 %v930_v0, %v929_v61  ;;  %v2430_v55 = vld [vmem:[#allocation2 + $0x48] sm:$0xff] }
  0x63   : > { %4221 = vmatprep.subr.bf16.mxu1 %v4573_v34  ;;  %4269 = vmatprep.subr.bf16.mxu0 %v4574_v35  ;;  %v4925_v30 = vpack.c.bf16 %v922_v24, %v921_v17  ;;  %v4579_v17 = vld [vmem:[%s5599_s1 + $0x170] sm:$0xff]  }
  0x64   : > { %4142 = vmatmul.mubr.bf16.gmra.mxu1 %v4887_v37  ;;  %4190 = vmatmul.mubr.bf16.gmra.mxu0 %v4889_v42  ;;  %v4580_v24 = vld [vmem:[%s5599_s1 + $0x1b0] sm:$0xff]  }
  0x65   : > { %4145 = vmatprep.mubr.bf16.mxu1 %v4891_v45  ;;  %4193 = vmatprep.mubr.bf16.mxu0 %v4893_v46  ;;  %v2431_v0 = vld [vmem:[#allocation2 + $0x50] sm:$0xff] }
  0x66   : > { %4222 = vmatpush3.bf16.msra.mxu1 %v4573_v34  ;;  %4270 = vmatpush3.bf16.msra.mxu0 %v4574_v35  ;;  %v379_v34 = vld [vmem:[#allocation2 + $0x1af] sm:$0xff] }
  0x67   : > { %4223 = vmatprep.subr.bf16.mxu1 %v4575_v47  ;;  %4271 = vmatprep.subr.bf16.mxu0 %v4576_v54  ;;  %v925_v35 = vld [vmem:[#allocation2 + $0x1a9] sm:$0xff]  ;;  %v4935_v49 = vpack.c.bf16 %v379_v34, %v378_v33  ;;  %v4595_v33 = vld [vmem:[%s5599_s1 + $0x238] sm:$0xff]  }
  0x68   : > { %v4937_v50 = vpack.c.bf16 %v926_v36, %v925_v35 }
  0x6a   : > { %4224 = vmatpush3.bf16.msra.mxu1 %v4575_v47  ;;  %4272 = vmatpush3.bf16.msra.mxu0 %v4576_v54  ;;  %v927_v47 = vld [vmem:[#allocation2 + $0x1c9] sm:$0xff] }
  0x6b   : > { %4305 = vmatprep.subr.bf16.mxu1 %v4577_v1  ;;  %4353 = vmatprep.subr.bf16.mxu0 %v4578_v4  ;;  %v4941_v54 = vpack.c.bf16 %v928_v48, %v927_v47  ;;  %v1847_v48 = vld [vmem:[#allocation2 + $0x209] sm:$0xff] }
  0x6c   : > { %4146 = vmatmul.mubr.bf16.gmra.mxu1 %v4911_v5  ;;  %4194 = vmatmul.mubr.bf16.gmra.mxu0 %v4913_v8 }
  0x6d   : > { %4149 = vmatprep.mubr.bf16.mxu1 %v4915_v9  ;;  %4197 = vmatprep.mubr.bf16.mxu0 %v4917_v12 }
  0x74   : > { %4150 = vmatmul.mubr.bf16.gmra.mxu1 %v4923_v29  ;;  %4198 = vmatmul.mubr.bf16.gmra.mxu0 %v4925_v30 }
  0x75   : > { %4153 = vmatprep.mubr.bf16.mxu1 %v4927_v31  ;;  %4201 = vmatprep.mubr.bf16.mxu0 %v4929_v32 }
  0x7c   : > { %4154 = vmatmul.mubr.bf16.gmra.mxu1 %v4935_v49  ;;  %4202 = vmatmul.mubr.bf16.gmra.mxu0 %v4937_v50 }
  0x7d   : > { %4157 = vmatprep.mubr.bf16.mxu1 %v4939_v53  ;;  %4205 = vmatprep.mubr.bf16.mxu0 %v4941_v54 }
  0x84   : > { %4158 = vmatmul.mubr.bf16.gmra.mxu1 %v4947_v13  ;;  %4206 = vmatmul.mubr.bf16.gmra.mxu0 %v4949_v16 }
  0x85   : > { %4225 = vmatprep.mubr.bf16.mxu1 %v4814_v38  ;;  %4273 = vmatprep.mubr.bf16.mxu0 %v4710_v51  ;;  %v4581_v51 = vld [vmem:[%s5599_s1 + $0x168] sm:$0xff]  }
  0x86   : > { %v4582_v38 = vld [vmem:[%s5599_s1 + $0x1a8] sm:$0xff]  }
  0x8c   : > { %4226 = vmatmul.mubr.bf16.vlgmr.msra.gmra.mxu1 %v4818_v40  ;;  %4274 = vmatmul.mubr.bf16.vlgmr.msra.gmra.mxu0 %v4723_v62  ;;  %v4583_v62 = vld [vmem:[%s5599_s1 + $0x160] sm:$0xff]  }
  0x8d   : > { %4306 = vmatpush3.bf16.msra.mxu1 %v4577_v1  ;;  %4354 = vmatpush3.bf16.msra.mxu0 %v4578_v4  ;;  %v4585_v1 = vld [vmem:[%s5599_s1 + $0x158] sm:$0xff]  }
  0x8e   : > { %4229 = vmatprep.mubr.bf16.mxu1 %v4838_v56  ;;  %4277 = vmatprep.mubr.bf16.mxu0 %v4739_v2  ;;  %v4584_v2 = vld [vmem:[%s5599_s1 + $0x1a0] sm:$0xff]   ;;  %v4586_v4 = vld [vmem:[%s5599_s1 + $0x198] sm:$0xff]  }
  0x8f   : > { %4307 = vmatprep.subr.bf16.mxu1 %v4579_v17  ;;  %4355 = vmatprep.subr.bf16.mxu0 %v4580_v24 }
  0x91   : > { %4308 = vmatpush3.bf16.msra.mxu1 %v4579_v17  ;;  %4356 = vmatpush3.bf16.msra.mxu0 %v4580_v24  ;;  %v2736_v17 = vld [vmem:[#allocation2 + $0x49] sm:$0xff]  ;;  %v2737_v24 = vld [vmem:[#allocation2 + $0x51] sm:$0xff] }
  0x92   : > { %4309 = vmatprep.subr.bf16.mxu1 %v4581_v51  ;;  %4357 = vmatprep.subr.bf16.mxu0 %v4582_v38 }
  0x94   : > { %4230 = vmatmul.mubr.bf16.gmra.mxu1 %v4842_v58  ;;  %4278 = vmatmul.mubr.bf16.gmra.mxu0 %v4751_v6  ;;  %v4587_v6 = vld [vmem:[%s5599_s1 + $0x150] sm:$0xff]  }
  0x95   : > { %4233 = vmatprep.mubr.bf16.mxu1 %v4862_v20  ;;  %4281 = vmatprep.mubr.bf16.mxu0 %v4767_v10  ;;  %v4588_v10 = vld [vmem:[%s5599_s1 + $0x190] sm:$0xff]  }
  0x96   : > { %4310 = vmatpush3.bf16.msra.mxu1 %v4581_v51  ;;  %4358 = vmatpush3.bf16.msra.mxu0 %v4582_v38 }
  0x97   : > { %4311 = vmatprep.subr.bf16.mxu1 %v4583_v62  ;;  %4359 = vmatprep.subr.bf16.mxu0 %v4584_v2 }
  0x9a   : > { %4312 = vmatpush3.bf16.msra.mxu1 %v4583_v62  ;;  %4360 = vmatpush3.bf16.msra.mxu0 %v4584_v2  ;;  %v2768_v62 = vpack.c.bf16 %v2737_v24, %v2736_v17 }
  0x9b   : > { %4313 = vmatprep.subr.bf16.mxu1 %v4585_v1  ;;  %4361 = vmatprep.subr.bf16.mxu0 %v4586_v4 }
  0x9c   : > { %4234 = vmatmul.mubr.bf16.gmra.mxu1 %v4866_v22  ;;  %4282 = vmatmul.mubr.bf16.gmra.mxu0 %v4779_v14  ;;  %v4592_v14 = vld [vmem:[%s5599_s1 + $0x140] sm:$0xff]  }
  0x9d   : > { %4237 = vmatprep.mubr.bf16.mxu1 %v4887_v37  ;;  %4285 = vmatprep.mubr.bf16.mxu0 %v4795_v18  ;;  %v4593_v18 = vld [vmem:[%s5599_s1 + $0x180] sm:$0xff]  }
  0x9e   : > { %4314 = vmatpush3.bf16.msra.mxu1 %v4585_v1  ;;  %4362 = vmatpush3.bf16.msra.mxu0 %v4586_v4 }
  0x9f   : > { %4315 = vmatprep.subr.bf16.mxu1 %v4587_v6  ;;  %4363 = vmatprep.subr.bf16.mxu0 %v4588_v10 }
  0xa2   : > { %4316 = vmatpush3.bf16.msra.mxu1 %v4587_v6  ;;  %4364 = vmatpush3.bf16.msra.mxu0 %v4588_v10  ;;  %v2432_v10 = vld [vmem:[#allocation2 + $0x68] sm:$0xff] }
  0xa3   : > { %4317 = vmatprep.subr.bf16.mxu1 %v4589_v25  ;;  %4365 = vmatprep.subr.bf16.mxu0 %v4590_v26 }
  0xa4   : > { %4238 = vmatmul.mubr.bf16.gmra.mxu1 %v4891_v45  ;;  %4286 = vmatmul.mubr.bf16.gmra.mxu0 %v4610_v27 }
  0xa5   : > { %4241 = vmatprep.mubr.bf16.mxu1 %v4911_v5  ;;  %4289 = vmatprep.mubr.bf16.mxu0 %v4713_v52  ;;  %v1235_v52 = vld [vmem:[#allocation2 + $0x207] sm:$0xff] }
  0xa6   : > { %4318 = vmatpush3.bf16.msra.mxu1 %v4589_v25  ;;  %4366 = vmatpush3.bf16.msra.mxu0 %v4590_v26  ;;  %v2433_v25 = vld [vmem:[#allocation2 + $0x70] sm:$0xff] }
  0xa7   : > { %4319 = vmatprep.subr.bf16.mxu1 %v4592_v14  ;;  %4367 = vmatprep.subr.bf16.mxu0 %v4593_v18  ;;  %v2738_v26 = vld [vmem:[#allocation2 + $0x69] sm:$0xff] }
  0xaa   : > { %4320 = vmatpush3.bf16.msra.mxu1 %v4592_v14  ;;  %4368 = vmatpush3.bf16.msra.mxu0 %v4593_v18  ;;  %v2739_v14 = vld [vmem:[#allocation2 + $0x71] sm:$0xff]  ;;  %v2434_v18 = vld [vmem:[#allocation2 + $0x88] sm:$0xff] }
  0xab   : > { %4401 = vmatprep.subr.bf16.mxu1 %v4594_v28  ;;  %4449 = vmatprep.subr.bf16.mxu0 %v4595_v33 }
  0xac   : > { %4242 = vmatmul.mubr.bf16.gmra.mxu1 %v4915_v9  ;;  %4290 = vmatmul.mubr.bf16.gmra.mxu0 %v4726_v63  ;;  %v1236_v63 = vld [vmem:[#allocation2 + $0x20f] sm:$0xff] }
  0xad   : > { %4245 = vmatprep.mubr.bf16.mxu1 %v4923_v29  ;;  %4293 = vmatprep.mubr.bf16.mxu0 %v4742_v3  ;;  %v5031_v34 = vpack.c.bf16 %v1236_v63, %v1235_v52  ;;  %v5034_v3 = vld [vmem:[%s4671_s23 + $0x78] sm:$0xff]  ;;  %v2740_v52 = vld [vmem:[#allocation2 + $0x89] sm:$0xff] }
  0xae   : > { %v2741_v63 = vld [vmem:[#allocation2 + $0x91] sm:$0xff] }
  0xb4   : > { %4246 = vmatmul.mubr.bf16.gmra.mxu1 %v4927_v31  ;;  %4294 = vmatmul.mubr.bf16.gmra.mxu0 %v4754_v7  ;;  %v4596_v7 = vld [vmem:[%s5599_s1 + $0x1f0] sm:$0xff]  }
  0xb5   : > { %4249 = vmatprep.mubr.bf16.mxu1 %v4935_v49  ;;  %4297 = vmatprep.mubr.bf16.mxu0 %v4770_v11  ;;  %v4597_v11 = vld [vmem:[%s5599_s1 + $0x230] sm:$0xff]  }
  0xbc   : > { %4250 = vmatmul.mubr.bf16.gmra.mxu1 %v4939_v53  ;;  %4298 = vmatmul.mubr.bf16.gmra.mxu0 %v4782_v15  ;;  %v4598_v15 = vld [vmem:[%s5599_s1 + $0x1e8] sm:$0xff]  }
  0xbd   : > { %4253 = vmatprep.mubr.bf16.mxu1 %v4947_v13  ;;  %4301 = vmatprep.mubr.bf16.mxu0 %v4798_v19  ;;  %v4599_v19 = vld [vmem:[%s5599_s1 + $0x228] sm:$0xff]  }
  0xc4   : > { %4254 = vmatmul.mubr.bf16.gmra.mxu1 %v5031_v34  ;;  %4302 = vmatmul.mubr.bf16.gmra.mxu0 %v5034_v3 }
  0xc5   : > { %4321 = vmatprep.mubr.bf16.mxu1 %v4816_v39  ;;  %4369 = vmatprep.mubr.bf16.mxu0 %v4818_v40  ;;  %v4600_v39 = vld [vmem:[%s5599_s1 + $0x1e0] sm:$0xff]  }
  0xc6   : > { %v4601_v40 = vld [vmem:[%s5599_s1 + $0x220] sm:$0xff]  }
  0xcc   : > { %4322 = vmatmul.mubr.bf16.vlgmr.msra.gmra.mxu1 %v4820_v41  ;;  %4370 = vmatmul.mubr.bf16.vlgmr.msra.gmra.mxu0 %v4838_v56  ;;  %v4602_v41 = vld [vmem:[%s5599_s1 + $0x1d8] sm:$0xff]  }
  0xcd   : > { %4402 = vmatpush3.bf16.msra.mxu1 %v4594_v28  ;;  %4450 = vmatpush3.bf16.msra.mxu0 %v4595_v33  ;;  %v4603_v56 = vld [vmem:[%s5599_s1 + $0x218] sm:$0xff]   ;;  %v2435_v33 = vld [vmem:[#allocation2 + $0x90] sm:$0xff] }
  0xce   : > { %4325 = vmatprep.mubr.bf16.mxu1 %v4840_v57  ;;  %4373 = vmatprep.mubr.bf16.mxu0 %v4842_v58  ;;  %v4604_v57 = vld [vmem:[%s5599_s1 + $0x1d0] sm:$0xff]  }
  0xcf   : > { %4403 = vmatprep.subr.bf16.mxu1 %v4596_v7  ;;  %4451 = vmatprep.subr.bf16.mxu0 %v4597_v11  ;;  %v4605_v58 = vld [vmem:[%s5599_s1 + $0x210] sm:$0xff]  }
  0xd1   : > { %4404 = vmatpush3.bf16.msra.mxu1 %v4596_v7  ;;  %4452 = vmatpush3.bf16.msra.mxu0 %v4597_v11  ;;  %v2463_v11 = vpack.c.bf16 %v2433_v25, %v2432_v10 }
  0xd2   : > { %4405 = vmatprep.subr.bf16.mxu1 %v4598_v15  ;;  %4453 = vmatprep.subr.bf16.mxu0 %v4599_v19 }
  0xd4   : > { %4326 = vmatmul.mubr.bf16.gmra.mxu1 %v4844_v59  ;;  %4374 = vmatmul.mubr.bf16.gmra.mxu0 %v4862_v20  ;;  %v4606_v59 = vld [vmem:[%s5599_s1 + $0x1c8] sm:$0xff]  }
  0xd5   : > { %4329 = vmatprep.mubr.bf16.mxu1 %v4864_v21  ;;  %4377 = vmatprep.mubr.bf16.mxu0 %v4866_v22  ;;  %v4607_v20 = vld [vmem:[%s5599_s1 + $0x208] sm:$0xff]   ;;  %v4608_v21 = vld [vmem:[%s5599_s1 + $0x1c0] sm:$0xff]  }
  0xd6   : > { %4406 = vmatpush3.bf16.msra.mxu1 %v4598_v15  ;;  %4454 = vmatpush3.bf16.msra.mxu0 %v4599_v19  ;;  %v4609_v22 = vld [vmem:[%s5599_s1 + $0x200] sm:$0xff]   ;;  %v2769_v15 = vpack.c.bf16 %v2739_v14, %v2738_v26  ;;  %v2464_v19 = vpack.c.bf16 %v2435_v33, %v2434_v18 }
  0xd7   : > { %4407 = vmatprep.subr.bf16.mxu1 %v4600_v39  ;;  %4455 = vmatprep.subr.bf16.mxu0 %v4601_v40 }
  0xda   : > { %4408 = vmatpush3.bf16.msra.mxu1 %v4600_v39  ;;  %4456 = vmatpush3.bf16.msra.mxu0 %v4601_v40  ;;  %v2770_v39 = vpack.c.bf16 %v2741_v63, %v2740_v52 }
  0xdb   : > { %4409 = vmatprep.subr.bf16.mxu1 %v4602_v41  ;;  %4457 = vmatprep.subr.bf16.mxu0 %v4603_v56 }
  0xdc   : > { %4330 = vmatmul.mubr.bf16.gmra.mxu1 %v4868_v23  ;;  %4378 = vmatmul.mubr.bf16.gmra.mxu0 %v4887_v37 }
  0xdd   : > { %4333 = vmatprep.mubr.bf16.mxu1 %v4889_v42  ;;  %4381 = vmatprep.mubr.bf16.mxu0 %v4891_v45 }
  0xde   : > { %4410 = vmatpush3.bf16.msra.mxu1 %v4602_v41  ;;  %4458 = vmatpush3.bf16.msra.mxu0 %v4603_v56 }
  0xdf   : > { %4411 = vmatprep.subr.bf16.mxu1 %v4604_v57  ;;  %4459 = vmatprep.subr.bf16.mxu0 %v4605_v58 }
  0xe2   : > { %4412 = vmatpush3.bf16.msra.mxu1 %v4604_v57  ;;  %4460 = vmatpush3.bf16.msra.mxu0 %v4605_v58  ;;  %v2436_v58 = vld [vmem:[#allocation2 + $0xa8] sm:$0xff] }
  0xe3   : > { %4413 = vmatprep.subr.bf16.mxu1 %v4606_v59  ;;  %4461 = vmatprep.subr.bf16.mxu0 %v4607_v20 }
  0xe4   : > { %4334 = vmatmul.mubr.bf16.gmra.mxu1 %v4893_v46  ;;  %4382 = vmatmul.mubr.bf16.gmra.mxu0 %v4911_v5 }
  0xe5   : > { %4337 = vmatprep.mubr.bf16.mxu1 %v4913_v8  ;;  %4385 = vmatprep.mubr.bf16.mxu0 %v4915_v9 }
  0xe6   : > { %4414 = vmatpush3.bf16.msra.mxu1 %v4606_v59  ;;  %4462 = vmatpush3.bf16.msra.mxu0 %v4607_v20  ;;  %v2437_v59 = vld [vmem:[#allocation2 + $0xb0] sm:$0xff] }
  0xe7   : > { %4415 = vmatprep.subr.bf16.mxu1 %v4608_v21  ;;  %4463 = vmatprep.subr.bf16.mxu0 %v4609_v22 }
  0xea   : > { %4416 = vmatpush3.bf16.msra.mxu1 %v4608_v21  ;;  %4464 = vmatpush3.bf16.msra.mxu0 %v4609_v22  ;;  %v2742_v21 = vld [vmem:[#allocation2 + $0xa9] sm:$0xff]  ;;  %v2743_v22 = vld [vmem:[#allocation2 + $0xb1] sm:$0xff] }
  0xeb   : > { %v2771_v10 = vpack.c.bf16 %v2743_v22, %v2742_v21  ;;  %v2443_v21 = vld [vmem:[#allocation2 + $0x110] sm:$0xff] }
  0xec   : > { %v5098_v23 = vpop.f32.mrf.mxu0  ;;  %v5100_v37 = vpop.f32.mrf.mxu1  ;;  %4338 = vmatmul.mubr.bf16.gmra.mxu1 %v4917_v12  ;;  %4386 = vmatmul.mubr.bf16.gmra.mxu0 %v4923_v29  ;;  %v2748_v22 = vld [vmem:[#allocation2 + $0x109] sm:$0xff] }
  0xed   : > { %4341 = vmatprep.mubr.bf16.mxu1 %v4925_v30  ;;  %4389 = vmatprep.mubr.bf16.mxu0 %v4927_v31 }
  0xee   : > { %v5106_v42 = vpop.f32.mrf.mxu0  ;;  %v5108_v45 = vpop.f32.mrf.mxu1 }
  0xf0   : > { %v5110_v46 = vpop.f32.mrf.mxu0  ;;  %v5112_v5 = vpop.f32.mrf.mxu1 }
  0xf2   : > { %v5114_v8 = vpop.f32.mrf.mxu0  ;;  %v5116_v9 = vpop.f32.mrf.mxu1 }
  0xf4   : > { %v5118_v35 = vpop.f32.mrf.mxu0  ;;  %v5120_v12 = vpop.f32.mrf.mxu1  ;;  %4342 = vmatmul.mubr.bf16.gmra.mxu1 %v4929_v32  ;;  %4390 = vmatmul.mubr.bf16.gmra.mxu0 %v4935_v49  ;;  %v1848_v49 = vld [vmem:[#allocation2 + $0x211] sm:$0xff] }
  0xf5   : > { %4345 = vmatprep.mubr.bf16.mxu1 %v4937_v50  ;;  %4393 = vmatprep.mubr.bf16.mxu0 %v4939_v53  ;;  %v2154_v50 = vld [vmem:[#allocation2 + $0x227] sm:$0xff]  ;;  %v2155_v53 = vld [vmem:[#allocation2 + $0x22f] sm:$0xff] }
  0xf6   : > { %v5126_v29 = vpop.f32.mrf.mxu0  ;;  %v5128_v30 = vpop.f32.mrf.mxu1  ;;  %v2171_v38 = vpack.c.bf16 %v2155_v53, %v2154_v50  ;;  %v2439_v53 = vld [vmem:[#allocation2 + $0xd0] sm:$0xff] }
  0xf8   : > { %v5130_v31 = vpop.f32.mrf.mxu0  ;;  %v5132_v36 = vpop.f32.mrf.mxu1 }
  0xfa   : > { %v5134_v43 = vpop.f32.mrf.mxu0  ;;  %v5136_v44 = vpop.f32.mrf.mxu1 }
  0xfc   : > { %v5138_v47 = vpop.f32.mrf.mxu0  ;;  %v5140_v32 = vpop.f32.mrf.mxu1  ;;  %4346 = vmatmul.mubr.bf16.gmra.mxu1 %v4941_v54  ;;  %4394 = vmatmul.mubr.bf16.gmra.mxu0 %v4947_v13  ;;  %v5154_v13 = vpack.c.bf16 %v1848_v49, %v1847_v48  ;;  %v2438_v48 = vld [vmem:[#allocation2 + $0xc8] sm:$0xff] }
  0xfd   : > { %4349 = vmatprep.mubr.bf16.mxu1 %v4949_v16  ;;  %4397 = vmatprep.mubr.bf16.mxu0 %v5031_v34  ;;  %v2462_v16 = vpack.c.bf16 %v2431_v0, %v2430_v55  ;;  %v2744_v55 = vld [vmem:[#allocation2 + $0xc9] sm:$0xff]  ;;  %v2745_v0 = vld [vmem:[#allocation2 + $0xd1] sm:$0xff]  ;;  %v2466_v26 = vpack.c.bf16 %v2439_v53, %v2438_v48 }
  0xfe   : > { %v5146_v60 = vpop.f32.mrf.mxu0  ;;  %v5148_v61 = vpop.f32.mrf.mxu1  ;;  %v2772_v14 = vpack.c.bf16 %v2745_v0, %v2744_v55 }
 0x100   : > { %v5150_v51 = vpop.f32.mrf.mxu0  ;;  %v5152_v54 = vpop.f32.mrf.mxu1 }
 0x102   : > { %v5156_v2 = vpop.f32.mrf.mxu0  ;;  %v5158_v1 = vpop.f32.mrf.mxu1 }
 0x104   : > { %v5160_v4 = vpop.f32.mrf.mxu0  ;;  %v5162_v6 = vpop.f32.mrf.mxu1  ;;  %4350 = vmatmul.mubr.bf16.gmra.mxu1 %v5154_v13  ;;  %4398 = vmatmul.mubr.bf16.gmra.mxu0 %v2171_v38 }
 0x105   : > { %4417 = vmatprep.mubr.bf16.mxu1 %v2462_v16  ;;  %4465 = vmatprep.mubr.bf16.mxu0 %v2768_v62  ;;  %v2465_v62 = vpack.c.bf16 %v2437_v59, %v2436_v58  ;;  %v2442_v58 = vld [vmem:[#allocation2 + $0x108] sm:$0xff] }
 0x106   : > { %v5165_v27 = vpop.f32.mrf.mxu0  ;;  %v5167_v28 = vpop.f32.mrf.mxu1 }
 0x108   : > { %v5169_v34 = vpop.f32.mrf.mxu0  ;;  %v5171_v7 = vpop.f32.mrf.mxu1 }
 0x10a   : > { %v5173_v40 = vpop.f32.mrf.mxu0  ;;  %v5175_v41 = vpop.f32.mrf.mxu1 }
 0x10c   : > { %v4131_v56 = vpop.f32.mrf.mxu1  ;;  %v4179_v57 = vpop.f32.mrf.mxu0  ;;  %4418 = vmatmul.mubr.bf16.vlgmr.msra.gmra.mxu1 %v2463_v11  ;;  %4466 = vmatmul.mubr.bf16.vlgmr.msra.gmra.mxu0 %v2769_v15 }
 0x10d   : > { %v781_v20 = vadd.f32 %v4131_v56, %v5098_v23  ;;  %4421 = vmatprep.mubr.bf16.mxu1 %v2464_v19  ;;  %4469 = vmatprep.mubr.bf16.mxu0 %v2770_v39  ;;  %v2441_v19 = vld [vmem:[#allocation2 + $0xf0] sm:$0xff] }
 0x10e   : > { %v772_v49 = vpop.f32.mrf.mxu1  ;;  %v1046_v50 = vpop.f32.mrf.mxu0 }
 0x10f   : > { %v5178_v17 = vadd.f32 %v4179_v57, %v781_v20  ;;  %v773_v24 = vadd.f32 %v772_v49, %v5106_v42  ;;  %v2440_v42 = vld [vmem:[#allocation2 + $0xe8] sm:$0xff]  ;;  %v2747_v57 = vld [vmem:[#allocation2 + $0xf1] sm:$0xff] }
 0x110   : > { %v4132_v38 = vpop.f32.mrf.mxu1  ;;  %v4180_v16 = vpop.f32.mrf.mxu0  ;;  %v2467_v55 = vpack.c.bf16 %v2441_v19, %v2440_v42  ;;  %v2446_v42 = vld [vmem:[#allocation2 + $0x148] sm:$0xff] }
 0x111   : > { %v5181_v25 = vadd.f32 %v1046_v50, %v773_v24  ;;  %v784_v23 = vadd.f32 %v4132_v38, %v5110_v46  ;;  %v2746_v46 = vld [vmem:[#allocation2 + $0xe9] sm:$0xff]  ;;  %v2468_v38 = vpack.c.bf16 %v2443_v21, %v2442_v58 }
 0x112   : > { %v775_v18 = vpop.f32.mrf.mxu1  ;;  %v1049_v33 = vpop.f32.mrf.mxu0  ;;  %v2773_v0 = vpack.c.bf16 %v2747_v57, %v2746_v46  ;;  %v2447_v46 = vld [vmem:[#allocation2 + $0x150] sm:$0xff] }
 0x113   : > { %v5184_v52 = vadd.f32 %v4180_v16, %v784_v23  ;;  %v776_v63 = vadd.f32 %v775_v18, %v5114_v8  ;;  %v2749_v8 = vld [vmem:[#allocation2 + $0x111] sm:$0xff]  ;;  %v2752_v57 = vld [vmem:[#allocation2 + $0x149] sm:$0xff] }
 0x114   : > { %v4135_v11 = vpop.f32.mrf.mxu1  ;;  %v4183_v15 = vpop.f32.mrf.mxu0  ;;  %4422 = vmatmul.mubr.bf16.gmra.mxu1 %v2465_v62  ;;  %4470 = vmatmul.mubr.bf16.gmra.mxu0 %v2771_v10  ;;  %v2774_v16 = vpack.c.bf16 %v2749_v8, %v2748_v22 }
 0x115   : > { %v5187_v39 = vadd.f32 %v1049_v33, %v776_v63  ;;  %v797_v56 = vadd.f32 %v4135_v11, %v5118_v35  ;;  %4425 = vmatprep.mubr.bf16.mxu1 %v2466_v26  ;;  %4473 = vmatprep.mubr.bf16.mxu0 %v2772_v14  ;;  %v2445_v33 = vld [vmem:[#allocation2 + $0x130] sm:$0xff] }
 0x116   : > { %v788_v59 = vpop.f32.mrf.mxu1  ;;  %v1062_v20 = vpop.f32.mrf.mxu0 }
 0x117   : > { %v5190_v48 = vadd.f32 %v4183_v15, %v797_v56  ;;  %v789_v49 = vadd.f32 %v788_v59, %v5126_v29  ;;  %v2444_v29 = vld [vmem:[#allocation2 + $0x128] sm:$0xff]  ;;  %v2751_v15 = vld [vmem:[#allocation2 + $0x131] sm:$0xff] }
 0x118   : > { %v4136_v50 = vpop.f32.mrf.mxu1  ;;  %v4184_v53 = vpop.f32.mrf.mxu0  ;;  %v2469_v22 = vpack.c.bf16 %v2445_v33, %v2444_v29  ;;  %v2450_v29 = vld [vmem:[#allocation2 + $0x188] sm:$0xff] }
 0x119   : > { %v5193_v24 = vadd.f32 %v1062_v20, %v789_v49  ;;  %v800_v35 = vadd.f32 %v4136_v50, %v5130_v31  ;;  %v2750_v31 = vld [vmem:[#allocation2 + $0x129] sm:$0xff]  ;;  %v2470_v50 = vpack.c.bf16 %v2447_v46, %v2446_v42 }
 0x11a   : > { %v791_v62 = vpop.f32.mrf.mxu1  ;;  %v1065_v10 = vpop.f32.mrf.mxu0  ;;  %v2775_v8 = vpack.c.bf16 %v2751_v15, %v2750_v31  ;;  %v2451_v31 = vld [vmem:[#allocation2 + $0x190] sm:$0xff] }
 0x11b   : > { %v5196_v23 = vadd.f32 %v4184_v53, %v800_v35  ;;  %v792_v26 = vadd.f32 %v791_v62, %v5134_v43  ;;  %v2753_v43 = vld [vmem:[#allocation2 + $0x151] sm:$0xff]  ;;  %v2756_v15 = vld [vmem:[#allocation2 + $0x189] sm:$0xff] }
 0x11c   : > { %v4139_v14 = vpop.f32.mrf.mxu1  ;;  %v4187_v18 = vpop.f32.mrf.mxu0  ;;  %4426 = vmatmul.mubr.bf16.gmra.mxu1 %v2467_v55  ;;  %4474 = vmatmul.mubr.bf16.gmra.mxu0 %v2773_v0  ;;  %v2776_v53 = vpack.c.bf16 %v2753_v43, %v2752_v57 }
 0x11d   : > { %v5199_v63 = vadd.f32 %v1065_v10, %v792_v26  ;;  %v813_v11 = vadd.f32 %v4139_v14, %v5138_v47  ;;  %4429 = vmatprep.mubr.bf16.mxu1 %v2468_v38  ;;  %4477 = vmatprep.mubr.bf16.mxu0 %v2774_v16  ;;  %v2449_v10 = vld [vmem:[#allocation2 + $0x170] sm:$0xff] }
 0x11e   : > { %v804_v19 = vpop.f32.mrf.mxu1  ;;  %v1078_v56 = vpop.f32.mrf.mxu0 }
 0x11f   : > { %v5202_v58 = vadd.f32 %v4187_v18, %v813_v11  ;;  %v805_v59 = vadd.f32 %v804_v19, %v5146_v60  ;;  %v2448_v60 = vld [vmem:[#allocation2 + $0x168] sm:$0xff]  ;;  %v2755_v18 = vld [vmem:[#allocation2 + $0x171] sm:$0xff] }
 0x120   : > { %v4140_v20 = vpop.f32.mrf.mxu1  ;;  %v4188_v21 = vpop.f32.mrf.mxu0  ;;  %v2471_v57 = vpack.c.bf16 %v2449_v10, %v2448_v60  ;;  %v2454_v60 = vld [vmem:[#allocation2 + $0x1c8] sm:$0xff] }
 0x121   : > { %v5205_v49 = vadd.f32 %v1078_v56, %v805_v59  ;;  %v816_v47 = vadd.f32 %v4140_v20, %v5150_v51  ;;  %v2754_v51 = vld [vmem:[#allocation2 + $0x169] sm:$0xff]  ;;  %v2472_v20 = vpack.c.bf16 %v2451_v31, %v2450_v29 }
 0x122   : > { %v807_v55 = vpop.f32.mrf.mxu1  ;;  %v1081_v0 = vpop.f32.mrf.mxu0  ;;  %v2777_v43 = vpack.c.bf16 %v2755_v18, %v2754_v51  ;;  %v2455_v51 = vld [vmem:[#allocation2 + $0x1d0] sm:$0xff] }
 0x123   : > { %v5208_v35 = vadd.f32 %v4188_v21, %v816_v47  ;;  %v808_v38 = vadd.f32 %v807_v55, %v5156_v2  ;;  %v2757_v2 = vld [vmem:[#allocation2 + $0x191] sm:$0xff]  ;;  %v2760_v18 = vld [vmem:[#allocation2 + $0x1c9] sm:$0xff] }
 0x124   : > { %v4143_v16 = vpop.f32.mrf.mxu1  ;;  %v4191_v62 = vpop.f32.mrf.mxu0  ;;  %4430 = vmatmul.mubr.bf16.gmra.mxu1 %v2469_v22  ;;  %4478 = vmatmul.mubr.bf16.gmra.mxu0 %v2775_v8  ;;  %v2778_v21 = vpack.c.bf16 %v2757_v2, %v2756_v15 }
 0x125   : > { %v5211_v26 = vadd.f32 %v1081_v0, %v808_v38  ;;  %v829_v14 = vadd.f32 %v4143_v16, %v5160_v4  ;;  %4433 = vmatprep.mubr.bf16.mxu1 %v2470_v50  ;;  %4481 = vmatprep.mubr.bf16.mxu0 %v2776_v53  ;;  %v2453_v0 = vld [vmem:[#allocation2 + $0x1b0] sm:$0xff] }
 0x126   : > { %v820_v33 = vpop.f32.mrf.mxu1  ;;  %v1094_v11 = vpop.f32.mrf.mxu0 }
 0x127   : > { %v5214_v42 = vadd.f32 %v4191_v62, %v829_v14  ;;  %v821_v19 = vadd.f32 %v820_v33, %v5165_v27  ;;  %v2452_v27 = vld [vmem:[#allocation2 + $0x1a8] sm:$0xff]  ;;  %v2759_v62 = vld [vmem:[#allocation2 + $0x1b1] sm:$0xff] }
 0x128   : > { %v4144_v56 = vpop.f32.mrf.mxu1  ;;  %v4192_v46 = vpop.f32.mrf.mxu0  ;;  %v2473_v15 = vpack.c.bf16 %v2453_v0, %v2452_v27 }
 0x129   : > { %v5217_v59 = vadd.f32 %v1094_v11, %v821_v19  ;;  %v832_v4 = vadd.f32 %v4144_v56, %v5169_v34  ;;  %v2758_v34 = vld [vmem:[#allocation2 + $0x1a9] sm:$0xff]  ;;  %v2474_v56 = vpack.c.bf16 %v2455_v51, %v2454_v60 }
 0x12a   : > { %v823_v22 = vpop.f32.mrf.mxu1  ;;  %v1097_v8 = vpop.f32.mrf.mxu0  ;;  %v2779_v2 = vpack.c.bf16 %v2759_v62, %v2758_v34 }
 0x12b   : > { %v5220_v47 = vadd.f32 %v4192_v46, %v832_v4  ;;  %v824_v50 = vadd.f32 %v823_v22, %v5173_v40  ;;  %v2761_v40 = vld [vmem:[#allocation2 + $0x1d1] sm:$0xff] }
 0x12c   : > { %v4147_v53 = vpop.f32.mrf.mxu1  ;;  %v4195_v55 = vpop.f32.mrf.mxu0  ;;  %4434 = vmatmul.mubr.bf16.gmra.mxu1 %v2471_v57  ;;  %4482 = vmatmul.mubr.bf16.gmra.mxu0 %v2777_v43  ;;  %v2780_v46 = vpack.c.bf16 %v2761_v40, %v2760_v18 }
 0x12d   : > { %v5223_v38 = vadd.f32 %v1097_v8, %v824_v50  ;;  %v845_v16 = vadd.f32 %v4147_v53, %v5100_v37  ;;  %4437 = vmatprep.mubr.bf16.mxu1 %v2472_v20  ;;  %4485 = vmatprep.mubr.bf16.mxu0 %v2778_v21  ;;  %v2762_v53 = vld [vmem:[#allocation2 + $0x1e9] sm:$0xff] }
 0x12e   : > { %v836_v10 = vpop.f32.mrf.mxu1  ;;  %v1110_v14 = vpop.f32.mrf.mxu0 }
 0x12f   : > { %v5226_v29 = vadd.f32 %v4195_v55, %v845_v16  ;;  %v837_v33 = vadd.f32 %v836_v10, %v5108_v45  ;;  %v2456_v45 = vld [vmem:[#allocation2 + $0x1e8] sm:$0xff]  ;;  %v2763_v55 = vld [vmem:[#allocation2 + $0x1f1] sm:$0xff] }
 0x130   : > { %v4148_v11 = vpop.f32.mrf.mxu1  ;;  %v4196_v31 = vpop.f32.mrf.mxu0  ;;  %v2781_v10 = vpack.c.bf16 %v2763_v55, %v2762_v53 }
 0x131   : > { %v5229_v19 = vadd.f32 %v1110_v14, %v837_v33  ;;  %v848_v37 = vadd.f32 %v4148_v11, %v5112_v5  ;;  %v2457_v5 = vld [vmem:[#allocation2 + $0x1f0] sm:$0xff] }
 0x132   : > { %v839_v57 = vpop.f32.mrf.mxu1  ;;  %v1113_v43 = vpop.f32.mrf.mxu0  ;;  %v2475_v60 = vpack.c.bf16 %v2457_v5, %v2456_v45 }
 0x133   : > { %v5232_v4 = vadd.f32 %v4196_v31, %v848_v37  ;;  %v840_v20 = vadd.f32 %v839_v57, %v5116_v9 }
 0x134   : > { %v4151_v21 = vpop.f32.mrf.mxu1  ;;  %v4199_v22 = vpop.f32.mrf.mxu0  ;;  %4438 = vmatmul.mubr.bf16.gmra.mxu1 %v2473_v15  ;;  %4486 = vmatmul.mubr.bf16.gmra.mxu0 %v2779_v2  ;;  %v2766_v2 = vld [vmem:[#allocation2 + $0x229] sm:$0xff] }
 0x135   : > { %v5235_v8 = vadd.f32 %v1113_v43, %v840_v20  ;;  %v861_v50 = vadd.f32 %v4151_v21, %v5120_v12  ;;  %4441 = vmatprep.mubr.bf16.mxu1 %v2474_v56  ;;  %4489 = vmatprep.mubr.bf16.mxu0 %v2780_v46  ;;  %v4611_v20 = vld [vmem:[#allocation2 + $0x8] sm:$0xff] }
 0x136   : > { %v852_v27 = vpop.f32.mrf.mxu1  ;;  %v1126_v0 = vpop.f32.mrf.mxu0  ;;  %v2477_v21 = vpack.c.bf16 %v4611_v20, %v4611_v20 }
 0x137   : > { %v5238_v16 = vadd.f32 %v4199_v22, %v861_v50  ;;  %v853_v9 = vadd.f32 %v852_v27, %v5128_v30 }
 0x138   : > { %v4152_v34 = vpop.f32.mrf.mxu1  ;;  %v4200_v62 = vpop.f32.mrf.mxu0 }
 0x139   : > { %v5241_v14 = vadd.f32 %v1126_v0, %v853_v9  ;;  %v864_v51 = vadd.f32 %v4152_v34, %v5132_v36  ;;  %v2767_v36 = vld [vmem:[#allocation2 + $0x231] sm:$0xff] }
 0x13a   : > { %v855_v12 = vpop.f32.mrf.mxu1  ;;  %v1129_v18 = vpop.f32.mrf.mxu0  ;;  %v2783_v22 = vpack.c.bf16 %v2767_v36, %v2766_v2 }
 0x13b   : > { %v5244_v40 = vadd.f32 %v4200_v62, %v864_v51  ;;  %v856_v33 = vadd.f32 %v855_v12, %v5136_v44 }
 0x13c   : > { %v4155_v11 = vpop.f32.mrf.mxu1  ;;  %v4203_v31 = vpop.f32.mrf.mxu0  ;;  %4442 = vmatmul.mubr.bf16.gmra.mxu1 %v2475_v60  ;;  %4490 = vmatmul.mubr.bf16.gmra.mxu0 %v2781_v10 }
 0x13d   : > { %v5247_v15 = vadd.f32 %v1129_v18, %v856_v33  ;;  %v877_v30 = vadd.f32 %v4155_v11, %v5140_v32  ;;  %4445 = vmatprep.mubr.bf16.mxu1 %v5034_v3  ;;  %4493 = vmatprep.mubr.bf16.mxu0 %v5154_v13 }
 0x13e   : > { %v868_v37 = vpop.f32.mrf.mxu1  ;;  %v1142_v56 = vpop.f32.mrf.mxu0 }
 0x13f   : > { %v5252_v46 = vadd.f32 %v4203_v31, %v877_v30  ;;  %v869_v44 = vadd.f32 %v868_v37, %v5148_v61 }
 0x140   : > { %v4156_v57 = vpop.f32.mrf.mxu1  ;;  %v4204_v43 = vpop.f32.mrf.mxu0 }
 0x141   : > { %v5255_v45 = vadd.f32 %v1142_v56, %v869_v44  ;;  %v880_v32 = vadd.f32 %v4156_v57, %v5152_v54 }
 0x142   : > { %v871_v3 = vpop.f32.mrf.mxu1  ;;  %v1145_v50 = vpop.f32.mrf.mxu0 }
 0x143   : > { %v5258_v13 = vadd.f32 %v4204_v43, %v880_v32  ;;  %v872_v5 = vadd.f32 %v871_v3, %v5158_v1 }
 0x144   : > { %v4159_v53 = vpop.f32.mrf.mxu1  ;;  %v4207_v55 = vpop.f32.mrf.mxu0  ;;  %4446 = vmatmul.mubr.bf16.gmra.mxu1 %v2477_v21  ;;  %4494 = vmatmul.mubr.bf16.gmra.mxu0 %v2783_v22 }
 0x145   : > { %v5261_v61 = vadd.f32 %v1145_v50, %v872_v5  ;;  %v893_v27 = vadd.f32 %v4159_v53, %v5162_v6 }
 0x146   : > { %v884_v0 = vpop.f32.mrf.mxu1  ;;  %v1158_v9 = vpop.f32.mrf.mxu0 }
 0x147   : > { %v5264_v34 = vadd.f32 %v4207_v55, %v893_v27  ;;  %v885_v54 = vadd.f32 %v884_v0, %v5167_v28 }
 0x148   : > { %v4160_v62 = vpop.f32.mrf.mxu1  ;;  %v4208_v60 = vpop.f32.mrf.mxu0 }
 0x149   : > { %v5267_v10 = vadd.f32 %v1158_v9, %v885_v54  ;;  %v896_v1 = vadd.f32 %v4160_v62, %v5171_v7 }
 0x14a   : > { %v887_v51 = vpop.f32.mrf.mxu1  ;;  %v1161_v12 = vpop.f32.mrf.mxu0 }
 0x14b   : > { %v5270_v18 = vadd.f32 %v4208_v60, %v896_v1  ;;  %v888_v33 = vadd.f32 %v887_v51, %v5175_v41 }
 0x14c   : > { %v4227_v11 = vpop.f32.mrf.mxu1  ;;  %v4275_v6 = vpop.f32.mrf.mxu0 }
 0x14d   : > { %v5273_v31 = vadd.f32 %v1161_v12, %v888_v33  ;;  %v1481_v30 = vadd.f32 %v4227_v11, %v5178_v17 }
 0x14e   : > { %v1352_v2 = vpop.f32.mrf.mxu1  ;;  %v1658_v28 = vpop.f32.mrf.mxu0 }
 0x14f   : > { %v5276_v36 = vadd.f32 %v4275_v6, %v1481_v30  ;;  %v1479_v37 = vadd.f32 %v1352_v2, %v5181_v25 }
 0x150   : > { %v4228_v56 = vpop.f32.mrf.mxu1  ;;  %v4276_v7 = vpop.f32.mrf.mxu0 }
 0x151   : > { %v5279_v44 = vadd.f32 %v1658_v28, %v1479_v37  ;;  %v1482_v57 = vadd.f32 %v4228_v56, %v5184_v52 }
 0x152   : > { %v1355_v43 = vpop.f32.mrf.mxu1  ;;  %v1661_v41 = vpop.f32.mrf.mxu0 }
 0x153   : > { %v5282_v20 = vadd.f32 %v4276_v7, %v1482_v57  ;;  %v1480_v21 = vadd.f32 %v1355_v43, %v5187_v39 }
 0x154   : > { %v4231_v22 = vpop.f32.mrf.mxu1  ;;  %v4279_v17 = vpop.f32.mrf.mxu0 }
 0x155   : > { %v5285_v32 = vadd.f32 %v1661_v41, %v1480_v21  ;;  %v1485_v3 = vadd.f32 %v4231_v22, %v5190_v48 }
 0x156   : > { %v1368_v50 = vpop.f32.mrf.mxu1  ;;  %v1674_v25 = vpop.f32.mrf.mxu0 }
 0x157   : > { %v5288_v5 = vadd.f32 %v4279_v17, %v1485_v3  ;;  %v1483_v53 = vadd.f32 %v1368_v50, %v5193_v24 }
 0x158   : > { %v4232_v55 = vpop.f32.mrf.mxu1  ;;  %v4280_v52 = vpop.f32.mrf.mxu0 }
 0x159   : > { %v5291_v27 = vadd.f32 %v1674_v25, %v1483_v53  ;;  %v1486_v0 = vadd.f32 %v4232_v55, %v5196_v23 }
 0x15a   : > { %v1371_v9 = vpop.f32.mrf.mxu1  ;;  %v1677_v39 = vpop.f32.mrf.mxu0 }
 0x15b   : > { %v5294_v54 = vadd.f32 %v4280_v52, %v1486_v0  ;;  %v1484_v62 = vadd.f32 %v1371_v9, %v5199_v63 }
 0x15c   : > { %v4235_v60 = vpop.f32.mrf.mxu1  ;;  %v4283_v48 = vpop.f32.mrf.mxu0 }
 0x15d   : > { %v5297_v1 = vadd.f32 %v1677_v39, %v1484_v62  ;;  %v1489_v51 = vadd.f32 %v4235_v60, %v5202_v58 }
 0x15e   : > { %v1384_v12 = vpop.f32.mrf.mxu1  ;;  %v1690_v24 = vpop.f32.mrf.mxu0 }
 0x15f   : > { %v5300_v33 = vadd.f32 %v4283_v48, %v1489_v51  ;;  %v1487_v11 = vadd.f32 %v1384_v12, %v5205_v49 }
 0x160   : > { %v4236_v6 = vpop.f32.mrf.mxu1  ;;  %v4284_v23 = vpop.f32.mrf.mxu0 }
 0x161   : > { %v5303_v30 = vadd.f32 %v1690_v24, %v1487_v11  ;;  %v1490_v2 = vadd.f32 %v4236_v6, %v5208_v35 }
 0x162   : > { %v1387_v28 = vpop.f32.mrf.mxu1  ;;  %v1693_v63 = vpop.f32.mrf.mxu0 }
 0x163   : > { %v5306_v37 = vadd.f32 %v4284_v23, %v1490_v2  ;;  %v1488_v56 = vadd.f32 %v1387_v28, %v5211_v26 }
 0x164   : > { %v4239_v7 = vpop.f32.mrf.mxu1  ;;  %v4287_v58 = vpop.f32.mrf.mxu0 }
 0x165   : > { %v5309_v57 = vadd.f32 %v1693_v63, %v1488_v56  ;;  %v1493_v43 = vadd.f32 %v4239_v7, %v5214_v42 }
 0x166   : > { %v1400_v41 = vpop.f32.mrf.mxu1  ;;  %v1706_v49 = vpop.f32.mrf.mxu0 }
 0x167   : > { %v5312_v21 = vadd.f32 %v4287_v58, %v1493_v43  ;;  %v1491_v22 = vadd.f32 %v1400_v41, %v5217_v59 }
 0x168   : > { %v4240_v17 = vpop.f32.mrf.mxu1  ;;  %v4288_v35 = vpop.f32.mrf.mxu0 }
 0x169   : > { %v5315_v3 = vadd.f32 %v1706_v49, %v1491_v22  ;;  %v1494_v50 = vadd.f32 %v4240_v17, %v5220_v47 }
 0x16a   : > { %v1403_v25 = vpop.f32.mrf.mxu1  ;;  %v1709_v26 = vpop.f32.mrf.mxu0 }
 0x16b   : > { %v5318_v53 = vadd.f32 %v4288_v35, %v1494_v50  ;;  %v1492_v55 = vadd.f32 %v1403_v25, %v5223_v38 }
 0x16c   : > { %v4243_v52 = vpop.f32.mrf.mxu1  ;;  %v4291_v42 = vpop.f32.mrf.mxu0 }
 0x16d   : > { %v5321_v0 = vadd.f32 %v1709_v26, %v1492_v55  ;;  %v1497_v9 = vadd.f32 %v4243_v52, %v5226_v29 }
 0x16e   : > { %v1416_v39 = vpop.f32.mrf.mxu1  ;;  %v1722_v59 = vpop.f32.mrf.mxu0 }
 0x16f   : > { %v5324_v62 = vadd.f32 %v4291_v42, %v1497_v9  ;;  %v1495_v60 = vadd.f32 %v1416_v39, %v5229_v19 }
 0x170   : > { %v4244_v48 = vpop.f32.mrf.mxu1  ;;  %v4292_v47 = vpop.f32.mrf.mxu0 }
 0x171   : > { %v5327_v51 = vadd.f32 %v1722_v59, %v1495_v60  ;;  %v1498_v12 = vadd.f32 %v4244_v48, %v5232_v4 }
 0x172   : > { %v1419_v24 = vpop.f32.mrf.mxu1  ;;  %v1725_v38 = vpop.f32.mrf.mxu0 }
 0x173   : > { %v5330_v11 = vadd.f32 %v4292_v47, %v1498_v12  ;;  %v1496_v6 = vadd.f32 %v1419_v24, %v5235_v8 }
 0x174   : > { %v4247_v23 = vpop.f32.mrf.mxu1  ;;  %v4295_v29 = vpop.f32.mrf.mxu0 }
 0x175   : > { %v5333_v2 = vadd.f32 %v1725_v38, %v1496_v6  ;;  %v1501_v28 = vadd.f32 %v4247_v23, %v5238_v16 }
 0x176   : > { %v1432_v63 = vpop.f32.mrf.mxu1  ;;  %v1738_v19 = vpop.f32.mrf.mxu0 }
 0x177   : > { %v5336_v56 = vadd.f32 %v4295_v29, %v1501_v28  ;;  %v1499_v7 = vadd.f32 %v1432_v63, %v5241_v14 }
 0x178   : > { %v4248_v58 = vpop.f32.mrf.mxu1  ;;  %v4296_v4 = vpop.f32.mrf.mxu0 }
 0x179   : > { %v5339_v43 = vadd.f32 %v1738_v19, %v1499_v7  ;;  %v1502_v41 = vadd.f32 %v4248_v58, %v5244_v40 }
 0x17a   : > { %v1435_v49 = vpop.f32.mrf.mxu1  ;;  %v1741_v8 = vpop.f32.mrf.mxu0 }
 0x17b   : > { %5602 = vst [vmem:[#allocation3_spill] sm:$0xff] %v5339_v43  ;;  %v5342_v22 = vadd.f32 %v4296_v4, %v1502_v41  ;;  %v1500_v17 = vadd.f32 %v1435_v49, %v5247_v15 }
 0x17c   : > { %v4251_v35 = vpop.f32.mrf.mxu1  ;;  %v4299_v16 = vpop.f32.mrf.mxu0 }
 0x17d   : > { %5603 = vst [vmem:[#allocation4_spill] sm:$0xff] %v5342_v22  ;;  %v5345_v50 = vadd.f32 %v1741_v8, %v1500_v17  ;;  %v1505_v25 = vadd.f32 %v4251_v35, %v5252_v46 }
 0x17e   : > { %v1448_v26 = vpop.f32.mrf.mxu1  ;;  %v1754_v14 = vpop.f32.mrf.mxu0 }
 0x17f   : > { %5604 = vst [vmem:[#allocation5_spill] sm:$0xff] %v5345_v50  ;;  %v5348_v55 = vadd.f32 %v4299_v16, %v1505_v25  ;;  %v1503_v52 = vadd.f32 %v1448_v26, %v5255_v45 }
 0x180   : > { %v4252_v42 = vpop.f32.mrf.mxu1  ;;  %v4300_v40 = vpop.f32.mrf.mxu0 }
 0x181   : > { %v5351_v9 = vadd.f32 %v1754_v14, %v1503_v52  ;;  %v1506_v39 = vadd.f32 %v4252_v42, %v5258_v13 }
 0x182   : > { %v1451_v59 = vpop.f32.mrf.mxu1  ;;  %v1757_v15 = vpop.f32.mrf.mxu0 }
 0x183   : > { %5605 = vst [vmem:[#allocation6_spill] sm:$0xff] %v5351_v9  ;;  %v5354_v60 = vadd.f32 %v4300_v40, %v1506_v39  ;;  %v1504_v48 = vadd.f32 %v1451_v59, %v5261_v61 }
 0x184   : > { %v4255_v47 = vpop.f32.mrf.mxu1  ;;  %v4303_v46 = vpop.f32.mrf.mxu0 }
 0x185   : > { %5606 = vst [vmem:[#allocation7_spill] sm:$0xff] %v5354_v60  ;;  %v5357_v12 = vadd.f32 %v1757_v15, %v1504_v48  ;;  %v1509_v24 = vadd.f32 %v4255_v47, %v5264_v34 }
 0x186   : > { %v1464_v38 = vpop.f32.mrf.mxu1  ;;  %v1770_v45 = vpop.f32.mrf.mxu0 }
 0x187   : > { %5607 = vst [vmem:[#allocation8_spill] sm:$0xff] %v5357_v12  ;;  %v5360_v6 = vadd.f32 %v4303_v46, %v1509_v24  ;;  %v1507_v23 = vadd.f32 %v1464_v38, %v5267_v10 }
 0x188   : > { %v4256_v29 = vpop.f32.mrf.mxu1  ;;  %v4304_v13 = vpop.f32.mrf.mxu0 }
 0x189   : > { %v5363_v28 = vadd.f32 %v1770_v45, %v1507_v23  ;;  %v1510_v63 = vadd.f32 %v4256_v29, %v5270_v18 }
 0x18a   : > { %v1467_v19 = vpop.f32.mrf.mxu1  ;;  %v1773_v61 = vpop.f32.mrf.mxu0 }
 0x18b   : > { %5608 = vst [vmem:[#allocation9_spill] sm:$0xff] %v5363_v28  ;;  %v5366_v7 = vadd.f32 %v4304_v13, %v1510_v63  ;;  %v1508_v58 = vadd.f32 %v1467_v19, %v5273_v31 }
 0x18c   : > { %v4323_v4 = vpop.f32.mrf.mxu1  ;;  %v4371_v34 = vpop.f32.mrf.mxu0 }
 0x18d   : > { %5609 = vst [vmem:[#allocation10_spill] sm:$0xff] %v5366_v7  ;;  %v5369_v41 = vadd.f32 %v1773_v61, %v1508_v58  ;;  %v2093_v49 = vadd.f32 %v4323_v4, %v5276_v36 }
 0x18e   : > { %v1964_v8 = vpop.f32.mrf.mxu1  ;;  %v2271_v10 = vpop.f32.mrf.mxu0 }
 0x18f   : > { %5610 = vst [vmem:[#allocation11_spill] sm:$0xff] %v5369_v41  ;;  %v5372_v17 = vadd.f32 %v4371_v34, %v2093_v49  ;;  %v2091_v35 = vadd.f32 %v1964_v8, %v5279_v44 }
 0x190   : > { %v5375_v16 = vpop.f32.mrf.mxu1  ;;  %v5377_v18 = vpop.f32.mrf.mxu0 }
 0x191   : > { %v5379_v25 = vadd.f32 %v2271_v10, %v2091_v35 }
 0x192   : > { %v5381_v26 = vpop.f32.mrf.mxu1  ;;  %v5383_v31 = vpop.f32.mrf.mxu0 }
 0x194   : > { %v4327_v14 = vpop.f32.mrf.mxu1  ;;  %v4375_v52 = vpop.f32.mrf.mxu0 }
 0x195   : > { %v2097_v36 = vadd.f32 %v4327_v14, %v5288_v5 }
 0x196   : > { %v5386_v42 = vpop.f32.mrf.mxu1  ;;  %v5388_v40 = vpop.f32.mrf.mxu0 }
 0x197   : > { %v5390_v39 = vadd.f32 %v4375_v52, %v2097_v36 }
 0x198   : > { %v5392_v44 = vpop.f32.mrf.mxu1  ;;  %v5394_v59 = vpop.f32.mrf.mxu0 }
 0x19a   : > { %v5396_v15 = vpop.f32.mrf.mxu1  ;;  %v5398_v48 = vpop.f32.mrf.mxu0 }
 0x19c   : > { %v4331_v47 = vpop.f32.mrf.mxu1  ;;  %v4379_v46 = vpop.f32.mrf.mxu0 }
 0x19d   : > { %v2101_v24 = vadd.f32 %v4331_v47, %v5300_v33 }
 0x19e   : > { %v5401_v38 = vpop.f32.mrf.mxu1  ;;  %v5403_v5 = vpop.f32.mrf.mxu0 }
 0x19f   : > { %v5405_v45 = vadd.f32 %v4379_v46, %v2101_v24 }
 0x1a0   : > { %v5407_v23 = vpop.f32.mrf.mxu1  ;;  %v5409_v29 = vpop.f32.mrf.mxu0 }
 0x1a2   : > { %v5411_v13 = vpop.f32.mrf.mxu1  ;;  %v5413_v63 = vpop.f32.mrf.mxu0 }
 0x1a4   : > { %v4335_v19 = vpop.f32.mrf.mxu1  ;;  %v4383_v61 = vpop.f32.mrf.mxu0 }
 0x1a5   : > { %v2105_v58 = vadd.f32 %v4335_v19, %v5312_v21 }
 0x1a6   : > { %v5416_v4 = vpop.f32.mrf.mxu1  ;;  %v5418_v33 = vpop.f32.mrf.mxu0 }
 0x1a7   : > { %v5420_v34 = vadd.f32 %v4383_v61, %v2105_v58 }
 0x1a8   : > { %v5422_v49 = vpop.f32.mrf.mxu1  ;;  %v5424_v8 = vpop.f32.mrf.mxu0 }
 0x1aa   : > { %v5426_v10 = vpop.f32.mrf.mxu1  ;;  %v5428_v35 = vpop.f32.mrf.mxu0 }
 0x1ac   : > { %v4339_v14 = vpop.f32.mrf.mxu1  ;;  %v4387_v52 = vpop.f32.mrf.mxu0 }
 0x1ad   : > { %v2109_v36 = vadd.f32 %v4339_v14, %v5324_v62 }
 0x1ae   : > { %v5431_v47 = vpop.f32.mrf.mxu1  ;;  %v5433_v21 = vpop.f32.mrf.mxu0 }
 0x1af   : > { %v5435_v46 = vadd.f32 %v4387_v52, %v2109_v36 }
 0x1b0   : > { %v5437_v24 = vpop.f32.mrf.mxu1  ;;  %v5439_v19 = vpop.f32.mrf.mxu0 }
 0x1b2   : > { %v5441_v61 = vpop.f32.mrf.mxu1  ;;  %v5443_v58 = vpop.f32.mrf.mxu0 }
 0x1b3   : > { %5611 = vst [vmem:[#allocation12_spill] sm:$0xff] %v5443_v58 }
 0x1b4   : > { %v4343_v41 = vpop.f32.mrf.mxu1  ;;  %v4391_v7 = vpop.f32.mrf.mxu0 }
 0x1b5   : > { %v2113_v28 = vadd.f32 %v4343_v41, %v5336_v56 }
 0x1b6   : > { %v5446_v12 = vpop.f32.mrf.mxu1  ;;  %v5448_v62 = vpop.f32.mrf.mxu0 }
 0x1b7   : > { %5612 = vst [vmem:[#allocation13_spill] sm:$0xff] %v5448_v62  ;;  %v5450_v14 = vadd.f32 %v4391_v7, %v2113_v28 }
 0x1b8   : > { %v5452_v52 = vpop.f32.mrf.mxu1  ;;  %v5454_v36 = vpop.f32.mrf.mxu0 }
 0x1b9   : > { %5613 = vst [vmem:[#allocation14_spill] sm:$0xff] %v5450_v14  ;;  %5614 = vst [vmem:[#allocation15_spill] sm:$0xff] %v5452_v52 }
 0x1ba   : > { %5615 = vst [vmem:[#allocation16_spill] sm:$0xff] %v5454_v36  ;;  %v5456_v60 = vpop.f32.mrf.mxu1  ;;  %v5458_v9 = vpop.f32.mrf.mxu0 }
 0x1bb   : > { %5616 = vst [vmem:[#allocation17_spill] sm:$0xff] %v5456_v60  ;;  %5617 = vst [vmem:[#allocation18_spill] sm:$0xff] %v5458_v9 }
 0x1bc   : > { %v4347_v50 = vpop.f32.mrf.mxu1  ;;  %v4395_v22 = vpop.f32.mrf.mxu0 }
 0x1bd   : > { %v2117_v43 = vadd.f32 %v4347_v50, %v5348_v55 }
 0x1be   : > { %v5461_v58 = vpop.f32.mrf.mxu1  ;;  %v5463_v56 = vpop.f32.mrf.mxu0 }
 0x1bf   : > { %5618 = vst [vmem:[#allocation19_spill] sm:$0xff] %v5463_v56  ;;  %v5465_v41 = vadd.f32 %v4395_v22, %v2117_v43 }
 0x1c0   : > { %v5467_v28 = vpop.f32.mrf.mxu1  ;;  %v5469_v7 = vpop.f32.mrf.mxu0 }
 0x1c1   : > { %5619 = vst [vmem:[#allocation20_spill] sm:$0xff] %v5465_v41  ;;  %5620 = vst [vmem:[#allocation21_spill] sm:$0xff] %v5467_v28 }
 0x1c2   : > { %5621 = vst [vmem:[#allocation22_spill] sm:$0xff] %v5469_v7  ;;  %v5471_v14 = vpop.f32.mrf.mxu1  ;;  %v5473_v36 = vpop.f32.mrf.mxu0 }
 0x1c3   : > { %5622 = vst [vmem:[#allocation23_spill] sm:$0xff] %v5471_v14  ;;  %5623 = vst [vmem:[#allocation24_spill] sm:$0xff] %v5473_v36  ;;  %v2094_v36 = vadd.f32 %v5375_v16, %v5282_v20  ;;  %v2095_v20 = vadd.f32 %v5386_v42, %v5291_v27 }
 0x1c4   : > { %v4351_v60 = vpop.f32.mrf.mxu1  ;;  %v4399_v9 = vpop.f32.mrf.mxu0 }
 0x1c5   : > { %v2121_v62 = vadd.f32 %v4351_v60, %v5360_v6  ;;  %v2092_v60 = vadd.f32 %v5381_v26, %v5285_v32  ;;  %v2098_v32 = vadd.f32 %v5392_v44, %v5294_v54  ;;  %v2402_v42 = vadd.f32 %v5388_v40, %v2095_v20 }
 0x1c6   : > { %v5476_v52 = vpop.f32.mrf.mxu1  ;;  %v5478_v50 = vpop.f32.mrf.mxu0 }
 0x1c7   : > { %5624 = vst [vmem:[#allocation25_spill] sm:$0xff] %v5476_v52  ;;  %5625 = vst [vmem:[#allocation26_spill] sm:$0xff] %v5478_v50  ;;  %v5480_v55 = vadd.f32 %v4399_v9, %v2121_v62  ;;  %v2401_v9 = vadd.f32 %v5377_v18, %v2094_v36  ;;  %v2405_v44 = vadd.f32 %v5394_v59, %v2098_v32 }
 0x1c8   : > { %v5482_v43 = vpop.f32.mrf.mxu1  ;;  %v5484_v22 = vpop.f32.mrf.mxu0 }
 0x1c9   : > { %5626 = vst [vmem:[#allocation27_spill] sm:$0xff] %v5480_v55  ;;  %5627 = vst [vmem:[#allocation28_spill] sm:$0xff] %v5482_v43 }
 0x1ca   : > { %5628 = vst [vmem:[#allocation29_spill] sm:$0xff] %v5484_v22  ;;  %v5486_v41 = vpop.f32.mrf.mxu1  ;;  %v5488_v7 = vpop.f32.mrf.mxu0 }
 0x1cb   : > { %5629 = vst [vmem:[#allocation30_spill] sm:$0xff] %v5486_v41  ;;  %5630 = vst [vmem:[#allocation31_spill] sm:$0xff] %v5488_v7  ;;  %v2399_v7 = vadd.f32 %v5383_v31, %v2092_v60 }
 0x1cc   : > { %v4419_v14 = vpop.f32.mrf.mxu1  ;;  %v4467_v56 = vpop.f32.mrf.mxu0 }
 0x1cd   : > { %v2706_v62 = vadd.f32 %v4419_v14, %v5372_v17  ;;  %v2096_v17 = vadd.f32 %v5396_v15, %v5297_v1 }
 0x1ce   : > { %v2577_v6 = vpop.f32.mrf.mxu1  ;;  %v2883_v50 = vpop.f32.mrf.mxu0 }
 0x1cf   : > { %v2704_v55 = vadd.f32 %v2577_v6, %v5379_v25  ;;  %v3012_v52 = vadd.f32 %v4467_v56, %v2706_v62 }
 0x1d0   : > { %v4420_v22 = vpop.f32.mrf.mxu1  ;;  %v4468_v41 = vpop.f32.mrf.mxu0 }
 0x1d1   : > { %v2707_v43 = vadd.f32 %v4420_v22, %v2401_v9  ;;  %v3010_v18 = vadd.f32 %v2883_v50, %v2704_v55  ;;  %v2403_v55 = vadd.f32 %v5398_v48, %v2096_v17  ;;  %v3241_v60 = vmul.f32 %v3012_v52, %v3012_v52 }
 0x1d2   : > { %v2580_v16 = vpop.f32.mrf.mxu1  ;;  %v2886_v26 = vpop.f32.mrf.mxu0  ;;  %v2102_v9 = vadd.f32 %v5407_v23, %v5306_v37 }
 0x1d3   : > { %v3013_v36 = vadd.f32 %v4468_v41, %v2707_v43  ;;  %v2705_v28 = vadd.f32 %v2580_v16, %v2399_v7  ;;  %v3239_v15 = vmul.f32 %v3010_v18, %v3010_v18  ;;  %v2099_v43 = vadd.f32 %v5401_v38, %v5303_v30 }
 0x1d4   : > { %v4423_v27 = vpop.f32.mrf.mxu1  ;;  %v4471_v25 = vpop.f32.mrf.mxu0 }
 0x1d5   : > { %v3747_v31 = vpack.c.bf16 %v3013_v36, %v3012_v52  ;;  %v3011_v54 = vadd.f32 %v2886_v26, %v2705_v28  ;;  %v2710_v14 = vadd.f32 %v4423_v27, %v5390_v39  ;;  %v3242_v62 = vmul.f32 %v3013_v36, %v3013_v36 }
 0x1d6   : > { %v2593_v56 = vpop.f32.mrf.mxu1  ;;  %v2899_v1 = vpop.f32.mrf.mxu0  ;;  %v2406_v17 = vadd.f32 %v5403_v5, %v2099_v43  ;;  %v2106_v43 = vadd.f32 %v5422_v49, %v5318_v53  ;;  %v2104_v53 = vadd.f32 %v5426_v10, %v5321_v0 }
 0x1d7   : > { %3834 = vst [vmem:[%s5509_s24 + $0x8] sm:$0xff] %v3747_v31   ;;  %v3742_v41 = vpack.c.bf16 %v3011_v54, %v3010_v18  ;;  %v3202_v7 = vadd.f32 %v3011_v54, %v3010_v18  ;;  %v3240_v50 = vmul.f32 %v3011_v54, %v3011_v54  ;;  %v2708_v28 = vadd.f32 %v2593_v56, %v2402_v42 }
 0x1d8   : > { %v4424_v22 = vpop.f32.mrf.mxu1  ;;  %v4472_v40 = vpop.f32.mrf.mxu0  ;;  %v3016_v20 = vadd.f32 %v4471_v25, %v2710_v14  ;;  %v2411_v10 = vadd.f32 %v5428_v35, %v2104_v53 }
 0x1d9   : > { %3743 = vst [vmem:[%s5509_s24] sm:$0xff] %v3742_v41   ;;  %v3203_v59 = vadd.f32 %v3202_v7, %v3012_v52  ;;  %v3271_v6 = vadd.f32 %v3240_v50, %v3239_v15  ;;  %v2711_v39 = vadd.f32 %v4424_v22, %v2405_v44  ;;  %v3014_v32 = vadd.f32 %v2899_v1, %v2708_v28 }
 0x1da   : > { %v2596_v16 = vpop.f32.mrf.mxu1  ;;  %v2902_v26 = vpop.f32.mrf.mxu0  ;;  %v2100_v52 = vadd.f32 %v5411_v13, %v5309_v57 }
 0x1db   : > { %v3272_v48 = vadd.f32 %v3271_v6, %v3241_v60  ;;  %v3204_v18 = vadd.f32 %v3203_v59, %v3013_v36  ;;  %v3017_v30 = vadd.f32 %v4472_v40, %v2711_v39  ;;  %v2709_v38 = vadd.f32 %v2596_v16, %v2403_v55 }
 0x1dc   : > { %v4427_v27 = vpop.f32.mrf.mxu1  ;;  %v4475_v31 = vpop.f32.mrf.mxu0  ;;  %v3243_v42 = vmul.f32 %v3014_v32, %v3014_v32  ;;  %v2409_v36 = vadd.f32 %v5409_v29, %v2102_v9  ;;  %v2407_v50 = vadd.f32 %v5413_v63, %v2100_v52  ;;  %v2103_v55 = vadd.f32 %v5416_v4, %v5315_v3 }
 0x1dd   : > { %v3205_v54 = vadd.f32 %v3204_v18, %v3014_v32  ;;  %v3273_v37 = vadd.f32 %v3272_v48, %v3242_v62  ;;  %v3757_v23 = vpack.c.bf16 %v3017_v30, %v3016_v20  ;;  %v3015_v25 = vadd.f32 %v2902_v26, %v2709_v38 }
 0x1de   : > { %v2609_v44 = vpop.f32.mrf.mxu1  ;;  %v2915_v14 = vpop.f32.mrf.mxu0  ;;  %v2714_v1 = vadd.f32 %v4427_v27, %v5405_v45  ;;  %v3245_v29 = vmul.f32 %v3016_v20, %v3016_v20  ;;  %v3246_v62 = vmul.f32 %v3017_v30, %v3017_v30  ;;  %v2410_v4 = vadd.f32 %v5418_v33, %v2103_v55 }
 0x1df   : > { %v3274_v56 = vadd.f32 %v3273_v37, %v3243_v42  ;;  %3836 = vst [vmem:[%s5509_s24 + $0x18] sm:$0xff] %v3757_v23   ;;  %v2712_v5 = vadd.f32 %v2609_v44, %v2406_v17  ;;  %v3752_v15 = vpack.c.bf16 %v3015_v25, %v3014_v32  ;;  %v3206_v41 = vadd.f32 %v3205_v54, %v3015_v25 }
 0x1e0   : > { %v3244_v57 = vmul.f32 %v3015_v25, %v3015_v25  ;;  %v4428_v13 = vpop.f32.mrf.mxu1  ;;  %v4476_v7 = vpop.f32.mrf.mxu0  ;;  %v3020_v6 = vadd.f32 %v4475_v31, %v2714_v1  ;;  %v2413_v26 = vadd.f32 %v5424_v8, %v2106_v43  ;;  %v2107_v8 = vadd.f32 %v5431_v47, %v5327_v51 }
 0x1e1   : > { %v2715_v28 = vadd.f32 %v4428_v13, %v2409_v36  ;;  %3835 = vst [vmem:[%s5509_s24 + $0x10] sm:$0xff] %v3752_v15   ;;  %v3207_v22 = vadd.f32 %v3206_v41, %v3016_v20  ;;  %v3018_v45 = vadd.f32 %v2915_v14, %v2712_v5  ;;  %v2110_v23 = vadd.f32 %v5437_v24, %v5330_v11 }
 0x1e2   : > { %v3275_v40 = vadd.f32 %v3274_v56, %v3244_v57  ;;  %v2612_v60 = vpop.f32.mrf.mxu1  ;;  %v2918_v59 = vpop.f32.mrf.mxu0  ;;  %v3249_v44 = vmul.f32 %v3020_v6, %v3020_v6  ;;  %v2414_v47 = vadd.f32 %v5433_v21, %v2107_v8  ;;  %v2108_v11 = vadd.f32 %v5441_v61, %v5333_v2  ;;  %v5631_v61 = vld [vmem:[#allocation12_spill] sm:$0xff] }
 0x1e3   : > { %v3021_v39 = vadd.f32 %v4476_v7, %v2715_v28  ;;  %v2713_v9 = vadd.f32 %v2612_v60, %v2407_v50  ;;  %v3208_v32 = vadd.f32 %v3207_v22, %v3017_v30  ;;  %v3247_v18 = vmul.f32 %v3018_v45, %v3018_v45 }
 0x1e4   : > { %v3276_v63 = vadd.f32 %v3275_v40, %v3245_v29  ;;  %v4431_v16 = vpop.f32.mrf.mxu1  ;;  %v4479_v3 = vpop.f32.mrf.mxu0  ;;  %v2417_v55 = vadd.f32 %v5439_v19, %v2110_v23  ;;  %v5638_v23 = vld [vmem:[#allocation16_spill] sm:$0xff] }
 0x1e5   : > { %v3767_v49 = vpack.c.bf16 %v3021_v39, %v3020_v6  ;;  %v3019_v20 = vadd.f32 %v2918_v59, %v2713_v9  ;;  %v3209_v48 = vadd.f32 %v3208_v32, %v3018_v45  ;;  %v2718_v31 = vadd.f32 %v4431_v16, %v5420_v34  ;;  %v5633_v32 = vld [vmem:[#allocation4_spill] sm:$0xff]  ;;  %v5634_v16 = vld [vmem:[#allocation15_spill] sm:$0xff] }
 0x1e6   : > { %v3277_v38 = vadd.f32 %v3276_v63, %v3246_v62  ;;  %v2625_v17 = vpop.f32.mrf.mxu1  ;;  %v2931_v52 = vpop.f32.mrf.mxu0  ;;  %v3250_v57 = vmul.f32 %v3021_v39, %v3021_v39  ;;  %v2415_v62 = vadd.f32 %v5631_v61, %v2108_v11  ;;  %v5632_v63 = vld [vmem:[#allocation3_spill] sm:$0xff] }
 0x1e7   : > { %3838 = vst [vmem:[%s5509_s24 + $0x28] sm:$0xff] %v3767_v49   ;;  %v3762_v27 = vpack.c.bf16 %v3019_v20, %v3018_v45  ;;  %v3248_v30 = vmul.f32 %v3019_v20, %v3019_v20  ;;  %v2716_v54 = vadd.f32 %v2625_v17, %v2410_v4  ;;  %v3210_v42 = vadd.f32 %v3209_v48, %v3019_v20 }
 0x1e8   : > { %v3278_v33 = vadd.f32 %v3277_v38, %v3247_v18  ;;  %v4432_v37 = vpop.f32.mrf.mxu1  ;;  %v4480_v0 = vpop.f32.mrf.mxu0  ;;  %v3024_v5 = vadd.f32 %v4479_v3, %v2718_v31  ;;  %v2111_v19 = vadd.f32 %v5446_v12, %v5632_v63  ;;  %v2114_v3 = vadd.f32 %v5634_v16, %v5633_v32  ;;  %v5645_v16 = vld [vmem:[#allocation8_spill] sm:$0xff] }
 0x1e9   : > { %3837 = vst [vmem:[%s5509_s24 + $0x20] sm:$0xff] %v3762_v27   ;;  %v2719_v25 = vadd.f32 %v4432_v37, %v2413_v26  ;;  %v3211_v14 = vadd.f32 %v3210_v42, %v3020_v6  ;;  %v3022_v56 = vadd.f32 %v2931_v52, %v2716_v54  ;;  %v5635_v54 = vld [vmem:[#allocation13_spill] sm:$0xff] }
 0x1ea   : > { %v3279_v36 = vadd.f32 %v3278_v33, %v3248_v30  ;;  %v2628_v34 = vpop.f32.mrf.mxu1  ;;  %v2934_v1 = vpop.f32.mrf.mxu0  ;;  %v3253_v53 = vmul.f32 %v3024_v5, %v3024_v5  ;;  %v2418_v33 = vadd.f32 %v5635_v54, %v2111_v19  ;;  %v5636_v42 = vld [vmem:[#allocation5_spill] sm:$0xff]  ;;  %v5644_v19 = vld [vmem:[#allocation19_spill] sm:$0xff] }
 0x1eb   : > { %v3025_v15 = vadd.f32 %v4480_v0, %v2719_v25  ;;  %v2717_v41 = vadd.f32 %v2628_v34, %v2411_v10  ;;  %v3212_v13 = vadd.f32 %v3211_v14, %v3021_v39  ;;  %v3251_v28 = vmul.f32 %v3022_v56, %v3022_v56  ;;  %v5637_v37 = vld [vmem:[#allocation17_spill] sm:$0xff] }
 0x1ec   : > { %v3280_v35 = vadd.f32 %v3279_v36, %v3249_v44  ;;  %v4435_v7 = vpop.f32.mrf.mxu1  ;;  %v4483_v51 = vpop.f32.mrf.mxu0  ;;  %v2112_v0 = vadd.f32 %v5637_v37, %v5636_v42  ;;  %v2421_v25 = vadd.f32 %v5638_v23, %v2114_v3  ;;  %v5646_v3 = vld [vmem:[#allocation23_spill] sm:$0xff]  ;;  %v5651_v23 = vld [vmem:[#allocation25_spill] sm:$0xff] }
 0x1ed   : > { %v3777_v24 = vpack.c.bf16 %v3025_v15, %v3024_v5  ;;  %v3023_v50 = vadd.f32 %v2934_v1, %v2717_v41  ;;  %v3213_v43 = vadd.f32 %v3212_v13, %v3022_v56  ;;  %v2722_v59 = vadd.f32 %v4435_v7, %v5435_v46 }
 0x1ee   : > { %v3281_v29 = vadd.f32 %v3280_v35, %v3250_v57  ;;  %v2641_v22 = vpop.f32.mrf.mxu1  ;;  %v2947_v40 = vpop.f32.mrf.mxu0  ;;  %v3254_v52 = vmul.f32 %v3025_v15, %v3025_v15 }
 0x1ef   : > { %3840 = vst [vmem:[%s5509_s24 + $0x38] sm:$0xff] %v3777_v24   ;;  %v3772_v45 = vpack.c.bf16 %v3023_v50, %v3022_v56  ;;  %v3252_v60 = vmul.f32 %v3023_v50, %v3023_v50  ;;  %v2720_v6 = vadd.f32 %v2641_v22, %v2414_v47  ;;  %v3214_v39 = vadd.f32 %v3213_v43, %v3023_v50  ;;  %v5640_v47 = vld [vmem:[#allocation18_spill] sm:$0xff]  ;;  %v5643_v43 = vld [vmem:[#allocation21_spill] sm:$0xff] }
 0x1f0   : > { %v3282_v21 = vadd.f32 %v3281_v29, %v3251_v28  ;;  %v4436_v9 = vpop.f32.mrf.mxu1  ;;  %v4484_v2 = vpop.f32.mrf.mxu0  ;;  %v3028_v18 = vadd.f32 %v4483_v51, %v2722_v59  ;;  %v2419_v11 = vadd.f32 %v5640_v47, %v2112_v0  ;;  %v5641_v24 = vld [vmem:[#allocation6_spill] sm:$0xff]  ;;  %v5649_v0 = vld [vmem:[#allocation24_spill] sm:$0xff] }
 0x1f1   : > { %3839 = vst [vmem:[%s5509_s24 + $0x30] sm:$0xff] %v3772_v45   ;;  %v2723_v4 = vadd.f32 %v4436_v9, %v2417_v55  ;;  %v3215_v49 = vadd.f32 %v3214_v39, %v3024_v5  ;;  %v3026_v26 = vadd.f32 %v2947_v40, %v2720_v6  ;;  %v2115_v50 = vadd.f32 %v5461_v58, %v5641_v24  ;;  %v5642_v55 = vld [vmem:[#allocation7_spill] sm:$0xff] }
 0x1f2   : > { %v3283_v20 = vadd.f32 %v3282_v21, %v3252_v60  ;;  %v2644_v46 = vpop.f32.mrf.mxu1  ;;  %v2950_v48 = vpop.f32.mrf.mxu0  ;;  %v2118_v28 = vadd.f32 %v5643_v43, %v5642_v55  ;;  %v3257_v22 = vmul.f32 %v3028_v18, %v3028_v18  ;;  %v5654_v55 = vld [vmem:[#allocation26_spill] sm:$0xff] }
 0x1f3   : > { %v3029_v38 = vadd.f32 %v4484_v2, %v2723_v4  ;;  %v2721_v17 = vadd.f32 %v2644_v46, %v2415_v62  ;;  %v3216_v30 = vadd.f32 %v3215_v49, %v3025_v15  ;;  %v3255_v14 = vmul.f32 %v3026_v26, %v3026_v26  ;;  %v5639_v15 = vld [vmem:[#allocation14_spill] sm:$0xff] }
 0x1f4   : > { %v3284_v27 = vadd.f32 %v3283_v20, %v3253_v53  ;;  %v4439_v31 = vpop.f32.mrf.mxu1  ;;  %v4487_v12 = vpop.f32.mrf.mxu0  ;;  %v2422_v32 = vadd.f32 %v5644_v19, %v2115_v50  ;;  %v2116_v4 = vadd.f32 %v5646_v3, %v5645_v16  ;;  %v5647_v20 = vld [vmem:[#allocation22_spill] sm:$0xff] }
 0x1f5   : > { %v3787_v10 = vpack.c.bf16 %v3029_v38, %v3028_v18  ;;  %v3027_v8 = vadd.f32 %v2950_v48, %v2721_v17  ;;  %v3217_v44 = vadd.f32 %v3216_v30, %v3026_v26  ;;  %v2726_v41 = vadd.f32 %v4439_v31, %v5639_v15  ;;  %v5648_v30 = vld [vmem:[#allocation20_spill] sm:$0xff] }
 0x1f6   : > { %v3285_v36 = vadd.f32 %v3284_v27, %v3254_v52  ;;  %v2657_v56 = vpop.f32.mrf.mxu1  ;;  %v2963_v34 = vpop.f32.mrf.mxu0  ;;  %v3258_v2 = vmul.f32 %v3029_v38, %v3029_v38 }
 0x1f7   : > { %3842 = vst [vmem:[%s5509_s24 + $0x48] sm:$0xff] %v3787_v10   ;;  %v3782_v1 = vpack.c.bf16 %v3027_v8, %v3026_v26  ;;  %v3256_v5 = vmul.f32 %v3027_v8, %v3027_v8  ;;  %v2724_v57 = vadd.f32 %v2657_v56, %v2418_v33  ;;  %v3218_v13 = vadd.f32 %v3217_v44, %v3027_v8  ;;  %v5650_v8 = vld [vmem:[#allocation9_spill] sm:$0xff]  ;;  %v5652_v44 = vld [vmem:[#allocation10_spill] sm:$0xff] }
 0x1f8   : > { %v3286_v35 = vadd.f32 %v3285_v36, %v3255_v14  ;;  %v4440_v7 = vpop.f32.mrf.mxu1  ;;  %v4488_v51 = vpop.f32.mrf.mxu0  ;;  %v3032_v21 = vadd.f32 %v4487_v12, %v2726_v41  ;;  %v2425_v26 = vadd.f32 %v5647_v20, %v2118_v28  ;;  %v2423_v10 = vadd.f32 %v5649_v0, %v2116_v4  ;;  %v5653_v14 = vld [vmem:[#allocation28_spill] sm:$0xff]  ;;  %v5655_v28 = vld [vmem:[#allocation11_spill] sm:$0xff] }
 0x1f9   : > { %3841 = vst [vmem:[%s5509_s24 + $0x40] sm:$0xff] %v3782_v1   ;;  %v2727_v29 = vadd.f32 %v4440_v7, %v2421_v25  ;;  %v3219_v40 = vadd.f32 %v3218_v13, %v3028_v18  ;;  %v3030_v60 = vadd.f32 %v2963_v34, %v2724_v57  ;;  %v2119_v25 = vadd.f32 %v5651_v23, %v5650_v8 }
 0x1fa   : > { %v3287_v45 = vadd.f32 %v3286_v35, %v3256_v5  ;;  %v2660_v59 = vpop.f32.mrf.mxu1  ;;  %v2966_v6 = vpop.f32.mrf.mxu0  ;;  %v2122_v36 = vadd.f32 %v5653_v14, %v5652_v44  ;;  %v3261_v34 = vmul.f32 %v3032_v21, %v3032_v21 }
 0x1fb   : > { %v3033_v39 = vadd.f32 %v4488_v51, %v2727_v29  ;;  %v2725_v9 = vadd.f32 %v2660_v59, %v2419_v11  ;;  %v3220_v62 = vadd.f32 %v3219_v40, %v3029_v38  ;;  %v3259_v48 = vmul.f32 %v3030_v60, %v3030_v60  ;;  %v5656_v29 = vld [vmem:[#allocation30_spill] sm:$0xff] }
 0x1fc   : > { %v3288_v61 = vadd.f32 %v3287_v45, %v3257_v22  ;;  %v4443_v63 = vpop.f32.mrf.mxu1  ;;  %v4491_v58 = vpop.f32.mrf.mxu0  ;;  %v2426_v43 = vadd.f32 %v5654_v55, %v2119_v25  ;;  %v2120_v22 = vadd.f32 %v5656_v29, %v5655_v28 }
 0x1fd   : > { %v3797_v53 = vpack.c.bf16 %v3033_v39, %v3032_v21  ;;  %v3031_v49 = vadd.f32 %v2966_v6, %v2725_v9  ;;  %v3221_v46 = vadd.f32 %v3220_v62, %v3030_v60  ;;  %v2730_v31 = vadd.f32 %v4443_v63, %v5648_v30  ;;  %v5658_v63 = vld [vmem:[#allocation27_spill] sm:$0xff] }
 0x1fe   : > { %v3289_v18 = vadd.f32 %v3288_v61, %v3258_v2  ;;  %v2673_v17 = vpop.f32.mrf.mxu1  ;;  %v2979_v52 = vpop.f32.mrf.mxu0  ;;  %v3262_v51 = vmul.f32 %v3033_v39, %v3033_v39 }
 0x1ff   : > { %3844 = vst [vmem:[%s5509_s24 + $0x58] sm:$0xff] %v3797_v53   ;;  %v3792_v27 = vpack.c.bf16 %v3031_v49, %v3030_v60  ;;  %v3260_v38 = vmul.f32 %v3031_v49, %v3031_v49  ;;  %v2728_v12 = vadd.f32 %v2673_v17, %v2422_v32  ;;  %v3222_v33 = vadd.f32 %v3221_v46, %v3031_v49  ;;  %v5657_v60 = vld [vmem:[#allocation29_spill] sm:$0xff]  ;;  %v5659_v53 = vld [vmem:[#allocation31_spill] sm:$0xff] }
 0x200   : > { %v3290_v54 = vadd.f32 %v3289_v18, %v3259_v48  ;;  %v4444_v42 = vpop.f32.mrf.mxu1  ;;  %v4492_v37 = vpop.f32.mrf.mxu0  ;;  %v3036_v35 = vadd.f32 %v4491_v58, %v2730_v31  ;;  %v2429_v59 = vadd.f32 %v5657_v60, %v2122_v36  ;;  %v2427_v49 = vadd.f32 %v5659_v53, %v2120_v22 }
 0x201   : > { %3843 = vst [vmem:[%s5509_s24 + $0x50] sm:$0xff] %v3792_v27   ;;  %v2731_v56 = vadd.f32 %v4444_v42, %v2425_v26  ;;  %v3223_v1 = vadd.f32 %v3222_v33, %v3032_v21  ;;  %v3034_v15 = vadd.f32 %v2979_v52, %v2728_v12 }
 0x202   : > { %v3291_v5 = vadd.f32 %v3290_v54, %v3260_v38  ;;  %v2676_v41 = vpop.f32.mrf.mxu1  ;;  %v2982_v57 = vpop.f32.mrf.mxu0  ;;  %v3265_v26 = vmul.f32 %v3036_v35, %v3036_v35 }
 0x203   : > { %v3037_v13 = vadd.f32 %v4492_v37, %v2731_v56  ;;  %v2729_v7 = vadd.f32 %v2676_v41, %v2423_v10  ;;  %v3224_v11 = vadd.f32 %v3223_v1, %v3033_v39  ;;  %v3263_v21 = vmul.f32 %v3034_v15, %v3034_v15 }
 0x204   : > { %v3292_v47 = vadd.f32 %v3291_v5, %v3261_v34  ;;  %v4447_v24 = vpop.f32.mrf.mxu1  ;;  %v4495_v50 = vpop.f32.mrf.mxu0 }
 0x205   : > { %v3807_v40 = vpack.c.bf16 %v3037_v13, %v3036_v35  ;;  %v3035_v45 = vadd.f32 %v2982_v57, %v2729_v7  ;;  %v3225_v6 = vadd.f32 %v3224_v11, %v3034_v15  ;;  %v2734_v58 = vadd.f32 %v4447_v24, %v5658_v63 }
 0x206   : > { %v3293_v9 = vadd.f32 %v3292_v47, %v3262_v51  ;;  %v2689_v2 = vpop.f32.mrf.mxu1  ;;  %v2995_v61 = vpop.f32.mrf.mxu0  ;;  %v3266_v30 = vmul.f32 %v3037_v13, %v3037_v13 }
 0x207   : > { %3846 = vst [vmem:[%s5509_s24 + $0x68] sm:$0xff] %v3807_v40   ;;  %v3802_v62 = vpack.c.bf16 %v3035_v45, %v3034_v15  ;;  %v3264_v39 = vmul.f32 %v3035_v45, %v3035_v45  ;;  %v2732_v19 = vadd.f32 %v2689_v2, %v2426_v43  ;;  %v3226_v16 = vadd.f32 %v3225_v6, %v3035_v45 }
 0x208   : > { %v3294_v32 = vadd.f32 %v3293_v9, %v3263_v21  ;;  %v4448_v3 = vpop.f32.mrf.mxu1  ;;  %v4496_v4 = vpop.f32.mrf.mxu0  ;;  %v3040_v52 = vadd.f32 %v4495_v50, %v2734_v58 }
 0x209   : > { %3845 = vst [vmem:[%s5509_s24 + $0x60] sm:$0xff] %v3802_v62   ;;  %v2735_v20 = vadd.f32 %v4448_v3, %v2429_v59  ;;  %v3227_v46 = vadd.f32 %v3226_v16, %v3036_v35  ;;  %v3038_v18 = vadd.f32 %v2995_v61, %v2732_v19 }
 0x20a   : > { %v3295_v48 = vadd.f32 %v3294_v32, %v3264_v39  ;;  %v2692_v17 = vpop.f32.mrf.mxu1  ;;  %v2998_v54 = vpop.f32.mrf.mxu0  ;;  %v3269_v14 = vmul.f32 %v3040_v52, %v3040_v52 }
 0x20b   : > { %v3041_v27 = vadd.f32 %v4496_v4, %v2735_v20  ;;  %v2733_v38 = vadd.f32 %v2692_v17, %v2427_v49  ;;  %v3228_v12 = vadd.f32 %v3227_v46, %v3037_v13  ;;  %v3267_v0 = vmul.f32 %v3038_v18, %v3038_v18 }
 0x20c   : > { %v3296_v31 = vadd.f32 %v3295_v48, %v3265_v26 }
 0x20d   : > { %v3817_v33 = vpack.c.bf16 %v3041_v27, %v3040_v52  ;;  %v3039_v42 = vadd.f32 %v2998_v54, %v2733_v38  ;;  %v3229_v37 = vadd.f32 %v3228_v12, %v3038_v18  ;;  %v3270_v34 = vmul.f32 %v3041_v27, %v3041_v27 }
 0x20e   : > { %v3297_v10 = vadd.f32 %v3296_v31, %v3266_v30 }
 0x20f   : > { %3848 = vst [vmem:[%s5509_s24 + $0x78] sm:$0xff] %v3817_v33   ;;  %v3812_v8 = vpack.c.bf16 %v3039_v42, %v3038_v18  ;;  %v3268_v23 = vmul.f32 %v3039_v42, %v3039_v42  ;;  %v3230_v44 = vadd.f32 %v3229_v37, %v3039_v42 }
 0x210   : > { %v3298_v25 = vadd.f32 %v3297_v10, %v3267_v0 }
 0x211   : > { %3847 = vst [vmem:[%s5509_s24 + $0x70] sm:$0xff] %v3812_v8   ;;  %v3231_v36 = vadd.f32 %v3230_v44, %v3040_v52 }
 0x212   : > { %v3299_v56 = vadd.f32 %v3298_v25, %v3268_v23 }
 0x213   : > { %v3232_v1 = vadd.f32 %v3231_v36, %v3041_v27 }
 0x214   : > { %v3300_v5 = vadd.f32 %v3299_v56, %v3269_v14 }
 0x215   : > { %v3233_v15 = vrot.slane %v3232_v1, 4 }
 0x216   : > { %v3301_v41 = vadd.f32 %v3300_v5, %v3270_v34 }
 0x217   : > { %v3234_v57 = vadd.f32 %v3233_v15, %v3232_v1 }
 0x218   : > { %v3302_v35 = vrot.slane %v3301_v41, 4 }
 0x219   : > { %v3235_v13 = vrot.slane %v3234_v57, 2 }
 0x21a   : > { %v3303_v7 = vadd.f32 %v3302_v35, %v3301_v41 }
 0x21b   : > { %v3236_v51 = vadd.f32 %v3235_v13, %v3234_v57 }
 0x21c   : > { %v3304_v47 = vrot.slane %v3303_v7, 2 }
 0x21d   : > { %v3237_v11 = vrot.slane %v3236_v51, 1 }
 0x21e   : > { %v3305_v24 = vadd.f32 %v3304_v47, %v3303_v7 }
 0x21f   : > { %v3238_v55 = vadd.f32 %v3237_v11, %v3236_v51 }
 0x220   : > { %v3306_v50 = vrot.slane %v3305_v24, 1 }
 0x222   : > { %v3307_v43 = vadd.f32 %v3306_v50, %v3305_v24 }
 0x224   : > { %v3309_v28 = vsel %vm3308_vm0, %v3238_v55, %v3307_v43 }
 0x225   : > { %3310 = vst [vmem:[%s181_s27] sm:$0x3] %v3309_v28 }
 0x226 PF: > { %s14_s12 = sadd.s32 1, %s4618_s12  }
 0x227   : > { %p11_p4 = scmp.ge.s32.totalorder %s14_s12, 4  }
 0x229   :  { %13 = sbr.rel (!%p11_p4) target bundleno = 1 (0x1), region = 80 }

// kernel: basic_block_forward.5
= control target key start
LH: loop header
LB: loop body
LE: loop exit
PB: predicated region body
PF: predicated region fallthrough
CT: control target
= control target key end

     0   :  { %s4801_s18 = smov 0   ;;  %s5929_s0 = inlined_call_operand.vmem [shape: bf16[2,256,128], index: 0, kind: input, shape index: {}]   ;;  %s5930_s1 = inlined_call_operand.vmem [shape: bf16[9,128,128], index: 1, kind: input, shape index: {}]   ;;  %s5931_s2 = inlined_call_operand.vmem [shape: f32[1,128], index: 2, kind: input, shape index: {}]   ;;  %s5932_s3 = inlined_call_operand.vmem [shape: f32[1,128], index: 3, kind: input, shape index: {}]   ;;  %s5933_s4 = inlined_call_operand.vmem [shape: bf16[2,256,128], index: 4, kind: output, shape index: {0}]   ;;  %s5934_s5 = inlined_call_operand.vmem [shape: f32[2,2,128], index: 5, kind: output, shape index: {1}]  }
   0x1 LB: > { %s3561_s19 = sadd.s32 4294967295, %s4767_s18   ;;  %p3565_p0 = scmp.ge.s32.totalorder %s4767_s18, 1  ;;  %s4767_s18 = sphi %s4801_s18, %s16_s18  }
   0x2   : > { %p190_p1 = scmp.lt.s32.totalorder %s4767_s18, 3 }
   0x4   : > { %p191_p2 = pnand %p3565_p0, %p190_p1 }
   0x6   : > { %194 = sbr.rel (%p191_p2) target bundleno = 550 (0x226), region = 36 }
   0xb   : > { %v4688_v0 = vld [vmem:[%s5930_s1 + $0x78] sm:$0xff]   ;;  %v4689_v1 = vld [vmem:[%s5930_s1 + $0x70] sm:$0xff]   ;;  %v4769_v2 = vmov 0.0   ;;  %p222_p3 = scmp.lt.s32.totalorder %s3561_s19, 1  ;;  %v4690_v3 = vld [vmem:[%s5930_s1 + $0x68] sm:$0xff]   ;;  %v4770_v4 = vmov 0.0|0.0  }
   0xc   : > { %412 = vst [vmem:[#allocation2 + $0x8] sm:$0xff] %v4769_v2  ;;  %413 = vst [vmem:[#allocation2 + $0x10] sm:$0xff] %v4769_v2  ;;  %4231 = vmatprep.subr.bf16.mxu0 %v4688_v0  ;;  %4663 = vmatprep.subr.bf16.mxu1 %v4688_v0  ;;  %v4691_v5 = vld [vmem:[%s5930_s1 + $0x60] sm:$0xff]   ;;  %v4692_v19 = vld [vmem:[%s5930_s1 + $0x58] sm:$0xff]   ;;  %vm3472_vm0 = vcmask 1040384  }
   0xd   : > { %411 = vst [vmem:[#allocation2] sm:$0xff] %v4769_v2  ;;  %414 = vst [vmem:[#allocation2 + $0x18] sm:$0xff] %v4769_v2  ;;  %4232 = vmatpush3.bf16.msra.mxu0 %v4688_v0  ;;  %4671 = vmatpush3.bf16.msra.mxu1 %v4688_v0  ;;  %s5994_s19 = smov (!%p222_p3, %s3561_s19), 1  ;;  %v4839_v7 = vld [vmem:[%s5931_s2] ss:$0 sm:$0xff]  ;;  %v4693_v37 = vld [vmem:[%s5930_s1 + $0x50] sm:$0xff]  }
   0xe   : > { %415 = vst [vmem:[#allocation2 + $0x20] sm:$0xff] %v4769_v2  ;;  %418 = vst [vmem:[#allocation2 + $0x38] sm:$0xff] %v4769_v2  ;;  %4233 = vmatprep.subr.bf16.mxu0 %v4689_v1  ;;  %4664 = vmatprep.subr.bf16.mxu1 %v4689_v1  ;;  %s3807_s26 = sshll.u32 %s5994_s19, 7  ;;  %v4846_v12 = vld [vmem:[%s5932_s3] ss:$0 sm:$0xff]  ;;  %v4694_v54 = vld [vmem:[%s5930_s1 + $0x48] sm:$0xff]  }
   0xf   : > { %419 = vst [vmem:[#allocation2 + $0x40] sm:$0xff] %v4769_v2  ;;  %422 = vst [vmem:[#allocation2 + $0x58] sm:$0xff] %v4769_v2  ;;  %4247 = vmatprep.mubr.bf16.mxu0 %v4770_v4  ;;  %s4830_s29 = scalar_lea.vmem %s5929_s0, %s3807_s26  ;;  %v4695_v4 = vld [vmem:[%s5930_s1 + $0x40] sm:$0xff]   ;;  %s5840_s21 = scalar_lea.vmem %s5933_s4, %s3807_s26 }
  0x10   : > { %423 = vst [vmem:[#allocation2 + $0x60] sm:$0xff] %v4769_v2  ;;  %426 = vst [vmem:[#allocation2 + $0x78] sm:$0xff] %v4769_v2  ;;  %v3991_v6 = vld [vmem:[%s4830_s29 + $0x38] sm:$0xff]   ;;  %v3842_v10 = vld [vmem:[%s4830_s29] sm:$0xff]   ;;  %s3570_s26 = sshll.u32 %s5994_s19, 1 }
  0x11   : > { %427 = vst [vmem:[#allocation2 + $0x80] sm:$0xff] %v4769_v2  ;;  %430 = vst [vmem:[#allocation2 + $0x98] sm:$0xff] %v4769_v2  ;;  %4234 = vmatpush3.bf16.msra.mxu0 %v4689_v1  ;;  %4672 = vmatpush3.bf16.msra.mxu1 %v4689_v1  ;;  %v3871_v8 = vunpack.c.l.bf16 %v3991_v6  ;;  %v3872_v9 = vunpack.c.h.bf16 %v3991_v6  ;;  %v3992_v11 = vld [vmem:[%s4830_s29 + $0x40] sm:$0xff]   ;;  %v3843_v13 = vunpack.c.l.bf16 %v3842_v10  ;;  %v3844_v14 = vunpack.c.h.bf16 %v3842_v10  ;;  %v3985_v26 = vld [vmem:[%s4830_s29 + $0x8] sm:$0xff]   ;;  %s235_s24 = scalar_lea.vmem %s5934_s5, %s3570_s26 }
  0x12   : > { %431 = vst [vmem:[#allocation2 + $0xa0] sm:$0xff] %v4769_v2  ;;  %434 = vst [vmem:[#allocation2 + $0xb8] sm:$0xff] %v4769_v2  ;;  %4235 = vmatprep.subr.bf16.mxu0 %v4690_v3  ;;  %4665 = vmatprep.subr.bf16.mxu1 %v4690_v3  ;;  %v3875_v15 = vunpack.c.l.bf16 %v3992_v11  ;;  %v3876_v16 = vunpack.c.h.bf16 %v3992_v11  ;;  %v3847_v30 = vunpack.c.l.bf16 %v3985_v26  ;;  %v3993_v31 = vld [vmem:[%s4830_s29 + $0x48] sm:$0xff]   ;;  %v3986_v32 = vld [vmem:[%s4830_s29 + $0x10] sm:$0xff]   ;;  %v3848_v36 = vunpack.c.h.bf16 %v3985_v26 }
  0x13   : > { %435 = vst [vmem:[#allocation2 + $0xc0] sm:$0xff] %v4769_v2  ;;  %438 = vst [vmem:[#allocation2 + $0xd8] sm:$0xff] %v4769_v2  ;;  %v322_v17 = vmul.f32 %v3871_v8, %v4839_v7  ;;  %v323_v18 = vmul.f32 %v3872_v9, %v4839_v7  ;;  %v308_v20 = vmul.f32 %v3843_v13, %v4839_v7  ;;  %v3879_v45 = vunpack.c.l.bf16 %v3993_v31  ;;  %v3994_v46 = vld [vmem:[%s4830_s29 + $0x50] sm:$0xff]   ;;  %v3987_v53 = vld [vmem:[%s4830_s29 + $0x18] sm:$0xff]  }
  0x14   : > { %439 = vst [vmem:[#allocation2 + $0xe0] sm:$0xff] %v4769_v2  ;;  %442 = vst [vmem:[#allocation2 + $0xf8] sm:$0xff] %v4769_v2  ;;  %v309_v21 = vmul.f32 %v3844_v14, %v4839_v7  ;;  %v324_v22 = vmul.f32 %v3875_v15, %v4839_v7  ;;  %v325_v25 = vmul.f32 %v3876_v16, %v4839_v7  ;;  %v3880_v48 = vunpack.c.h.bf16 %v3993_v31  ;;  %v4697_v26 = vld [vmem:[%s5930_s1 + $0xb8] sm:$0xff]  }
  0x15   : > { %443 = vst [vmem:[#allocation2 + $0x100] sm:$0xff] %v4769_v2  ;;  %446 = vst [vmem:[#allocation2 + $0x118] sm:$0xff] %v4769_v2  ;;  %4236 = vmatpush3.bf16.msra.mxu0 %v4690_v3  ;;  %4673 = vmatpush3.bf16.msra.mxu1 %v4690_v3  ;;  %v361_v23 = vadd.f32 %v4846_v12, %v322_v17  ;;  %v362_v24 = vadd.f32 %v4846_v12, %v323_v18  ;;  %v3851_v49 = vunpack.c.l.bf16 %v3986_v32  ;;  %v3995_v3 = vld [vmem:[%s4830_s29 + $0x58] sm:$0xff]   ;;  %v3988_v18 = vld [vmem:[%s4830_s29 + $0x20] sm:$0xff]  }
  0x16   : > { %447 = vst [vmem:[#allocation2 + $0x120] sm:$0xff] %v4769_v2  ;;  %450 = vst [vmem:[#allocation2 + $0x138] sm:$0xff] %v4769_v2  ;;  %4237 = vmatprep.subr.bf16.mxu0 %v4691_v5  ;;  %4666 = vmatprep.subr.bf16.mxu1 %v4691_v5  ;;  %v4861_v27 = vadd.f32 %v4846_v12, %v308_v20  ;;  %v4864_v28 = vadd.f32 %v4846_v12, %v309_v21  ;;  %v3852_v52 = vunpack.c.h.bf16 %v3986_v32  ;;  %v4696_v20 = vld [vmem:[%s5930_s1 + $0x38] sm:$0xff]  }
  0x17   : > { %451 = vst [vmem:[#allocation2 + $0x140] sm:$0xff] %v4769_v2  ;;  %454 = vst [vmem:[#allocation2 + $0x158] sm:$0xff] %v4769_v2  ;;  %v4867_v29 = vadd.f32 %v4846_v12, %v324_v22  ;;  %v393_v33 = vmax.f32 %v361_v23, 0.0  ;;  %v394_v34 = vmax.f32 %v362_v24, 0.0  ;;  %v4872_v35 = vadd.f32 %v4846_v12, %v325_v25  ;;  %v3996_v24 = vld [vmem:[%s4830_s29 + $0x60] sm:$0xff]  }
  0x18   : > { %455 = vst [vmem:[#allocation2 + $0x160] sm:$0xff] %v4769_v2  ;;  %458 = vst [vmem:[#allocation2 + $0x178] sm:$0xff] %v4769_v2  ;;  %v379_v38 = vmax.f32 %v4861_v27, 0.0  ;;  %v380_v39 = vmax.f32 %v4864_v28, 0.0  ;;  %v310_v41 = vmul.f32 %v3847_v30, %v4839_v7  ;;  %v311_v44 = vmul.f32 %v3848_v36, %v4839_v7 }
  0x19   : > { %459 = vst [vmem:[#allocation2 + $0x180] sm:$0xff] %v4769_v2  ;;  %462 = vst [vmem:[#allocation2 + $0x198] sm:$0xff] %v4769_v2  ;;  %4238 = vmatpush3.bf16.msra.mxu0 %v4691_v5  ;;  %4674 = vmatpush3.bf16.msra.mxu1 %v4691_v5  ;;  %v395_v40 = vmax.f32 %v4867_v29, 0.0  ;;  %v620_v42 = vpack.c.bf16 %v394_v34, %v393_v33  ;;  %v396_v43 = vmax.f32 %v4872_v35, 0.0  ;;  %v3883_v58 = vunpack.c.l.bf16 %v3994_v46 }
  0x1a   : > { %463 = vst [vmem:[#allocation2 + $0x1a0] sm:$0xff] %v4769_v2  ;;  %466 = vst [vmem:[#allocation2 + $0x1b8] sm:$0xff] %v4769_v2  ;;  %4239 = vmatprep.subr.bf16.mxu0 %v4692_v19  ;;  %4667 = vmatprep.subr.bf16.mxu1 %v4692_v19  ;;  %v4887_v47 = vadd.f32 %v4846_v12, %v310_v41  ;;  %v4892_v50 = vadd.f32 %v4846_v12, %v311_v44  ;;  %v3884_v62 = vunpack.c.h.bf16 %v3994_v46 }
  0x1b   : > { %467 = vst [vmem:[#allocation2 + $0x1c0] sm:$0xff] %v4769_v2  ;;  %470 = vst [vmem:[#allocation2 + $0x1d8] sm:$0xff] %v4769_v2  ;;  %v326_v51 = vmul.f32 %v3879_v45, %v4839_v7  ;;  %v327_v56 = vmul.f32 %v3880_v48, %v4839_v7  ;;  %v312_v57 = vmul.f32 %v3851_v49, %v4839_v7  ;;  %4263 = vmatprep.mubr.bf16.mxu1 %v620_v42  ;;  %v4698_v48 = vld [vmem:[%s5930_s1 + $0x30] sm:$0xff]  }
  0x1c   : > { %471 = vst [vmem:[#allocation2 + $0x1e0] sm:$0xff] %v4769_v2  ;;  %474 = vst [vmem:[#allocation2 + $0x1f8] sm:$0xff] %v4769_v2  ;;  %v381_v55 = vmax.f32 %v4887_v47, 0.0  ;;  %v382_v59 = vmax.f32 %v4892_v50, 0.0  ;;  %v313_v61 = vmul.f32 %v3852_v52, %v4839_v7  ;;  %v328_v1 = vmul.f32 %v3883_v58, %v4839_v7  ;;  %v3997_v47 = vld [vmem:[%s4830_s29 + $0x68] sm:$0xff]   ;;  %v4699_v49 = vld [vmem:[%s5930_s1 + $0xb0] sm:$0xff]  }
  0x1d   : > { %475 = vst [vmem:[#allocation2 + $0x200] sm:$0xff] %v4769_v2  ;;  %478 = vst [vmem:[#allocation2 + $0x218] sm:$0xff] %v4769_v2  ;;  %4240 = vmatpush3.bf16.msra.mxu0 %v4692_v19  ;;  %4675 = vmatpush3.bf16.msra.mxu1 %v4692_v19  ;;  %v4904_v60 = vadd.f32 %v4846_v12, %v326_v51  ;;  %v4908_v63 = vadd.f32 %v4846_v12, %v327_v56  ;;  %v3856_v13 = vunpack.c.h.bf16 %v3987_v53  ;;  %v3990_v58 = vld [vmem:[%s4830_s29 + $0x30] sm:$0xff]  }
  0x1e   : > { %479 = vst [vmem:[#allocation2 + $0x220] sm:$0xff] %v4769_v2  ;;  %480 = vst [vmem:[#allocation2 + $0x228] sm:$0xff] %v4769_v2  ;;  %4241 = vmatprep.subr.bf16.mxu0 %v4693_v37  ;;  %4668 = vmatprep.subr.bf16.mxu1 %v4693_v37  ;;  %v4911_v0 = vadd.f32 %v4846_v12, %v312_v57  ;;  %v4920_v6 = vadd.f32 %v4846_v12, %v313_v61  ;;  %v3887_v17 = vunpack.c.l.bf16 %v3995_v3 }
  0x1f   : > { %481 = vst [vmem:[#allocation2 + $0x230] sm:$0xff] %v4769_v2  ;;  %482 = vst [vmem:[#allocation2 + $0x238] sm:$0xff] %v4769_v2  ;;  %v3855_v2 = vunpack.c.l.bf16 %v3987_v53  ;;  %v397_v5 = vmax.f32 %v4904_v60, 0.0  ;;  %v329_v8 = vmul.f32 %v3884_v62, %v4839_v7  ;;  %v398_v9 = vmax.f32 %v4908_v63, 0.0 }
  0x20   : > { %498 = vst [vmem:[#allocation2 + $0x108] sm:$0xff] %v393_v33  ;;  %499 = vst [vmem:[#allocation2 + $0x110] sm:$0xff] %v394_v34  ;;  %v383_v10 = vmax.f32 %v4911_v0, 0.0  ;;  %v4926_v11 = vadd.f32 %v4846_v12, %v328_v1  ;;  %v384_v14 = vmax.f32 %v4920_v6, 0.0  ;;  %v4934_v19 = vpack.c.bf16 %v380_v39, %v379_v38  ;;  %v3989_v34 = vld [vmem:[%s4830_s29 + $0x28] sm:$0xff]  }
  0x21   : > { %484 = vst [vmem:[#allocation2 + $0x28] sm:$0xff] %v379_v38  ;;  %485 = vst [vmem:[#allocation2 + $0x30] sm:$0xff] %v380_v39  ;;  %4242 = vmatpush3.bf16.msra.mxu0 %v4693_v37  ;;  %4676 = vmatpush3.bf16.msra.mxu1 %v4693_v37  ;;  %v4930_v15 = vadd.f32 %v4846_v12, %v329_v8  ;;  %v314_v16 = vmul.f32 %v3855_v2, %v4839_v7  ;;  %v3888_v23 = vunpack.c.h.bf16 %v3995_v3  ;;  %v3998_v3 = vld [vmem:[%s4830_s29 + $0x70] sm:$0xff]   ;;  %v4701_v6 = vld [vmem:[%s5930_s1 + $0xa8] sm:$0xff]  }
  0x22   : > { %500 = vst [vmem:[#allocation2 + $0x128] sm:$0xff] %v395_v40  ;;  %501 = vst [vmem:[#allocation2 + $0x130] sm:$0xff] %v396_v43  ;;  %4243 = vmatprep.subr.bf16.mxu0 %v4694_v54  ;;  %4669 = vmatprep.subr.bf16.mxu1 %v4694_v54  ;;  %v399_v21 = vmax.f32 %v4926_v11, 0.0  ;;  %v315_v22 = vmul.f32 %v3856_v13, %v4839_v7  ;;  %v621_v25 = vpack.c.bf16 %v396_v43, %v395_v40 }
  0x23   : > { %486 = vst [vmem:[#allocation2 + $0x48] sm:$0xff] %v381_v55  ;;  %487 = vst [vmem:[#allocation2 + $0x50] sm:$0xff] %v382_v59  ;;  %v400_v27 = vmax.f32 %v4930_v15, 0.0  ;;  %v4955_v28 = vadd.f32 %v4846_v12, %v314_v16  ;;  %v330_v30 = vmul.f32 %v3887_v17, %v4839_v7  ;;  %v331_v31 = vmul.f32 %v3888_v23, %v4839_v7 }
  0x24   : > { %502 = vst [vmem:[#allocation2 + $0x148] sm:$0xff] %v397_v5  ;;  %503 = vst [vmem:[#allocation2 + $0x150] sm:$0xff] %v398_v9  ;;  %v4961_v29 = vadd.f32 %v4846_v12, %v315_v22  ;;  %v3859_v32 = vunpack.c.l.bf16 %v3988_v18  ;;  %v3860_v33 = vunpack.c.h.bf16 %v3988_v18  ;;  %v4965_v35 = vpack.c.bf16 %v382_v59, %v381_v55 }
  0x25   : > { %488 = vst [vmem:[#allocation2 + $0x68] sm:$0xff] %v383_v10  ;;  %4244 = vmatpush3.bf16.msra.mxu0 %v4694_v54  ;;  %4677 = vmatpush3.bf16.msra.mxu1 %v4694_v54  ;;  %489 = vst [vmem:[#allocation2 + $0x70] sm:$0xff] %v384_v14  ;;  %v385_v36 = vmax.f32 %v4955_v28, 0.0  ;;  %v4969_v37 = vadd.f32 %v4846_v12, %v330_v30  ;;  %v3891_v38 = vunpack.c.l.bf16 %v3996_v24  ;;  %v3892_v44 = vunpack.c.h.bf16 %v3996_v24  ;;  %v4702_v24 = vld [vmem:[%s5930_s1 + $0x20] sm:$0xff]  }
  0x26   : > { %4245 = vmatprep.subr.bf16.mxu0 %v4695_v4  ;;  %4670 = vmatprep.subr.bf16.mxu1 %v4695_v4  ;;  %504 = vst [vmem:[#allocation2 + $0x168] sm:$0xff] %v399_v21  ;;  %505 = vst [vmem:[#allocation2 + $0x170] sm:$0xff] %v400_v27  ;;  %v386_v39 = vmax.f32 %v4961_v29, 0.0  ;;  %v4973_v40 = vadd.f32 %v4846_v12, %v331_v31  ;;  %v316_v41 = vmul.f32 %v3859_v32, %v4839_v7  ;;  %v4704_v29 = vld [vmem:[%s5930_s1 + $0x18] sm:$0xff]  }
  0x27   : > { %v317_v42 = vmul.f32 %v3860_v33, %v4839_v7  ;;  %490 = vst [vmem:[#allocation2 + $0x88] sm:$0xff] %v385_v36  ;;  %v401_v43 = vmax.f32 %v4969_v37, 0.0  ;;  %v332_v45 = vmul.f32 %v3891_v38, %v4839_v7  ;;  %v3863_v46 = vunpack.c.l.bf16 %v3989_v34 }
  0x28   : > { %v622_v50 = vpack.c.bf16 %v398_v9, %v397_v5  ;;  %491 = vst [vmem:[#allocation2 + $0x90] sm:$0xff] %v386_v39  ;;  %v402_v51 = vmax.f32 %v4973_v40, 0.0  ;;  %v4992_v52 = vadd.f32 %v4846_v12, %v316_v41  ;;  %v333_v54 = vmul.f32 %v3892_v44, %v4839_v7  ;;  %v4700_v5 = vld [vmem:[%s5930_s1 + $0x28] sm:$0xff]  }
  0x29   : > { %4246 = vmatpush3.bf16.msra.mxu0 %v4695_v4  ;;  %4678 = vmatpush3.bf16.msra.mxu1 %v4695_v4  ;;  %v4995_v53 = vadd.f32 %v4846_v12, %v317_v42  ;;  %506 = vst [vmem:[#allocation2 + $0x188] sm:$0xff] %v401_v43  ;;  %v5001_v55 = vadd.f32 %v4846_v12, %v332_v45  ;;  %v3864_v56 = vunpack.c.h.bf16 %v3989_v34  ;;  %v3895_v62 = vunpack.c.l.bf16 %v3997_v47 }
  0x2a   : > { %4279 = vmatprep.subr.bf16.mxu1 %v4696_v20  ;;  %4327 = vmatprep.subr.bf16.mxu0 %v4697_v26  ;;  %v318_v57 = vmul.f32 %v3863_v46, %v4839_v7  ;;  %v5010_v59 = vpack.c.bf16 %v384_v14, %v383_v10  ;;  %507 = vst [vmem:[#allocation2 + $0x190] sm:$0xff] %v402_v51  ;;  %v387_v60 = vmax.f32 %v4992_v52, 0.0  ;;  %v3896_v8 = vunpack.c.h.bf16 %v3997_v47  ;;  %v4706_v46 = vld [vmem:[%s5930_s1 + $0x10] sm:$0xff]   ;;  %v516_v52 = vld [vmem:[#allocation2 + $0x7] sm:$0xff] }
  0x2b   : > { %v388_v61 = vmax.f32 %v4995_v53, 0.0  ;;  %v5015_v63 = vadd.f32 %v4846_v12, %v333_v54  ;;  %v403_v1 = vmax.f32 %v5001_v55, 0.0  ;;  %v319_v2 = vmul.f32 %v3864_v56, %v4839_v7  ;;  %v4707_v47 = vld [vmem:[%s5930_s1 + $0x90] sm:$0xff]  }
  0x2c   : > { %4248 = vmatmul.mubr.bf16.vlgmr.msra.gmra.mxu0 %v4934_v19  ;;  %4264 = vmatmul.mubr.bf16.vlgmr.msra.gmra.mxu1 %v621_v25  ;;  %v5020_v0 = vadd.f32 %v4846_v12, %v318_v57  ;;  %v623_v4 = vpack.c.bf16 %v400_v27, %v399_v21  ;;  %492 = vst [vmem:[#allocation2 + $0xa8] sm:$0xff] %v387_v60  ;;  %v3867_v10 = vunpack.c.l.bf16 %v3990_v58  ;;  %v3868_v15 = vunpack.c.h.bf16 %v3990_v58  ;;  %v4703_v25 = vld [vmem:[%s5930_s1 + $0xa0] sm:$0xff]   ;;  %v517_v55 = vld [vmem:[#allocation2 + $0xf] sm:$0xff] }
  0x2d   : > { %4280 = vmatpush3.bf16.msra.mxu1 %v4696_v20  ;;  %4328 = vmatpush3.bf16.msra.mxu0 %v4697_v26  ;;  %493 = vst [vmem:[#allocation2 + $0xb0] sm:$0xff] %v388_v61  ;;  %v334_v9 = vmul.f32 %v3895_v62, %v4839_v7  ;;  %v404_v11 = vmax.f32 %v5015_v63, 0.0  ;;  %508 = vst [vmem:[#allocation2 + $0x1a8] sm:$0xff] %v403_v1  ;;  %v358_v13 = vadd.f32 %v4846_v12, %v319_v2  ;;  %v1063_v56 = vld [vmem:[#allocation2 + $0x9] sm:$0xff]  ;;  %v1064_v57 = vld [vmem:[#allocation2 + $0x11] sm:$0xff] }
  0x2e   : > { %4281 = vmatprep.subr.bf16.mxu1 %v4698_v48  ;;  %4329 = vmatprep.subr.bf16.mxu0 %v4699_v49  ;;  %v389_v14 = vmax.f32 %v5020_v0, 0.0  ;;  %v335_v16 = vmul.f32 %v3896_v8, %v4839_v7  ;;  %v320_v18 = vmul.f32 %v3867_v10, %v4839_v7  ;;  %v3899_v20 = vunpack.c.l.bf16 %v3998_v3  ;;  %v4710_v58 = vld [vmem:[%s5930_s1] sm:$0xff]   ;;  %v1065_v2 = vld [vmem:[#allocation2 + $0x29] sm:$0xff]  ;;  %v1066_v0 = vld [vmem:[#allocation2 + $0x31] sm:$0xff] }
  0x2f   : > { %4251 = vmatprep.mubr.bf16.mxu0 %v4965_v35  ;;  %4267 = vmatprep.mubr.bf16.mxu1 %v622_v50  ;;  %v373_v17 = vadd.f32 %v4846_v12, %v334_v9  ;;  %509 = vst [vmem:[#allocation2 + $0x1b0] sm:$0xff] %v404_v11  ;;  %v390_v21 = vmax.f32 %v358_v13, 0.0  ;;  %v321_v22 = vmul.f32 %v3868_v15, %v4839_v7  ;;  %v3900_v23 = vunpack.c.h.bf16 %v3998_v3  ;;  %v4708_v50 = vld [vmem:[%s5930_s1 + $0x8] sm:$0xff]   ;;  %v4712_v3 = vld [vmem:[%s5930_s1 + $0xf8] sm:$0xff]  }
  0x30   : > { %494 = vst [vmem:[#allocation2 + $0xc8] sm:$0xff] %v389_v14  ;;  %v374_v26 = vadd.f32 %v4846_v12, %v335_v16  ;;  %v359_v30 = vadd.f32 %v4846_v12, %v320_v18  ;;  %v336_v31 = vmul.f32 %v3899_v20, %v4839_v7  ;;  %v5059_v32 = vpack.c.bf16 %v386_v39, %v385_v36  ;;  %v4705_v39 = vld [vmem:[%s5930_s1 + $0x98] sm:$0xff]   ;;  %v518_v63 = vld [vmem:[#allocation2 + $0x27] sm:$0xff]  ;;  %v523_v16 = vld [vmem:[#allocation2 + $0x6f] sm:$0xff] }
  0x31   : > { %4282 = vmatpush3.bf16.msra.mxu1 %v4698_v48  ;;  %4330 = vmatpush3.bf16.msra.mxu0 %v4699_v49  ;;  %v405_v27 = vmax.f32 %v373_v17, 0.0  ;;  %v5063_v33 = vpack.c.bf16 %v402_v51, %v401_v43  ;;  %495 = vst [vmem:[#allocation2 + $0xd0] sm:$0xff] %v390_v21  ;;  %v360_v34 = vadd.f32 %v4846_v12, %v321_v22  ;;  %v4709_v51 = vld [vmem:[%s5930_s1 + $0x88] sm:$0xff]   ;;  %v1068_v9 = vld [vmem:[#allocation2 + $0x51] sm:$0xff] }
  0x32   : > { %4283 = vmatprep.subr.bf16.mxu1 %v4700_v5  ;;  %4331 = vmatprep.subr.bf16.mxu0 %v4701_v6  ;;  %v337_v38 = vmul.f32 %v3900_v23, %v4839_v7  ;;  %v406_v40 = vmax.f32 %v374_v26, 0.0  ;;  %v391_v41 = vmax.f32 %v359_v30, 0.0  ;;  %v375_v28 = vadd.f32 %v4846_v12, %v336_v31  ;;  %v1067_v8 = vld [vmem:[#allocation2 + $0x49] sm:$0xff]  ;;  %v1070_v18 = vld [vmem:[#allocation2 + $0x71] sm:$0xff] }
  0x33   : > { %510 = vst [vmem:[#allocation2 + $0x1c8] sm:$0xff] %v405_v27  ;;  %v392_v36 = vmax.f32 %v360_v34, 0.0  ;;  %v5082_v44 = vpack.c.bf16 %v388_v61, %v387_v60  ;;  %v5086_v45 = vpack.c.bf16 %v404_v11, %v403_v1  ;;  %v5094_v48 = vpack.c.bf16 %v390_v21, %v389_v14  ;;  %v4711_v60 = vld [vmem:[%s5930_s1 + $0x80] sm:$0xff]   ;;  %v519_v1 = vld [vmem:[#allocation2 + $0x2f] sm:$0xff] }
  0x34   : > { %4252 = vmatmul.mubr.bf16.gmra.mxu0 %v5010_v59  ;;  %4268 = vmatmul.mubr.bf16.gmra.mxu1 %v623_v4  ;;  %v376_v37 = vadd.f32 %v4846_v12, %v337_v38  ;;  %511 = vst [vmem:[#allocation2 + $0x1d0] sm:$0xff] %v406_v40  ;;  %496 = vst [vmem:[#allocation2 + $0xe8] sm:$0xff] %v391_v41  ;;  %v407_v42 = vmax.f32 %v375_v28, 0.0  ;;  %v5096_v49 = vpack.c.bf16 %v406_v40, %v405_v27  ;;  %v4713_v4 = vld [vmem:[%s5930_s1 + $0x138] sm:$0xff]   ;;  %v522_v15 = vld [vmem:[#allocation2 + $0x67] sm:$0xff] }
  0x35   : > { %4284 = vmatpush3.bf16.msra.mxu1 %v4700_v5  ;;  %4332 = vmatpush3.bf16.msra.mxu0 %v4701_v6  ;;  %497 = vst [vmem:[#allocation2 + $0xf0] sm:$0xff] %v392_v36  ;;  %v5108_v53 = vpack.c.bf16 %v392_v36, %v391_v41  ;;  %v548_v61 = vpack.c.bf16 %v517_v55, %v516_v52  ;;  %v520_v5 = vld [vmem:[#allocation2 + $0x47] sm:$0xff]  ;;  %v521_v6 = vld [vmem:[#allocation2 + $0x4f] sm:$0xff] }
  0x36   : > { %4285 = vmatprep.subr.bf16.mxu1 %v4702_v24  ;;  %4333 = vmatprep.subr.bf16.mxu0 %v4703_v25  ;;  %v408_v43 = vmax.f32 %v376_v37, 0.0  ;;  %512 = vst [vmem:[#allocation2 + $0x1e8] sm:$0xff] %v407_v42  ;;  %v1095_v62 = vpack.c.bf16 %v1064_v57, %v1063_v56  ;;  %v5126_v10 = vpack.c.bf16 %v519_v1, %v518_v63  ;;  %v1069_v17 = vld [vmem:[#allocation2 + $0x69] sm:$0xff]  ;;  %v4718_v40 = vld [vmem:[%s5930_s1 + $0xe0] sm:$0xff]   ;;  %v1074_v37 = vld [vmem:[#allocation2 + $0xb1] sm:$0xff] }
  0x37   : > { %4255 = vmatprep.mubr.bf16.mxu0 %v5059_v32  ;;  %4271 = vmatprep.mubr.bf16.mxu1 %v5063_v33  ;;  %v5128_v11 = vpack.c.bf16 %v1066_v0, %v1065_v2  ;;  %v5130_v13 = vpack.c.bf16 %v521_v6, %v520_v5  ;;  %v5132_v14 = vpack.c.bf16 %v1068_v9, %v1067_v8  ;;  %v4714_v20 = vld [vmem:[%s5930_s1 + $0xf0] sm:$0xff]   ;;  %v524_v22 = vld [vmem:[#allocation2 + $0x87] sm:$0xff]  ;;  %v3999_v5 = vld [vmem:[%s4830_s29 + $0x78] sm:$0xff]  }
  0x38   : > { %513 = vst [vmem:[#allocation2 + $0x1f0] sm:$0xff] %v408_v43  ;;  %v5110_v54 = vpack.c.bf16 %v408_v43, %v407_v42  ;;  %v4715_v21 = vld [vmem:[%s5930_s1 + $0x130] sm:$0xff]   ;;  %v4716_v26 = vld [vmem:[%s5930_s1 + $0xe8] sm:$0xff]   ;;  %v5150_v30 = vpack.c.bf16 %v523_v16, %v522_v15  ;;  %v5152_v31 = vpack.c.bf16 %v1070_v18, %v1069_v17  ;;  %v4719_v36 = vld [vmem:[%s5930_s1 + $0x120] sm:$0xff]   ;;  %v3903_v8 = vunpack.c.l.bf16 %v3999_v5 }
  0x39   : > { %4286 = vmatpush3.bf16.msra.mxu1 %v4702_v24  ;;  %4334 = vmatpush3.bf16.msra.mxu0 %v4703_v25  ;;  %v525_v23 = vld [vmem:[#allocation2 + $0x8f] sm:$0xff]  ;;  %v526_v41 = vld [vmem:[#allocation2 + $0xa7] sm:$0xff]  ;;  %v3904_v9 = vunpack.c.h.bf16 %v3999_v5 }
  0x3a   : > { %4287 = vmatprep.subr.bf16.mxu1 %v4704_v29  ;;  %4335 = vmatprep.subr.bf16.mxu0 %v4705_v39  ;;  %v1071_v24 = vld [vmem:[#allocation2 + $0x89] sm:$0xff]  ;;  %v1072_v25 = vld [vmem:[#allocation2 + $0x91] sm:$0xff]  ;;  %v5154_v34 = vpack.c.bf16 %v525_v23, %v524_v22  ;;  %v4726_v22 = vld [vmem:[%s5930_s1 + $0xc0] sm:$0xff]  }
  0x3b   : > { %v4717_v27 = vld [vmem:[%s5930_s1 + $0x128] sm:$0xff]   ;;  %v5156_v38 = vpack.c.bf16 %v1072_v25, %v1071_v24  ;;  %v4722_v57 = vld [vmem:[%s5930_s1 + $0xd0] sm:$0xff]  }
  0x3c   : > { %4256 = vmatmul.mubr.bf16.gmra.mxu0 %v5082_v44  ;;  %4272 = vmatmul.mubr.bf16.gmra.mxu1 %v5086_v45  ;;  %v527_v28 = vld [vmem:[#allocation2 + $0xaf] sm:$0xff]  ;;  %v532_v63 = vld [vmem:[#allocation2 + $0x107] sm:$0xff] }
  0x3d   : > { %4288 = vmatpush3.bf16.msra.mxu1 %v4704_v29  ;;  %4336 = vmatpush3.bf16.msra.mxu0 %v4705_v39  ;;  %v1073_v29 = vld [vmem:[#allocation2 + $0xa9] sm:$0xff]  ;;  %v1080_v0 = vld [vmem:[#allocation2 + $0x111] sm:$0xff] }
  0x3e   : > { %4289 = vmatprep.subr.bf16.mxu1 %v4706_v46  ;;  %4337 = vmatprep.subr.bf16.mxu0 %v4707_v47  ;;  %v528_v39 = vld [vmem:[#allocation2 + $0xc7] sm:$0xff]  ;;  %v529_v42 = vld [vmem:[#allocation2 + $0xcf] sm:$0xff]  ;;  %v5176_v52 = vpack.c.bf16 %v1074_v37, %v1073_v29 }
  0x3f   : > { %4259 = vmatprep.mubr.bf16.mxu0 %v5094_v48  ;;  %4275 = vmatprep.mubr.bf16.mxu1 %v5096_v49  ;;  %v1075_v43 = vld [vmem:[#allocation2 + $0xc9] sm:$0xff]  ;;  %v5178_v55 = vpack.c.bf16 %v529_v42, %v528_v39  ;;  %v4729_v42 = vld [vmem:[%s5930_s1 + $0x1b8] sm:$0xff]  }
  0x40   : > { %v533_v1 = vld [vmem:[#allocation2 + $0x10f] sm:$0xff]  ;;  %v534_v23 = vld [vmem:[#allocation2 + $0x127] sm:$0xff] }
  0x41   : > { %4290 = vmatpush3.bf16.msra.mxu1 %v4706_v46  ;;  %4338 = vmatpush3.bf16.msra.mxu0 %v4707_v47  ;;  %v1076_v46 = vld [vmem:[#allocation2 + $0xd1] sm:$0xff]  ;;  %v1079_v2 = vld [vmem:[#allocation2 + $0x109] sm:$0xff]  ;;  %v5203_v17 = vpack.c.bf16 %v533_v1, %v532_v63 }
  0x42   : > { %4291 = vmatprep.subr.bf16.mxu1 %v4708_v50  ;;  %4339 = vmatprep.subr.bf16.mxu0 %v4709_v51  ;;  %v4720_v47 = vld [vmem:[%s5930_s1 + $0xd8] sm:$0xff]   ;;  %v5180_v56 = vpack.c.bf16 %v1076_v46, %v1075_v43  ;;  %v4725_v6 = vld [vmem:[%s5930_s1 + $0x108] sm:$0xff]   ;;  %v5205_v18 = vpack.c.bf16 %v1080_v0, %v1079_v2 }
  0x43   : > { %v535_v24 = vld [vmem:[#allocation2 + $0x12f] sm:$0xff]  ;;  %v540_v63 = vld [vmem:[#allocation2 + $0x187] sm:$0xff] }
  0x44   : > { %4260 = vmatmul.mubr.bf16.gmra.mxu0 %v5108_v53  ;;  %4276 = vmatmul.mubr.bf16.gmra.mxu1 %v5110_v54  ;;  %v1081_v25 = vld [vmem:[#allocation2 + $0x129] sm:$0xff]  ;;  %v5231_v46 = vpack.c.bf16 %v535_v24, %v534_v23  ;;  %v1088_v0 = vld [vmem:[#allocation2 + $0x191] sm:$0xff] }
  0x45   : > { %4292 = vmatpush3.bf16.msra.mxu1 %v4708_v50  ;;  %4340 = vmatpush3.bf16.msra.mxu0 %v4709_v51  ;;  %v4721_v50 = vld [vmem:[%s5930_s1 + $0x118] sm:$0xff]   ;;  %v5174_v51 = vpack.c.bf16 %v527_v28, %v526_v41  ;;  %v536_v41 = vld [vmem:[#allocation2 + $0x147] sm:$0xff]  ;;  %v537_v28 = vld [vmem:[#allocation2 + $0x14f] sm:$0xff] }
  0x46   : > { %4293 = vmatprep.subr.bf16.mxu1 %v4710_v58  ;;  %4341 = vmatprep.subr.bf16.mxu0 %v4711_v60  ;;  %v1083_v29 = vld [vmem:[#allocation2 + $0x149] sm:$0xff] }
  0x47   : > { %4295 = vmatprep.mubr.bf16.mxu1 %v548_v61  ;;  %4343 = vmatprep.mubr.bf16.mxu0 %v1095_v62  ;;  %v4723_v61 = vld [vmem:[%s5930_s1 + $0x110] sm:$0xff]  }
  0x48   : > { %v1077_v62 = vld [vmem:[#allocation2 + $0xe9] sm:$0xff] }
  0x49   : > { %4294 = vmatpush3.bf16.msra.mxu1 %v4710_v58  ;;  %4342 = vmatpush3.bf16.msra.mxu0 %v4711_v60  ;;  %v530_v58 = vld [vmem:[#allocation2 + $0xe7] sm:$0xff]  ;;  %v531_v60 = vld [vmem:[#allocation2 + $0xef] sm:$0xff] }
  0x4a   : > { %4375 = vmatprep.subr.bf16.mxu1 %v4712_v3  ;;  %4423 = vmatprep.subr.bf16.mxu0 %v4713_v4  ;;  %v5199_v15 = vpack.c.bf16 %v531_v60, %v530_v58  ;;  %v538_v58 = vld [vmem:[#allocation2 + $0x167] sm:$0xff]  ;;  %v539_v60 = vld [vmem:[#allocation2 + $0x16f] sm:$0xff] }
  0x4b   : > { %v541_v1 = vld [vmem:[#allocation2 + $0x18f] sm:$0xff] }
  0x4c   : > { %4296 = vmatmul.mubr.bf16.vlgmr.msra.gmra.mxu1 %v5126_v10  ;;  %4344 = vmatmul.mubr.bf16.vlgmr.msra.gmra.mxu0 %v5128_v11  ;;  %v1087_v2 = vld [vmem:[#allocation2 + $0x189] sm:$0xff]  ;;  %v5248_v5 = vpack.c.bf16 %v541_v1, %v540_v63 }
  0x4d   : > { %4376 = vmatpush3.bf16.msra.mxu1 %v4712_v3  ;;  %4424 = vmatpush3.bf16.msra.mxu0 %v4713_v4  ;;  %v1078_v3 = vld [vmem:[#allocation2 + $0xf1] sm:$0xff]  ;;  %v4724_v4 = vld [vmem:[%s5930_s1 + $0xc8] sm:$0xff]  }
  0x4e   : > { %4299 = vmatprep.mubr.bf16.mxu1 %v5130_v13  ;;  %4347 = vmatprep.mubr.bf16.mxu0 %v5132_v14  ;;  %v5201_v16 = vpack.c.bf16 %v1078_v3, %v1077_v62  ;;  %v1086_v62 = vld [vmem:[#allocation2 + $0x171] sm:$0xff]  ;;  %v5244_v3 = vpack.c.bf16 %v539_v60, %v538_v58  ;;  %v1091_v24 = vld [vmem:[#allocation2 + $0x1c9] sm:$0xff] }
  0x4f   : > { %4377 = vmatprep.subr.bf16.mxu1 %v4714_v20  ;;  %4425 = vmatprep.subr.bf16.mxu0 %v4715_v21  ;;  %v545_v23 = vld [vmem:[#allocation2 + $0x1cf] sm:$0xff] }
  0x50   : > { %v4730_v58 = vld [vmem:[%s5930_s1 + $0x170] sm:$0xff]   ;;  %v1691_v63 = vld [vmem:[#allocation2 + $0x128] sm:$0xff] }
  0x51   : > { %4378 = vmatpush3.bf16.msra.mxu1 %v4714_v20  ;;  %4426 = vmatpush3.bf16.msra.mxu0 %v4715_v21  ;;  %v338_v20 = vmul.f32 %v3903_v8, %v4839_v7  ;;  %v339_v21 = vmul.f32 %v3904_v9, %v4839_v7  ;;  %v542_v8 = vld [vmem:[#allocation2 + $0x1a7] sm:$0xff]  ;;  %v543_v9 = vld [vmem:[#allocation2 + $0x1af] sm:$0xff] }
  0x52   : > { %4379 = vmatprep.subr.bf16.mxu1 %v4716_v26  ;;  %4427 = vmatprep.subr.bf16.mxu0 %v4717_v27  ;;  %v4731_v60 = vld [vmem:[%s5930_s1 + $0x1b0] sm:$0xff]  }
  0x53   : > { %v378_v7 = vadd.f32 %v4846_v12, %v339_v21  ;;  %v1090_v21 = vld [vmem:[#allocation2 + $0x1b1] sm:$0xff] }
  0x54   : > { %4300 = vmatmul.mubr.bf16.gmra.mxu1 %v5150_v30  ;;  %4348 = vmatmul.mubr.bf16.gmra.mxu0 %v5152_v31  ;;  %v1692_v1 = vld [vmem:[#allocation2 + $0x130] sm:$0xff] }
  0x55   : > { %4303 = vmatprep.mubr.bf16.mxu1 %v5154_v34  ;;  %4351 = vmatprep.mubr.bf16.mxu0 %v5156_v38  ;;  %v410_v39 = vmax.f32 %v378_v7, 0.0 }
  0x56   : > { %4380 = vmatpush3.bf16.msra.mxu1 %v4716_v26  ;;  %4428 = vmatpush3.bf16.msra.mxu0 %v4717_v27  ;;  %v1082_v26 = vld [vmem:[#allocation2 + $0x131] sm:$0xff]  ;;  %v4727_v27 = vld [vmem:[%s5930_s1 + $0x100] sm:$0xff]  }
  0x57   : > { %4381 = vmatprep.subr.bf16.mxu1 %v4718_v40  ;;  %4429 = vmatprep.subr.bf16.mxu0 %v4719_v36  ;;  %515 = vst [vmem:[#allocation2 + $0x210] sm:$0xff] %v410_v39 }
  0x5a   : > { %4382 = vmatpush3.bf16.msra.mxu1 %v4718_v40  ;;  %4430 = vmatpush3.bf16.msra.mxu0 %v4719_v36  ;;  %v377_v40 = vadd.f32 %v4846_v12, %v338_v20  ;;  %v1084_v36 = vld [vmem:[#allocation2 + $0x151] sm:$0xff]  ;;  %v1089_v20 = vld [vmem:[#allocation2 + $0x1a9] sm:$0xff] }
  0x5b   : > { %4383 = vmatprep.subr.bf16.mxu1 %v4720_v47  ;;  %4431 = vmatprep.subr.bf16.mxu0 %v4721_v50  ;;  %v5224_v12 = vld [vmem:[%s5930_s1 + $0x178] sm:$0xff]  }
  0x5c   : > { %4304 = vmatmul.mubr.bf16.gmra.mxu1 %v5174_v51  ;;  %4352 = vmatmul.mubr.bf16.gmra.mxu0 %v5176_v52  ;;  %v409_v37 = vmax.f32 %v377_v40, 0.0 }
  0x5d   : > { %4307 = vmatprep.mubr.bf16.mxu1 %v5178_v55  ;;  %4355 = vmatprep.mubr.bf16.mxu0 %v5180_v56 }
  0x5e   : > { %4384 = vmatpush3.bf16.msra.mxu1 %v4720_v47  ;;  %4432 = vmatpush3.bf16.msra.mxu0 %v4721_v50  ;;  %514 = vst [vmem:[#allocation2 + $0x208] sm:$0xff] %v409_v37  ;;  %v5229_v43 = vpack.c.bf16 %v410_v39, %v409_v37  ;;  %v5233_v47 = vpack.c.bf16 %v1082_v26, %v1081_v25  ;;  %v1092_v25 = vld [vmem:[#allocation2 + $0x1d1] sm:$0xff] }
  0x5f   : > { %4385 = vmatprep.subr.bf16.mxu1 %v4722_v57  ;;  %4433 = vmatprep.subr.bf16.mxu0 %v4723_v61  ;;  %v5235_v50 = vpack.c.bf16 %v537_v28, %v536_v41  ;;  %v5256_v26 = vpack.c.bf16 %v543_v9, %v542_v8  ;;  %v5262_v7 = vpack.c.bf16 %v1092_v25, %v1091_v24  ;;  %v546_v41 = vld [vmem:[#allocation2 + $0x1e7] sm:$0xff]  ;;  %v547_v28 = vld [vmem:[#allocation2 + $0x1ef] sm:$0xff]  ;;  %v4744_v24 = vld [vmem:[%s5930_s1 + $0x1f8] sm:$0xff]  }
  0x60   : > { %v5268_v37 = vpack.c.bf16 %v547_v28, %v546_v41  ;;  %v5327_v8 = vpack.c.bf16 %v1692_v1, %v1691_v63  ;;  %v4743_v9 = vld [vmem:[%s5930_s1 + $0x180] sm:$0xff]   ;;  %v4745_v25 = vld [vmem:[%s5930_s1 + $0x238] sm:$0xff]  }
  0x61   : > { %v2901_v63 = vld [vmem:[#allocation2 + $0x51] sm:$0xff] }
  0x62   : > { %4386 = vmatpush3.bf16.msra.mxu1 %v4722_v57  ;;  %4434 = vmatpush3.bf16.msra.mxu0 %v4723_v61  ;;  %v5237_v57 = vpack.c.bf16 %v1084_v36, %v1083_v29  ;;  %v1085_v61 = vld [vmem:[#allocation2 + $0x169] sm:$0xff]  ;;  %v1094_v36 = vld [vmem:[#allocation2 + $0x1f1] sm:$0xff] }
  0x63   : > { %4387 = vmatprep.subr.bf16.mxu1 %v4724_v4  ;;  %4435 = vmatprep.subr.bf16.mxu0 %v4725_v6  ;;  %v1093_v29 = vld [vmem:[#allocation2 + $0x1e9] sm:$0xff] }
  0x64   : > { %4308 = vmatmul.mubr.bf16.gmra.mxu1 %v5199_v15  ;;  %4356 = vmatmul.mubr.bf16.gmra.mxu0 %v5201_v16  ;;  %v5270_v39 = vpack.c.bf16 %v1094_v36, %v1093_v29 }
  0x65   : > { %4311 = vmatprep.mubr.bf16.mxu1 %v5203_v17  ;;  %4359 = vmatprep.mubr.bf16.mxu0 %v5205_v18  ;;  %v1399_v29 = vld [vmem:[#allocation2 + $0x207] sm:$0xff]  ;;  %v1400_v36 = vld [vmem:[#allocation2 + $0x20f] sm:$0xff] }
  0x66   : > { %4388 = vmatpush3.bf16.msra.mxu1 %v4724_v4  ;;  %4436 = vmatpush3.bf16.msra.mxu0 %v4725_v6  ;;  %v5246_v4 = vpack.c.bf16 %v1086_v62, %v1085_v61  ;;  %v5250_v6 = vpack.c.bf16 %v1088_v0, %v1087_v2  ;;  %v1689_v61 = vld [vmem:[#allocation2 + $0x108] sm:$0xff]  ;;  %v1690_v62 = vld [vmem:[#allocation2 + $0x110] sm:$0xff] }
  0x67   : > { %4389 = vmatprep.subr.bf16.mxu1 %v4726_v22  ;;  %4437 = vmatprep.subr.bf16.mxu0 %v4727_v27  ;;  %v4740_v2 = vld [vmem:[%s5930_s1 + $0x148] sm:$0xff]   ;;  %v5325_v0 = vpack.c.bf16 %v1690_v62, %v1689_v61  ;;  %v2595_v61 = vld [vmem:[#allocation2 + $0x50] sm:$0xff] }
  0x68   : > { %v2900_v62 = vld [vmem:[#allocation2 + $0x49] sm:$0xff] }
  0x6a   : > { %4390 = vmatpush3.bf16.msra.mxu1 %v4726_v22  ;;  %4438 = vmatpush3.bf16.msra.mxu0 %v4727_v27  ;;  %v544_v22 = vld [vmem:[#allocation2 + $0x1c7] sm:$0xff]  ;;  %v5258_v27 = vpack.c.bf16 %v1090_v21, %v1089_v20  ;;  %v1694_v21 = vld [vmem:[#allocation2 + $0x150] sm:$0xff] }
  0x6b   : > { %4471 = vmatprep.subr.bf16.mxu1 %v5224_v12  ;;  %4519 = vmatprep.subr.bf16.mxu0 %v4729_v42  ;;  %v5260_v40 = vpack.c.bf16 %v545_v23, %v544_v22  ;;  %v1693_v20 = vld [vmem:[#allocation2 + $0x148] sm:$0xff]  ;;  %v1696_v23 = vld [vmem:[#allocation2 + $0x170] sm:$0xff] }
  0x6c   : > { %4312 = vmatmul.mubr.bf16.gmra.mxu1 %v5231_v46  ;;  %4360 = vmatmul.mubr.bf16.gmra.mxu0 %v5233_v47  ;;  %v1695_v22 = vld [vmem:[#allocation2 + $0x168] sm:$0xff]  ;;  %v5345_v41 = vpack.c.bf16 %v1694_v21, %v1693_v20 }
  0x6d   : > { %4315 = vmatprep.mubr.bf16.mxu1 %v5235_v50  ;;  %4363 = vmatprep.mubr.bf16.mxu0 %v5237_v57  ;;  %v5347_v28 = vpack.c.bf16 %v1696_v23, %v1695_v22  ;;  %v2596_v22 = vld [vmem:[#allocation2 + $0x68] sm:$0xff]  ;;  %v2597_v23 = vld [vmem:[#allocation2 + $0x70] sm:$0xff] }
  0x74   : > { %4316 = vmatmul.mubr.bf16.gmra.mxu1 %v5244_v3  ;;  %4364 = vmatmul.mubr.bf16.gmra.mxu0 %v5246_v4 }
  0x75   : > { %4319 = vmatprep.mubr.bf16.mxu1 %v5248_v5  ;;  %4367 = vmatprep.mubr.bf16.mxu0 %v5250_v6 }
  0x7c   : > { %4320 = vmatmul.mubr.bf16.gmra.mxu1 %v5256_v26  ;;  %4368 = vmatmul.mubr.bf16.gmra.mxu0 %v5258_v27 }
  0x7d   : > { %4323 = vmatprep.mubr.bf16.mxu1 %v5260_v40  ;;  %4371 = vmatprep.mubr.bf16.mxu0 %v5262_v7 }
  0x84   : > { %4324 = vmatmul.mubr.bf16.gmra.mxu1 %v5268_v37  ;;  %4372 = vmatmul.mubr.bf16.gmra.mxu0 %v5270_v39 }
  0x85   : > { %4391 = vmatprep.mubr.bf16.mxu1 %v5126_v10  ;;  %4439 = vmatprep.mubr.bf16.mxu0 %v4934_v19  ;;  %v4732_v19 = vld [vmem:[%s5930_s1 + $0x168] sm:$0xff]  }
  0x86   : > { %v4733_v10 = vld [vmem:[%s5930_s1 + $0x1a8] sm:$0xff]  }
  0x8c   : > { %4392 = vmatmul.mubr.bf16.vlgmr.msra.gmra.mxu1 %v5130_v13  ;;  %4440 = vmatmul.mubr.bf16.vlgmr.msra.gmra.mxu0 %v4965_v35  ;;  %v4734_v35 = vld [vmem:[%s5930_s1 + $0x160] sm:$0xff]  }
  0x8d   : > { %4472 = vmatpush3.bf16.msra.mxu1 %v5224_v12  ;;  %4520 = vmatpush3.bf16.msra.mxu0 %v4729_v42  ;;  %v4736_v12 = vld [vmem:[%s5930_s1 + $0x158] sm:$0xff]  }
  0x8e   : > { %4395 = vmatprep.mubr.bf16.mxu1 %v5150_v30  ;;  %4443 = vmatprep.mubr.bf16.mxu0 %v5010_v59  ;;  %v4735_v59 = vld [vmem:[%s5930_s1 + $0x1a0] sm:$0xff]   ;;  %v4737_v42 = vld [vmem:[%s5930_s1 + $0x198] sm:$0xff]  }
  0x8f   : > { %4473 = vmatprep.subr.bf16.mxu1 %v4730_v58  ;;  %4521 = vmatprep.subr.bf16.mxu0 %v4731_v60 }
  0x91   : > { %4474 = vmatpush3.bf16.msra.mxu1 %v4730_v58  ;;  %4522 = vmatpush3.bf16.msra.mxu0 %v4731_v60  ;;  %v5361_v58 = vpack.c.bf16 %v1400_v36, %v1399_v29  ;;  %v2598_v29 = vld [vmem:[#allocation2 + $0x88] sm:$0xff] }
  0x92   : > { %4475 = vmatprep.subr.bf16.mxu1 %v4732_v19  ;;  %4523 = vmatprep.subr.bf16.mxu0 %v4733_v10 }
  0x94   : > { %4396 = vmatmul.mubr.bf16.gmra.mxu1 %v5154_v34  ;;  %4444 = vmatmul.mubr.bf16.gmra.mxu0 %v5059_v32  ;;  %v4738_v32 = vld [vmem:[%s5930_s1 + $0x150] sm:$0xff]  }
  0x95   : > { %4399 = vmatprep.mubr.bf16.mxu1 %v5174_v51  ;;  %4447 = vmatprep.mubr.bf16.mxu0 %v5082_v44  ;;  %v4739_v44 = vld [vmem:[%s5930_s1 + $0x190] sm:$0xff]  }
  0x96   : > { %4476 = vmatpush3.bf16.msra.mxu1 %v4732_v19  ;;  %4524 = vmatpush3.bf16.msra.mxu0 %v4733_v10 }
  0x97   : > { %4477 = vmatprep.subr.bf16.mxu1 %v4734_v35  ;;  %4525 = vmatprep.subr.bf16.mxu0 %v4735_v59 }
  0x9a   : > { %4478 = vmatpush3.bf16.msra.mxu1 %v4734_v35  ;;  %4526 = vmatpush3.bf16.msra.mxu0 %v4735_v59 }
  0x9b   : > { %4479 = vmatprep.subr.bf16.mxu1 %v4736_v12  ;;  %4527 = vmatprep.subr.bf16.mxu0 %v4737_v42 }
  0x9c   : > { %4400 = vmatmul.mubr.bf16.gmra.mxu1 %v5178_v55  ;;  %4448 = vmatmul.mubr.bf16.gmra.mxu0 %v5094_v48  ;;  %v4741_v48 = vld [vmem:[%s5930_s1 + $0x188] sm:$0xff]  }
  0x9d   : > { %4403 = vmatprep.mubr.bf16.mxu1 %v5199_v15  ;;  %4451 = vmatprep.mubr.bf16.mxu0 %v5108_v53  ;;  %v4742_v53 = vld [vmem:[%s5930_s1 + $0x140] sm:$0xff]  }
  0x9e   : > { %4480 = vmatpush3.bf16.msra.mxu1 %v4736_v12  ;;  %4528 = vmatpush3.bf16.msra.mxu0 %v4737_v42  ;;  %v2319_v12 = vld [vmem:[#allocation2 + $0x22f] sm:$0xff] }
  0x9f   : > { %4481 = vmatprep.subr.bf16.mxu1 %v4738_v32  ;;  %4529 = vmatprep.subr.bf16.mxu0 %v4739_v44  ;;  %v2594_v42 = vld [vmem:[#allocation2 + $0x48] sm:$0xff] }
  0xa2   : > { %4482 = vmatpush3.bf16.msra.mxu1 %v4738_v32  ;;  %4530 = vmatpush3.bf16.msra.mxu0 %v4739_v44 }
  0xa3   : > { %4483 = vmatprep.subr.bf16.mxu1 %v4740_v2  ;;  %4531 = vmatprep.subr.bf16.mxu0 %v4741_v48 }
  0xa4   : > { %4404 = vmatmul.mubr.bf16.gmra.mxu1 %v5203_v17  ;;  %4452 = vmatmul.mubr.bf16.gmra.mxu0 %v5325_v0 }
  0xa5   : > { %4407 = vmatprep.mubr.bf16.mxu1 %v5231_v46  ;;  %4455 = vmatprep.mubr.bf16.mxu0 %v5327_v8 }
  0xa6   : > { %4484 = vmatpush3.bf16.msra.mxu1 %v4740_v2  ;;  %4532 = vmatpush3.bf16.msra.mxu0 %v4741_v48  ;;  %v2932_v48 = vpack.c.bf16 %v2901_v63, %v2900_v62  ;;  %v2603_v63 = vld [vmem:[#allocation2 + $0xd0] sm:$0xff] }
  0xa7   : > { %4485 = vmatprep.subr.bf16.mxu1 %v4742_v53  ;;  %4533 = vmatprep.subr.bf16.mxu0 %v4743_v9 }
  0xaa   : > { %4486 = vmatpush3.bf16.msra.mxu1 %v4742_v53  ;;  %4534 = vmatpush3.bf16.msra.mxu0 %v4743_v9 }
  0xab   : > { %4567 = vmatprep.subr.bf16.mxu1 %v4744_v24  ;;  %4615 = vmatprep.subr.bf16.mxu0 %v4745_v25 }
  0xac   : > { %4408 = vmatmul.mubr.bf16.gmra.mxu1 %v5235_v50  ;;  %4456 = vmatmul.mubr.bf16.gmra.mxu0 %v5345_v41 }
  0xad   : > { %4411 = vmatprep.mubr.bf16.mxu1 %v5244_v3  ;;  %4459 = vmatprep.mubr.bf16.mxu0 %v5347_v28 }
  0xb4   : > { %4412 = vmatmul.mubr.bf16.gmra.mxu1 %v5248_v5  ;;  %4460 = vmatmul.mubr.bf16.gmra.mxu0 %v5063_v33  ;;  %v4746_v33 = vld [vmem:[%s5930_s1 + $0x1f0] sm:$0xff]  }
  0xb5   : > { %4415 = vmatprep.mubr.bf16.mxu1 %v5256_v26  ;;  %4463 = vmatprep.mubr.bf16.mxu0 %v5086_v45  ;;  %v4747_v45 = vld [vmem:[%s5930_s1 + $0x230] sm:$0xff]  }
  0xbc   : > { %4416 = vmatmul.mubr.bf16.gmra.mxu1 %v5260_v40  ;;  %4464 = vmatmul.mubr.bf16.gmra.mxu0 %v5096_v49  ;;  %v4748_v49 = vld [vmem:[%s5930_s1 + $0x1e8] sm:$0xff]  }
  0xbd   : > { %4419 = vmatprep.mubr.bf16.mxu1 %v5268_v37  ;;  %4467 = vmatprep.mubr.bf16.mxu0 %v5110_v54  ;;  %v4749_v54 = vld [vmem:[%s5930_s1 + $0x228] sm:$0xff]  }
  0xc4   : > { %4420 = vmatmul.mubr.bf16.gmra.mxu1 %v5361_v58  ;;  %4468 = vmatmul.mubr.bf16.gmra.mxu0 %v5229_v43 }
  0xc5   : > { %4487 = vmatprep.mubr.bf16.mxu1 %v5128_v11  ;;  %4535 = vmatprep.mubr.bf16.mxu0 %v5130_v13  ;;  %v4750_v11 = vld [vmem:[%s5930_s1 + $0x1e0] sm:$0xff]  }
  0xc6   : > { %v4751_v13 = vld [vmem:[%s5930_s1 + $0x220] sm:$0xff]  }
  0xcc   : > { %4488 = vmatmul.mubr.bf16.vlgmr.msra.gmra.mxu1 %v5132_v14  ;;  %4536 = vmatmul.mubr.bf16.vlgmr.msra.gmra.mxu0 %v5150_v30  ;;  %v4752_v14 = vld [vmem:[%s5930_s1 + $0x1d8] sm:$0xff]  }
  0xcd   : > { %4568 = vmatpush3.bf16.msra.mxu1 %v4744_v24  ;;  %4616 = vmatpush3.bf16.msra.mxu0 %v4745_v25  ;;  %v4753_v30 = vld [vmem:[%s5930_s1 + $0x218] sm:$0xff]   ;;  %v2902_v24 = vld [vmem:[#allocation2 + $0x69] sm:$0xff] }
  0xce   : > { %4491 = vmatprep.mubr.bf16.mxu1 %v5152_v31  ;;  %4539 = vmatprep.mubr.bf16.mxu0 %v5154_v34  ;;  %v4754_v31 = vld [vmem:[%s5930_s1 + $0x1d0] sm:$0xff]  }
  0xcf   : > { %4569 = vmatprep.subr.bf16.mxu1 %v4746_v33  ;;  %4617 = vmatprep.subr.bf16.mxu0 %v4747_v45  ;;  %v4755_v34 = vld [vmem:[%s5930_s1 + $0x210] sm:$0xff]  }
  0xd0   : > { %v2903_v25 = vld [vmem:[#allocation2 + $0x71] sm:$0xff] }
  0xd1   : > { %4570 = vmatpush3.bf16.msra.mxu1 %v4746_v33  ;;  %4618 = vmatpush3.bf16.msra.mxu0 %v4747_v45  ;;  %v2599_v33 = vld [vmem:[#allocation2 + $0x90] sm:$0xff] }
  0xd2   : > { %4571 = vmatprep.subr.bf16.mxu1 %v4748_v49  ;;  %4619 = vmatprep.subr.bf16.mxu0 %v4749_v54  ;;  %v2904_v45 = vld [vmem:[#allocation2 + $0x89] sm:$0xff] }
  0xd4   : > { %4492 = vmatmul.mubr.bf16.gmra.mxu1 %v5156_v38  ;;  %4540 = vmatmul.mubr.bf16.gmra.mxu0 %v5174_v51  ;;  %v4756_v38 = vld [vmem:[%s5930_s1 + $0x1c8] sm:$0xff]  }
  0xd5   : > { %4495 = vmatprep.mubr.bf16.mxu1 %v5176_v52  ;;  %4543 = vmatprep.mubr.bf16.mxu0 %v5178_v55  ;;  %v4757_v51 = vld [vmem:[%s5930_s1 + $0x208] sm:$0xff]   ;;  %v4758_v52 = vld [vmem:[%s5930_s1 + $0x1c0] sm:$0xff]  }
  0xd6   : > { %4572 = vmatpush3.bf16.msra.mxu1 %v4748_v49  ;;  %4620 = vmatpush3.bf16.msra.mxu0 %v4749_v54  ;;  %v4759_v55 = vld [vmem:[%s5930_s1 + $0x200] sm:$0xff]   ;;  %v2905_v49 = vld [vmem:[#allocation2 + $0x91] sm:$0xff] }
  0xd7   : > { %4573 = vmatprep.subr.bf16.mxu1 %v4750_v11  ;;  %4621 = vmatprep.subr.bf16.mxu0 %v4751_v13 }
  0xda   : > { %4574 = vmatpush3.bf16.msra.mxu1 %v4750_v11  ;;  %4622 = vmatpush3.bf16.msra.mxu0 %v4751_v13  ;;  %v2627_v13 = vpack.c.bf16 %v2597_v23, %v2596_v22 }
  0xdb   : > { %4575 = vmatprep.subr.bf16.mxu1 %v4752_v14  ;;  %4623 = vmatprep.subr.bf16.mxu0 %v4753_v30 }
  0xdc   : > { %4496 = vmatmul.mubr.bf16.gmra.mxu1 %v5180_v56  ;;  %4544 = vmatmul.mubr.bf16.gmra.mxu0 %v5199_v15 }
  0xdd   : > { %4499 = vmatprep.mubr.bf16.mxu1 %v5201_v16  ;;  %4547 = vmatprep.mubr.bf16.mxu0 %v5203_v17 }
  0xde   : > { %4576 = vmatpush3.bf16.msra.mxu1 %v4752_v14  ;;  %4624 = vmatpush3.bf16.msra.mxu0 %v4753_v30  ;;  %v2933_v14 = vpack.c.bf16 %v2903_v25, %v2902_v24  ;;  %v2628_v30 = vpack.c.bf16 %v2599_v33, %v2598_v29 }
  0xdf   : > { %4577 = vmatprep.subr.bf16.mxu1 %v4754_v31  ;;  %4625 = vmatprep.subr.bf16.mxu0 %v4755_v34 }
  0xe2   : > { %4578 = vmatpush3.bf16.msra.mxu1 %v4754_v31  ;;  %4626 = vmatpush3.bf16.msra.mxu0 %v4755_v34  ;;  %v2934_v31 = vpack.c.bf16 %v2905_v49, %v2904_v45 }
  0xe3   : > { %4579 = vmatprep.subr.bf16.mxu1 %v4756_v38  ;;  %4627 = vmatprep.subr.bf16.mxu0 %v4757_v51 }
  0xe4   : > { %4500 = vmatmul.mubr.bf16.gmra.mxu1 %v5205_v18  ;;  %4548 = vmatmul.mubr.bf16.gmra.mxu0 %v5231_v46 }
  0xe5   : > { %4503 = vmatprep.mubr.bf16.mxu1 %v5233_v47  ;;  %4551 = vmatprep.mubr.bf16.mxu0 %v5235_v50 }
  0xe6   : > { %4580 = vmatpush3.bf16.msra.mxu1 %v4756_v38  ;;  %4628 = vmatpush3.bf16.msra.mxu0 %v4757_v51 }
  0xe7   : > { %4581 = vmatprep.subr.bf16.mxu1 %v4758_v52  ;;  %4629 = vmatprep.subr.bf16.mxu0 %v4759_v55 }
  0xea   : > { %4582 = vmatpush3.bf16.msra.mxu1 %v4758_v52  ;;  %4630 = vmatpush3.bf16.msra.mxu0 %v4759_v55  ;;  %v2600_v55 = vld [vmem:[#allocation2 + $0xa8] sm:$0xff] }
  0xec   : > { %v5425_v56 = vpop.f32.mrf.mxu0  ;;  %v5427_v15 = vpop.f32.mrf.mxu1  ;;  %4504 = vmatmul.mubr.bf16.gmra.mxu1 %v5237_v57  ;;  %4552 = vmatmul.mubr.bf16.gmra.mxu0 %v5244_v3 }
  0xed   : > { %4507 = vmatprep.mubr.bf16.mxu1 %v5246_v4  ;;  %4555 = vmatprep.mubr.bf16.mxu0 %v5248_v5 }
  0xee   : > { %v5433_v16 = vpop.f32.mrf.mxu0  ;;  %v5435_v17 = vpop.f32.mrf.mxu1 }
  0xf0   : > { %v5437_v18 = vpop.f32.mrf.mxu0  ;;  %v5439_v46 = vpop.f32.mrf.mxu1 }
  0xf2   : > { %v5441_v47 = vpop.f32.mrf.mxu0  ;;  %v5443_v50 = vpop.f32.mrf.mxu1 }
  0xf4   : > { %v5445_v60 = vpop.f32.mrf.mxu0  ;;  %v5447_v57 = vpop.f32.mrf.mxu1  ;;  %4508 = vmatmul.mubr.bf16.gmra.mxu1 %v5250_v6  ;;  %4556 = vmatmul.mubr.bf16.gmra.mxu0 %v5256_v26  ;;  %v2011_v26 = vld [vmem:[#allocation2 + $0x209] sm:$0xff] }
  0xf5   : > { %4511 = vmatprep.mubr.bf16.mxu1 %v5258_v27  ;;  %4559 = vmatprep.mubr.bf16.mxu0 %v5260_v40  ;;  %v2012_v27 = vld [vmem:[#allocation2 + $0x211] sm:$0xff]  ;;  %v2318_v40 = vld [vmem:[#allocation2 + $0x227] sm:$0xff] }
  0xf6   : > { %v5453_v3 = vpop.f32.mrf.mxu0  ;;  %v5455_v4 = vpop.f32.mrf.mxu1  ;;  %v2335_v2 = vpack.c.bf16 %v2319_v12, %v2318_v40  ;;  %v2906_v40 = vld [vmem:[#allocation2 + $0xa9] sm:$0xff]  ;;  %v2907_v12 = vld [vmem:[#allocation2 + $0xb1] sm:$0xff] }
  0xf7   : > { %v2935_v29 = vpack.c.bf16 %v2907_v12, %v2906_v40  ;;  %v2911_v40 = vld [vmem:[#allocation2 + $0xf1] sm:$0xff] }
  0xf8   : > { %v5457_v5 = vpop.f32.mrf.mxu0  ;;  %v5459_v19 = vpop.f32.mrf.mxu1 }
  0xfa   : > { %v5461_v10 = vpop.f32.mrf.mxu0  ;;  %v5463_v35 = vpop.f32.mrf.mxu1 }
  0xfc   : > { %v5465_v59 = vpop.f32.mrf.mxu0  ;;  %v5467_v6 = vpop.f32.mrf.mxu1  ;;  %4512 = vmatmul.mubr.bf16.gmra.mxu1 %v5262_v7  ;;  %4560 = vmatmul.mubr.bf16.gmra.mxu0 %v5268_v37  ;;  %v5481_v37 = vpack.c.bf16 %v2012_v27, %v2011_v26  ;;  %v2601_v26 = vld [vmem:[#allocation2 + $0xb0] sm:$0xff] }
  0xfd   : > { %4515 = vmatprep.mubr.bf16.mxu1 %v5270_v39  ;;  %4563 = vmatprep.mubr.bf16.mxu0 %v5361_v58  ;;  %v2626_v39 = vpack.c.bf16 %v2595_v61, %v2594_v42  ;;  %v2602_v42 = vld [vmem:[#allocation2 + $0xc8] sm:$0xff]  ;;  %v2629_v25 = vpack.c.bf16 %v2601_v26, %v2600_v55 }
  0xfe   : > { %v5473_v32 = vpop.f32.mrf.mxu0  ;;  %v5475_v44 = vpop.f32.mrf.mxu1  ;;  %v2630_v45 = vpack.c.bf16 %v2603_v63, %v2602_v42  ;;  %v2910_v26 = vld [vmem:[#allocation2 + $0xe9] sm:$0xff] }
 0x100   : > { %v5477_v1 = vpop.f32.mrf.mxu0  ;;  %v5479_v7 = vpop.f32.mrf.mxu1 }
 0x102   : > { %v5483_v53 = vpop.f32.mrf.mxu0  ;;  %v5485_v9 = vpop.f32.mrf.mxu1 }
 0x104   : > { %v5487_v20 = vpop.f32.mrf.mxu0  ;;  %v5489_v21 = vpop.f32.mrf.mxu1  ;;  %4516 = vmatmul.mubr.bf16.gmra.mxu1 %v5481_v37  ;;  %4564 = vmatmul.mubr.bf16.gmra.mxu0 %v2335_v2  ;;  %v2908_v2 = vld [vmem:[#allocation2 + $0xc9] sm:$0xff] }
 0x105   : > { %4583 = vmatprep.mubr.bf16.mxu1 %v2626_v39  ;;  %4631 = vmatprep.mubr.bf16.mxu0 %v2932_v48  ;;  %v2909_v39 = vld [vmem:[#allocation2 + $0xd1] sm:$0xff] }
 0x106   : > { %v5492_v36 = vpop.f32.mrf.mxu0  ;;  %v5494_v58 = vpop.f32.mrf.mxu1  ;;  %v2936_v49 = vpack.c.bf16 %v2909_v39, %v2908_v2 }
 0x108   : > { %v5496_v54 = vpop.f32.mrf.mxu0  ;;  %v5498_v11 = vpop.f32.mrf.mxu1 }
 0x10a   : > { %v5500_v34 = vpop.f32.mrf.mxu0  ;;  %v5502_v38 = vpop.f32.mrf.mxu1 }
 0x10c   : > { %v4297_v51 = vpop.f32.mrf.mxu1  ;;  %v4345_v52 = vpop.f32.mrf.mxu0  ;;  %4584 = vmatmul.mubr.bf16.vlgmr.msra.gmra.mxu1 %v2627_v13  ;;  %4632 = vmatmul.mubr.bf16.vlgmr.msra.gmra.mxu0 %v2933_v14 }
 0x10d   : > { %v945_v27 = vadd.f32 %v4297_v51, %v5425_v56  ;;  %4587 = vmatprep.mubr.bf16.mxu1 %v2628_v30  ;;  %4635 = vmatprep.mubr.bf16.mxu0 %v2934_v31 }
 0x10e   : > { %v936_v61 = vpop.f32.mrf.mxu1  ;;  %v1210_v62 = vpop.f32.mrf.mxu0 }
 0x10f   : > { %v5505_v48 = vadd.f32 %v4345_v52, %v945_v27  ;;  %v937_v22 = vadd.f32 %v936_v61, %v5433_v16  ;;  %v2604_v16 = vld [vmem:[#allocation2 + $0xe8] sm:$0xff] }
 0x110   : > { %v4298_v23 = vpop.f32.mrf.mxu1  ;;  %v4346_v24 = vpop.f32.mrf.mxu0  ;;  %v2912_v61 = vld [vmem:[#allocation2 + $0x109] sm:$0xff] }
 0x111   : > { %v5508_v33 = vadd.f32 %v1210_v62, %v937_v22  ;;  %v948_v56 = vadd.f32 %v4298_v23, %v5437_v18  ;;  %v2605_v18 = vld [vmem:[#allocation2 + $0xf0] sm:$0xff]  ;;  %v2937_v23 = vpack.c.bf16 %v2911_v40, %v2910_v26 }
 0x112   : > { %v939_v13 = vpop.f32.mrf.mxu1  ;;  %v1213_v14 = vpop.f32.mrf.mxu0  ;;  %v2913_v62 = vld [vmem:[#allocation2 + $0x111] sm:$0xff]  ;;  %v2631_v22 = vpack.c.bf16 %v2605_v18, %v2604_v16 }
 0x113   : > { %v5511_v30 = vadd.f32 %v4346_v24, %v948_v56  ;;  %v940_v31 = vadd.f32 %v939_v13, %v5441_v47  ;;  %v2917_v18 = vld [vmem:[#allocation2 + $0x151] sm:$0xff] }
 0x114   : > { %v4301_v51 = vpop.f32.mrf.mxu1  ;;  %v4349_v52 = vpop.f32.mrf.mxu0  ;;  %4588 = vmatmul.mubr.bf16.gmra.mxu1 %v2629_v25  ;;  %4636 = vmatmul.mubr.bf16.gmra.mxu0 %v2935_v29  ;;  %v2938_v25 = vpack.c.bf16 %v2913_v62, %v2912_v61 }
 0x115   : > { %v5514_v27 = vadd.f32 %v1213_v14, %v940_v31  ;;  %v961_v55 = vadd.f32 %v4301_v51, %v5445_v60  ;;  %4591 = vmatprep.mubr.bf16.mxu1 %v2630_v45  ;;  %4639 = vmatprep.mubr.bf16.mxu0 %v2936_v49  ;;  %v2914_v51 = vld [vmem:[#allocation2 + $0x129] sm:$0xff] }
 0x116   : > { %v952_v12 = vpop.f32.mrf.mxu1  ;;  %v1226_v42 = vpop.f32.mrf.mxu0 }
 0x117   : > { %v5517_v63 = vadd.f32 %v4349_v52, %v961_v55  ;;  %v953_v47 = vadd.f32 %v952_v12, %v5453_v3  ;;  %v2916_v55 = vld [vmem:[#allocation2 + $0x149] sm:$0xff] }
 0x118   : > { %v4302_v2 = vpop.f32.mrf.mxu1  ;;  %v4350_v39 = vpop.f32.mrf.mxu0  ;;  %v2940_v62 = vpack.c.bf16 %v2917_v18, %v2916_v55 }
 0x119   : > { %v5520_v24 = vadd.f32 %v1226_v42, %v953_v47  ;;  %v964_v60 = vadd.f32 %v4302_v2, %v5457_v5  ;;  %v2915_v5 = vld [vmem:[#allocation2 + $0x131] sm:$0xff] }
 0x11a   : > { %v955_v29 = vpop.f32.mrf.mxu1  ;;  %v1229_v56 = vpop.f32.mrf.mxu0  ;;  %v2939_v42 = vpack.c.bf16 %v2915_v5, %v2914_v51 }
 0x11b   : > { %v5523_v45 = vadd.f32 %v4350_v39, %v964_v60  ;;  %v956_v49 = vadd.f32 %v955_v29, %v5461_v10  ;;  %v2614_v29 = vld [vmem:[#allocation2 + $0x188] sm:$0xff] }
 0x11c   : > { %v4305_v13 = vpop.f32.mrf.mxu1  ;;  %v4353_v14 = vpop.f32.mrf.mxu0  ;;  %4592 = vmatmul.mubr.bf16.gmra.mxu1 %v2631_v22  ;;  %4640 = vmatmul.mubr.bf16.gmra.mxu0 %v2937_v23 }
 0x11d   : > { %v5526_v3 = vadd.f32 %v1229_v56, %v956_v49  ;;  %v977_v31 = vadd.f32 %v4305_v13, %v5465_v59  ;;  %4595 = vmatprep.mubr.bf16.mxu1 %v5325_v0  ;;  %4643 = vmatprep.mubr.bf16.mxu0 %v2938_v25  ;;  %v2919_v25 = vld [vmem:[#allocation2 + $0x171] sm:$0xff] }
 0x11e   : > { %v968_v52 = vpop.f32.mrf.mxu1  ;;  %v1242_v16 = vpop.f32.mrf.mxu0  ;;  %v2615_v13 = vld [vmem:[#allocation2 + $0x190] sm:$0xff] }
 0x11f   : > { %v5530_v26 = vadd.f32 %v4353_v14, %v977_v31  ;;  %v969_v10 = vadd.f32 %v968_v52, %v5473_v32  ;;  %v2920_v14 = vld [vmem:[#allocation2 + $0x189] sm:$0xff] }
 0x120   : > { %v4306_v40 = vpop.f32.mrf.mxu1  ;;  %v4354_v12 = vpop.f32.mrf.mxu0 }
 0x121   : > { %v5533_v61 = vadd.f32 %v1242_v16, %v969_v10  ;;  %v980_v59 = vadd.f32 %v4306_v40, %v5477_v1  ;;  %v2918_v1 = vld [vmem:[#allocation2 + $0x169] sm:$0xff] }
 0x122   : > { %v971_v0 = vpop.f32.mrf.mxu1  ;;  %v1245_v47 = vpop.f32.mrf.mxu0  ;;  %v2941_v52 = vpack.c.bf16 %v2919_v25, %v2918_v1  ;;  %v2619_v1 = vld [vmem:[#allocation2 + $0x1d0] sm:$0xff] }
 0x123   : > { %v5536_v2 = vadd.f32 %v4354_v12, %v980_v59  ;;  %v972_v39 = vadd.f32 %v971_v0, %v5483_v53  ;;  %v2921_v53 = vld [vmem:[#allocation2 + $0x191] sm:$0xff] }
 0x124   : > { %v4309_v22 = vpop.f32.mrf.mxu1  ;;  %v4357_v23 = vpop.f32.mrf.mxu0  ;;  %4596 = vmatmul.mubr.bf16.gmra.mxu1 %v5327_v8  ;;  %4644 = vmatmul.mubr.bf16.gmra.mxu0 %v2939_v42  ;;  %v2942_v55 = vpack.c.bf16 %v2921_v53, %v2920_v14  ;;  %v2925_v25 = vld [vmem:[#allocation2 + $0x1d1] sm:$0xff] }
 0x125   : > { %v5540_v32 = vadd.f32 %v1245_v47, %v972_v39  ;;  %v993_v60 = vadd.f32 %v4309_v22, %v5487_v20  ;;  %4599 = vmatprep.mubr.bf16.mxu1 %v5345_v41  ;;  %4647 = vmatprep.mubr.bf16.mxu0 %v2940_v62  ;;  %v2636_v20 = vpack.c.bf16 %v2615_v13, %v2614_v29  ;;  %v2617_v62 = vld [vmem:[#allocation2 + $0x1b0] sm:$0xff]  ;;  %v2618_v22 = vld [vmem:[#allocation2 + $0x1c8] sm:$0xff] }
 0x126   : > { %v984_v56 = vpop.f32.mrf.mxu1  ;;  %v1258_v49 = vpop.f32.mrf.mxu0  ;;  %v2923_v39 = vld [vmem:[#allocation2 + $0x1b1] sm:$0xff] }
 0x127   : > { %v5544_v31 = vadd.f32 %v4357_v23, %v993_v60  ;;  %v985_v8 = vadd.f32 %v984_v56, %v5492_v36  ;;  %v2616_v36 = vld [vmem:[#allocation2 + $0x1a8] sm:$0xff] }
 0x128   : > { %v4310_v51 = vpop.f32.mrf.mxu1  ;;  %v4358_v5 = vpop.f32.mrf.mxu0  ;;  %v2637_v13 = vpack.c.bf16 %v2617_v62, %v2616_v36 }
 0x129   : > { %v5547_v16 = vadd.f32 %v1258_v49, %v985_v8  ;;  %v996_v41 = vadd.f32 %v4310_v51, %v5496_v54  ;;  %v2922_v54 = vld [vmem:[#allocation2 + $0x1a9] sm:$0xff]  ;;  %v2638_v8 = vpack.c.bf16 %v2619_v1, %v2618_v22 }
 0x12a   : > { %v987_v18 = vpop.f32.mrf.mxu1  ;;  %v1261_v10 = vpop.f32.mrf.mxu0  ;;  %v2943_v14 = vpack.c.bf16 %v2923_v39, %v2922_v54 }
 0x12b   : > { %v5550_v40 = vadd.f32 %v4358_v5, %v996_v41  ;;  %v988_v12 = vadd.f32 %v987_v18, %v5500_v34  ;;  %v2924_v34 = vld [vmem:[#allocation2 + $0x1c9] sm:$0xff] }
 0x12c   : > { %v4313_v42 = vpop.f32.mrf.mxu1  ;;  %v4361_v59 = vpop.f32.mrf.mxu0  ;;  %4600 = vmatmul.mubr.bf16.gmra.mxu1 %v5347_v28  ;;  %4648 = vmatmul.mubr.bf16.gmra.mxu0 %v2941_v52  ;;  %v2944_v51 = vpack.c.bf16 %v2925_v25, %v2924_v34 }
 0x12d   : > { %v5554_v0 = vadd.f32 %v1261_v10, %v988_v12  ;;  %v1009_v47 = vadd.f32 %v4313_v42, %v5427_v15  ;;  %4603 = vmatprep.mubr.bf16.mxu1 %v2636_v20  ;;  %4651 = vmatprep.mubr.bf16.mxu0 %v2942_v55  ;;  %v2926_v42 = vld [vmem:[#allocation2 + $0x1e9] sm:$0xff] }
 0x12e   : > { %v1000_v23 = vpop.f32.mrf.mxu1  ;;  %v1274_v60 = vpop.f32.mrf.mxu0 }
 0x12f   : > { %v5557_v29 = vadd.f32 %v4361_v59, %v1009_v47  ;;  %v1001_v28 = vadd.f32 %v1000_v23, %v5435_v17  ;;  %v2620_v17 = vld [vmem:[#allocation2 + $0x1e8] sm:$0xff]  ;;  %v2927_v59 = vld [vmem:[#allocation2 + $0x1f1] sm:$0xff] }
 0x130   : > { %v4314_v56 = vpop.f32.mrf.mxu1  ;;  %v4362_v49 = vpop.f32.mrf.mxu0  ;;  %v2945_v23 = vpack.c.bf16 %v2927_v59, %v2926_v42 }
 0x131   : > { %v5560_v53 = vadd.f32 %v1274_v60, %v1001_v28  ;;  %v1012_v15 = vadd.f32 %v4314_v56, %v5439_v46  ;;  %v2621_v46 = vld [vmem:[#allocation2 + $0x1f0] sm:$0xff] }
 0x132   : > { %v1003_v5 = vpop.f32.mrf.mxu1  ;;  %v1277_v52 = vpop.f32.mrf.mxu0  ;;  %v2639_v22 = vpack.c.bf16 %v2621_v46, %v2620_v17 }
 0x133   : > { %v5563_v41 = vadd.f32 %v4362_v49, %v1012_v15  ;;  %v1004_v20 = vadd.f32 %v1003_v5, %v5443_v50 }
 0x134   : > { %v4317_v55 = vpop.f32.mrf.mxu1  ;;  %v4365_v18 = vpop.f32.mrf.mxu0  ;;  %4604 = vmatmul.mubr.bf16.gmra.mxu1 %v2637_v13  ;;  %4652 = vmatmul.mubr.bf16.gmra.mxu0 %v2943_v14  ;;  %v2930_v14 = vld [vmem:[#allocation2 + $0x229] sm:$0xff] }
 0x135   : > { %v5566_v10 = vadd.f32 %v1277_v52, %v1004_v20  ;;  %v1025_v12 = vadd.f32 %v4317_v55, %v5447_v57  ;;  %4607 = vmatprep.mubr.bf16.mxu1 %v2638_v8  ;;  %4655 = vmatprep.mubr.bf16.mxu0 %v2944_v51  ;;  %v4760_v20 = vld [vmem:[#allocation2 + $0x8] sm:$0xff] }
 0x136   : > { %v1016_v36 = vpop.f32.mrf.mxu1  ;;  %v1290_v62 = vpop.f32.mrf.mxu0  ;;  %v2641_v55 = vpack.c.bf16 %v4760_v20, %v4760_v20 }
 0x137   : > { %v5569_v47 = vadd.f32 %v4365_v18, %v1025_v12  ;;  %v1017_v50 = vadd.f32 %v1016_v36, %v5455_v4 }
 0x138   : > { %v4318_v54 = vpop.f32.mrf.mxu1  ;;  %v4366_v39 = vpop.f32.mrf.mxu0 }
 0x139   : > { %v5572_v60 = vadd.f32 %v1290_v62, %v1017_v50  ;;  %v1028_v1 = vadd.f32 %v4318_v54, %v5459_v19  ;;  %v2931_v19 = vld [vmem:[#allocation2 + $0x231] sm:$0xff] }
 0x13a   : > { %v1019_v57 = vpop.f32.mrf.mxu1  ;;  %v1293_v34 = vpop.f32.mrf.mxu0  ;;  %v2947_v18 = vpack.c.bf16 %v2931_v19, %v2930_v14 }
 0x13b   : > { %v5575_v25 = vadd.f32 %v4366_v39, %v1028_v1  ;;  %v1020_v28 = vadd.f32 %v1019_v57, %v5463_v35 }
 0x13c   : > { %v4321_v56 = vpop.f32.mrf.mxu1  ;;  %v4369_v49 = vpop.f32.mrf.mxu0  ;;  %4608 = vmatmul.mubr.bf16.gmra.mxu1 %v2639_v22  ;;  %4656 = vmatmul.mubr.bf16.gmra.mxu0 %v2945_v23 }
 0x13d   : > { %v5578_v13 = vadd.f32 %v1293_v34, %v1020_v28  ;;  %v1041_v4 = vadd.f32 %v4321_v56, %v5467_v6  ;;  %4611 = vmatprep.mubr.bf16.mxu1 %v5229_v43  ;;  %4659 = vmatprep.mubr.bf16.mxu0 %v5481_v37 }
 0x13e   : > { %v1032_v15 = vpop.f32.mrf.mxu1  ;;  %v1306_v8 = vpop.f32.mrf.mxu0 }
 0x13f   : > { %v5583_v51 = vadd.f32 %v4369_v49, %v1041_v4  ;;  %v1033_v35 = vadd.f32 %v1032_v15, %v5475_v44 }
 0x140   : > { %v4322_v5 = vpop.f32.mrf.mxu1  ;;  %v4370_v52 = vpop.f32.mrf.mxu0 }
 0x141   : > { %v5586_v17 = vadd.f32 %v1306_v8, %v1033_v35  ;;  %v1044_v6 = vadd.f32 %v4322_v5, %v5479_v7 }
 0x142   : > { %v1035_v43 = vpop.f32.mrf.mxu1  ;;  %v1309_v12 = vpop.f32.mrf.mxu0 }
 0x143   : > { %v5589_v37 = vadd.f32 %v4370_v52, %v1044_v6  ;;  %v1036_v46 = vadd.f32 %v1035_v43, %v5485_v9 }
 0x144   : > { %v4325_v42 = vpop.f32.mrf.mxu1  ;;  %v4373_v59 = vpop.f32.mrf.mxu0  ;;  %4612 = vmatmul.mubr.bf16.gmra.mxu1 %v2641_v55  ;;  %4660 = vmatmul.mubr.bf16.gmra.mxu0 %v2947_v18 }
 0x145   : > { %v5592_v44 = vadd.f32 %v1309_v12, %v1036_v46  ;;  %v1057_v36 = vadd.f32 %v4325_v42, %v5489_v21 }
 0x146   : > { %v1048_v62 = vpop.f32.mrf.mxu1  ;;  %v1322_v50 = vpop.f32.mrf.mxu0 }
 0x147   : > { %v5595_v54 = vadd.f32 %v4373_v59, %v1057_v36  ;;  %v1049_v7 = vadd.f32 %v1048_v62, %v5494_v58 }
 0x148   : > { %v4326_v39 = vpop.f32.mrf.mxu1  ;;  %v4374_v22 = vpop.f32.mrf.mxu0 }
 0x149   : > { %v5598_v23 = vadd.f32 %v1322_v50, %v1049_v7  ;;  %v1060_v9 = vadd.f32 %v4326_v39, %v5498_v11 }
 0x14a   : > { %v1051_v1 = vpop.f32.mrf.mxu1  ;;  %v1325_v57 = vpop.f32.mrf.mxu0 }
 0x14b   : > { %v5601_v34 = vadd.f32 %v4374_v22, %v1060_v9  ;;  %v1052_v28 = vadd.f32 %v1051_v1, %v5502_v38 }
 0x14c   : > { %v4393_v56 = vpop.f32.mrf.mxu1  ;;  %v4441_v21 = vpop.f32.mrf.mxu0 }
 0x14d   : > { %v5604_v49 = vadd.f32 %v1325_v57, %v1052_v28  ;;  %v1645_v4 = vadd.f32 %v4393_v56, %v5505_v48 }
 0x14e   : > { %v1516_v14 = vpop.f32.mrf.mxu1  ;;  %v1822_v58 = vpop.f32.mrf.mxu0 }
 0x14f   : > { %v5607_v19 = vadd.f32 %v4441_v21, %v1645_v4  ;;  %v1643_v15 = vadd.f32 %v1516_v14, %v5508_v33 }
 0x150   : > { %v4394_v8 = vpop.f32.mrf.mxu1  ;;  %v4442_v11 = vpop.f32.mrf.mxu0 }
 0x151   : > { %v5610_v35 = vadd.f32 %v1822_v58, %v1643_v15  ;;  %v1646_v5 = vadd.f32 %v4394_v8, %v5511_v30 }
 0x152   : > { %v1519_v52 = vpop.f32.mrf.mxu1  ;;  %v1825_v38 = vpop.f32.mrf.mxu0 }
 0x153   : > { %v5613_v20 = vadd.f32 %v4442_v11, %v1646_v5  ;;  %v1644_v55 = vadd.f32 %v1519_v52, %v5514_v27 }
 0x154   : > { %v4397_v18 = vpop.f32.mrf.mxu1  ;;  %v4445_v48 = vpop.f32.mrf.mxu0 }
 0x155   : > { %v5616_v6 = vadd.f32 %v1825_v38, %v1644_v55  ;;  %v1649_v43 = vadd.f32 %v4397_v18, %v5517_v63 }
 0x156   : > { %v1532_v12 = vpop.f32.mrf.mxu1  ;;  %v1838_v33 = vpop.f32.mrf.mxu0 }
 0x157   : > { %v5619_v46 = vadd.f32 %v4445_v48, %v1649_v43  ;;  %v1647_v42 = vadd.f32 %v1532_v12, %v5520_v24 }
 0x158   : > { %v4398_v59 = vpop.f32.mrf.mxu1  ;;  %v4446_v30 = vpop.f32.mrf.mxu0 }
 0x159   : > { %v5622_v36 = vadd.f32 %v1838_v33, %v1647_v42  ;;  %v1650_v62 = vadd.f32 %v4398_v59, %v5523_v45 }
 0x15a   : > { %v1535_v50 = vpop.f32.mrf.mxu1  ;;  %v1841_v27 = vpop.f32.mrf.mxu0 }
 0x15b   : > { %v5625_v7 = vadd.f32 %v4446_v30, %v1650_v62  ;;  %v1648_v39 = vadd.f32 %v1535_v50, %v5526_v3 }
 0x15c   : > { %v4401_v22 = vpop.f32.mrf.mxu1  ;;  %v4449_v63 = vpop.f32.mrf.mxu0 }
 0x15d   : > { %v5628_v9 = vadd.f32 %v1841_v27, %v1648_v39  ;;  %v1653_v1 = vadd.f32 %v4401_v22, %v5530_v26 }
 0x15e   : > { %v1548_v57 = vpop.f32.mrf.mxu1  ;;  %v1854_v24 = vpop.f32.mrf.mxu0 }
 0x15f   : > { %v5631_v28 = vadd.f32 %v4449_v63, %v1653_v1  ;;  %v1651_v56 = vadd.f32 %v1548_v57, %v5533_v61 }
 0x160   : > { %v4402_v21 = vpop.f32.mrf.mxu1  ;;  %v4450_v45 = vpop.f32.mrf.mxu0 }
 0x161   : > { %v5634_v4 = vadd.f32 %v1854_v24, %v1651_v56  ;;  %v1654_v14 = vadd.f32 %v4402_v21, %v5536_v2 }
 0x162   : > { %v1551_v58 = vpop.f32.mrf.mxu1  ;;  %v1857_v3 = vpop.f32.mrf.mxu0 }
 0x163   : > { %v5637_v15 = vadd.f32 %v4450_v45, %v1654_v14  ;;  %v1652_v8 = vadd.f32 %v1551_v58, %v5540_v32 }
 0x164   : > { %v4405_v11 = vpop.f32.mrf.mxu1  ;;  %v4453_v26 = vpop.f32.mrf.mxu0 }
 0x165   : > { %v5640_v5 = vadd.f32 %v1857_v3, %v1652_v8  ;;  %v1657_v52 = vadd.f32 %v4405_v11, %v5544_v31 }
 0x166   : > { %v1564_v38 = vpop.f32.mrf.mxu1  ;;  %v1870_v61 = vpop.f32.mrf.mxu0 }
 0x167   : > { %v5643_v55 = vadd.f32 %v4453_v26, %v1657_v52  ;;  %v1655_v18 = vadd.f32 %v1564_v38, %v5547_v16 }
 0x168   : > { %v4406_v48 = vpop.f32.mrf.mxu1  ;;  %v4454_v2 = vpop.f32.mrf.mxu0 }
 0x169   : > { %v5646_v43 = vadd.f32 %v1870_v61, %v1655_v18  ;;  %v1658_v12 = vadd.f32 %v4406_v48, %v5550_v40 }
 0x16a   : > { %v1567_v33 = vpop.f32.mrf.mxu1  ;;  %v1873_v32 = vpop.f32.mrf.mxu0 }
 0x16b   : > { %v5649_v42 = vadd.f32 %v4454_v2, %v1658_v12  ;;  %v1656_v59 = vadd.f32 %v1567_v33, %v5554_v0 }
 0x16c   : > { %v4409_v30 = vpop.f32.mrf.mxu1  ;;  %v4457_v31 = vpop.f32.mrf.mxu0 }
 0x16d   : > { %v5652_v62 = vadd.f32 %v1873_v32, %v1656_v59  ;;  %v1661_v50 = vadd.f32 %v4409_v30, %v5557_v29 }
 0x16e   : > { %v1580_v27 = vpop.f32.mrf.mxu1  ;;  %v1886_v16 = vpop.f32.mrf.mxu0 }
 0x16f   : > { %v5655_v39 = vadd.f32 %v4457_v31, %v1661_v50  ;;  %v1659_v22 = vadd.f32 %v1580_v27, %v5560_v53 }
 0x170   : > { %v4410_v63 = vpop.f32.mrf.mxu1  ;;  %v4458_v40 = vpop.f32.mrf.mxu0 }
 0x171   : > { %v5658_v1 = vadd.f32 %v1886_v16, %v1659_v22  ;;  %v1662_v57 = vadd.f32 %v4410_v63, %v5563_v41 }
 0x172   : > { %v1583_v24 = vpop.f32.mrf.mxu1  ;;  %v1889_v0 = vpop.f32.mrf.mxu0 }
 0x173   : > { %v5661_v56 = vadd.f32 %v4458_v40, %v1662_v57  ;;  %v1660_v21 = vadd.f32 %v1583_v24, %v5566_v10 }
 0x174   : > { %v4413_v45 = vpop.f32.mrf.mxu1  ;;  %v4461_v29 = vpop.f32.mrf.mxu0 }
 0x175   : > { %v5664_v14 = vadd.f32 %v1889_v0, %v1660_v21  ;;  %v1665_v58 = vadd.f32 %v4413_v45, %v5569_v47 }
 0x176   : > { %v1596_v3 = vpop.f32.mrf.mxu1  ;;  %v1902_v53 = vpop.f32.mrf.mxu0 }
 0x177   : > { %v5667_v8 = vadd.f32 %v4461_v29, %v1665_v58  ;;  %v1663_v11 = vadd.f32 %v1596_v3, %v5572_v60 }
 0x178   : > { %v4414_v26 = vpop.f32.mrf.mxu1  ;;  %v4462_v41 = vpop.f32.mrf.mxu0 }
 0x179   : > { %v5670_v52 = vadd.f32 %v1902_v53, %v1663_v11  ;;  %v1666_v38 = vadd.f32 %v4414_v26, %v5575_v25 }
 0x17a   : > { %v1599_v61 = vpop.f32.mrf.mxu1  ;;  %v1905_v10 = vpop.f32.mrf.mxu0 }
 0x17b   : > { %5935 = vst [vmem:[#allocation3_spill] sm:$0xff] %v5670_v52  ;;  %v5673_v18 = vadd.f32 %v4462_v41, %v1666_v38  ;;  %v1664_v48 = vadd.f32 %v1599_v61, %v5578_v13 }
 0x17c   : > { %v4417_v2 = vpop.f32.mrf.mxu1  ;;  %v4465_v47 = vpop.f32.mrf.mxu0 }
 0x17d   : > { %5936 = vst [vmem:[#allocation4_spill] sm:$0xff] %v5673_v18  ;;  %v5676_v12 = vadd.f32 %v1905_v10, %v1664_v48  ;;  %v1669_v33 = vadd.f32 %v4417_v2, %v5583_v51 }
 0x17e   : > { %v1612_v32 = vpop.f32.mrf.mxu1  ;;  %v1918_v60 = vpop.f32.mrf.mxu0 }
 0x17f   : > { %5937 = vst [vmem:[#allocation5_spill] sm:$0xff] %v5676_v12  ;;  %v5679_v59 = vadd.f32 %v4465_v47, %v1669_v33  ;;  %v1667_v30 = vadd.f32 %v1612_v32, %v5586_v17 }
 0x180   : > { %v4418_v31 = vpop.f32.mrf.mxu1  ;;  %v4466_v25 = vpop.f32.mrf.mxu0 }
 0x181   : > { %v5682_v50 = vadd.f32 %v1918_v60, %v1667_v30  ;;  %v1670_v27 = vadd.f32 %v4418_v31, %v5589_v37 }
 0x182   : > { %v1615_v16 = vpop.f32.mrf.mxu1  ;;  %v1921_v13 = vpop.f32.mrf.mxu0 }
 0x183   : > { %5938 = vst [vmem:[#allocation6_spill] sm:$0xff] %v5682_v50  ;;  %v5685_v22 = vadd.f32 %v4466_v25, %v1670_v27  ;;  %v1668_v63 = vadd.f32 %v1615_v16, %v5592_v44 }
 0x184   : > { %v4421_v40 = vpop.f32.mrf.mxu1  ;;  %v4469_v51 = vpop.f32.mrf.mxu0 }
 0x185   : > { %5939 = vst [vmem:[#allocation7_spill] sm:$0xff] %v5685_v22  ;;  %v5688_v57 = vadd.f32 %v1921_v13, %v1668_v63  ;;  %v1673_v24 = vadd.f32 %v4421_v40, %v5595_v54 }
 0x186   : > { %v1628_v0 = vpop.f32.mrf.mxu1  ;;  %v1934_v17 = vpop.f32.mrf.mxu0 }
 0x187   : > { %5940 = vst [vmem:[#allocation8_spill] sm:$0xff] %v5688_v57  ;;  %v5691_v21 = vadd.f32 %v4469_v51, %v1673_v24  ;;  %v1671_v45 = vadd.f32 %v1628_v0, %v5598_v23 }
 0x188   : > { %v4422_v29 = vpop.f32.mrf.mxu1  ;;  %v4470_v37 = vpop.f32.mrf.mxu0 }
 0x189   : > { %v5694_v58 = vadd.f32 %v1934_v17, %v1671_v45  ;;  %v1674_v3 = vadd.f32 %v4422_v29, %v5601_v34 }
 0x18a   : > { %v1631_v53 = vpop.f32.mrf.mxu1  ;;  %v1937_v44 = vpop.f32.mrf.mxu0 }
 0x18b   : > { %5941 = vst [vmem:[#allocation9_spill] sm:$0xff] %v5694_v58  ;;  %v5697_v11 = vadd.f32 %v4470_v37, %v1674_v3  ;;  %v1672_v26 = vadd.f32 %v1631_v53, %v5604_v49 }
 0x18c   : > { %v4489_v41 = vpop.f32.mrf.mxu1  ;;  %v4537_v54 = vpop.f32.mrf.mxu0 }
 0x18d   : > { %5942 = vst [vmem:[#allocation10_spill] sm:$0xff] %v5697_v11  ;;  %v5700_v38 = vadd.f32 %v1937_v44, %v1672_v26  ;;  %v2257_v61 = vadd.f32 %v4489_v41, %v5607_v19 }
 0x18e   : > { %v2128_v10 = vpop.f32.mrf.mxu1  ;;  %v2435_v23 = vpop.f32.mrf.mxu0 }
 0x18f   : > { %5943 = vst [vmem:[#allocation11_spill] sm:$0xff] %v5700_v38  ;;  %v5703_v48 = vadd.f32 %v4537_v54, %v2257_v61  ;;  %v2255_v2 = vadd.f32 %v2128_v10, %v5610_v35 }
 0x190   : > { %v5706_v47 = vpop.f32.mrf.mxu1  ;;  %v5708_v34 = vpop.f32.mrf.mxu0 }
 0x191   : > { %v5710_v33 = vadd.f32 %v2435_v23, %v2255_v2 }
 0x192   : > { %v5712_v32 = vpop.f32.mrf.mxu1  ;;  %v5714_v49 = vpop.f32.mrf.mxu0 }
 0x194   : > { %v4493_v60 = vpop.f32.mrf.mxu1  ;;  %v4541_v30 = vpop.f32.mrf.mxu0 }
 0x195   : > { %v2261_v19 = vadd.f32 %v4493_v60, %v5619_v46 }
 0x196   : > { %v5717_v31 = vpop.f32.mrf.mxu1  ;;  %v5719_v25 = vpop.f32.mrf.mxu0 }
 0x197   : > { %v5721_v27 = vadd.f32 %v4541_v30, %v2261_v19 }
 0x198   : > { %v5723_v35 = vpop.f32.mrf.mxu1  ;;  %v5725_v16 = vpop.f32.mrf.mxu0 }
 0x19a   : > { %v5727_v13 = vpop.f32.mrf.mxu1  ;;  %v5729_v63 = vpop.f32.mrf.mxu0 }
 0x19c   : > { %v4497_v40 = vpop.f32.mrf.mxu1  ;;  %v4545_v51 = vpop.f32.mrf.mxu0 }
 0x19d   : > { %v2265_v24 = vadd.f32 %v4497_v40, %v5631_v28 }
 0x19e   : > { %v5732_v0 = vpop.f32.mrf.mxu1  ;;  %v5734_v46 = vpop.f32.mrf.mxu0 }
 0x19f   : > { %v5736_v17 = vadd.f32 %v4545_v51, %v2265_v24 }
 0x1a0   : > { %v5738_v45 = vpop.f32.mrf.mxu1  ;;  %v5740_v29 = vpop.f32.mrf.mxu0 }
 0x1a2   : > { %v5742_v37 = vpop.f32.mrf.mxu1  ;;  %v5744_v3 = vpop.f32.mrf.mxu0 }
 0x1a4   : > { %v4501_v53 = vpop.f32.mrf.mxu1  ;;  %v4549_v44 = vpop.f32.mrf.mxu0 }
 0x1a5   : > { %v2269_v26 = vadd.f32 %v4501_v53, %v5643_v55 }
 0x1a6   : > { %v5747_v41 = vpop.f32.mrf.mxu1  ;;  %v5749_v28 = vpop.f32.mrf.mxu0 }
 0x1a7   : > { %v5751_v54 = vadd.f32 %v4549_v44, %v2269_v26 }
 0x1a8   : > { %v5753_v61 = vpop.f32.mrf.mxu1  ;;  %v5755_v10 = vpop.f32.mrf.mxu0 }
 0x1aa   : > { %v5757_v23 = vpop.f32.mrf.mxu1  ;;  %v5759_v2 = vpop.f32.mrf.mxu0 }
 0x1ac   : > { %v4505_v60 = vpop.f32.mrf.mxu1  ;;  %v4553_v30 = vpop.f32.mrf.mxu0 }
 0x1ad   : > { %v2273_v19 = vadd.f32 %v4505_v60, %v5655_v39 }
 0x1ae   : > { %v5762_v40 = vpop.f32.mrf.mxu1  ;;  %v5764_v55 = vpop.f32.mrf.mxu0 }
 0x1af   : > { %v5766_v51 = vadd.f32 %v4553_v30, %v2273_v19 }
 0x1b0   : > { %v5768_v24 = vpop.f32.mrf.mxu1  ;;  %v5770_v53 = vpop.f32.mrf.mxu0 }
 0x1b2   : > { %v5772_v44 = vpop.f32.mrf.mxu1  ;;  %v5774_v26 = vpop.f32.mrf.mxu0 }
 0x1b3   : > { %5944 = vst [vmem:[#allocation12_spill] sm:$0xff] %v5774_v26 }
 0x1b4   : > { %v4509_v38 = vpop.f32.mrf.mxu1  ;;  %v4557_v11 = vpop.f32.mrf.mxu0 }
 0x1b5   : > { %v2277_v58 = vadd.f32 %v4509_v38, %v5667_v8 }
 0x1b6   : > { %v5777_v57 = vpop.f32.mrf.mxu1  ;;  %v5779_v39 = vpop.f32.mrf.mxu0 }
 0x1b7   : > { %5945 = vst [vmem:[#allocation13_spill] sm:$0xff] %v5779_v39  ;;  %v5781_v60 = vadd.f32 %v4557_v11, %v2277_v58 }
 0x1b8   : > { %v5783_v30 = vpop.f32.mrf.mxu1  ;;  %v5785_v19 = vpop.f32.mrf.mxu0 }
 0x1b9   : > { %5946 = vst [vmem:[#allocation14_spill] sm:$0xff] %v5781_v60  ;;  %5947 = vst [vmem:[#allocation15_spill] sm:$0xff] %v5783_v30 }
 0x1ba   : > { %5948 = vst [vmem:[#allocation16_spill] sm:$0xff] %v5785_v19  ;;  %v5787_v22 = vpop.f32.mrf.mxu1  ;;  %v5789_v50 = vpop.f32.mrf.mxu0 }
 0x1bb   : > { %5949 = vst [vmem:[#allocation17_spill] sm:$0xff] %v5787_v22  ;;  %5950 = vst [vmem:[#allocation18_spill] sm:$0xff] %v5789_v50 }
 0x1bc   : > { %v4513_v12 = vpop.f32.mrf.mxu1  ;;  %v4561_v18 = vpop.f32.mrf.mxu0 }
 0x1bd   : > { %v2281_v52 = vadd.f32 %v4513_v12, %v5679_v59 }
 0x1be   : > { %v5792_v26 = vpop.f32.mrf.mxu1  ;;  %v5794_v8 = vpop.f32.mrf.mxu0 }
 0x1bf   : > { %5951 = vst [vmem:[#allocation19_spill] sm:$0xff] %v5794_v8  ;;  %v5796_v38 = vadd.f32 %v4561_v18, %v2281_v52 }
 0x1c0   : > { %v5798_v58 = vpop.f32.mrf.mxu1  ;;  %v5800_v11 = vpop.f32.mrf.mxu0 }
 0x1c1   : > { %5952 = vst [vmem:[#allocation20_spill] sm:$0xff] %v5796_v38  ;;  %5953 = vst [vmem:[#allocation21_spill] sm:$0xff] %v5798_v58 }
 0x1c2   : > { %5954 = vst [vmem:[#allocation22_spill] sm:$0xff] %v5800_v11  ;;  %v5802_v60 = vpop.f32.mrf.mxu1  ;;  %v5804_v19 = vpop.f32.mrf.mxu0 }
 0x1c3   : > { %5955 = vst [vmem:[#allocation23_spill] sm:$0xff] %v5802_v60  ;;  %5956 = vst [vmem:[#allocation24_spill] sm:$0xff] %v5804_v19  ;;  %v2258_v19 = vadd.f32 %v5706_v47, %v5613_v20  ;;  %v2259_v20 = vadd.f32 %v5717_v31, %v5622_v36 }
 0x1c4   : > { %v4517_v22 = vpop.f32.mrf.mxu1  ;;  %v4565_v50 = vpop.f32.mrf.mxu0 }
 0x1c5   : > { %v2285_v39 = vadd.f32 %v4517_v22, %v5691_v21  ;;  %v2256_v22 = vadd.f32 %v5712_v32, %v5616_v6  ;;  %v2262_v6 = vadd.f32 %v5723_v35, %v5625_v7  ;;  %v2566_v31 = vadd.f32 %v5719_v25, %v2259_v20 }
 0x1c6   : > { %v5807_v30 = vpop.f32.mrf.mxu1  ;;  %v5809_v12 = vpop.f32.mrf.mxu0 }
 0x1c7   : > { %5957 = vst [vmem:[#allocation25_spill] sm:$0xff] %v5807_v30  ;;  %5958 = vst [vmem:[#allocation26_spill] sm:$0xff] %v5809_v12  ;;  %v5811_v59 = vadd.f32 %v4565_v50, %v2285_v39  ;;  %v2565_v50 = vadd.f32 %v5708_v34, %v2258_v19  ;;  %v2569_v35 = vadd.f32 %v5725_v16, %v2262_v6 }
 0x1c8   : > { %v5813_v52 = vpop.f32.mrf.mxu1  ;;  %v5815_v18 = vpop.f32.mrf.mxu0 }
 0x1c9   : > { %5959 = vst [vmem:[#allocation27_spill] sm:$0xff] %v5811_v59  ;;  %5960 = vst [vmem:[#allocation28_spill] sm:$0xff] %v5813_v52 }
 0x1ca   : > { %5961 = vst [vmem:[#allocation29_spill] sm:$0xff] %v5815_v18  ;;  %v5817_v38 = vpop.f32.mrf.mxu1  ;;  %v5819_v11 = vpop.f32.mrf.mxu0 }
 0x1cb   : > { %5962 = vst [vmem:[#allocation30_spill] sm:$0xff] %v5817_v38  ;;  %5963 = vst [vmem:[#allocation31_spill] sm:$0xff] %v5819_v11  ;;  %v2563_v11 = vadd.f32 %v5714_v49, %v2256_v22 }
 0x1cc   : > { %v4585_v60 = vpop.f32.mrf.mxu1  ;;  %v4633_v8 = vpop.f32.mrf.mxu0 }
 0x1cd   : > { %v2870_v39 = vadd.f32 %v4585_v60, %v5703_v48  ;;  %v2260_v48 = vadd.f32 %v5727_v13, %v5628_v9 }
 0x1ce   : > { %v2741_v21 = vpop.f32.mrf.mxu1  ;;  %v3047_v12 = vpop.f32.mrf.mxu0 }
 0x1cf   : > { %v2868_v59 = vadd.f32 %v2741_v21, %v5710_v33  ;;  %v3176_v30 = vadd.f32 %v4633_v8, %v2870_v39 }
 0x1d0   : > { %v4586_v18 = vpop.f32.mrf.mxu1  ;;  %v4634_v38 = vpop.f32.mrf.mxu0 }
 0x1d1   : > { %v2871_v52 = vadd.f32 %v4586_v18, %v2565_v50  ;;  %v3174_v34 = vadd.f32 %v3047_v12, %v2868_v59  ;;  %v2567_v59 = vadd.f32 %v5729_v63, %v2260_v48  ;;  %v3405_v22 = vmul.f32 %v3176_v30, %v3176_v30 }
 0x1d2   : > { %v2744_v47 = vpop.f32.mrf.mxu1  ;;  %v3050_v32 = vpop.f32.mrf.mxu0  ;;  %v2266_v50 = vadd.f32 %v5738_v45, %v5637_v15 }
 0x1d3   : > { %v3177_v19 = vadd.f32 %v4634_v38, %v2871_v52  ;;  %v2869_v58 = vadd.f32 %v2744_v47, %v2563_v11  ;;  %v3403_v13 = vmul.f32 %v3174_v34, %v3174_v34  ;;  %v2263_v52 = vadd.f32 %v5732_v0, %v5634_v4 }
 0x1d4   : > { %v4589_v36 = vpop.f32.mrf.mxu1  ;;  %v4637_v33 = vpop.f32.mrf.mxu0 }
 0x1d5   : > { %v3913_v49 = vpack.c.bf16 %v3177_v19, %v3176_v30  ;;  %v3175_v7 = vadd.f32 %v3050_v32, %v2869_v58  ;;  %v2874_v60 = vadd.f32 %v4589_v36, %v5721_v27  ;;  %v3406_v39 = vmul.f32 %v3177_v19, %v3177_v19 }
 0x1d6   : > { %v2757_v8 = vpop.f32.mrf.mxu1  ;;  %v3063_v9 = vpop.f32.mrf.mxu0  ;;  %v2570_v48 = vadd.f32 %v5734_v46, %v2263_v52  ;;  %v2270_v52 = vadd.f32 %v5753_v61, %v5649_v42  ;;  %v2268_v42 = vadd.f32 %v5757_v23, %v5652_v62 }
 0x1d7   : > { %4000 = vst [vmem:[%s5840_s21 + $0x8] sm:$0xff] %v3913_v49   ;;  %v3908_v38 = vpack.c.bf16 %v3175_v7, %v3174_v34  ;;  %v3366_v11 = vadd.f32 %v3175_v7, %v3174_v34  ;;  %v3404_v12 = vmul.f32 %v3175_v7, %v3175_v7  ;;  %v2872_v58 = vadd.f32 %v2757_v8, %v2566_v31 }
 0x1d8   : > { %v4590_v18 = vpop.f32.mrf.mxu1  ;;  %v4638_v25 = vpop.f32.mrf.mxu0  ;;  %v3180_v20 = vadd.f32 %v4637_v33, %v2874_v60  ;;  %v2575_v23 = vadd.f32 %v5759_v2, %v2268_v42 }
 0x1d9   : > { %3909 = vst [vmem:[%s5840_s21] sm:$0xff] %v3908_v38   ;;  %v3367_v16 = vadd.f32 %v3366_v11, %v3176_v30  ;;  %v3435_v21 = vadd.f32 %v3404_v12, %v3403_v13  ;;  %v2875_v27 = vadd.f32 %v4590_v18, %v2569_v35  ;;  %v3178_v6 = vadd.f32 %v3063_v9, %v2872_v58 }
 0x1da   : > { %v2760_v47 = vpop.f32.mrf.mxu1  ;;  %v3066_v32 = vpop.f32.mrf.mxu0  ;;  %v2264_v30 = vadd.f32 %v5742_v37, %v5640_v5 }
 0x1db   : > { %v3436_v63 = vadd.f32 %v3435_v21, %v3405_v22  ;;  %v3368_v34 = vadd.f32 %v3367_v16, %v3177_v19  ;;  %v3181_v4 = vadd.f32 %v4638_v25, %v2875_v27  ;;  %v2873_v0 = vadd.f32 %v2760_v47, %v2567_v59 }
 0x1dc   : > { %v4593_v36 = vpop.f32.mrf.mxu1  ;;  %v4641_v49 = vpop.f32.mrf.mxu0  ;;  %v3407_v31 = vmul.f32 %v3178_v6, %v3178_v6  ;;  %v2573_v19 = vadd.f32 %v5740_v29, %v2266_v50  ;;  %v2571_v12 = vadd.f32 %v5744_v3, %v2264_v30  ;;  %v2267_v59 = vadd.f32 %v5747_v41, %v5646_v43 }
 0x1dd   : > { %v3369_v7 = vadd.f32 %v3368_v34, %v3178_v6  ;;  %v3437_v15 = vadd.f32 %v3436_v63, %v3406_v39  ;;  %v3923_v45 = vpack.c.bf16 %v3181_v4, %v3180_v20  ;;  %v3179_v33 = vadd.f32 %v3066_v32, %v2873_v0 }
 0x1de   : > { %v2773_v35 = vpop.f32.mrf.mxu1  ;;  %v3079_v60 = vpop.f32.mrf.mxu0  ;;  %v2878_v9 = vadd.f32 %v4593_v36, %v5736_v17  ;;  %v3409_v29 = vmul.f32 %v3180_v20, %v3180_v20  ;;  %v3410_v39 = vmul.f32 %v3181_v4, %v3181_v4  ;;  %v2574_v41 = vadd.f32 %v5749_v28, %v2267_v59 }
 0x1df   : > { %v3438_v8 = vadd.f32 %v3437_v15, %v3407_v31  ;;  %4002 = vst [vmem:[%s5840_s21 + $0x18] sm:$0xff] %v3923_v45   ;;  %v2876_v46 = vadd.f32 %v2773_v35, %v2570_v48  ;;  %v3918_v13 = vpack.c.bf16 %v3179_v33, %v3178_v6  ;;  %v3370_v38 = vadd.f32 %v3369_v7, %v3179_v33 }
 0x1e0   : > { %v3408_v5 = vmul.f32 %v3179_v33, %v3179_v33  ;;  %v4594_v37 = vpop.f32.mrf.mxu1  ;;  %v4642_v11 = vpop.f32.mrf.mxu0  ;;  %v3184_v21 = vadd.f32 %v4641_v49, %v2878_v9  ;;  %v2577_v32 = vadd.f32 %v5755_v10, %v2270_v52  ;;  %v2271_v10 = vadd.f32 %v5762_v40, %v5658_v1 }
 0x1e1   : > { %v2879_v58 = vadd.f32 %v4594_v37, %v2573_v19  ;;  %4001 = vst [vmem:[%s5840_s21 + $0x10] sm:$0xff] %v3918_v13   ;;  %v3371_v18 = vadd.f32 %v3370_v38, %v3180_v20  ;;  %v3182_v17 = vadd.f32 %v3079_v60, %v2876_v46  ;;  %v2274_v45 = vadd.f32 %v5768_v24, %v5661_v56 }
 0x1e2   : > { %v3439_v25 = vadd.f32 %v3438_v8, %v3408_v5  ;;  %v2776_v22 = vpop.f32.mrf.mxu1  ;;  %v3082_v16 = vpop.f32.mrf.mxu0  ;;  %v3413_v35 = vmul.f32 %v3184_v21, %v3184_v21  ;;  %v2578_v40 = vadd.f32 %v5764_v55, %v2271_v10  ;;  %v2272_v56 = vadd.f32 %v5772_v44, %v5664_v14  ;;  %v5964_v44 = vld [vmem:[#allocation12_spill] sm:$0xff] }
 0x1e3   : > { %v3185_v27 = vadd.f32 %v4642_v11, %v2879_v58  ;;  %v2877_v50 = vadd.f32 %v2776_v22, %v2571_v12  ;;  %v3372_v6 = vadd.f32 %v3371_v18, %v3181_v4  ;;  %v3411_v34 = vmul.f32 %v3182_v17, %v3182_v17 }
 0x1e4   : > { %v3440_v3 = vadd.f32 %v3439_v25, %v3409_v29  ;;  %v4597_v47 = vpop.f32.mrf.mxu1  ;;  %v4645_v43 = vpop.f32.mrf.mxu0  ;;  %v2581_v59 = vadd.f32 %v5770_v53, %v2274_v45  ;;  %v5971_v45 = vld [vmem:[#allocation16_spill] sm:$0xff] }
 0x1e5   : > { %v3933_v61 = vpack.c.bf16 %v3185_v27, %v3184_v21  ;;  %v3183_v20 = vadd.f32 %v3082_v16, %v2877_v50  ;;  %v3373_v63 = vadd.f32 %v3372_v6, %v3182_v17  ;;  %v2882_v49 = vadd.f32 %v4597_v47, %v5751_v54  ;;  %v5966_v6 = vld [vmem:[#allocation4_spill] sm:$0xff]  ;;  %v5967_v47 = vld [vmem:[#allocation15_spill] sm:$0xff] }
 0x1e6   : > { %v3441_v0 = vadd.f32 %v3440_v3, %v3410_v39  ;;  %v2789_v48 = vpop.f32.mrf.mxu1  ;;  %v3095_v30 = vpop.f32.mrf.mxu0  ;;  %v3414_v5 = vmul.f32 %v3185_v27, %v3185_v27  ;;  %v2579_v39 = vadd.f32 %v5964_v44, %v2272_v56  ;;  %v5965_v3 = vld [vmem:[#allocation3_spill] sm:$0xff] }
 0x1e7   : > { %4004 = vst [vmem:[%s5840_s21 + $0x28] sm:$0xff] %v3933_v61   ;;  %v3928_v36 = vpack.c.bf16 %v3183_v20, %v3182_v17  ;;  %v3412_v4 = vmul.f32 %v3183_v20, %v3183_v20  ;;  %v2880_v7 = vadd.f32 %v2789_v48, %v2574_v41  ;;  %v3374_v31 = vadd.f32 %v3373_v63, %v3183_v20 }
 0x1e8   : > { %v3442_v28 = vadd.f32 %v3441_v0, %v3411_v34  ;;  %v4598_v15 = vpop.f32.mrf.mxu1  ;;  %v4646_v62 = vpop.f32.mrf.mxu0  ;;  %v3188_v46 = vadd.f32 %v4645_v43, %v2882_v49  ;;  %v2275_v53 = vadd.f32 %v5777_v57, %v5965_v3  ;;  %v2278_v43 = vadd.f32 %v5967_v47, %v5966_v6  ;;  %v5978_v47 = vld [vmem:[#allocation8_spill] sm:$0xff] }
 0x1e9   : > { %4003 = vst [vmem:[%s5840_s21 + $0x20] sm:$0xff] %v3928_v36   ;;  %v2883_v33 = vadd.f32 %v4598_v15, %v2577_v32  ;;  %v3375_v60 = vadd.f32 %v3374_v31, %v3184_v21  ;;  %v3186_v8 = vadd.f32 %v3095_v30, %v2880_v7  ;;  %v5968_v7 = vld [vmem:[#allocation13_spill] sm:$0xff] }
 0x1ea   : > { %v3443_v19 = vadd.f32 %v3442_v28, %v3412_v4  ;;  %v2792_v54 = vpop.f32.mrf.mxu1  ;;  %v3098_v9 = vpop.f32.mrf.mxu0  ;;  %v3417_v42 = vmul.f32 %v3188_v46, %v3188_v46  ;;  %v2582_v28 = vadd.f32 %v5968_v7, %v2275_v53  ;;  %v5969_v31 = vld [vmem:[#allocation5_spill] sm:$0xff]  ;;  %v5977_v53 = vld [vmem:[#allocation19_spill] sm:$0xff] }
 0x1eb   : > { %v3189_v13 = vadd.f32 %v4646_v62, %v2883_v33  ;;  %v2881_v38 = vadd.f32 %v2792_v54, %v2575_v23  ;;  %v3376_v37 = vadd.f32 %v3375_v60, %v3185_v27  ;;  %v3415_v58 = vmul.f32 %v3186_v8, %v3186_v8  ;;  %v5970_v15 = vld [vmem:[#allocation17_spill] sm:$0xff] }
 0x1ec   : > { %v3444_v2 = vadd.f32 %v3443_v19, %v3413_v35  ;;  %v4601_v11 = vpop.f32.mrf.mxu1  ;;  %v4649_v1 = vpop.f32.mrf.mxu0  ;;  %v2276_v62 = vadd.f32 %v5970_v15, %v5969_v31  ;;  %v2585_v33 = vadd.f32 %v5971_v45, %v2278_v43  ;;  %v5979_v43 = vld [vmem:[#allocation23_spill] sm:$0xff]  ;;  %v5984_v45 = vld [vmem:[#allocation25_spill] sm:$0xff] }
 0x1ed   : > { %v3943_v24 = vpack.c.bf16 %v3189_v13, %v3188_v46  ;;  %v3187_v12 = vadd.f32 %v3098_v9, %v2881_v38  ;;  %v3377_v52 = vadd.f32 %v3376_v37, %v3186_v8  ;;  %v2886_v16 = vadd.f32 %v4601_v11, %v5766_v51 }
 0x1ee   : > { %v3445_v29 = vadd.f32 %v3444_v2, %v3414_v5  ;;  %v2805_v18 = vpop.f32.mrf.mxu1  ;;  %v3111_v25 = vpop.f32.mrf.mxu0  ;;  %v3418_v30 = vmul.f32 %v3189_v13, %v3189_v13 }
 0x1ef   : > { %4006 = vst [vmem:[%s5840_s21 + $0x38] sm:$0xff] %v3943_v24   ;;  %v3938_v17 = vpack.c.bf16 %v3187_v12, %v3186_v8  ;;  %v3416_v22 = vmul.f32 %v3187_v12, %v3187_v12  ;;  %v2884_v21 = vadd.f32 %v2805_v18, %v2578_v40  ;;  %v3378_v27 = vadd.f32 %v3377_v52, %v3187_v12  ;;  %v5973_v40 = vld [vmem:[#allocation18_spill] sm:$0xff]  ;;  %v5976_v52 = vld [vmem:[#allocation21_spill] sm:$0xff] }
 0x1f0   : > { %v3446_v55 = vadd.f32 %v3445_v29, %v3415_v58  ;;  %v4602_v50 = vpop.f32.mrf.mxu1  ;;  %v4650_v14 = vpop.f32.mrf.mxu0  ;;  %v3192_v34 = vadd.f32 %v4649_v1, %v2886_v16  ;;  %v2583_v56 = vadd.f32 %v5973_v40, %v2276_v62  ;;  %v5974_v24 = vld [vmem:[#allocation6_spill] sm:$0xff]  ;;  %v5982_v62 = vld [vmem:[#allocation24_spill] sm:$0xff] }
 0x1f1   : > { %4005 = vst [vmem:[%s5840_s21 + $0x30] sm:$0xff] %v3938_v17   ;;  %v2887_v41 = vadd.f32 %v4602_v50, %v2581_v59  ;;  %v3379_v61 = vadd.f32 %v3378_v27, %v3188_v46  ;;  %v3190_v32 = vadd.f32 %v3111_v25, %v2884_v21  ;;  %v2279_v12 = vadd.f32 %v5792_v26, %v5974_v24  ;;  %v5975_v59 = vld [vmem:[#allocation7_spill] sm:$0xff] }
 0x1f2   : > { %v3447_v20 = vadd.f32 %v3446_v55, %v3416_v22  ;;  %v2808_v51 = vpop.f32.mrf.mxu1  ;;  %v3114_v63 = vpop.f32.mrf.mxu0  ;;  %v2282_v58 = vadd.f32 %v5976_v52, %v5975_v59  ;;  %v3421_v18 = vmul.f32 %v3192_v34, %v3192_v34  ;;  %v5987_v59 = vld [vmem:[#allocation26_spill] sm:$0xff] }
 0x1f3   : > { %v3193_v0 = vadd.f32 %v4650_v14, %v2887_v41  ;;  %v2885_v48 = vadd.f32 %v2808_v51, %v2579_v39  ;;  %v3380_v4 = vadd.f32 %v3379_v61, %v3189_v13  ;;  %v3419_v60 = vmul.f32 %v3190_v32, %v3190_v32  ;;  %v5972_v13 = vld [vmem:[#allocation14_spill] sm:$0xff] }
 0x1f4   : > { %v3448_v36 = vadd.f32 %v3447_v20, %v3417_v42  ;;  %v4605_v49 = vpop.f32.mrf.mxu1  ;;  %v4653_v57 = vpop.f32.mrf.mxu0  ;;  %v2586_v6 = vadd.f32 %v5977_v53, %v2279_v12  ;;  %v2280_v41 = vadd.f32 %v5979_v43, %v5978_v47  ;;  %v5980_v20 = vld [vmem:[#allocation22_spill] sm:$0xff] }
 0x1f5   : > { %v3953_v23 = vpack.c.bf16 %v3193_v0, %v3192_v34  ;;  %v3191_v10 = vadd.f32 %v3114_v63, %v2885_v48  ;;  %v3381_v35 = vadd.f32 %v3380_v4, %v3190_v32  ;;  %v2890_v38 = vadd.f32 %v4605_v49, %v5972_v13  ;;  %v5981_v4 = vld [vmem:[#allocation20_spill] sm:$0xff] }
 0x1f6   : > { %v3449_v19 = vadd.f32 %v3448_v36, %v3418_v30  ;;  %v2821_v8 = vpop.f32.mrf.mxu1  ;;  %v3127_v54 = vpop.f32.mrf.mxu0  ;;  %v3422_v14 = vmul.f32 %v3193_v0, %v3193_v0 }
 0x1f7   : > { %4008 = vst [vmem:[%s5840_s21 + $0x48] sm:$0xff] %v3953_v23   ;;  %v3948_v9 = vpack.c.bf16 %v3191_v10, %v3190_v32  ;;  %v3420_v46 = vmul.f32 %v3191_v10, %v3191_v10  ;;  %v2888_v5 = vadd.f32 %v2821_v8, %v2582_v28  ;;  %v3382_v37 = vadd.f32 %v3381_v35, %v3191_v10  ;;  %v5983_v10 = vld [vmem:[#allocation9_spill] sm:$0xff]  ;;  %v5985_v35 = vld [vmem:[#allocation10_spill] sm:$0xff] }
 0x1f8   : > { %v3450_v2 = vadd.f32 %v3449_v19, %v3419_v60  ;;  %v4606_v11 = vpop.f32.mrf.mxu1  ;;  %v4654_v1 = vpop.f32.mrf.mxu0  ;;  %v3196_v55 = vadd.f32 %v4653_v57, %v2890_v38  ;;  %v2589_v32 = vadd.f32 %v5980_v20, %v2282_v58  ;;  %v2587_v23 = vadd.f32 %v5982_v62, %v2280_v41  ;;  %v5986_v60 = vld [vmem:[#allocation28_spill] sm:$0xff]  ;;  %v5988_v58 = vld [vmem:[#allocation11_spill] sm:$0xff] }
 0x1f9   : > { %4007 = vst [vmem:[%s5840_s21 + $0x40] sm:$0xff] %v3948_v9   ;;  %v2891_v29 = vadd.f32 %v4606_v11, %v2585_v33  ;;  %v3383_v25 = vadd.f32 %v3382_v37, %v3192_v34  ;;  %v3194_v22 = vadd.f32 %v3127_v54, %v2888_v5  ;;  %v2283_v33 = vadd.f32 %v5984_v45, %v5983_v10 }
 0x1fa   : > { %v3451_v17 = vadd.f32 %v3450_v2, %v3420_v46  ;;  %v2824_v16 = vpop.f32.mrf.mxu1  ;;  %v3130_v21 = vpop.f32.mrf.mxu0  ;;  %v2286_v19 = vadd.f32 %v5986_v60, %v5985_v35  ;;  %v3425_v54 = vmul.f32 %v3196_v55, %v3196_v55 }
 0x1fb   : > { %v3197_v27 = vadd.f32 %v4654_v1, %v2891_v29  ;;  %v2889_v50 = vadd.f32 %v2824_v16, %v2583_v56  ;;  %v3384_v39 = vadd.f32 %v3383_v25, %v3193_v0  ;;  %v3423_v63 = vmul.f32 %v3194_v22, %v3194_v22  ;;  %v5989_v29 = vld [vmem:[#allocation30_spill] sm:$0xff] }
 0x1fc   : > { %v3452_v44 = vadd.f32 %v3451_v17, %v3421_v18  ;;  %v4609_v3 = vpop.f32.mrf.mxu1  ;;  %v4657_v26 = vpop.f32.mrf.mxu0  ;;  %v2590_v52 = vadd.f32 %v5987_v59, %v2283_v33  ;;  %v2284_v18 = vadd.f32 %v5989_v29, %v5988_v58 }
 0x1fd   : > { %v3963_v42 = vpack.c.bf16 %v3197_v27, %v3196_v55  ;;  %v3195_v61 = vadd.f32 %v3130_v21, %v2889_v50  ;;  %v3385_v51 = vadd.f32 %v3384_v39, %v3194_v22  ;;  %v2894_v49 = vadd.f32 %v4609_v3, %v5981_v4  ;;  %v5991_v3 = vld [vmem:[#allocation27_spill] sm:$0xff] }
 0x1fe   : > { %v3453_v34 = vadd.f32 %v3452_v44, %v3422_v14  ;;  %v2837_v48 = vpop.f32.mrf.mxu1  ;;  %v3143_v30 = vpop.f32.mrf.mxu0  ;;  %v3426_v1 = vmul.f32 %v3197_v27, %v3197_v27 }
 0x1ff   : > { %4010 = vst [vmem:[%s5840_s21 + $0x58] sm:$0xff] %v3963_v42   ;;  %v3958_v36 = vpack.c.bf16 %v3195_v61, %v3194_v22  ;;  %v3424_v0 = vmul.f32 %v3195_v61, %v3195_v61  ;;  %v2892_v57 = vadd.f32 %v2837_v48, %v2586_v6  ;;  %v3386_v28 = vadd.f32 %v3385_v51, %v3195_v61  ;;  %v5990_v22 = vld [vmem:[#allocation29_spill] sm:$0xff]  ;;  %v5992_v42 = vld [vmem:[#allocation31_spill] sm:$0xff] }
 0x200   : > { %v3454_v7 = vadd.f32 %v3453_v34, %v3423_v63  ;;  %v4610_v31 = vpop.f32.mrf.mxu1  ;;  %v4658_v15 = vpop.f32.mrf.mxu0  ;;  %v3200_v2 = vadd.f32 %v4657_v26, %v2894_v49  ;;  %v2593_v16 = vadd.f32 %v5990_v22, %v2286_v19  ;;  %v2591_v61 = vadd.f32 %v5992_v42, %v2284_v18 }
 0x201   : > { %4009 = vst [vmem:[%s5840_s21 + $0x50] sm:$0xff] %v3958_v36   ;;  %v2895_v8 = vadd.f32 %v4610_v31, %v2589_v32  ;;  %v3387_v9 = vadd.f32 %v3386_v28, %v3196_v55  ;;  %v3198_v13 = vadd.f32 %v3143_v30, %v2892_v57 }
 0x202   : > { %v3455_v46 = vadd.f32 %v3454_v7, %v3424_v0  ;;  %v2840_v38 = vpop.f32.mrf.mxu1  ;;  %v3146_v5 = vpop.f32.mrf.mxu0  ;;  %v3429_v32 = vmul.f32 %v3200_v2, %v3200_v2 }
 0x203   : > { %v3201_v37 = vadd.f32 %v4658_v15, %v2895_v8  ;;  %v2893_v11 = vadd.f32 %v2840_v38, %v2587_v23  ;;  %v3388_v56 = vadd.f32 %v3387_v9, %v3197_v27  ;;  %v3427_v55 = vmul.f32 %v3198_v13, %v3198_v13 }
 0x204   : > { %v3456_v40 = vadd.f32 %v3455_v46, %v3425_v54  ;;  %v4613_v24 = vpop.f32.mrf.mxu1  ;;  %v4661_v12 = vpop.f32.mrf.mxu0 }
 0x205   : > { %v3973_v25 = vpack.c.bf16 %v3201_v37, %v3200_v2  ;;  %v3199_v17 = vadd.f32 %v3146_v5, %v2893_v11  ;;  %v3389_v21 = vadd.f32 %v3388_v56, %v3198_v13  ;;  %v2898_v26 = vadd.f32 %v4613_v24, %v5991_v3 }
 0x206   : > { %v3457_v50 = vadd.f32 %v3456_v40, %v3426_v1  ;;  %v2853_v14 = vpop.f32.mrf.mxu1  ;;  %v3159_v44 = vpop.f32.mrf.mxu0  ;;  %v3430_v4 = vmul.f32 %v3201_v37, %v3201_v37 }
 0x207   : > { %4012 = vst [vmem:[%s5840_s21 + $0x68] sm:$0xff] %v3973_v25   ;;  %v3968_v39 = vpack.c.bf16 %v3199_v17, %v3198_v13  ;;  %v3428_v27 = vmul.f32 %v3199_v17, %v3199_v17  ;;  %v2896_v53 = vadd.f32 %v2853_v14, %v2590_v52  ;;  %v3390_v47 = vadd.f32 %v3389_v21, %v3199_v17 }
 0x208   : > { %v3458_v6 = vadd.f32 %v3457_v50, %v3427_v55  ;;  %v4614_v43 = vpop.f32.mrf.mxu1  ;;  %v4662_v41 = vpop.f32.mrf.mxu0  ;;  %v3204_v30 = vadd.f32 %v4661_v12, %v2898_v26 }
 0x209   : > { %4011 = vst [vmem:[%s5840_s21 + $0x60] sm:$0xff] %v3968_v39   ;;  %v2899_v20 = vadd.f32 %v4614_v43, %v2593_v16  ;;  %v3391_v51 = vadd.f32 %v3390_v47, %v3200_v2  ;;  %v3202_v34 = vadd.f32 %v3159_v44, %v2896_v53 }
 0x20a   : > { %v3459_v63 = vadd.f32 %v3458_v6, %v3428_v27  ;;  %v2856_v48 = vpop.f32.mrf.mxu1  ;;  %v3162_v7 = vpop.f32.mrf.mxu0  ;;  %v3433_v60 = vmul.f32 %v3204_v30, %v3204_v30 }
 0x20b   : > { %v3205_v36 = vadd.f32 %v4662_v41, %v2899_v20  ;;  %v2897_v0 = vadd.f32 %v2856_v48, %v2591_v61  ;;  %v3392_v57 = vadd.f32 %v3391_v51, %v3201_v37  ;;  %v3431_v62 = vmul.f32 %v3202_v34, %v3202_v34 }
 0x20c   : > { %v3460_v49 = vadd.f32 %v3459_v63, %v3429_v32 }
 0x20d   : > { %v3983_v28 = vpack.c.bf16 %v3205_v36, %v3204_v30  ;;  %v3203_v31 = vadd.f32 %v3162_v7, %v2897_v0  ;;  %v3393_v15 = vadd.f32 %v3392_v57, %v3202_v34  ;;  %v3434_v54 = vmul.f32 %v3205_v36, %v3205_v36 }
 0x20e   : > { %v3461_v23 = vadd.f32 %v3460_v49, %v3430_v4 }
 0x20f   : > { %4014 = vst [vmem:[%s5840_s21 + $0x78] sm:$0xff] %v3983_v28   ;;  %v3978_v10 = vpack.c.bf16 %v3203_v31, %v3202_v34  ;;  %v3432_v45 = vmul.f32 %v3203_v31, %v3203_v31  ;;  %v3394_v35 = vadd.f32 %v3393_v15, %v3203_v31 }
 0x210   : > { %v3462_v33 = vadd.f32 %v3461_v23, %v3431_v62 }
 0x211   : > { %4013 = vst [vmem:[%s5840_s21 + $0x70] sm:$0xff] %v3978_v10   ;;  %v3395_v19 = vadd.f32 %v3394_v35, %v3204_v30 }
 0x212   : > { %v3463_v8 = vadd.f32 %v3462_v33, %v3432_v45 }
 0x213   : > { %v3396_v9 = vadd.f32 %v3395_v19, %v3205_v36 }
 0x214   : > { %v3464_v46 = vadd.f32 %v3463_v8, %v3433_v60 }
 0x215   : > { %v3397_v13 = vrot.slane %v3396_v9, 4 }
 0x216   : > { %v3465_v38 = vadd.f32 %v3464_v46, %v3434_v54 }
 0x217   : > { %v3398_v5 = vadd.f32 %v3397_v13, %v3396_v9 }
 0x218   : > { %v3466_v2 = vrot.slane %v3465_v38, 4 }
 0x219   : > { %v3399_v37 = vrot.slane %v3398_v5, 2 }
 0x21a   : > { %v3467_v11 = vadd.f32 %v3466_v2, %v3465_v38 }
 0x21b   : > { %v3400_v1 = vadd.f32 %v3399_v37, %v3398_v5 }
 0x21c   : > { %v3468_v40 = vrot.slane %v3467_v11, 2 }
 0x21d   : > { %v3401_v56 = vrot.slane %v3400_v1, 1 }
 0x21e   : > { %v3469_v24 = vadd.f32 %v3468_v40, %v3467_v11 }
 0x21f   : > { %v3402_v59 = vadd.f32 %v3401_v56, %v3400_v1 }
 0x220   : > { %v3470_v12 = vrot.slane %v3469_v24, 1 }
 0x222   : > { %v3471_v52 = vadd.f32 %v3470_v12, %v3469_v24 }
 0x224   : > { %v3473_v58 = vsel %vm3472_vm0, %v3402_v59, %v3471_v52 }
 0x225   : > { %3474 = vst [vmem:[%s235_s24] sm:$0x3] %v3473_v58 }
 0x226 PF: > { %s16_s18 = sadd.s32 1, %s4767_s18  }
 0x227   : > { %p13_p4 = scmp.ge.s32.totalorder %s16_s18, 4  }
 0x229   :  { %15 = sbr.rel (!%p13_p4) target bundleno = 1 (0x1), region = 88 }

</bundles_post_ra>
